<compile_context>
chip_gen: v7x
topology: tpu7x:2x2x1
jax: 0.10.0
libtpu: 0.0.40
codegen_flags: <defaults>
</compile_context>

<pallas_src>
import functools
import math

import jax
import jax.numpy as jnp
from jax import lax
from jax.experimental import pallas as pl
from jax.experimental.pallas import tpu as pltpu

WIN = 5                      # kornia.losses.SSIMLoss(5)
PAD = WIN // 2               # reflect halo = 2
HALO = 2 * PAD               # rows in the halo block = 4
SIGMA = 1.5                  # kornia default gaussian sigma
C1 = (0.01 * 1.0) ** 2       # max_val = 1.0
C2 = (0.03 * 1.0) ** 2
EPS = 1e-12                  # kornia.metrics.ssim adds eps to the denominator
LANES = 128                  # images per lane block


def _gauss_weights():
    xs = [i - WIN // 2 for i in range(WIN)]
    g = [math.exp(-(v * v) / (2.0 * SIGMA * SIGMA)) for v in xs]
    s = sum(g)
    return [v / s for v in g]


GW = _gauss_weights()        # separable 1D gaussian (outer product == 2D window)


def _round_up(a, b):
    return ((a + b - 1) // b) * b


def combined_loss_kernel(xm_ref, xh_ref, ym_ref, yh_ref, out_ref,
                         *, S, H, W, M, L):
    """One (128-image lane block, S-row strip) step.

    Layout: reflect-padded image rows on the leading dim, image width W on
    sublanes, 128 independent images on lanes.
    """
    blk = pl.program_id(0)       # which group of 128 images
    strip = pl.program_id(1)     # which row strip

    # Output rows [strip*S, strip*S+S) need padded rows [strip*S, strip*S+S+4):
    # main block (S rows) + halo block (4 rows).  Leading-dim slices below are
    # plain address offsets, so this single concat is all the "padding" needed.
    x = jnp.concatenate([xm_ref[...], xh_ref[...]], axis=0).astype(jnp.float32)
    y = jnp.concatenate([ym_ref[...], yh_ref[...]], axis=0).astype(jnp.float32)

    partial_rows = (H % S) != 0          # trace-time: last strip overhangs H?

    def sum_rows(m3):
        """Sum an (S, W, L) map over rows, dropping rows past the image height."""
        if not partial_rows:
            return jnp.sum(m3, axis=0)
        nvalid = H - strip * S           # rows of this strip that are real
        acc = jnp.zeros((W, L), jnp.float32)
        for l in range(S):               # leading-dim reads are free
            acc = acc + jnp.where(l < nvalid, m3[l], 0.0)
        return acc

    # --- MSE: reduce immediately so the map is not live across the filters ---
    d = x[PAD:PAD + S] - y[PAD:PAD + S]      # this strip's original rows
    mse_wl = sum_rows(d * d)                 # (W, L)

    # --- fused separable 5-tap Gaussian: W-pass (reflect via roll + patch) ---
    col = lax.broadcasted_iota(jnp.int32, x.shape, 1)   # hoisted once

    def wtap(a, v):
        """`a` shifted by (v - 2) columns, reflecting at the W boundary."""
        k = v - PAD
        if k == 0:
            return a
        r = pltpu.roll(a, shift=(PAD - v) % W, axis=1)  # wrapped shift (XLU)
        if k < 0:                                       # fix wrapped left cols
            for j in range(-k):
                src = -(j + k)                          # reflect(j + k), < 0
                r = jnp.where(col == j, a[:, src:src + 1, :], r)
        else:                                           # fix wrapped right cols
            for j in range(W - k, W):
                src = 2 * (W - 1) - (j + k)             # reflect(j + k), >= W
                r = jnp.where(col == j, a[:, src:src + 1, :], r)
        return r

    # Shift x and y once per tap; accumulate all five moments (shift commutes
    # with the products, so x*x / y*y / x*y are never materialized or shifted).
    tx = GW[PAD] * x
    ty = GW[PAD] * y
    txx = GW[PAD] * (x * x)
    tyy = GW[PAD] * (y * y)
    txy = GW[PAD] * (x * y)
    for v in (0, 1, 3, 4):
        g = GW[v]
        sx = wtap(x, v)
        sy = wtap(y, v)
        tx = tx + g * sx
        ty = ty + g * sy
        txx = txx + g * (sx * sx)
        tyy = tyy + g * (sy * sy)
        txy = txy + g * (sx * sy)

    # --- fused H-pass: leading-dim offset slices, no data movement ---
    mu1 = GW[0] * tx[0:S]
    mu2 = GW[0] * ty[0:S]
    mxx = GW[0] * txx[0:S]
    myy = GW[0] * tyy[0:S]
    mxy = GW[0] * txy[0:S]
    for u in range(1, WIN):
        g = GW[u]
        mu1 = mu1 + g * tx[u:u + S]
        mu2 = mu2 + g * ty[u:u + S]
        mxx = mxx + g * txx[u:u + S]
        myy = myy + g * tyy[u:u + S]
        mxy = mxy + g * txy[u:u + S]

    # --- SSIM map -> kornia SSIMLoss map ---
    mu1_sq = mu1 * mu1
    mu2_sq = mu2 * mu2
    mu12 = mu1 * mu2
    s1 = mxx - mu1_sq
    s2 = myy - mu2_sq
    s12 = mxy - mu12
    num = (2.0 * mu12 + C1) * (2.0 * s12 + C2)
    den = (mu1_sq + mu2_sq + C1) * (s1 + s2 + C2)
    ssim = num * pl.reciprocal(den + EPS, approx=False)    # divide -> EUP slot
    loss_map = jnp.clip(0.5 * (1.0 - ssim), 0.0, 1.0)      # (S, W, L)

    # --- reduce to a lane-dense (1, L) partial sum and store it ---
    acc_wl = mse_wl + sum_rows(loss_map)                   # (W, L)
    part = jnp.sum(acc_wl, axis=0, keepdims=True)          # (1, L)
    if (M % L) != 0:                                       # mask padded lanes
        lane = blk * L + lax.broadcasted_iota(jnp.int32, (1, L), 1)
        part = jnp.where(lane < M, part, 0.0)

    out_rows = lax.broadcasted_iota(jnp.int32, (8, L), 0)
    out_ref[0, 0] = jnp.where(out_rows == 0, part, 0.0)


def combined_losses(x, y, *, strip_rows=32):
    """mean((x-y)^2) + mean(clip((1 - SSIM_5(x, y)) / 2, 0, 1)) over all pixels."""
    b, n, c, h, w = x.shape
    assert y.shape == x.shape
    assert h >= 3 and w >= 3, "reflect pad(2) requires h >= 3 and w >= 3"
    M = b * n * c
    L = LANES
    n_blk = pl.cdiv(M, L)
    m_pad = n_blk * L

    # Row-strip size: multiple of 4 (so the 4-row halo block index is exact),
    # capped so the per-step working set stays small (v7x has only 64 MiB VMEM).
    S = max(HALO, min(_round_up(strip_rows, HALO), _round_up(h, HALO)))
    n_strips = pl.cdiv(h, S)
    rows_total = n_strips * S + HALO       # every strip + halo read is in bounds

    # HBM layout: (reflect-padded rows, w, images) — image index on the lanes.
    # NOTE: this relayout is one extra HBM pass per input in XLA; producers that
    # already emit image-last layout can feed the kernel directly.
    def prep(t):
        tm = t.reshape(M, h, w)
        top = jnp.flip(tm[:, 1:1 + PAD, :], axis=1)            # rows [2, 1]
        bot = jnp.flip(tm[:, h - 1 - PAD:h - 1, :], axis=1)    # rows [h-2, h-3]
        tp = jnp.concatenate([top, tm, bot], axis=1)           # (M, h+4, w)
        if rows_total > h + HALO:
            tp = jnp.pad(tp, ((0, 0), (0, rows_total - (h + HALO)), (0, 0)))
        tt = jnp.transpose(tp, (1, 2, 0))                      # (rows, w, M)
        if m_pad > M:
            tt = jnp.pad(tt, ((0, 0), (0, 0), (0, m_pad - M)))
        return tt

    xt = prep(x)
    yt = prep(y)

    main_spec = pl.BlockSpec((S, w, L), lambda i, s: (s, 0, i))
    halo_spec = pl.BlockSpec((HALO, w, L),
                             lambda i, s: ((s + 1) * (S // HALO), 0, i))

    kernel = functools.partial(combined_loss_kernel, S=S, H=h, W=w, M=M, L=L)
    partials = pl.pallas_call(
        kernel,
        out_shape=jax.ShapeDtypeStruct((n_blk, n_strips, 8, L), jnp.float32),
        grid_spec=pltpu.PrefetchScalarGridSpec(
            num_scalar_prefetch=0,
            grid=(n_blk, n_strips),
            in_specs=[main_spec, halo_spec, main_spec, halo_spec],
            out_specs=pl.BlockSpec((1, 1, 8, L), lambda i, s: (i, s, 0, 0)),
        ),
        compiler_params=pltpu.CompilerParams(
            dimension_semantics=("parallel", "parallel"),
            # Defaults are only 16/32 MiB on v5e/v6e; 64 MiB is safe on every
            # generation (== physical VMEM on v7x) and the strip sizing keeps
            # the actual working set well below it.
            vmem_limit_bytes=64 * 1024 * 1024,
        ),
    )(xt, xt, yt, yt)

    # Tiny cross-lane reduce + single divide, once, outside the kernel.
    return jnp.sum(partials) / jnp.float32(M * h * w)


# ---------------- pure-JAX reference (same math, vectorized) ----------------
def _filter_sep_batch(a, H, W):
    tmp = sum(GW[v] * a[:, :, v:v + W] for v in range(WIN))
    return sum(GW[u] * tmp[:, u:u + H, :] for u in range(WIN))


def combined_losses_ref(x, y):
    b, n, c, h, w = x.shape
    M = b * n * c
    xf = x.reshape(M, h, w).astype(jnp.float32)
    yf = y.reshape(M, h, w).astype(jnp.float32)
    mse = jnp.mean((xf - yf) ** 2)
    xp = jnp.pad(xf, ((0, 0), (PAD, PAD), (PAD, PAD)), mode="reflect")
    yp = jnp.pad(yf, ((0, 0), (PAD, PAD), (PAD, PAD)), mode="reflect")
    mu1 = _filter_sep_batch(xp, h, w)
    mu2 = _filter_sep_batch(yp, h, w)
    mu_x2 = _filter_sep_batch(xp * xp, h, w)
    mu_y2 = _filter_sep_batch(yp * yp, h, w)
    mu_xy = _filter_sep_batch(xp * yp, h, w)
    mu1_sq, mu2_sq, mu1_mu2 = mu1 * mu1, mu2 * mu2, mu1 * mu2
    s1, s2, s12 = mu_x2 - mu1_sq, mu_y2 - mu2_sq, mu_xy - mu1_mu2
    ssim = ((2 * mu1_mu2 + C1) * (2 * s12 + C2)) / (
        (mu1_sq + mu2_sq + C1) * (s1 + s2 + C2) + EPS)
    ssim_loss = jnp.mean(jnp.clip((1.0 - ssim) * 0.5, 0.0, 1.0))
    return mse + ssim_loss


if __name__ == "__main__":
    key = jax.random.PRNGKey(0)
    kx, ky = jax.random.split(key)

    # (b_len, n, c, h, w) — shapes implied by the original module
    x = jax.random.uniform(kx, (2, 2, 3, 16, 16), dtype=jnp.float32)
    y = jax.random.uniform(ky, (2, 2, 3, 16, 16), dtype=jnp.float32)

    f = jax.jit(functools.partial(combined_losses, strip_rows=8))  # 2 row strips
    out = jax.block_until_ready(f(x, y))
    ref = combined_losses_ref(x, y)
    assert jnp.allclose(out, ref, rtol=1e-5, atol=1e-5), (out, ref)

    # Second case: >128 images (2 lane blocks) and h not a multiple of the strip
    # size (exercises lane masking and the partial last-strip row masking).
    x2 = jax.random.uniform(kx, (3, 5, 9, 12, 16), dtype=jnp.float32)
    y2 = jax.random.uniform(ky, (3, 5, 9, 12, 16), dtype=jnp.float32)
    out2 = jax.block_until_ready(f(x2, y2))
    ref2 = combined_losses_ref(x2, y2)
    assert jnp.allclose(out2, ref2, rtol=1e-5, atol=1e-5), (out2, ref2)

    print("KERNEL_OK")
</pallas_src>

<mosaic_0001>
module attributes {stable_mosaic.version = 11 : i64} {
  func.func @combined_loss_kernel(%arg0: i32, %arg1: i32, %arg2: memref<8x16x128xf32, #tpu.memory_space<vmem>>, %arg3: memref<4x16x128xf32, #tpu.memory_space<vmem>>, %arg4: memref<8x16x128xf32, #tpu.memory_space<vmem>>, %arg5: memref<4x16x128xf32, #tpu.memory_space<vmem>>, %arg6: memref<1x1x8x128xf32, #tpu.memory_space<vmem>>) attributes {dimension_semantics = [#tpu.dimension_semantics<parallel>, #tpu.dimension_semantics<parallel>], iteration_bounds = array<i64: 1, 2>, scalar_prefetch = 0 : i64, scratch_operands = 0 : i64, tpu.core_type = #tpu.core_type<tc>, window_params = [{transform_indices = @transform_0, window_bounds = array<i64: 8, 16, 128>}, {transform_indices = @transform_1, window_bounds = array<i64: 4, 16, 128>}, {transform_indices = @transform_2, window_bounds = array<i64: 8, 16, 128>}, {transform_indices = @transform_3, window_bounds = array<i64: 4, 16, 128>}, {transform_indices = @transform_4, window_bounds = array<i64: 1, 1, 8, 128>}]} {
    %c0 = arith.constant 0 : index
    %c0_0 = arith.constant 0 : index
    %c0_1 = arith.constant 0 : index
    %0 = vector.load %arg2[%c0, %c0_0, %c0_1] : memref<8x16x128xf32, #tpu.memory_space<vmem>>, vector<8x16x128xf32>
    %c0_2 = arith.constant 0 : index
    %c0_3 = arith.constant 0 : index
    %c0_4 = arith.constant 0 : index
    %1 = vector.load %arg3[%c0_2, %c0_3, %c0_4] : memref<4x16x128xf32, #tpu.memory_space<vmem>>, vector<4x16x128xf32>
    %2 = tpu.concatenate %0, %1 in 0 : vector<8x16x128xf32>, vector<4x16x128xf32> -> vector<12x16x128xf32>
    %c0_5 = arith.constant 0 : index
    %c0_6 = arith.constant 0 : index
    %c0_7 = arith.constant 0 : index
    %3 = vector.load %arg4[%c0_5, %c0_6, %c0_7] : memref<8x16x128xf32, #tpu.memory_space<vmem>>, vector<8x16x128xf32>
    %c0_8 = arith.constant 0 : index
    %c0_9 = arith.constant 0 : index
    %c0_10 = arith.constant 0 : index
    %4 = vector.load %arg5[%c0_8, %c0_9, %c0_10] : memref<4x16x128xf32, #tpu.memory_space<vmem>>, vector<4x16x128xf32>
    %5 = tpu.concatenate %3, %4 in 0 : vector<8x16x128xf32>, vector<4x16x128xf32> -> vector<12x16x128xf32>
    %6 = vector.extract_strided_slice %2 {offsets = [2, 0, 0], sizes = [8, 16, 128], strides = [1, 1, 1]} : vector<12x16x128xf32> to vector<8x16x128xf32>
    %7 = vector.extract_strided_slice %5 {offsets = [2, 0, 0], sizes = [8, 16, 128], strides = [1, 1, 1]} : vector<12x16x128xf32> to vector<8x16x128xf32>
    %8 = arith.subf %6, %7 : vector<8x16x128xf32>
    %9 = arith.mulf %8, %8 : vector<8x16x128xf32>
    %cst = arith.constant dense<0.000000e+00> : vector<16x128xf32>
    %10 = vector.multi_reduction <add>, %9, %cst [0] : vector<8x16x128xf32> to vector<16x128xf32>
    %11 = tpu.iota {dimensions = array<i32: 1>} : vector<12x16x128xi32>
    %cst_11 = arith.constant 0.292081714 : f32
    %12 = vector.broadcast %cst_11 : f32 to vector<12x16x128xf32>
    %13 = arith.mulf %12, %2 : vector<12x16x128xf32>
    %cst_12 = arith.constant 0.292081714 : f32
    %14 = vector.broadcast %cst_12 : f32 to vector<12x16x128xf32>
    %15 = arith.mulf %14, %5 : vector<12x16x128xf32>
    %16 = arith.mulf %2, %2 : vector<12x16x128xf32>
    %cst_13 = arith.constant 0.292081714 : f32
    %17 = vector.broadcast %cst_13 : f32 to vector<12x16x128xf32>
    %18 = arith.mulf %17, %16 : vector<12x16x128xf32>
    %19 = arith.mulf %5, %5 : vector<12x16x128xf32>
    %cst_14 = arith.constant 0.292081714 : f32
    %20 = vector.broadcast %cst_14 : f32 to vector<12x16x128xf32>
    %21 = arith.mulf %20, %19 : vector<12x16x128xf32>
    %22 = arith.mulf %2, %5 : vector<12x16x128xf32>
    %cst_15 = arith.constant 0.292081714 : f32
    %23 = vector.broadcast %cst_15 : f32 to vector<12x16x128xf32>
    %24 = arith.mulf %23, %22 : vector<12x16x128xf32>
    %c2_i32 = arith.constant 2 : i32
    %25 = tpu.dynamic_rotate %2 by %c2_i32 dim 1 : vector<12x16x128xf32>, i32 -> vector<12x16x128xf32>
    %c0_i32 = arith.constant 0 : i32
    %26 = vector.broadcast %c0_i32 : i32 to vector<12x16x128xi32>
    %27 = arith.cmpi eq, %11, %26 : vector<12x16x128xi32>
    %28 = vector.extract_strided_slice %2 {offsets = [0, 2, 0], sizes = [12, 1, 128], strides = [1, 1, 1]} : vector<12x16x128xf32> to vector<12x1x128xf32>
    %29 = vector.shape_cast %28 : vector<12x1x128xf32> to vector<12x1x128xf32>
    %30 = vector.broadcast %29 : vector<12x1x128xf32> to vector<12x16x128xf32>
    %31 = arith.select %27, %30, %25 : vector<12x16x128xi1>, vector<12x16x128xf32>
    %c1_i32 = arith.constant 1 : i32
    %32 = vector.broadcast %c1_i32 : i32 to vector<12x16x128xi32>
    %33 = arith.cmpi eq, %11, %32 : vector<12x16x128xi32>
    %34 = vector.extract_strided_slice %2 {offsets = [0, 1, 0], sizes = [12, 1, 128], strides = [1, 1, 1]} : vector<12x16x128xf32> to vector<12x1x128xf32>
    %35 = vector.shape_cast %34 : vector<12x1x128xf32> to vector<12x1x128xf32>
    %36 = vector.broadcast %35 : vector<12x1x128xf32> to vector<12x16x128xf32>
    %37 = arith.select %33, %36, %31 : vector<12x16x128xi1>, vector<12x16x128xf32>
    %c2_i32_16 = arith.constant 2 : i32
    %38 = tpu.dynamic_rotate %5 by %c2_i32_16 dim 1 : vector<12x16x128xf32>, i32 -> vector<12x16x128xf32>
    %c0_i32_17 = arith.constant 0 : i32
    %39 = vector.broadcast %c0_i32_17 : i32 to vector<12x16x128xi32>
    %40 = arith.cmpi eq, %11, %39 : vector<12x16x128xi32>
    %41 = vector.extract_strided_slice %5 {offsets = [0, 2, 0], sizes = [12, 1, 128], strides = [1, 1, 1]} : vector<12x16x128xf32> to vector<12x1x128xf32>
    %42 = vector.shape_cast %41 : vector<12x1x128xf32> to vector<12x1x128xf32>
    %43 = vector.broadcast %42 : vector<12x1x128xf32> to vector<12x16x128xf32>
    %44 = arith.select %40, %43, %38 : vector<12x16x128xi1>, vector<12x16x128xf32>
    %c1_i32_18 = arith.constant 1 : i32
    %45 = vector.broadcast %c1_i32_18 : i32 to vector<12x16x128xi32>
    %46 = arith.cmpi eq, %11, %45 : vector<12x16x128xi32>
    %47 = vector.extract_strided_slice %5 {offsets = [0, 1, 0], sizes = [12, 1, 128], strides = [1, 1, 1]} : vector<12x16x128xf32> to vector<12x1x128xf32>
    %48 = vector.shape_cast %47 : vector<12x1x128xf32> to vector<12x1x128xf32>
    %49 = vector.broadcast %48 : vector<12x1x128xf32> to vector<12x16x128xf32>
    %50 = arith.select %46, %49, %44 : vector<12x16x128xi1>, vector<12x16x128xf32>
    %cst_19 = arith.constant 0.120078385 : f32
    %51 = vector.broadcast %cst_19 : f32 to vector<12x16x128xf32>
    %52 = arith.mulf %51, %37 : vector<12x16x128xf32>
    %53 = arith.addf %13, %52 : vector<12x16x128xf32>
    %cst_20 = arith.constant 0.120078385 : f32
    %54 = vector.broadcast %cst_20 : f32 to vector<12x16x128xf32>
    %55 = arith.mulf %54, %50 : vector<12x16x128xf32>
    %56 = arith.addf %15, %55 : vector<12x16x128xf32>
    %57 = arith.mulf %37, %37 : vector<12x16x128xf32>
    %cst_21 = arith.constant 0.120078385 : f32
    %58 = vector.broadcast %cst_21 : f32 to vector<12x16x128xf32>
    %59 = arith.mulf %58, %57 : vector<12x16x128xf32>
    %60 = arith.addf %18, %59 : vector<12x16x128xf32>
    %61 = arith.mulf %50, %50 : vector<12x16x128xf32>
    %cst_22 = arith.constant 0.120078385 : f32
    %62 = vector.broadcast %cst_22 : f32 to vector<12x16x128xf32>
    %63 = arith.mulf %62, %61 : vector<12x16x128xf32>
    %64 = arith.addf %21, %63 : vector<12x16x128xf32>
    %65 = arith.mulf %37, %50 : vector<12x16x128xf32>
    %cst_23 = arith.constant 0.120078385 : f32
    %66 = vector.broadcast %cst_23 : f32 to vector<12x16x128xf32>
    %67 = arith.mulf %66, %65 : vector<12x16x128xf32>
    %68 = arith.addf %24, %67 : vector<12x16x128xf32>
    %c1_i32_24 = arith.constant 1 : i32
    %69 = tpu.dynamic_rotate %2 by %c1_i32_24 dim 1 : vector<12x16x128xf32>, i32 -> vector<12x16x128xf32>
    %c0_i32_25 = arith.constant 0 : i32
    %70 = vector.broadcast %c0_i32_25 : i32 to vector<12x16x128xi32>
    %71 = arith.cmpi eq, %11, %70 : vector<12x16x128xi32>
    %72 = vector.extract_strided_slice %2 {offsets = [0, 1, 0], sizes = [12, 1, 128], strides = [1, 1, 1]} : vector<12x16x128xf32> to vector<12x1x128xf32>
    %73 = vector.shape_cast %72 : vector<12x1x128xf32> to vector<12x1x128xf32>
    %74 = vector.broadcast %73 : vector<12x1x128xf32> to vector<12x16x128xf32>
    %75 = arith.select %71, %74, %69 : vector<12x16x128xi1>, vector<12x16x128xf32>
    %c1_i32_26 = arith.constant 1 : i32
    %76 = tpu.dynamic_rotate %5 by %c1_i32_26 dim 1 : vector<12x16x128xf32>, i32 -> vector<12x16x128xf32>
    %c0_i32_27 = arith.constant 0 : i32
    %77 = vector.broadcast %c0_i32_27 : i32 to vector<12x16x128xi32>
    %78 = arith.cmpi eq, %11, %77 : vector<12x16x128xi32>
    %79 = vector.extract_strided_slice %5 {offsets = [0, 1, 0], sizes = [12, 1, 128], strides = [1, 1, 1]} : vector<12x16x128xf32> to vector<12x1x128xf32>
    %80 = vector.shape_cast %79 : vector<12x1x128xf32> to vector<12x1x128xf32>
    %81 = vector.broadcast %80 : vector<12x1x128xf32> to vector<12x16x128xf32>
    %82 = arith.select %78, %81, %76 : vector<12x16x128xi1>, vector<12x16x128xf32>
    %cst_28 = arith.constant 0.233880758 : f32
    %83 = vector.broadcast %cst_28 : f32 to vector<12x16x128xf32>
    %84 = arith.mulf %83, %75 : vector<12x16x128xf32>
    %85 = arith.addf %53, %84 : vector<12x16x128xf32>
    %cst_29 = arith.constant 0.233880758 : f32
    %86 = vector.broadcast %cst_29 : f32 to vector<12x16x128xf32>
    %87 = arith.mulf %86, %82 : vector<12x16x128xf32>
    %88 = arith.addf %56, %87 : vector<12x16x128xf32>
    %89 = arith.mulf %75, %75 : vector<12x16x128xf32>
    %cst_30 = arith.constant 0.233880758 : f32
    %90 = vector.broadcast %cst_30 : f32 to vector<12x16x128xf32>
    %91 = arith.mulf %90, %89 : vector<12x16x128xf32>
    %92 = arith.addf %60, %91 : vector<12x16x128xf32>
    %93 = arith.mulf %82, %82 : vector<12x16x128xf32>
    %cst_31 = arith.constant 0.233880758 : f32
    %94 = vector.broadcast %cst_31 : f32 to vector<12x16x128xf32>
    %95 = arith.mulf %94, %93 : vector<12x16x128xf32>
    %96 = arith.addf %64, %95 : vector<12x16x128xf32>
    %97 = arith.mulf %75, %82 : vector<12x16x128xf32>
    %cst_32 = arith.constant 0.233880758 : f32
    %98 = vector.broadcast %cst_32 : f32 to vector<12x16x128xf32>
    %99 = arith.mulf %98, %97 : vector<12x16x128xf32>
    %100 = arith.addf %68, %99 : vector<12x16x128xf32>
    %c15_i32 = arith.constant 15 : i32
    %101 = tpu.dynamic_rotate %2 by %c15_i32 dim 1 : vector<12x16x128xf32>, i32 -> vector<12x16x128xf32>
    %c15_i32_33 = arith.constant 15 : i32
    %102 = vector.broadcast %c15_i32_33 : i32 to vector<12x16x128xi32>
    %103 = arith.cmpi eq, %11, %102 : vector<12x16x128xi32>
    %104 = vector.extract_strided_slice %2 {offsets = [0, 14, 0], sizes = [12, 1, 128], strides = [1, 1, 1]} : vector<12x16x128xf32> to vector<12x1x128xf32>
    %105 = vector.shape_cast %104 : vector<12x1x128xf32> to vector<12x1x128xf32>
    %106 = vector.broadcast %105 : vector<12x1x128xf32> to vector<12x16x128xf32>
    %107 = arith.select %103, %106, %101 : vector<12x16x128xi1>, vector<12x16x128xf32>
    %c15_i32_34 = arith.constant 15 : i32
    %108 = tpu.dynamic_rotate %5 by %c15_i32_34 dim 1 : vector<12x16x128xf32>, i32 -> vector<12x16x128xf32>
    %c15_i32_35 = arith.constant 15 : i32
    %109 = vector.broadcast %c15_i32_35 : i32 to vector<12x16x128xi32>
    %110 = arith.cmpi eq, %11, %109 : vector<12x16x128xi32>
    %111 = vector.extract_strided_slice %5 {offsets = [0, 14, 0], sizes = [12, 1, 128], strides = [1, 1, 1]} : vector<12x16x128xf32> to vector<12x1x128xf32>
    %112 = vector.shape_cast %111 : vector<12x1x128xf32> to vector<12x1x128xf32>
    %113 = vector.broadcast %112 : vector<12x1x128xf32> to vector<12x16x128xf32>
    %114 = arith.select %110, %113, %108 : vector<12x16x128xi1>, vector<12x16x128xf32>
    %cst_36 = arith.constant 0.233880758 : f32
    %115 = vector.broadcast %cst_36 : f32 to vector<12x16x128xf32>
    %116 = arith.mulf %115, %107 : vector<12x16x128xf32>
    %117 = arith.addf %85, %116 : vector<12x16x128xf32>
    %cst_37 = arith.constant 0.233880758 : f32
    %118 = vector.broadcast %cst_37 : f32 to vector<12x16x128xf32>
    %119 = arith.mulf %118, %114 : vector<12x16x128xf32>
    %120 = arith.addf %88, %119 : vector<12x16x128xf32>
    %121 = arith.mulf %107, %107 : vector<12x16x128xf32>
    %cst_38 = arith.constant 0.233880758 : f32
    %122 = vector.broadcast %cst_38 : f32 to vector<12x16x128xf32>
    %123 = arith.mulf %122, %121 : vector<12x16x128xf32>
    %124 = arith.addf %92, %123 : vector<12x16x128xf32>
    %125 = arith.mulf %114, %114 : vector<12x16x128xf32>
    %cst_39 = arith.constant 0.233880758 : f32
    %126 = vector.broadcast %cst_39 : f32 to vector<12x16x128xf32>
    %127 = arith.mulf %126, %125 : vector<12x16x128xf32>
    %128 = arith.addf %96, %127 : vector<12x16x128xf32>
    %129 = arith.mulf %107, %114 : vector<12x16x128xf32>
    %cst_40 = arith.constant 0.233880758 : f32
    %130 = vector.broadcast %cst_40 : f32 to vector<12x16x128xf32>
    %131 = arith.mulf %130, %129 : vector<12x16x128xf32>
    %132 = arith.addf %100, %131 : vector<12x16x128xf32>
    %c14_i32 = arith.constant 14 : i32
    %133 = tpu.dynamic_rotate %2 by %c14_i32 dim 1 : vector<12x16x128xf32>, i32 -> vector<12x16x128xf32>
    %c14_i32_41 = arith.constant 14 : i32
    %134 = vector.broadcast %c14_i32_41 : i32 to vector<12x16x128xi32>
    %135 = arith.cmpi eq, %11, %134 : vector<12x16x128xi32>
    %136 = vector.extract_strided_slice %2 {offsets = [0, 14, 0], sizes = [12, 1, 128], strides = [1, 1, 1]} : vector<12x16x128xf32> to vector<12x1x128xf32>
    %137 = vector.shape_cast %136 : vector<12x1x128xf32> to vector<12x1x128xf32>
    %138 = vector.broadcast %137 : vector<12x1x128xf32> to vector<12x16x128xf32>
    %139 = arith.select %135, %138, %133 : vector<12x16x128xi1>, vector<12x16x128xf32>
    %c15_i32_42 = arith.constant 15 : i32
    %140 = vector.broadcast %c15_i32_42 : i32 to vector<12x16x128xi32>
    %141 = arith.cmpi eq, %11, %140 : vector<12x16x128xi32>
    %142 = vector.extract_strided_slice %2 {offsets = [0, 13, 0], sizes = [12, 1, 128], strides = [1, 1, 1]} : vector<12x16x128xf32> to vector<12x1x128xf32>
    %143 = vector.shape_cast %142 : vector<12x1x128xf32> to vector<12x1x128xf32>
    %144 = vector.broadcast %143 : vector<12x1x128xf32> to vector<12x16x128xf32>
    %145 = arith.select %141, %144, %139 : vector<12x16x128xi1>, vector<12x16x128xf32>
    %c14_i32_43 = arith.constant 14 : i32
    %146 = tpu.dynamic_rotate %5 by %c14_i32_43 dim 1 : vector<12x16x128xf32>, i32 -> vector<12x16x128xf32>
    %c14_i32_44 = arith.constant 14 : i32
    %147 = vector.broadcast %c14_i32_44 : i32 to vector<12x16x128xi32>
    %148 = arith.cmpi eq, %11, %147 : vector<12x16x128xi32>
    %149 = vector.extract_strided_slice %5 {offsets = [0, 14, 0], sizes = [12, 1, 128], strides = [1, 1, 1]} : vector<12x16x128xf32> to vector<12x1x128xf32>
    %150 = vector.shape_cast %149 : vector<12x1x128xf32> to vector<12x1x128xf32>
    %151 = vector.broadcast %150 : vector<12x1x128xf32> to vector<12x16x128xf32>
    %152 = arith.select %148, %151, %146 : vector<12x16x128xi1>, vector<12x16x128xf32>
    %c15_i32_45 = arith.constant 15 : i32
    %153 = vector.broadcast %c15_i32_45 : i32 to vector<12x16x128xi32>
    %154 = arith.cmpi eq, %11, %153 : vector<12x16x128xi32>
    %155 = vector.extract_strided_slice %5 {offsets = [0, 13, 0], sizes = [12, 1, 128], strides = [1, 1, 1]} : vector<12x16x128xf32> to vector<12x1x128xf32>
    %156 = vector.shape_cast %155 : vector<12x1x128xf32> to vector<12x1x128xf32>
    %157 = vector.broadcast %156 : vector<12x1x128xf32> to vector<12x16x128xf32>
    %158 = arith.select %154, %157, %152 : vector<12x16x128xi1>, vector<12x16x128xf32>
    %cst_46 = arith.constant 0.120078385 : f32
    %159 = vector.broadcast %cst_46 : f32 to vector<12x16x128xf32>
    %160 = arith.mulf %159, %145 : vector<12x16x128xf32>
    %161 = arith.addf %117, %160 : vector<12x16x128xf32>
    %cst_47 = arith.constant 0.120078385 : f32
    %162 = vector.broadcast %cst_47 : f32 to vector<12x16x128xf32>
    %163 = arith.mulf %162, %158 : vector<12x16x128xf32>
    %164 = arith.addf %120, %163 : vector<12x16x128xf32>
    %165 = arith.mulf %145, %145 : vector<12x16x128xf32>
    %cst_48 = arith.constant 0.120078385 : f32
    %166 = vector.broadcast %cst_48 : f32 to vector<12x16x128xf32>
    %167 = arith.mulf %166, %165 : vector<12x16x128xf32>
    %168 = arith.addf %124, %167 : vector<12x16x128xf32>
    %169 = arith.mulf %158, %158 : vector<12x16x128xf32>
    %cst_49 = arith.constant 0.120078385 : f32
    %170 = vector.broadcast %cst_49 : f32 to vector<12x16x128xf32>
    %171 = arith.mulf %170, %169 : vector<12x16x128xf32>
    %172 = arith.addf %128, %171 : vector<12x16x128xf32>
    %173 = arith.mulf %145, %158 : vector<12x16x128xf32>
    %cst_50 = arith.constant 0.120078385 : f32
    %174 = vector.broadcast %cst_50 : f32 to vector<12x16x128xf32>
    %175 = arith.mulf %174, %173 : vector<12x16x128xf32>
    %176 = arith.addf %132, %175 : vector<12x16x128xf32>
    %177 = vector.extract_strided_slice %161 {offsets = [0, 0, 0], sizes = [8, 16, 128], strides = [1, 1, 1]} : vector<12x16x128xf32> to vector<8x16x128xf32>
    %cst_51 = arith.constant 0.120078385 : f32
    %178 = vector.broadcast %cst_51 : f32 to vector<8x16x128xf32>
    %179 = arith.mulf %178, %177 : vector<8x16x128xf32>
    %180 = vector.extract_strided_slice %164 {offsets = [0, 0, 0], sizes = [8, 16, 128], strides = [1, 1, 1]} : vector<12x16x128xf32> to vector<8x16x128xf32>
    %cst_52 = arith.constant 0.120078385 : f32
    %181 = vector.broadcast %cst_52 : f32 to vector<8x16x128xf32>
    %182 = arith.mulf %181, %180 : vector<8x16x128xf32>
    %183 = vector.extract_strided_slice %168 {offsets = [0, 0, 0], sizes = [8, 16, 128], strides = [1, 1, 1]} : vector<12x16x128xf32> to vector<8x16x128xf32>
    %cst_53 = arith.constant 0.120078385 : f32
    %184 = vector.broadcast %cst_53 : f32 to vector<8x16x128xf32>
    %185 = arith.mulf %184, %183 : vector<8x16x128xf32>
    %186 = vector.extract_strided_slice %172 {offsets = [0, 0, 0], sizes = [8, 16, 128], strides = [1, 1, 1]} : vector<12x16x128xf32> to vector<8x16x128xf32>
    %cst_54 = arith.constant 0.120078385 : f32
    %187 = vector.broadcast %cst_54 : f32 to vector<8x16x128xf32>
    %188 = arith.mulf %187, %186 : vector<8x16x128xf32>
    %189 = vector.extract_strided_slice %176 {offsets = [0, 0, 0], sizes = [8, 16, 128], strides = [1, 1, 1]} : vector<12x16x128xf32> to vector<8x16x128xf32>
    %cst_55 = arith.constant 0.120078385 : f32
    %190 = vector.broadcast %cst_55 : f32 to vector<8x16x128xf32>
    %191 = arith.mulf %190, %189 : vector<8x16x128xf32>
    %192 = vector.extract_strided_slice %161 {offsets = [1, 0, 0], sizes = [8, 16, 128], strides = [1, 1, 1]} : vector<12x16x128xf32> to vector<8x16x128xf32>
    %cst_56 = arith.constant 0.233880758 : f32
    %193 = vector.broadcast %cst_56 : f32 to vector<8x16x128xf32>
    %194 = arith.mulf %193, %192 : vector<8x16x128xf32>
    %195 = arith.addf %179, %194 : vector<8x16x128xf32>
    %196 = vector.extract_strided_slice %164 {offsets = [1, 0, 0], sizes = [8, 16, 128], strides = [1, 1, 1]} : vector<12x16x128xf32> to vector<8x16x128xf32>
    %cst_57 = arith.constant 0.233880758 : f32
    %197 = vector.broadcast %cst_57 : f32 to vector<8x16x128xf32>
    %198 = arith.mulf %197, %196 : vector<8x16x128xf32>
    %199 = arith.addf %182, %198 : vector<8x16x128xf32>
    %200 = vector.extract_strided_slice %168 {offsets = [1, 0, 0], sizes = [8, 16, 128], strides = [1, 1, 1]} : vector<12x16x128xf32> to vector<8x16x128xf32>
    %cst_58 = arith.constant 0.233880758 : f32
    %201 = vector.broadcast %cst_58 : f32 to vector<8x16x128xf32>
    %202 = arith.mulf %201, %200 : vector<8x16x128xf32>
    %203 = arith.addf %185, %202 : vector<8x16x128xf32>
    %204 = vector.extract_strided_slice %172 {offsets = [1, 0, 0], sizes = [8, 16, 128], strides = [1, 1, 1]} : vector<12x16x128xf32> to vector<8x16x128xf32>
    %cst_59 = arith.constant 0.233880758 : f32
    %205 = vector.broadcast %cst_59 : f32 to vector<8x16x128xf32>
    %206 = arith.mulf %205, %204 : vector<8x16x128xf32>
    %207 = arith.addf %188, %206 : vector<8x16x128xf32>
    %208 = vector.extract_strided_slice %176 {offsets = [1, 0, 0], sizes = [8, 16, 128], strides = [1, 1, 1]} : vector<12x16x128xf32> to vector<8x16x128xf32>
    %cst_60 = arith.constant 0.233880758 : f32
    %209 = vector.broadcast %cst_60 : f32 to vector<8x16x128xf32>
    %210 = arith.mulf %209, %208 : vector<8x16x128xf32>
    %211 = arith.addf %191, %210 : vector<8x16x128xf32>
    %212 = vector.extract_strided_slice %161 {offsets = [2, 0, 0], sizes = [8, 16, 128], strides = [1, 1, 1]} : vector<12x16x128xf32> to vector<8x16x128xf32>
    %cst_61 = arith.constant 0.292081714 : f32
    %213 = vector.broadcast %cst_61 : f32 to vector<8x16x128xf32>
    %214 = arith.mulf %213, %212 : vector<8x16x128xf32>
    %215 = arith.addf %195, %214 : vector<8x16x128xf32>
    %216 = vector.extract_strided_slice %164 {offsets = [2, 0, 0], sizes = [8, 16, 128], strides = [1, 1, 1]} : vector<12x16x128xf32> to vector<8x16x128xf32>
    %cst_62 = arith.constant 0.292081714 : f32
    %217 = vector.broadcast %cst_62 : f32 to vector<8x16x128xf32>
    %218 = arith.mulf %217, %216 : vector<8x16x128xf32>
    %219 = arith.addf %199, %218 : vector<8x16x128xf32>
    %220 = vector.extract_strided_slice %168 {offsets = [2, 0, 0], sizes = [8, 16, 128], strides = [1, 1, 1]} : vector<12x16x128xf32> to vector<8x16x128xf32>
    %cst_63 = arith.constant 0.292081714 : f32
    %221 = vector.broadcast %cst_63 : f32 to vector<8x16x128xf32>
    %222 = arith.mulf %221, %220 : vector<8x16x128xf32>
    %223 = arith.addf %203, %222 : vector<8x16x128xf32>
    %224 = vector.extract_strided_slice %172 {offsets = [2, 0, 0], sizes = [8, 16, 128], strides = [1, 1, 1]} : vector<12x16x128xf32> to vector<8x16x128xf32>
    %cst_64 = arith.constant 0.292081714 : f32
    %225 = vector.broadcast %cst_64 : f32 to vector<8x16x128xf32>
    %226 = arith.mulf %225, %224 : vector<8x16x128xf32>
    %227 = arith.addf %207, %226 : vector<8x16x128xf32>
    %228 = vector.extract_strided_slice %176 {offsets = [2, 0, 0], sizes = [8, 16, 128], strides = [1, 1, 1]} : vector<12x16x128xf32> to vector<8x16x128xf32>
    %cst_65 = arith.constant 0.292081714 : f32
    %229 = vector.broadcast %cst_65 : f32 to vector<8x16x128xf32>
    %230 = arith.mulf %229, %228 : vector<8x16x128xf32>
    %231 = arith.addf %211, %230 : vector<8x16x128xf32>
    %232 = vector.extract_strided_slice %161 {offsets = [3, 0, 0], sizes = [8, 16, 128], strides = [1, 1, 1]} : vector<12x16x128xf32> to vector<8x16x128xf32>
    %cst_66 = arith.constant 0.233880758 : f32
    %233 = vector.broadcast %cst_66 : f32 to vector<8x16x128xf32>
    %234 = arith.mulf %233, %232 : vector<8x16x128xf32>
    %235 = arith.addf %215, %234 : vector<8x16x128xf32>
    %236 = vector.extract_strided_slice %164 {offsets = [3, 0, 0], sizes = [8, 16, 128], strides = [1, 1, 1]} : vector<12x16x128xf32> to vector<8x16x128xf32>
    %cst_67 = arith.constant 0.233880758 : f32
    %237 = vector.broadcast %cst_67 : f32 to vector<8x16x128xf32>
    %238 = arith.mulf %237, %236 : vector<8x16x128xf32>
    %239 = arith.addf %219, %238 : vector<8x16x128xf32>
    %240 = vector.extract_strided_slice %168 {offsets = [3, 0, 0], sizes = [8, 16, 128], strides = [1, 1, 1]} : vector<12x16x128xf32> to vector<8x16x128xf32>
    %cst_68 = arith.constant 0.233880758 : f32
    %241 = vector.broadcast %cst_68 : f32 to vector<8x16x128xf32>
    %242 = arith.mulf %241, %240 : vector<8x16x128xf32>
    %243 = arith.addf %223, %242 : vector<8x16x128xf32>
    %244 = vector.extract_strided_slice %172 {offsets = [3, 0, 0], sizes = [8, 16, 128], strides = [1, 1, 1]} : vector<12x16x128xf32> to vector<8x16x128xf32>
    %cst_69 = arith.constant 0.233880758 : f32
    %245 = vector.broadcast %cst_69 : f32 to vector<8x16x128xf32>
    %246 = arith.mulf %245, %244 : vector<8x16x128xf32>
    %247 = arith.addf %227, %246 : vector<8x16x128xf32>
    %248 = vector.extract_strided_slice %176 {offsets = [3, 0, 0], sizes = [8, 16, 128], strides = [1, 1, 1]} : vector<12x16x128xf32> to vector<8x16x128xf32>
    %cst_70 = arith.constant 0.233880758 : f32
    %249 = vector.broadcast %cst_70 : f32 to vector<8x16x128xf32>
    %250 = arith.mulf %249, %248 : vector<8x16x128xf32>
    %251 = arith.addf %231, %250 : vector<8x16x128xf32>
    %252 = vector.extract_strided_slice %161 {offsets = [4, 0, 0], sizes = [8, 16, 128], strides = [1, 1, 1]} : vector<12x16x128xf32> to vector<8x16x128xf32>
    %cst_71 = arith.constant 0.120078385 : f32
    %253 = vector.broadcast %cst_71 : f32 to vector<8x16x128xf32>
    %254 = arith.mulf %253, %252 : vector<8x16x128xf32>
    %255 = arith.addf %235, %254 : vector<8x16x128xf32>
    %256 = vector.extract_strided_slice %164 {offsets = [4, 0, 0], sizes = [8, 16, 128], strides = [1, 1, 1]} : vector<12x16x128xf32> to vector<8x16x128xf32>
    %cst_72 = arith.constant 0.120078385 : f32
    %257 = vector.broadcast %cst_72 : f32 to vector<8x16x128xf32>
    %258 = arith.mulf %257, %256 : vector<8x16x128xf32>
    %259 = arith.addf %239, %258 : vector<8x16x128xf32>
    %260 = vector.extract_strided_slice %168 {offsets = [4, 0, 0], sizes = [8, 16, 128], strides = [1, 1, 1]} : vector<12x16x128xf32> to vector<8x16x128xf32>
    %cst_73 = arith.constant 0.120078385 : f32
    %261 = vector.broadcast %cst_73 : f32 to vector<8x16x128xf32>
    %262 = arith.mulf %261, %260 : vector<8x16x128xf32>
    %263 = arith.addf %243, %262 : vector<8x16x128xf32>
    %264 = vector.extract_strided_slice %172 {offsets = [4, 0, 0], sizes = [8, 16, 128], strides = [1, 1, 1]} : vector<12x16x128xf32> to vector<8x16x128xf32>
    %cst_74 = arith.constant 0.120078385 : f32
    %265 = vector.broadcast %cst_74 : f32 to vector<8x16x128xf32>
    %266 = arith.mulf %265, %264 : vector<8x16x128xf32>
    %267 = arith.addf %247, %266 : vector<8x16x128xf32>
    %268 = vector.extract_strided_slice %176 {offsets = [4, 0, 0], sizes = [8, 16, 128], strides = [1, 1, 1]} : vector<12x16x128xf32> to vector<8x16x128xf32>
    %cst_75 = arith.constant 0.120078385 : f32
    %269 = vector.broadcast %cst_75 : f32 to vector<8x16x128xf32>
    %270 = arith.mulf %269, %268 : vector<8x16x128xf32>
    %271 = arith.addf %251, %270 : vector<8x16x128xf32>
    %272 = arith.mulf %255, %255 : vector<8x16x128xf32>
    %273 = arith.mulf %259, %259 : vector<8x16x128xf32>
    %274 = arith.mulf %255, %259 : vector<8x16x128xf32>
    %275 = arith.subf %263, %272 : vector<8x16x128xf32>
    %276 = arith.subf %267, %273 : vector<8x16x128xf32>
    %277 = arith.subf %271, %274 : vector<8x16x128xf32>
    %cst_76 = arith.constant 2.000000e+00 : f32
    %278 = vector.broadcast %cst_76 : f32 to vector<8x16x128xf32>
    %279 = arith.mulf %278, %274 : vector<8x16x128xf32>
    %cst_77 = arith.constant 9.99999974E-5 : f32
    %280 = vector.broadcast %cst_77 : f32 to vector<8x16x128xf32>
    %281 = arith.addf %279, %280 : vector<8x16x128xf32>
    %cst_78 = arith.constant 2.000000e+00 : f32
    %282 = vector.broadcast %cst_78 : f32 to vector<8x16x128xf32>
    %283 = arith.mulf %282, %277 : vector<8x16x128xf32>
    %cst_79 = arith.constant 8.99999984E-4 : f32
    %284 = vector.broadcast %cst_79 : f32 to vector<8x16x128xf32>
    %285 = arith.addf %283, %284 : vector<8x16x128xf32>
    %286 = arith.mulf %281, %285 : vector<8x16x128xf32>
    %287 = arith.addf %272, %273 : vector<8x16x128xf32>
    %cst_80 = arith.constant 9.99999974E-5 : f32
    %288 = vector.broadcast %cst_80 : f32 to vector<8x16x128xf32>
    %289 = arith.addf %287, %288 : vector<8x16x128xf32>
    %290 = arith.addf %275, %276 : vector<8x16x128xf32>
    %cst_81 = arith.constant 8.99999984E-4 : f32
    %291 = vector.broadcast %cst_81 : f32 to vector<8x16x128xf32>
    %292 = arith.addf %290, %291 : vector<8x16x128xf32>
    %293 = arith.mulf %289, %292 : vector<8x16x128xf32>
    %cst_82 = arith.constant 9.99999996E-13 : f32
    %294 = vector.broadcast %cst_82 : f32 to vector<8x16x128xf32>
    %295 = arith.addf %293, %294 : vector<8x16x128xf32>
    %296 = tpu.reciprocal %295 : vector<8x16x128xf32> -> vector<8x16x128xf32>
    %297 = arith.mulf %286, %296 : vector<8x16x128xf32>
    %cst_83 = arith.constant 1.000000e+00 : f32
    %298 = vector.broadcast %cst_83 : f32 to vector<8x16x128xf32>
    %299 = arith.subf %298, %297 : vector<8x16x128xf32>
    %cst_84 = arith.constant 5.000000e-01 : f32
    %300 = vector.broadcast %cst_84 : f32 to vector<8x16x128xf32>
    %301 = arith.mulf %300, %299 : vector<8x16x128xf32>
    %cst_85 = arith.constant 0.000000e+00 : f32
    %cst_86 = arith.constant 1.000000e+00 : f32
    %302 = vector.broadcast %cst_85 : f32 to vector<8x16x128xf32>
    %303 = arith.maximumf %302, %301 : vector<8x16x128xf32>
    %304 = vector.broadcast %cst_86 : f32 to vector<8x16x128xf32>
    %305 = arith.minimumf %304, %303 : vector<8x16x128xf32>
    %cst_87 = arith.constant dense<0.000000e+00> : vector<16x128xf32>
    %306 = vector.multi_reduction <add>, %305, %cst_87 [0] : vector<8x16x128xf32> to vector<16x128xf32>
    %307 = arith.addf %10, %306 : vector<16x128xf32>
    %cst_88 = arith.constant dense<0.000000e+00> : vector<128xf32>
    %308 = vector.multi_reduction <add>, %307, %cst_88 [0] : vector<16x128xf32> to vector<128xf32>
    %309 = vector.shape_cast %308 : vector<128xf32> to vector<1x128xf32>
    %c128_i32 = arith.constant 128 : i32
    %310 = arith.muli %arg0, %c128_i32 : i32
    %311 = tpu.iota {dimensions = array<i32: 1>} : vector<1x128xi32>
    %312 = vector.broadcast %310 : i32 to vector<1x128xi32>
    %313 = arith.addi %312, %311 : vector<1x128xi32>
    %c12_i32 = arith.constant 12 : i32
    %314 = vector.broadcast %c12_i32 : i32 to vector<1x128xi32>
    %315 = arith.cmpi slt, %313, %314 : vector<1x128xi32>
    %cst_89 = arith.constant 0.000000e+00 : f32
    %316 = vector.broadcast %cst_89 : f32 to vector<1x128xf32>
    %317 = arith.select %315, %309, %316 : vector<1x128xi1>, vector<1x128xf32>
    %318 = tpu.iota {dimensions = array<i32: 0>} : vector<8x128xi32>
    %c0_i32_90 = arith.constant 0 : i32
    %319 = vector.broadcast %c0_i32_90 : i32 to vector<8x128xi32>
    %320 = arith.cmpi eq, %318, %319 : vector<8x128xi32>
    %cst_91 = arith.constant 0.000000e+00 : f32
    %321 = vector.shape_cast %317 : vector<1x128xf32> to vector<1x128xf32>
    %322 = vector.broadcast %321 : vector<1x128xf32> to vector<8x128xf32>
    %323 = vector.broadcast %cst_91 : f32 to vector<8x128xf32>
    %324 = arith.select %320, %322, %323 : vector<8x128xi1>, vector<8x128xf32>
    %c0_92 = arith.constant 0 : index
    %c0_93 = arith.constant 0 : index
    %c0_94 = arith.constant 0 : index
    %c0_95 = arith.constant 0 : index
    %325 = vector.load %arg6[%c0_92, %c0_93, %c0_94, %c0_95] : memref<1x1x8x128xf32, #tpu.memory_space<vmem>>, vector<1x1x8x128xf32>
    %326 = vector.shape_cast %325 : vector<1x1x8x128xf32> to vector<8x128xf32>
    %327 = vector.shape_cast %324 : vector<8x128xf32> to vector<1x1x8x128xf32>
    tpu.vector_store %arg6[%c0_92, %c0_93, %c0_94, %c0_95], %327 {strides = array<i32>} : memref<1x1x8x128xf32, #tpu.memory_space<vmem>>, vector<1x1x8x128xf32>,
    return
  }
  func.func @transform_0(%arg0: i32, %arg1: i32) -> (i32, i32, i32) {
    %c0_i32 = arith.constant 0 : i32
    %c0_i32_0 = arith.constant 0 : i32
    return %arg1, %c0_i32, %arg0 : i32, i32, i32
  }
  func.func @transform_1(%arg0: i32, %arg1: i32) -> (i32, i32, i32) {
    %c1_i32 = arith.constant 1 : i32
    %0 = arith.addi %arg1, %c1_i32 : i32
    %c2_i32 = arith.constant 2 : i32
    %1 = arith.muli %0, %c2_i32 : i32
    %c0_i32 = arith.constant 0 : i32
    %c0_i32_0 = arith.constant 0 : i32
    return %1, %c0_i32, %arg0 : i32, i32, i32
  }
  func.func @transform_2(%arg0: i32, %arg1: i32) -> (i32, i32, i32) {
    %c0_i32 = arith.constant 0 : i32
    %c0_i32_0 = arith.constant 0 : i32
    return %arg1, %c0_i32, %arg0 : i32, i32, i32
  }
  func.func @transform_3(%arg0: i32, %arg1: i32) -> (i32, i32, i32) {
    %c1_i32 = arith.constant 1 : i32
    %0 = arith.addi %arg1, %c1_i32 : i32
    %c2_i32 = arith.constant 2 : i32
    %1 = arith.muli %0, %c2_i32 : i32
    %c0_i32 = arith.constant 0 : i32
    %c0_i32_0 = arith.constant 0 : i32
    return %1, %c0_i32, %arg0 : i32, i32, i32
  }
  func.func @transform_4(%arg0: i32, %arg1: i32) -> (i32, i32, i32, i32) {
    %c0_i32 = arith.constant 0 : i32
    %c0_i32_0 = arith.constant 0 : i32
    %c0_i32_1 = arith.constant 0 : i32
    return %arg0, %arg1, %c0_i32, %c0_i32_0 : i32, i32, i32, i32
  }
}

</mosaic_0001>

<bundles_post_ra>
// kernel: combined_losses.1
= control target key start
LH: loop header
LB: loop body
LE: loop exit
PB: predicated region body
PF: predicated region fallthrough
CT: control target
= control target key end

     0   :  { %s12354_s0 = inlined_call_operand.hbm [shape: f32[20,16,128], index: 0, kind: input, shape index: {}, may-alias: {0,1}]   ;;  %s12355_s1 = inlined_call_operand.hbm [shape: f32[20,16,128], index: 1, kind: input, shape index: {}, may-alias: {0,1}]   ;;  %s12356_s2 = inlined_call_operand.hbm [shape: f32[20,16,128], index: 2, kind: input, shape index: {}, may-alias: {2,3}]   ;;  %s12357_s3 = inlined_call_operand.hbm [shape: f32[20,16,128], index: 3, kind: input, shape index: {}, may-alias: {2,3}]   ;;  %s12358_s4 = inlined_call_operand.hbm [shape: f32[1,2,8,128], index: 4, kind: output, shape index: {}]  }
   0x1   :  { %13009 = sst [smem:[#allocation282_spill]] %s12354_s0 }
   0x2   :  { %9 = vsyncpa [#allocation3], 0 }
   0x3   :  { %11 = vsyncpa [#allocation3 + $0x1], 0 }
   0x4   :  { %12 = vsyncpa [#allocation6], 0 }
   0x5   :  { %14 = vsyncpa [#allocation6 + $0x1], 0 }
   0x6   :  { %15 = vsyncpa [#allocation9], 0 }
   0x7   :  { %17 = vsyncpa [#allocation9 + $0x1], 0 }
   0x8   :  { %18 = vsyncpa [#allocation4], 0 }
   0x9   :  { %20 = vsyncpa [#allocation4 + $0x1], 0  ;;  %s4763_s15 = smov 0   ;;  %s4765_s16 = smov 0  }
   0xa   :  { %s4767_s17 = smov 0   ;;  %s4769_s18 = smov 0  }
   0xb   :  { %s4771_s19 = smov 0   ;;  %s4773_s20 = smov 0  }
   0xc   :  { %s4775_s21 = smov 0   ;;  %s4777_s22 = smov 0  }
   0xd   :  { %s4779_s23 = smov 0  }
   0xe LB: > { %13010 = sst [smem:[#allocation16_spill]] %s4705_s18  ;;  %s4809_s24 = sadd.s32 4294967295, %s4725_s23   ;;  %s4725_s23 = sphi %s4779_s23, %s26_s23   ;;  %s4721_s22 = sphi %s4777_s22, %s15918_s22   ;;  %s4717_s21 = sphi %s4775_s21, %s15917_s21   ;;  %s4713_s20 = sphi %s4773_s20, %s15916_s20   ;;  %s4709_s19 = sphi %s4771_s19, %s15915_s19   ;;  %s4705_s18 = sphi %s4769_s18, %s15914_s18   ;;  %s4701_s17 = sphi %s4767_s17, %s15913_s17   ;;  %s4697_s16 = sphi %s4765_s16, %s15912_s16   ;;  %s4693_s15 = sphi %s4763_s15, %s15911_s15  }
   0xf   : > { %s4207_s25 = sadd.s32 4294967294, %s4725_s23   ;;  %s35_s26 = sadd.s32 1, %s4721_s22 }
  0x10   : > { %s47_s27 = sadd.s32 1, %s4713_s20  ;;  %p36_p0 = scmp.ge.s32.totalorder %s35_s26, 2 }
  0x11   : > { %p54_p1 = scmp.ne.s32.totalorder %s4713_s20, %s4709_s19  ;;  %p55_p2 = scmp.eq.s32.totalorder %s4725_s23, 0 }
  0x12   : > { %p60_p3 = scmp.ne.s32.totalorder %s4709_s19, %s4705_s18  ;;  %s15920_s26 = smov (%p36_p0, %s35_s26), 0 }
  0x13   : > { %13011 = sst [smem:[#allocation17_spill]] %s15920_s26  ;;  %p4826_p4 = por %p55_p2, %p54_p1 }
  0x14   : > { %p61_p5 = scmp.eq.s32.totalorder %s4809_s24, 0  ;;  %s42_s29 = ssub.s32 %s4721_s22, %s15920_s26 }
  0x15   : > { %s4250_s30 = sshll.u32 %s4721_s22, 1  ;;  %p45_p6 = scmp.eq.s32.totalorder %s42_s29, 0 }
  0x16   : > { %p4839_p7 = por %p61_p5, %p60_p3  ;;  %s4251_s6 = sadd.s32 2, %s4250_s30 }
  0x17   : > { %s4252_s7 = sshll.u32 %s15920_s26, 1  ;;  %s79_s10 = sadd.s32 1, %s4701_s17 }
  0x18   : > { %s13013_s5 = scalar_select %p4839_p7, 1, 0 }
  0x19   : > { %s4845_s8 = scalar_select %p45_p6, %s4713_s20, %s47_s27  }
  0x1a   : > { %s4253_s9 = sadd.s32 2, %s4252_s7  ;;  %p86_p8 = scmp.ne.s32.totalorder %s4701_s17, %s4697_s16 }
  0x1b   : > { %13014 = sst [smem:[#allocation18_spill]] %s4845_s8  ;;  %s74_s11 = ssub.s32 %s4251_s6, %s4253_s9 }
  0x1c   : > { %p77_p9 = scmp.eq.s32.totalorder %s74_s11, 0  ;;  %p92_p10 = scmp.ne.s32.totalorder %s4697_s16, %s4693_s15 }
  0x1d   : > { %p4854_p11 = por %p86_p8, %p55_p2  ;;  %p178_p12 = scmp.eq.s32.totalorder %s4809_s24, 1 }
  0x1e   : > { %s4860_s13 = scalar_select %p77_p9, %s4701_s17, %s79_s10  }
  0x1f   : > { %p4864_p13 = por %p92_p10, %p61_p5  ;;  %p4871_p0 = por %p178_p12, %p54_p1 }
  0x20   : > { %13016 = sst [smem:[#allocation19_spill]] %s4860_s13  ;;  %p184_p6 = scmp.eq.s32.totalorder %s4207_s25, 1 }
  0x21   : > { %s13017_s14 = scalar_select %p4864_p13, 1, 0 }
  0x22   : > { %s13018_s27 = scalar_select %p4871_p0, 1, 0 }
  0x23   : > { %p4878_p7 = por %p184_p6, %p60_p3  ;;  %p12363_p2 = scmp.ge.s32.totalorder %s4725_s23, 2 }
  0x25   : > { %s13019_s15 = scalar_select %p4878_p7, 1, 0 }
  0x26   : > { %200 = sbr.rel (%p12363_p2) target bundleno = 158 (0x9e), region = 16 }
  0x27   : > { %13020 = sst [smem:[#allocation20_spill]] %s13019_s15 }
  0x2d   : > { %203 = sbr.rel (!%p4826_p4) target bundleno = 77 (0x4d), region = 20  ;;  %s204_s29 = sand.u32 (%p4826_p4), 1, %s4713_s20  }
  0x2e   : > { %s4214_s30 = sshll.u32 (%p4826_p4), %s204_s29, 7  ;;  %s4888_s6 = scalar_lea.sflag (%p4826_p4), [#allocation3], %s204_s29 }
  0x2f   : > { %s208_s25 = scalar_lea.vmem (%p4826_p4), [#allocation2], %s4214_s30  ;;  %s4260_s7 = sshll.u32 (%p4826_p4), %s4721_s22, 11 }
  0x30   : > { %s13021_s0 = sld [smem:[#allocation282_spill]] (%p4826_p4)  ;;  %s225_s26 = sshll.u32 (%p4826_p4), %s208_s25, 4  ;;  %s226_s26 = int_to_ptr.vmem [resolvable:$true] %s225_s26 }
  0x36   : > { %s4894_s11 = scalar_lea.hbm %s13021_s0, %s4260_s7  ;;  %s4493_s29 = scalar_lea.hbm %s13021_s0, 5120 }
  0x37   : > { %s4489_s8 = scalar_lea.hbm %s4894_s11, 2048  ;;  %p4494_p3 = scmp.lt.u32.totalorder %s4894_s11, %s13021_s0 }
  0x38   : > { %p4490_p1 = scmp.ne.s32.totalorder %s4894_s11, %s4489_s8  ;;  %p4495_p5 = scmp.lt.u32.totalorder %s4493_s29, %s4489_s8 }
  0x39   : > { %p4497_p9 = scmp.lt.u32.totalorder %s4489_s8, %s4894_s11 }
  0x3a   : > { %p4496_p8 = por %p4495_p5, %p4494_p3 }
  0x3c   : > { %p4498_p10 = por %p4497_p9, %p4496_p8 }
  0x3e   : > { %p4499_p12 = pnand %p4498_p10, %p4490_p1 }
  0x40   : > { %4502 = shalt.err (!%p4499_p12)
}
  0x41   : > { %s4503_s7 = scalar_lea.vmem %s226_s26, 2048  ;;  %s4727_s25 = smov [#allocation2]  }
  0x42   : > { %p4504_p6 = scmp.ne.s32.totalorder %s226_s26, %s4503_s7  ;;  %s4507_s9 = sshll.u32 %s4727_s25, 4  ;;  %s4508_s9 = int_to_ptr.vmem [resolvable:$false] %s4507_s9 }
  0x43   : > { %s4509_s10 = scalar_lea.vmem %s4508_s9, 4096  ;;  %p4510_p2 = scmp.lt.s32.totalorder %s226_s26, %s4508_s9 }
  0x44   : > { %p4511_p7 = scmp.lt.s32.totalorder %s4509_s10, %s4503_s7 }
  0x46   : > { %p4512_p0 = por %p4511_p7, %p4510_p2 }
  0x48   : > { %p4513_p13 = pnand %p4512_p0, %p4504_p6 }
  0x4a   : > { %4516 = shalt.err (!%p4513_p13)
}
  0x4b   : > { %s4728_s13 = smov 128   ;;  %s4729_s18 = smov 8  }
  0x4c   : > { %231 = dma.hbm_to_vmem [thread:$0]  %s4894_s11, 2048, %s226_s26, %s4888_s6, %s4728_s13, %s4728_s13, %s4729_s18  }
  0x4d PF: > { %s235_s8 = sand.u32 1, %s4725_s23   ;;  %s12366_s15 = sand.u32 1, %s4701_s17  }
  0x4e   : > { %s4912_s29 = sshll.u32 %s12366_s15, 6  ;;  %s4915_s30 = sshll.u32 %s4721_s22, 11 }
  0x4f   : > { %s4093_s9 = scalar_lea.hbm %s12355_s1, %s4915_s30  ;;  %s239_s26 = scalar_lea.vmem [#allocation5], %s4912_s29 }
  0x50   : > { %s250_s6 = sshll.u32 %s239_s26, 4  ;;  %s4922_s11 = scalar_lea.hbm %s4093_s9, 2048  ;;  %s4924_s6 = int_to_ptr.vmem [resolvable:$true] %s250_s6 }
  0x51   : > { %s4926_s10 = scalar_lea.sflag [#allocation6], %s235_s8  ;;  %s4545_s13 = scalar_lea.hbm %s4093_s9, 3072 }
  0x52   : > { %p4518_p7 = scmp.ne.s32.totalorder %s4922_s11, %s4545_s13  ;;  %s4521_s7 = scalar_lea.hbm %s12355_s1, 5120 }
  0x53   : > { %p4522_p2 = scmp.lt.u32.totalorder %s4922_s11, %s12355_s1  ;;  %p4523_p1 = scmp.lt.u32.totalorder %s4521_s7, %s4545_s13 }
  0x54   : > { %p4519_p13 = pnand %p4518_p7, %p4854_p11  ;;  %p4525_p5 = scmp.lt.u32.totalorder %s4545_s13, %s4922_s11 }
  0x55   : > { %p4524_p3 = por %p4523_p1, %p4522_p2 }
  0x56   : > { %p4520_p0 = pneg %p4519_p13 }
  0x57   : > { %p4526_p8 = por %p4525_p5, %p4524_p3 }
  0x59   : > { %p4527_p9 = pnand %p4526_p8, %p4520_p0 }
  0x5b   : > { %4530 = shalt.err (!%p4527_p9)
}
  0x5c   : > { %s4531_s8 = scalar_lea.vmem %s4924_s6, 1024  ;;  %s4730_s15 = smov [#allocation5]  }
  0x5d   : > { %p4532_p10 = scmp.ne.s32.totalorder %s4924_s6, %s4531_s8  ;;  %s4535_s9 = sshll.u32 %s4730_s15, 4  ;;  %s4536_s9 = int_to_ptr.vmem [resolvable:$false] %s4535_s9 }
  0x5e   : > { %s4537_s18 = scalar_lea.vmem %s4536_s9, 2048  ;;  %p4538_p7 = scmp.lt.s32.totalorder %s4924_s6, %s4536_s9 }
  0x5f   : > { %p4533_p12 = pnand %p4532_p10, %p4854_p11  ;;  %p4539_p13 = scmp.lt.s32.totalorder %s4537_s18, %s4531_s8 }
  0x61   : > { %p4534_p6 = pneg %p4533_p12  ;;  %p4540_p2 = por %p4539_p13, %p4538_p7 }
  0x63   : > { %p4541_p1 = pnand %p4540_p2, %p4534_p6 }
  0x65   : > { %4544 = shalt.err (!%p4541_p1)
}
  0x66   : > { %s12367_s13 = smov 128   ;;  %s12368_s7 = smov 8  }
  0x67   : > { %4270 = dma.hbm_to_vmem [thread:$0]  (%p4854_p11), %s4922_s11, 1024, %s4924_s6, %s4926_s10, %s12367_s13, %s12367_s13, %s12368_s7  }
  0x68   : > { %259 = sbr.rel (!%p4826_p4) target bundleno = 132 (0x84), region = 28  ;;  %s262_s25 = sand.u32 (%p4826_p4), 1, %s4713_s20  }
  0x69   : > { %s4227_s26 = sshll.u32 (%p4826_p4), %s262_s25, 7  ;;  %s4959_s18 = scalar_lea.hbm (%p4826_p4), %s12356_s2, %s4915_s30 }
  0x6a   : > { %s264_s8 = scalar_lea.vmem (%p4826_p4), [#allocation7], %s4227_s26  ;;  %s4546_s6 = scalar_lea.hbm (%p4826_p4), %s4959_s18, 2048 }
  0x6b   : > { %s281_s0 = sshll.u32 (%p4826_p4), %s264_s8, 4  ;;  %p4547_p0 = scmp.ne.s32.totalorder (%p4826_p4), %s4959_s18, %s4546_s6  ;;  %s282_s0 = int_to_ptr.vmem [resolvable:$true] %s281_s0 }
  0x6c   : > { %s4550_s13 = scalar_lea.hbm (%p4826_p4), %s12356_s2, 5120  ;;  %p4551_p4 = scmp.lt.u32.totalorder (%p4826_p4), %s4959_s18, %s12356_s2 }
  0x6f   : > { %p4552_p3 = scmp.lt.u32.totalorder %s4550_s13, %s4546_s6  ;;  %p4554_p8 = scmp.lt.u32.totalorder %s4546_s6, %s4959_s18 }
  0x71   : > { %p4553_p5 = por %p4552_p3, %p4551_p4 }
  0x73   : > { %p4555_p9 = por %p4554_p8, %p4553_p5 }
  0x75   : > { %p4556_p10 = pnand %p4555_p9, %p4547_p0 }
  0x77   : > { %4559 = shalt.err (!%p4556_p10)
}
  0x78   : > { %s4560_s26 = scalar_lea.vmem %s282_s0, 2048  ;;  %s4733_s8 = smov [#allocation7]  }
  0x79   : > { %p4561_p12 = scmp.ne.s32.totalorder %s282_s0, %s4560_s26  ;;  %s4564_s15 = sshll.u32 %s4733_s8, 4  ;;  %s4565_s15 = int_to_ptr.vmem [resolvable:$false] %s4564_s15 }
  0x7a   : > { %s4566_s9 = scalar_lea.vmem %s4565_s15, 4096  ;;  %p4567_p6 = scmp.lt.s32.totalorder %s282_s0, %s4565_s15 }
  0x7b   : > { %p4568_p7 = scmp.lt.s32.totalorder %s4566_s9, %s4560_s26 }
  0x7d   : > { %p4569_p13 = por %p4568_p7, %p4567_p6 }
  0x7f   : > { %p4570_p2 = pnand %p4569_p13, %p4561_p12 }
  0x81   : > { %4573 = shalt.err (!%p4570_p2)
}
  0x82   : > { %s4734_s28 = smov 128   ;;  %s4735_s13 = smov 8  }
  0x83   : > { %287 = dma.hbm_to_vmem [thread:$0]  %s4959_s18, 2048, %s282_s0, %s4926_s10, %s4734_s28, %s4734_s28, %s4735_s13  }
  0x84 PF: > { %s4108_s11 = scalar_lea.hbm %s12357_s3, %s4915_s30  ;;  %s295_s25 = scalar_lea.vmem [#allocation8], %s4912_s29 }
  0x85   : > { %s306_s8 = sshll.u32 %s295_s25, 4  ;;  %s4978_s26 = scalar_lea.hbm %s4108_s11, 2048  ;;  %s4980_s8 = int_to_ptr.vmem [resolvable:$true] %s306_s8 }
  0x86   : > { %s13022_s15 = sand.u32 1, %s4701_s17   ;;  %s4602_s10 = scalar_lea.hbm %s4108_s11, 3072 }
  0x87   : > { %s4984_s0 = scalar_lea.sflag [#allocation9], %s13022_s15  ;;  %p4575_p1 = scmp.ne.s32.totalorder %s4978_s26, %s4602_s10 }
  0x88   : > { %s4578_s29 = scalar_lea.hbm %s12357_s3, 5120  ;;  %p4579_p3 = scmp.lt.u32.totalorder %s4978_s26, %s12357_s3 }
  0x89   : > { %p4576_p0 = pnand %p4575_p1, %p4854_p11  ;;  %p4580_p5 = scmp.lt.u32.totalorder %s4578_s29, %s4602_s10 }
  0x8a   : > { %p4582_p9 = scmp.lt.u32.totalorder %s4602_s10, %s4978_s26 }
  0x8b   : > { %p4577_p4 = pneg %p4576_p0  ;;  %p4581_p8 = por %p4580_p5, %p4579_p3 }
  0x8d   : > { %p4583_p10 = por %p4582_p9, %p4581_p8 }
  0x8f   : > { %p4584_p12 = pnand %p4583_p10, %p4577_p4 }
  0x91   : > { %4587 = shalt.err (!%p4584_p12)
}
  0x92   : > { %s4588_s13 = scalar_lea.vmem %s4980_s8, 1024  ;;  %s4736_s7 = smov [#allocation8]  }
  0x93   : > { %p4589_p6 = scmp.ne.s32.totalorder %s4980_s8, %s4588_s13  ;;  %s4592_s6 = sshll.u32 %s4736_s7, 4  ;;  %s4593_s6 = int_to_ptr.vmem [resolvable:$false] %s4592_s6 }
  0x94   : > { %s4594_s11 = scalar_lea.vmem %s4593_s6, 2048  ;;  %p4595_p2 = scmp.lt.s32.totalorder %s4980_s8, %s4593_s6 }
  0x95   : > { %p4590_p7 = pnand %p4589_p6, %p4854_p11  ;;  %p4596_p1 = scmp.lt.s32.totalorder %s4594_s11, %s4588_s13 }
  0x97   : > { %p4591_p13 = pneg %p4590_p7  ;;  %p4597_p0 = por %p4596_p1, %p4595_p2 }
  0x99   : > { %p4598_p3 = pnand %p4597_p0, %p4591_p13 }
  0x9b   : > { %4601 = shalt.err (!%p4598_p3)
}
  0x9c   : > { %s13023_s25 = smov 8   ;;  %s13024_s15 = smov 128  }
  0x9d   : > { %4271 = dma.hbm_to_vmem [thread:$0]  (%p4854_p11), %s4978_s26, 1024, %s4980_s8, %s4984_s0, %s13024_s15, %s13024_s15, %s13023_s25  }
  0x9e PF: > { %p4240_p4 = scmp.ge.s32.totalorder %s4725_s23, 1  ;;  %p314_p5 = scmp.lt.s32.totalorder %s4725_s23, 3 }
  0xa0   : > { %p315_p8 = pnand %p4240_p4, %p314_p5 }
  0xa2   : > { %318 = sbr.rel (%p315_p8) target bundleno = 1295 (0x50f), region = 36 }
  0xa9   : > { %s5013_s10 = sand.u32 1, %s4709_s19   ;;  %p13025_p9 = scmp.ne.s32.totalorder %s13013_s5, 0 }
  0xaa   : > { %s4241_s12 = sshll.u32 %s5013_s10, 7  ;;  %s321_s18 = scalar_lea.sflag [#allocation3], %s5013_s10 }
  0xab   : > { %s5017_s9 = scalar_lea.vmem [#allocation2], %s4241_s12 }
  0xac   : > { %4668 = dma.done.wait (%p13025_p9), %s321_s18, 2048  }
  0xad   : > { %4670 = vsyncadd (%p13025_p9), %s321_s18, 4294965248  ;;  %s329_s8 = sand.u32 1, %s4809_s24   ;;  %s331_s26 = sand.u32 1, %s4697_s16  }
  0xae   : > { %s4242_s0 = sshll.u32 %s331_s26, 6  ;;  %s330_s29 = scalar_lea.sflag [#allocation6], %s329_s8 }
  0xaf   : > { %s5025_s30 = scalar_lea.vmem [#allocation5], %s4242_s0  ;;  %p13026_p11 = scmp.ne.s32.totalorder %s13017_s14, 0 }
  0xb1   : > { %4672 = dma.done.wait (%p13026_p11), %s330_s29, 1024  }
  0xb2   : > { %4674 = vsyncadd (%p13026_p11), %s330_s29, 4294966272  ;;  %s5031_s28 = scalar_lea.vmem [#allocation7], %s4241_s12 }
  0xb3   : > { %4676 = dma.done.wait (%p13025_p9), %s330_s29, 2048  }
  0xb4   : > { %4678 = vsyncadd (%p13025_p9), %s330_s29, 4294965248  ;;  %s348_s24 = scalar_lea.sflag [#allocation9], %s331_s26  ;;  %s5037_s13 = scalar_lea.vmem [#allocation8], %s4242_s0 }
  0xb5   : > { %4680 = dma.done.wait (%p13026_p11), %s348_s24, 1024  }
  0xb6   : > { %4682 = vsyncadd (%p13026_p11), %s348_s24, 4294966272  ;;  %v12369_v0 = vlaneseq  ;;  %v5047_v2 = vld [vmem:[%s5017_s9] sm:$0xff]  ;;  %v5050_v3 = vld [vmem:[%s5017_s9 + $0x8] sm:$0xff]  ;;  %s4245_s5 = sshll.u32 %s5013_s10, 3  ;;  %s4247_s14 = sshll.u32 %s4717_s21, 7 }
  0xb7   : > { %13028 = vst [vmem:[#allocation22_spill] sm:$0xff] %v5047_v2  ;;  %13029 = vst [vmem:[#allocation23_spill] sm:$0xff] %v5050_v3  ;;  %v5059_v6 = vld [vmem:[%s5017_s9 + $0x10] sm:$0xff]  ;;  %v5062_v7 = vld [vmem:[%s5017_s9 + $0x18] sm:$0xff]  ;;  %v5068_v9 = vmul.f32 0.2920817, %v5047_v2  ;;  %v5072_v10 = vmul.f32 %v5047_v2, %v5047_v2  ;;  %v5091_v16 = vmul.f32 %v5050_v3, %v5050_v3  ;;  %s12294_s15 = scalar_lea.hbm %s12358_s4, %s4247_s14 }
  0xb8   : > { %v5044_v1 = vshrl.u32 %v12369_v0, 7  ;;  %13032 = vst [vmem:[#allocation26_spill] sm:$0xff] %v5059_v6  ;;  %13033 = vst [vmem:[#allocation27_spill] sm:$0xff] %v5062_v7  ;;  %v5065_v8 = vld [vmem:[%s5017_s9 + $0x20] sm:$0xff]  ;;  %v5078_v12 = vld [vmem:[%s5017_s9 + $0x28] sm:$0xff]  ;;  %v5095_v17 = vmul.f32 %v5059_v6, %v5059_v6  ;;  %v5099_v18 = vmul.f32 %v5062_v7, %v5062_v7  ;;  %s390_s7 = scalar_lea.vmem [#allocation10], %s4245_s5 }
  0xb9   : > { %13034 = vst [vmem:[#allocation28_spill] sm:$0xff] %v5065_v8  ;;  %13035 = vst [vmem:[#allocation29_spill] sm:$0xff] %v5068_v9  ;;  %v5081_v13 = vld [vmem:[%s5017_s9 + $0x30] sm:$0xff]  ;;  %v5084_v14 = vld [vmem:[%s5017_s9 + $0x38] sm:$0xff]  ;;  %v5087_v15 = vmul.f32 0.2920817, %v5050_v3  ;;  %v5115_v23 = vmul.f32 %v5065_v8, %v5065_v8  ;;  %v5119_v24 = vmul.f32 %v5078_v12, %v5078_v12 }
  0xba   : > { %13027 = vst [vmem:[#allocation21_spill] sm:$0xff] %v5044_v1  ;;  %v5053_v4 = vadd.s32 8, %v5044_v1  ;;  %v5056_v5 = vsub.s32 2, %v5044_v1  ;;  %v5075_v11 = vsub.s32 1, %v5044_v1  ;;  %13037 = vst [vmem:[#allocation31_spill] sm:$0xff] %v5078_v12  ;;  %v5102_v19 = vld [vmem:[%s5017_s9 + $0x40] sm:$0xff]  ;;  %v5123_v25 = vmul.f32 %v5081_v13, %v5081_v13 }
  0xbb   : > { %13038 = vst [vmem:[#allocation32_spill] sm:$0xff] %v5081_v13  ;;  %13039 = vst [vmem:[#allocation33_spill] sm:$0xff] %v5084_v14  ;;  %v5105_v20 = vld [vmem:[%s5017_s9 + $0x48] sm:$0xff]  ;;  %v5108_v21 = vld [vmem:[%s5017_s9 + $0x50] sm:$0xff]  ;;  %v5111_v22 = vmul.f32 0.2920817, %v5059_v6  ;;  %v5139_v30 = vmul.f32 %v5084_v14, %v5084_v14  ;;  %v5143_v31 = vmul.f32 %v5102_v19, %v5102_v19 }
  0xbc   : > { %13030 = vst [vmem:[#allocation24_spill] sm:$0xff] %v5053_v4  ;;  %13031 = vst [vmem:[#allocation25_spill] sm:$0xff] %v5056_v5  ;;  %v5126_v26 = vld [vmem:[%s5017_s9 + $0x58] sm:$0xff]  ;;  %v5129_v27 = vld [vmem:[%s5017_s9 + $0x60] sm:$0xff]  ;;  %v5135_v29 = vmul.f32 0.2920817, %v5062_v7  ;;  %v5147_v32 = vmul.f32 %v5105_v20, %v5105_v20  ;;  %v5163_v37 = vmul.f32 %v5108_v21, %v5108_v21 }
  0xbd   : > { %13036 = vst [vmem:[#allocation30_spill] sm:$0xff] %v5075_v11  ;;  %13040 = vst [vmem:[#allocation34_spill] sm:$0xff] %v5087_v15  ;;  %v5132_v28 = vld [vmem:[%s5017_s9 + $0x68] sm:$0xff]  ;;  %v5150_v33 = vld [vmem:[%s5017_s9 + $0x70] sm:$0xff]  ;;  %v5159_v36 = vmul.f32 0.2920817, %v5065_v8  ;;  %v5167_v38 = vmul.f32 %v5126_v26, %v5126_v26  ;;  %v5171_v39 = vmul.f32 %v5129_v27, %v5129_v27 }
  0xbe   : > { %13041 = vst [vmem:[#allocation35_spill] sm:$0xff] %v5102_v19  ;;  %13042 = vst [vmem:[#allocation36_spill] sm:$0xff] %v5105_v20  ;;  %v5153_v34 = vld [vmem:[%s5017_s9 + $0x78] sm:$0xff]  ;;  %v5156_v35 = vld [vmem:[%s5025_s30] sm:$0xff]  ;;  %v5183_v43 = vmul.f32 0.2920817, %v5078_v12  ;;  %v5187_v44 = vmul.f32 %v5132_v28, %v5132_v28  ;;  %v5191_v45 = vmul.f32 %v5150_v33, %v5150_v33 }
  0xbf   : > { %13043 = vst [vmem:[#allocation37_spill] sm:$0xff] %v5108_v21  ;;  %13044 = vst [vmem:[#allocation38_spill] sm:$0xff] %v5111_v22  ;;  %v5174_v40 = vld [vmem:[%s5025_s30 + $0x8] sm:$0xff]  ;;  %v5177_v41 = vld [vmem:[%s5025_s30 + $0x10] sm:$0xff]  ;;  %v5195_v46 = vmul.f32 %v5153_v34, %v5153_v34  ;;  %v5207_v50 = vmul.f32 0.2920817, %v5081_v13  ;;  %v5211_v51 = vmul.f32 %v5156_v35, %v5156_v35 }
  0xc0   : > { %13045 = vst [vmem:[#allocation39_spill] sm:$0xff] %v5119_v24  ;;  %13046 = vst [vmem:[#allocation40_spill] sm:$0xff] %v5123_v25  ;;  %v5180_v42 = vld [vmem:[%s5025_s30 + $0x18] sm:$0xff]  ;;  %v5198_v47 = vld [vmem:[%s5025_s30 + $0x20] sm:$0xff]  ;;  %v5215_v52 = vmul.f32 %v5174_v40, %v5174_v40  ;;  %v5219_v53 = vmul.f32 %v5177_v41, %v5177_v41  ;;  %v5231_v57 = vmul.f32 0.2920817, %v5084_v14 }
  0xc1   : > { %13047 = vst [vmem:[#allocation41_spill] sm:$0xff] %v5135_v29  ;;  %13048 = vst [vmem:[#allocation42_spill] sm:$0xff] %v5139_v30  ;;  %v5201_v48 = vld [vmem:[%s5025_s30 + $0x28] sm:$0xff]  ;;  %v5204_v49 = vld [vmem:[%s5025_s30 + $0x30] sm:$0xff]  ;;  %v5235_v58 = vmul.f32 %v5180_v42, %v5180_v42  ;;  %v5239_v59 = vmul.f32 %v5198_v47, %v5198_v47  ;;  %v5257_v4 = vmul.f32 0.2920817, %v5102_v19 }
  0xc2   : > { %13049 = vst [vmem:[#allocation43_spill] sm:$0xff] %v5143_v31  ;;  %13050 = vst [vmem:[#allocation44_spill] sm:$0xff] %v5147_v32  ;;  %v5222_v54 = vld [vmem:[%s5025_s30 + $0x38] sm:$0xff]  ;;  %v5225_v55 = vld [vmem:[%s5031_s28] sm:$0xff]  ;;  %v5243_v60 = vmul.f32 %v5201_v48, %v5201_v48  ;;  %v5304_v7 = vmul.f32 0.2920817, %v5105_v20 }
  0xc3   : > { %13051 = vst [vmem:[#allocation45_spill] sm:$0xff] %v5159_v36  ;;  %13052 = vst [vmem:[#allocation46_spill] sm:$0xff] %v5163_v37  ;;  %v5228_v56 = vld [vmem:[%s5031_s28 + $0x20] sm:$0xff]  ;;  %v5246_v61 = vld [vmem:[%s5031_s28 + $0x8] sm:$0xff]  ;;  %v5280_v22 = vmul.f32 %v5225_v55, %v5225_v55  ;;  %v5369_v30 = vmul.f32 0.2920817, %v5126_v26 }
  0xc4   : > { %13053 = vst [vmem:[#allocation47_spill] sm:$0xff] %v5167_v38  ;;  %13054 = vst [vmem:[#allocation48_spill] sm:$0xff] %v5171_v39  ;;  %v5249_v62 = vld [vmem:[%s5031_s28 + $0x10] sm:$0xff]  ;;  %v5252_v63 = vld [vmem:[%s5031_s28 + $0x28] sm:$0xff]  ;;  %v457_v0 = vsub.f32 %v5065_v8, %v5228_v56  ;;  %v5284_v15 = vmul.f32 %v5246_v61, %v5246_v61  ;;  %v5375_v25 = vmul.f32 0.2920817, %v5132_v28 }
  0xc5   : > { %13055 = vst [vmem:[#allocation49_spill] sm:$0xff] %v5183_v43  ;;  %13056 = vst [vmem:[#allocation50_spill] sm:$0xff] %v5187_v44  ;;  %v5268_v43 = vld [vmem:[%s5031_s28 + $0x18] sm:$0xff]  ;;  %v5271_v36 = vld [vmem:[%s5031_s28 + $0x30] sm:$0xff]  ;;  %v5288_v9 = vmul.f32 %v5249_v62, %v5249_v62  ;;  %v5380_v24 = vmul.f32 0.2920817, %v5150_v33 }
  0xc6   : > { %13057 = vst [vmem:[#allocation51_spill] sm:$0xff] %v5191_v45  ;;  %13058 = vst [vmem:[#allocation52_spill] sm:$0xff] %v5195_v46  ;;  %v5274_v29 = vld [vmem:[%s5031_s28 + $0x38] sm:$0xff]  ;;  %v5291_v11 = vld [vmem:[%s5031_s28 + $0x40] sm:$0xff]  ;;  %v5308_v6 = vmul.f32 %v5268_v43, %v5268_v43  ;;  %s4050_s6 = sshll.u32 %s390_s7, 4  ;;  %s4035_s12 = scalar_lea.sflag [#allocation4], %s5013_s10  ;;  %s12296_s6 = int_to_ptr.vmem [resolvable:$true] %s4050_s6 }
  0xc7   : > { %13059 = vst [vmem:[#allocation53_spill] sm:$0xff] %v5201_v48  ;;  %13060 = vst [vmem:[#allocation54_spill] sm:$0xff] %v5204_v49  ;;  %v5294_v1 = vld [vmem:[%s5031_s28 + $0x48] sm:$0xff]  ;;  %v5297_v5 = vld [vmem:[%s5031_s28 + $0x50] sm:$0xff]  ;;  %v460_v8 = vsub.f32 %v5084_v14, %v5274_v29  ;;  %s4603_s21 = scalar_lea.vmem %s12296_s6, 128  ;;  %p15903_p12 = scmp.ne.s32.totalorder %s13018_s27, 0 }
  0xc8   : > { %13061 = vst [vmem:[#allocation55_spill] sm:$0xff] %v5207_v50  ;;  %13062 = vst [vmem:[#allocation56_spill] sm:$0xff] %v5211_v51  ;;  %v5265_v50 = vmul.f32 %v5222_v54, %v5222_v54  ;;  %v5311_v3 = vld [vmem:[%s5031_s28 + $0x58] sm:$0xff]  ;;  %v5314_v2 = vld [vmem:[%s5031_s28 + $0x60] sm:$0xff]  ;;  %v462_v14 = vsub.f32 %v5105_v20, %v5294_v1  ;;  %p4604_p10 = scmp.ne.s32.totalorder %s12296_s6, %s4603_s21  ;;  %s4737_s18 = smov [#allocation10]  }
  0xc9   : > { %13063 = vst [vmem:[#allocation57_spill] sm:$0xff] %v5215_v52  ;;  %13064 = vst [vmem:[#allocation58_spill] sm:$0xff] %v5219_v53  ;;  %v476_v39 = vmul.f32 %v460_v8, %v460_v8  ;;  %v5383_v8 = vmul.f32 0.2920817, %v5153_v34 }
  0xca   : > { %13065 = vst [vmem:[#allocation59_spill] sm:$0xff] %v5222_v54  ;;  %13066 = vst [vmem:[#allocation60_spill] sm:$0xff] %v5231_v57  ;;  %v5261_v57 = vmul.f32 %v5204_v49, %v5204_v49  ;;  %v478_v37 = vmul.f32 %v462_v14, %v462_v14  ;;  %v5394_v14 = vmul.f32 0.2920817, %v5177_v41  ;;  %p4605_p6 = pnand %p4604_p10, %p15903_p12 }
  0xcb   : > { %13067 = vst [vmem:[#allocation61_spill] sm:$0xff] %v5235_v58  ;;  %13068 = vst [vmem:[#allocation62_spill] sm:$0xff] %v5239_v59  ;;  %v5344_v59 = vld [vmem:[%s5037_s13 + $0x8] sm:$0xff] }
  0xcc   : > { %13069 = vst [vmem:[#allocation63_spill] sm:$0xff] %v5243_v60  ;;  %13070 = vst [vmem:[#allocation64_spill] sm:$0xff] %v5246_v61  ;;  %v473_v60 = vmul.f32 %v457_v0, %v457_v0  ;;  %v470_v46 = vsub.f32 %v5174_v40, %v5344_v59  ;;  %p4606_p7 = pneg %p4605_p6 }
  0xcd   : > { %13071 = vst [vmem:[#allocation65_spill] sm:$0xff] %v5252_v63  ;;  %13072 = vst [vmem:[#allocation66_spill] sm:$0xff] %v5257_v4  ;;  %v458_v4 = vsub.f32 %v5078_v12, %v5252_v63  ;;  %v459_v12 = vsub.f32 %v5081_v13, %v5271_v36  ;;  %v461_v13 = vsub.f32 %v5102_v19, %v5291_v11 }
  0xce   : > { %13073 = vst [vmem:[#allocation67_spill] sm:$0xff] %v5261_v57  ;;  %13074 = vst [vmem:[#allocation68_spill] sm:$0xff] %v5265_v50  ;;  %v5335_v50 = vld [vmem:[%s5037_s13] sm:$0xff]  ;;  %v464_v57 = vsub.f32 %v5126_v26, %v5311_v3  ;;  %v465_v19 = vsub.f32 %v5129_v27, %v5314_v2 }
  0xcf   : > { %13075 = vst [vmem:[#allocation69_spill] sm:$0xff] %v5268_v43  ;;  %13076 = vst [vmem:[#allocation70_spill] sm:$0xff] %v5274_v29  ;;  %v469_v52 = vsub.f32 %v5156_v35, %v5335_v50  ;;  %v474_v51 = vmul.f32 %v458_v4, %v458_v4  ;;  %v475_v44 = vmul.f32 %v459_v12, %v459_v12  ;;  %v5372_v4 = vmul.f32 0.2920817, %v5129_v27 }
  0xd0   : > { %13077 = vst [vmem:[#allocation71_spill] sm:$0xff] %v5280_v22  ;;  %13078 = vst [vmem:[#allocation72_spill] sm:$0xff] %v5284_v15  ;;  %v5326_v15 = vmul.f32 0.2920817, %v5108_v21  ;;  %v5332_v22 = vld [vmem:[%s5031_s28 + $0x78] sm:$0xff]  ;;  %v477_v38 = vmul.f32 %v461_v13, %v461_v13  ;;  %v480_v31 = vmul.f32 %v464_v57, %v464_v57 }
  0xd1   : > { %13079 = vst [vmem:[#allocation73_spill] sm:$0xff] %v5288_v9  ;;  %13080 = vst [vmem:[#allocation74_spill] sm:$0xff] %v5294_v1  ;;  %v5317_v9 = vld [vmem:[%s5031_s28 + $0x68] sm:$0xff]  ;;  %v468_v53 = vsub.f32 %v5153_v34, %v5332_v22  ;;  %v5391_v13 = vmul.f32 0.2920817, %v5174_v40  ;;  %v489_v57 = vadd.f32 %v475_v44, %v473_v60 }
  0xd2   : > { %13081 = vst [vmem:[#allocation75_spill] sm:$0xff] %v5297_v5  ;;  %13082 = vst [vmem:[#allocation76_spill] sm:$0xff] %v5304_v7  ;;  %v463_v7 = vsub.f32 %v5108_v21, %v5297_v5  ;;  %v466_v20 = vsub.f32 %v5132_v28, %v5317_v9  ;;  %v5347_v21 = vld [vmem:[%s5037_s13 + $0x10] sm:$0xff]  ;;  %v5415_v44 = vmul.f32 0.2920817, %v5246_v61 }
  0xd3   : > { %13083 = vst [vmem:[#allocation77_spill] sm:$0xff] %v5308_v6  ;;  %13084 = vst [vmem:[#allocation78_spill] sm:$0xff] %v5311_v3  ;;  %v5329_v6 = vld [vmem:[%s5031_s28 + $0x70] sm:$0xff]  ;;  %v5362_v0 = vsub.f32 %v5177_v41, %v5347_v21 }
  0xd4   : > { %13085 = vst [vmem:[#allocation79_spill] sm:$0xff] %v5314_v2  ;;  %13086 = vst [vmem:[#allocation80_spill] sm:$0xff] %v5317_v9  ;;  %v467_v58 = vsub.f32 %v5150_v33, %v5329_v6  ;;  %v479_v32 = vmul.f32 %v463_v7, %v463_v7  ;;  %v5386_v7 = vmul.f32 0.2920817, %v5156_v35  ;;  %v5388_v12 = vmul.f32 %v466_v20, %v466_v20 }
  0xd5   : > { %13087 = vst [vmem:[#allocation81_spill] sm:$0xff] %v5326_v15  ;;  %13088 = vst [vmem:[#allocation82_spill] sm:$0xff] %v5329_v6  ;;  %v5350_v15 = vld [vmem:[%s5037_s13 + $0x18] sm:$0xff]  ;;  %v496_v20 = vadd.f32 %v476_v39, %v474_v51  ;;  %v5426_v39 = vmul.f32 0.2920817, %v5228_v56  ;;  %v5428_v51 = vmul.f32 %v468_v53, %v468_v53  ;;  %v5449_v53 = vld [vmem:[%s5037_s13 + $0x20] sm:$0xff] }
  0xd6   : > { %13089 = vst [vmem:[#allocation83_spill] sm:$0xff] %v5332_v22  ;;  %13090 = vst [vmem:[#allocation84_spill] sm:$0xff] %v5335_v50  ;;  %v5366_v45 = vsub.f32 %v5180_v42, %v5350_v15  ;;  %v5417_v60 = vmul.f32 %v467_v58, %v467_v58  ;;  %v5437_v58 = vmul.f32 0.2920817, %v5274_v29 }
  0xd7   : > { %13091 = vst [vmem:[#allocation85_spill] sm:$0xff] %v5344_v59  ;;  %13092 = vst [vmem:[#allocation86_spill] sm:$0xff] %v5347_v21 }
  0xd8   : > { %13093 = vst [vmem:[#allocation87_spill] sm:$0xff] %v5350_v15  ;;  %13094 = vst [vmem:[#allocation88_spill] sm:$0xff] %v5362_v0  ;;  %v5377_v0 = vmul.f32 %v465_v19, %v465_v19  ;;  %v5397_v19 = vmul.f32 0.2920817, %v5180_v42 }
  0xd9   : > { %13095 = vst [vmem:[#allocation89_spill] sm:$0xff] %v5366_v45  ;;  %13096 = vst [vmem:[#allocation90_spill] sm:$0xff] %v5369_v30  ;;  %v5400_v45 = vmul.f32 0.2920817, %v5198_v47 }
  0xda   : > { %13097 = vst [vmem:[#allocation91_spill] sm:$0xff] %v5372_v4  ;;  %13098 = vst [vmem:[#allocation92_spill] sm:$0xff] %v5375_v25  ;;  %v13192_v25 = vld [vmem:[#allocation73_spill] sm:$0xff] }
  0xdb   : > { %13099 = vst [vmem:[#allocation93_spill] sm:$0xff] %v5377_v0  ;;  %13100 = vst [vmem:[#allocation94_spill] sm:$0xff] %v5380_v24  ;;  %v5403_v0 = vmul.f32 0.2920817, %v5201_v48  ;;  %v5626_v4 = vmul.f32 0.2920817, %v13192_v25 }
  0xdc   : > { %13101 = vst [vmem:[#allocation95_spill] sm:$0xff] %v5383_v8  ;;  %13102 = vst [vmem:[#allocation96_spill] sm:$0xff] %v5386_v7  ;;  %v5406_v7 = vmul.f32 0.2920817, %v5204_v49  ;;  %v13190_v8 = vld [vmem:[#allocation72_spill] sm:$0xff]  ;;  %v13194_v30 = vld [vmem:[#allocation77_spill] sm:$0xff] }
  0xdd   : > { %13103 = vst [vmem:[#allocation97_spill] sm:$0xff] %v5388_v12  ;;  %13104 = vst [vmem:[#allocation98_spill] sm:$0xff] %v5391_v13  ;;  %v5409_v12 = vmul.f32 0.2920817, %v5222_v54  ;;  %v5623_v24 = vmul.f32 0.2920817, %v13190_v8 }
  0xde   : > { %13105 = vst [vmem:[#allocation99_spill] sm:$0xff] %v5394_v14  ;;  %13106 = vst [vmem:[#allocation100_spill] sm:$0xff] %v5397_v19  ;;  %v5412_v14 = vmul.f32 0.2920817, %v5225_v55  ;;  %v13188_v19 = vld [vmem:[#allocation71_spill] sm:$0xff] }
  0xdf   : > { %13107 = vst [vmem:[#allocation101_spill] sm:$0xff] %v5400_v45  ;;  %13108 = vst [vmem:[#allocation102_spill] sm:$0xff] %v5403_v0  ;;  %v5420_v0 = vmul.f32 0.2920817, %v5249_v62  ;;  %v5620_v13 = vmul.f32 0.2920817, %v13188_v19 }
  0xe0   : > { %13109 = vst [vmem:[#allocation103_spill] sm:$0xff] %v5406_v7  ;;  %13110 = vst [vmem:[#allocation104_spill] sm:$0xff] %v5409_v12  ;;  %v5423_v7 = vmul.f32 0.2920817, %v5268_v43  ;;  %v5434_v12 = vmul.f32 0.2920817, %v5271_v36 }
  0xe1   : > { %13111 = vst [vmem:[#allocation105_spill] sm:$0xff] %v5412_v14  ;;  %13112 = vst [vmem:[#allocation106_spill] sm:$0xff] %v5415_v44  ;;  %v5431_v14 = vmul.f32 0.2920817, %v5252_v63  ;;  %v5458_v44 = vmul.f32 0.2920817, %v5311_v3 }
  0xe2   : > { %13113 = vst [vmem:[#allocation107_spill] sm:$0xff] %v5417_v60  ;;  %13114 = vst [vmem:[#allocation108_spill] sm:$0xff] %v5420_v0  ;;  %v490_v60 = vadd.f32 %v489_v57, %v477_v38  ;;  %v5440_v0 = vmul.f32 0.2920817, %v5291_v11  ;;  %v5461_v38 = vmul.f32 0.2920817, %v5314_v2 }
  0xe3   : > { %13115 = vst [vmem:[#allocation109_spill] sm:$0xff] %v5423_v7  ;;  %13116 = vst [vmem:[#allocation110_spill] sm:$0xff] %v5426_v39  ;;  %v5443_v7 = vmul.f32 0.2920817, %v5294_v1  ;;  %v5446_v39 = vmul.f32 0.2920817, %v5297_v5 }
  0xe4   : > { %13117 = vst [vmem:[#allocation111_spill] sm:$0xff] %v5428_v51  ;;  %13118 = vst [vmem:[#allocation112_spill] sm:$0xff] %v5431_v14  ;;  %v5452_v51 = vld [vmem:[%s5037_s13 + $0x28] sm:$0xff]  ;;  %v5455_v14 = vld [vmem:[%s5037_s13 + $0x30] sm:$0xff]  ;;  %v5464_v57 = vmul.f32 0.2920817, %v5317_v9 }
  0xe5   : > { %13119 = vst [vmem:[#allocation113_spill] sm:$0xff] %v5434_v12  ;;  %13120 = vst [vmem:[#allocation114_spill] sm:$0xff] %v5437_v58  ;;  %v497_v12 = vadd.f32 %v496_v20, %v478_v37  ;;  %v5475_v58 = vmul.f32 0.2920817, %v5332_v22  ;;  %v5478_v37 = vmul.f32 0.2920817, %v5335_v50  ;;  %v5480_v20 = vmul.f32 %v470_v46, %v470_v46 }
  0xe6   : > { %13121 = vst [vmem:[#allocation115_spill] sm:$0xff] %v5440_v0  ;;  %13122 = vst [vmem:[#allocation116_spill] sm:$0xff] %v5443_v7  ;;  %v5467_v7 = vld [vmem:[%s5037_s13 + $0x38] sm:$0xff]  ;;  %v5469_v0 = vmul.f32 %v469_v52, %v469_v52  ;;  %v5489_v52 = vmul.f32 0.2920817, %v5350_v15 }
  0xe7   : > { %13123 = vst [vmem:[#allocation117_spill] sm:$0xff] %v5446_v39  ;;  %13124 = vst [vmem:[#allocation118_spill] sm:$0xff] %v5449_v53  ;;  %v5472_v39 = vmul.f32 0.2920817, %v5329_v6  ;;  %v5500_v46 = vmul.f32 0.2920817, %v5455_v14  ;;  %v625_v45 = vmul.f32 %v5467_v7, %v5467_v7 }
  0xe8   : > { %13125 = vst [vmem:[#allocation119_spill] sm:$0xff] %v5452_v51  ;;  %13126 = vst [vmem:[#allocation120_spill] sm:$0xff] %v5455_v14  ;;  %v5629_v54 = vmul.f32 0.2920817, %v13194_v30 }
  0xe9   : > { %13127 = vst [vmem:[#allocation121_spill] sm:$0xff] %v5458_v44  ;;  %13128 = vst [vmem:[#allocation122_spill] sm:$0xff] %v5461_v38  ;;  %v5483_v38 = vmul.f32 0.2920817, %v5344_v59  ;;  %v624_v44 = vmul.f32 %v5455_v14, %v5455_v14 }
  0xea   : > { %13129 = vst [vmem:[#allocation123_spill] sm:$0xff] %v5464_v57  ;;  %13130 = vst [vmem:[#allocation124_spill] sm:$0xff] %v5467_v7  ;;  %v5486_v57 = vmul.f32 0.2920817, %v5347_v21 }
  0xeb   : > { %13131 = vst [vmem:[#allocation125_spill] sm:$0xff] %v5469_v0  ;;  %13132 = vst [vmem:[#allocation126_spill] sm:$0xff] %v5472_v39  ;;  %v5491_v0 = vadd.f32 %v490_v60, %v479_v32  ;;  %v5494_v39 = vmul.f32 0.2920817, %v5449_v53  ;;  %v5511_v32 = vmul.f32 0.2920817, %v5091_v16 }
  0xec   : > { %13133 = vst [vmem:[#allocation127_spill] sm:$0xff] %v5475_v58  ;;  %13134 = vst [vmem:[#allocation128_spill] sm:$0xff] %v5478_v37  ;;  %v5497_v58 = vmul.f32 0.2920817, %v5452_v51  ;;  %v5514_v60 = vmul.f32 0.2920817, %v5095_v17  ;;  %v607_v17 = vmul.f32 %v5252_v63, %v5252_v63 }
  0xed   : > { %13135 = vst [vmem:[#allocation129_spill] sm:$0xff] %v5480_v20  ;;  %13136 = vst [vmem:[#allocation130_spill] sm:$0xff] %v5483_v38  ;;  %v5502_v20 = vadd.f32 %v497_v12, %v480_v31  ;;  %v5505_v38 = vmul.f32 0.2920817, %v5467_v7  ;;  %v606_v31 = vmul.f32 %v5228_v56, %v5228_v56  ;;  %v13150_v12 = vld [vmem:[#allocation39_spill] sm:$0xff]  ;;  %v13154_v16 = vld [vmem:[#allocation42_spill] sm:$0xff] }
  0xee   : > { %13137 = vst [vmem:[#allocation131_spill] sm:$0xff] %v5486_v57  ;;  %13138 = vst [vmem:[#allocation132_spill] sm:$0xff] %v5489_v52  ;;  %v5508_v57 = vmul.f32 0.2920817, %v5072_v10  ;;  %v13152_v10 = vld [vmem:[#allocation40_spill] sm:$0xff] }
  0xef   : > { %13139 = vst [vmem:[#allocation133_spill] sm:$0xff] %v5491_v0  ;;  %13140 = vst [vmem:[#allocation134_spill] sm:$0xff] %v5494_v39  ;;  %v5517_v0 = vmul.f32 0.2920817, %v5099_v18  ;;  %v13156_v18 = vld [vmem:[#allocation43_spill] sm:$0xff] }
  0xf0   : > { %13141 = vst [vmem:[#allocation135_spill] sm:$0xff] %v5497_v58  ;;  %13142 = vst [vmem:[#allocation136_spill] sm:$0xff] %v5500_v46  ;;  %v5520_v58 = vmul.f32 0.2920817, %v5115_v23  ;;  %v13158_v23 = vld [vmem:[#allocation44_spill] sm:$0xff] }
  0xf1   : > { %13143 = vst [vmem:[#allocation137_spill] sm:$0xff] %v5502_v20  ;;  %13144 = vst [vmem:[#allocation138_spill] sm:$0xff] %v5505_v38  ;;  %v5525_v20 = vmul.f32 0.2920817, %v13150_v12  ;;  %v608_v12 = vmul.f32 %v5271_v36, %v5271_v36  ;;  %v5631_v49 = vmul.f32 0.2920817, %v606_v31 }
  0xf2   : > { %13145 = vst [vmem:[#allocation139_spill] sm:$0xff] %v5508_v57  ;;  %13146 = vst [vmem:[#allocation140_spill] sm:$0xff] %v5511_v32  ;;  %v5528_v57 = vmul.f32 0.2920817, %v13152_v10  ;;  %v5531_v32 = vmul.f32 0.2920817, %v13154_v16 }
  0xf3   : > { %13147 = vst [vmem:[#allocation141_spill] sm:$0xff] %v5514_v60  ;;  %13148 = vst [vmem:[#allocation142_spill] sm:$0xff] %v5517_v0  ;;  %v5536_v0 = vmul.f32 0.2920817, %v13156_v18  ;;  %v13160_v60 = vld [vmem:[#allocation46_spill] sm:$0xff]  ;;  %v13162_v10 = vld [vmem:[#allocation47_spill] sm:$0xff]  ;;  %v609_v18 = vmul.f32 %v5274_v29, %v5274_v29 }
  0xf4   : > { %13149 = vst [vmem:[#allocation143_spill] sm:$0xff] %v5520_v58  ;;  %13151 = vst [vmem:[#allocation39_spill] sm:$0xff] %v5525_v20  ;;  %v5539_v58 = vmul.f32 0.2920817, %v13158_v23  ;;  %v5542_v38 = vmul.f32 0.2920817, %v13160_v60 }
  0xf5   : > { %13153 = vst [vmem:[#allocation40_spill] sm:$0xff] %v5528_v57  ;;  %13155 = vst [vmem:[#allocation42_spill] sm:$0xff] %v5531_v32  ;;  %v5547_v57 = vmul.f32 0.2920817, %v13162_v10  ;;  %v13164_v16 = vld [vmem:[#allocation48_spill] sm:$0xff]  ;;  %v13166_v20 = vld [vmem:[#allocation50_spill] sm:$0xff]  ;;  %v610_v10 = vmul.f32 %v5291_v11, %v5291_v11 }
  0xf6   : > { %13157 = vst [vmem:[#allocation43_spill] sm:$0xff] %v5536_v0  ;;  %13159 = vst [vmem:[#allocation44_spill] sm:$0xff] %v5539_v58  ;;  %v5550_v32 = vmul.f32 0.2920817, %v13164_v16  ;;  %v5553_v46 = vmul.f32 0.2920817, %v13166_v20 }
  0xf7   : > { %13161 = vst [vmem:[#allocation46_spill] sm:$0xff] %v5542_v38  ;;  %13163 = vst [vmem:[#allocation47_spill] sm:$0xff] %v5547_v57  ;;  %v13168_v23 = vld [vmem:[#allocation51_spill] sm:$0xff]  ;;  %v13170_v60 = vld [vmem:[#allocation52_spill] sm:$0xff]  ;;  %v5635_v48 = vmul.f32 0.2920817, %v607_v17 }
  0xf8   : > { %13165 = vst [vmem:[#allocation48_spill] sm:$0xff] %v5550_v32  ;;  %13167 = vst [vmem:[#allocation50_spill] sm:$0xff] %v5553_v46  ;;  %v5558_v58 = vmul.f32 0.2920817, %v13168_v23  ;;  %v5561_v38 = vmul.f32 0.2920817, %v13170_v60  ;;  %v611_v23 = vmul.f32 %v5294_v1, %v5294_v1 }
  0xf9   : > { %v13172_v0 = vld [vmem:[#allocation56_spill] sm:$0xff]  ;;  %v13174_v16 = vld [vmem:[#allocation57_spill] sm:$0xff]  ;;  %v13176_v20 = vld [vmem:[#allocation58_spill] sm:$0xff]  ;;  %13189 = vst [vmem:[#allocation71_spill] sm:$0xff] %v5620_v13  ;;  %v5637_v7 = vmul.f32 0.2920817, %v608_v12 }
  0xfa   : > { %13169 = vst [vmem:[#allocation51_spill] sm:$0xff] %v5558_v58  ;;  %13171 = vst [vmem:[#allocation52_spill] sm:$0xff] %v5561_v38  ;;  %v5564_v39 = vmul.f32 0.2920817, %v13172_v0  ;;  %v5569_v32 = vmul.f32 0.2920817, %v13174_v16  ;;  %v612_v16 = vmul.f32 %v5297_v5, %v5297_v5 }
  0xfb   : > { %v5572_v46 = vmul.f32 0.2920817, %v13176_v20  ;;  %v13178_v57 = vld [vmem:[#allocation61_spill] sm:$0xff]  ;;  %v13180_v60 = vld [vmem:[#allocation62_spill] sm:$0xff]  ;;  %v13182_v0 = vld [vmem:[#allocation63_spill] sm:$0xff]  ;;  %13191 = vst [vmem:[#allocation72_spill] sm:$0xff] %v5623_v24 }
  0xfc   : > { %13173 = vst [vmem:[#allocation56_spill] sm:$0xff] %v5564_v39  ;;  %13175 = vst [vmem:[#allocation57_spill] sm:$0xff] %v5569_v32  ;;  %v5575_v52 = vmul.f32 0.2920817, %v13178_v57  ;;  %v5580_v38 = vmul.f32 0.2920817, %v13180_v60  ;;  %v613_v57 = vmul.f32 %v5311_v3, %v5311_v3  ;;  %v615_v60 = vmul.f32 %v5317_v9, %v5317_v9 }
  0xfd   : > { %13177 = vst [vmem:[#allocation58_spill] sm:$0xff] %v5572_v46  ;;  %v5583_v39 = vmul.f32 0.2920817, %v13182_v0  ;;  %v13184_v58 = vld [vmem:[#allocation67_spill] sm:$0xff]  ;;  %v13186_v20 = vld [vmem:[#allocation68_spill] sm:$0xff]  ;;  %v616_v0 = vmul.f32 %v5329_v6, %v5329_v6  ;;  %v623_v32 = vmul.f32 %v5452_v51, %v5452_v51  ;;  %13193 = vst [vmem:[#allocation73_spill] sm:$0xff] %v5626_v4 }
  0xfe   : > { %13179 = vst [vmem:[#allocation61_spill] sm:$0xff] %v5575_v52  ;;  %13181 = vst [vmem:[#allocation62_spill] sm:$0xff] %v5580_v38  ;;  %v5586_v37 = vmul.f32 0.2920817, %v13184_v58  ;;  %v5591_v46 = vmul.f32 0.2920817, %v13186_v20  ;;  %v614_v52 = vmul.f32 %v5314_v2, %v5314_v2  ;;  %v617_v58 = vmul.f32 %v5332_v22, %v5332_v22 }
  0xff   : > { %13183 = vst [vmem:[#allocation63_spill] sm:$0xff] %v5583_v39  ;;  %v619_v20 = vmul.f32 %v5344_v59, %v5344_v59  ;;  %v621_v39 = vmul.f32 %v5350_v15, %v5350_v15  ;;  %v622_v38 = vmul.f32 %v5449_v53, %v5449_v53  ;;  %13195 = vst [vmem:[#allocation77_spill] sm:$0xff] %v5629_v54  ;;  %v13197_v51 = vld [vmem:[#allocation22_spill] sm:$0xff]  ;;  %v5639_v19 = vmul.f32 0.2920817, %v609_v18  ;;  %v13201_v13 = vld [vmem:[#allocation23_spill] sm:$0xff] }
 0x100   : > { %13185 = vst [vmem:[#allocation67_spill] sm:$0xff] %v5586_v37  ;;  %13187 = vst [vmem:[#allocation68_spill] sm:$0xff] %v5591_v46  ;;  %v618_v37 = vmul.f32 %v5335_v50, %v5335_v50  ;;  %v620_v46 = vmul.f32 %v5347_v21, %v5347_v21  ;;  %v650_v14 = vmul.f32 %v5225_v55, %v13197_v51  ;;  %v5643_v24 = vmul.f32 0.2920817, %v610_v10  ;;  %v13205_v31 = vld [vmem:[#allocation26_spill] sm:$0xff]  ;;  %v13209_v18 = vld [vmem:[#allocation27_spill] sm:$0xff] }
 0x101   : > { %13196 = vst [vmem:[#allocation144_spill] sm:$0xff] %v5631_v49  ;;  %13198 = vst [vmem:[#allocation22_spill] sm:$0xff] %v5635_v48  ;;  %v651_v8 = vmul.f32 %v5246_v61, %v13201_v13  ;;  %v5645_v25 = vmul.f32 0.2920817, %v611_v23  ;;  %v5647_v30 = vmul.f32 0.2920817, %v612_v16  ;;  %v652_v49 = vmul.f32 %v5249_v62, %v13205_v31 }
 0x102   : > { %13199 = vst [vmem:[#allocation145_spill] sm:$0xff] %v5637_v7  ;;  %13200 = vst [vmem:[#allocation146_spill] sm:$0xff] %v5639_v19  ;;  %v5651_v54 = vmul.f32 0.2920817, %v613_v57  ;;  %v5653_v17 = vmul.f32 0.2920817, %v614_v52  ;;  %v653_v19 = vmul.f32 %v5268_v43, %v13209_v18  ;;  %v670_v48 = vmul.f32 %v5449_v53, %v5198_v47 }
 0x103   : > { %13202 = vst [vmem:[#allocation23_spill] sm:$0xff] %v5643_v24  ;;  %13203 = vst [vmem:[#allocation147_spill] sm:$0xff] %v5645_v25  ;;  %v5655_v12 = vmul.f32 0.2920817, %v615_v60  ;;  %v5659_v7 = vmul.f32 0.2920817, %v616_v0  ;;  %v669_v24 = vmul.f32 %v5350_v15, %v5180_v42 }
 0x104   : > { %13204 = vst [vmem:[#allocation148_spill] sm:$0xff] %v5647_v30  ;;  %13206 = vst [vmem:[#allocation26_spill] sm:$0xff] %v5651_v54  ;;  %v5661_v10 = vmul.f32 0.2920817, %v617_v58  ;;  %v5663_v23 = vmul.f32 0.2920817, %v618_v37  ;;  %v668_v54 = vmul.f32 %v5347_v21, %v5177_v41 }
 0x105   : > { %13207 = vst [vmem:[#allocation149_spill] sm:$0xff] %v5653_v17  ;;  %13208 = vst [vmem:[#allocation150_spill] sm:$0xff] %v5655_v12  ;;  %v13213_v16 = vld [vmem:[#allocation28_spill] sm:$0xff]  ;;  %v5667_v25 = vmul.f32 0.2920817, %v619_v20  ;;  %v13217_v60 = vld [vmem:[#allocation31_spill] sm:$0xff] }
 0x106   : > { %13210 = vst [vmem:[#allocation27_spill] sm:$0xff] %v5659_v7  ;;  %13211 = vst [vmem:[#allocation151_spill] sm:$0xff] %v5661_v10  ;;  %v654_v30 = vmul.f32 %v5228_v56, %v13213_v16  ;;  %v5669_v57 = vmul.f32 0.2920817, %v620_v46  ;;  %v5671_v52 = vmul.f32 0.2920817, %v621_v39  ;;  %v655_v12 = vmul.f32 %v5252_v63, %v13217_v60 }
 0x107   : > { %13212 = vst [vmem:[#allocation152_spill] sm:$0xff] %v5663_v23  ;;  %13214 = vst [vmem:[#allocation28_spill] sm:$0xff] %v5667_v25  ;;  %v5675_v17 = vmul.f32 0.2920817, %v622_v38  ;;  %v5677_v0 = vmul.f32 0.2920817, %v623_v32  ;;  %v667_v7 = vmul.f32 %v5344_v59, %v5174_v40 }
 0x108   : > { %13215 = vst [vmem:[#allocation153_spill] sm:$0xff] %v5669_v57  ;;  %13216 = vst [vmem:[#allocation154_spill] sm:$0xff] %v5671_v52  ;;  %v5679_v58 = vmul.f32 0.2920817, %v624_v44  ;;  %v13221_v37 = vld [vmem:[#allocation32_spill] sm:$0xff]  ;;  %v13223_v20 = vld [vmem:[#allocation33_spill] sm:$0xff]  ;;  %v661_v44 = vmul.f32 %v5311_v3, %v5126_v26 }
 0x109   : > { %13218 = vst [vmem:[#allocation31_spill] sm:$0xff] %v5675_v17  ;;  %13219 = vst [vmem:[#allocation155_spill] sm:$0xff] %v5677_v0  ;;  %v656_v23 = vmul.f32 %v5271_v36, %v13221_v37  ;;  %v5683_v10 = vmul.f32 0.2920817, %v625_v45  ;;  %v657_v46 = vmul.f32 %v5274_v29, %v13223_v20  ;;  %v13224_v57 = vld [vmem:[#allocation35_spill] sm:$0xff]  ;;  %v13225_v52 = vld [vmem:[#allocation36_spill] sm:$0xff]  ;;  %v663_v45 = vmul.f32 %v5317_v9, %v5132_v28 }
 0x10a   : > { %13220 = vst [vmem:[#allocation156_spill] sm:$0xff] %v5679_v58  ;;  %v658_v39 = vmul.f32 %v5291_v11, %v13224_v57  ;;  %v659_v25 = vmul.f32 %v5294_v1, %v13225_v52  ;;  %v13226_v38 = vld [vmem:[#allocation37_spill] sm:$0xff]  ;;  %v662_v58 = vmul.f32 %v5314_v2, %v5129_v27  ;;  %v665_v0 = vmul.f32 %v5332_v22, %v5153_v34  ;;  %v13228_v9 = vld [vmem:[#allocation119_spill] sm:$0xff]  ;;  %v13229_v1 = vld [vmem:[#allocation54_spill] sm:$0xff] }
 0x10b   : > { %13222 = vst [vmem:[#allocation32_spill] sm:$0xff] %v5683_v10  ;;  %v660_v32 = vmul.f32 %v5297_v5, %v13226_v38  ;;  %v664_v10 = vmul.f32 %v5329_v6, %v5150_v33  ;;  %v666_v17 = vmul.f32 %v5335_v50, %v5156_v35  ;;  %v13227_v4 = vld [vmem:[#allocation53_spill] sm:$0xff]  ;;  %v13230_v22 = vld [vmem:[#allocation120_spill] sm:$0xff]  ;;  %v13231_v63 = vld [vmem:[#allocation59_spill] sm:$0xff]  ;;  %v5719_v50 = vmul.f32 0.2920817, %v650_v14 }
 0x10c   : > { %v671_v3 = vmul.f32 %v13228_v9, %v13227_v4  ;;  %v672_v29 = vmul.f32 %v13230_v22, %v13229_v1  ;;  %v13232_v43 = vld [vmem:[#allocation124_spill] sm:$0xff]  ;;  %v5721_v59 = vmul.f32 0.2920817, %v651_v8  ;;  %v5723_v21 = vmul.f32 0.2920817, %v652_v49  ;;  %v13238_v53 = vld [vmem:[#allocation25_spill] sm:$0xff] }
 0x10d   : > { %v673_v61 = vmul.f32 %v13232_v43, %v13231_v63  ;;  %13233 = vst [vmem:[#allocation33_spill] sm:$0xff] %v5719_v50  ;;  %v5725_v6 = vmul.f32 0.2920817, %v653_v19  ;;  %v5727_v15 = vmul.f32 0.2920817, %v654_v30  ;;  %v701_v30 = vrot.slane %v13221_v37, 6 }
 0x10e   : > { %13234 = vst [vmem:[#allocation35_spill] sm:$0xff] %v5721_v59  ;;  %13235 = vst [vmem:[#allocation36_spill] sm:$0xff] %v5723_v21  ;;  %v5731_v9 = vmul.f32 0.2920817, %v655_v12  ;;  %v5733_v5 = vmul.f32 0.2920817, %v656_v23 }
 0x10f   : > { %13236 = vst [vmem:[#allocation37_spill] sm:$0xff] %v5725_v6  ;;  %13237 = vst [vmem:[#allocation53_spill] sm:$0xff] %v5727_v15  ;;  %v5735_v22 = vmul.f32 0.2920817, %v657_v46  ;;  %v5739_v8 = vmul.f32 0.2920817, %v658_v39 }
 0x110   : > { %13239 = vst [vmem:[#allocation54_spill] sm:$0xff] %v5731_v9  ;;  %13240 = vst [vmem:[#allocation59_spill] sm:$0xff] %v5733_v5  ;;  %v5741_v49 = vmul.f32 0.2920817, %v659_v25  ;;  %v5743_v19 = vmul.f32 0.2920817, %v660_v32 }
 0x111   : > { %13241 = vst [vmem:[#allocation124_spill] sm:$0xff] %v5735_v22  ;;  %13242 = vst [vmem:[#allocation25_spill] sm:$0xff] %v5739_v8  ;;  %v5747_v15 = vmul.f32 0.2920817, %v661_v44  ;;  %v5749_v12 = vmul.f32 0.2920817, %v662_v58 }
 0x112   : > { %13243 = vst [vmem:[#allocation157_spill] sm:$0xff] %v5741_v49  ;;  %13244 = vst [vmem:[#allocation158_spill] sm:$0xff] %v5743_v19  ;;  %v5751_v23 = vmul.f32 0.2920817, %v663_v45  ;;  %v5755_v2 = vmul.f32 0.2920817, %v664_v10 }
 0x113   : > { %13245 = vst [vmem:[#allocation159_spill] sm:$0xff] %v5747_v15  ;;  %13246 = vst [vmem:[#allocation160_spill] sm:$0xff] %v5749_v12  ;;  %v5757_v39 = vmul.f32 0.2920817, %v665_v0  ;;  %v5759_v25 = vmul.f32 0.2920817, %v666_v17 }
 0x114   : > { %13247 = vst [vmem:[#allocation161_spill] sm:$0xff] %v5751_v23  ;;  %13248 = vst [vmem:[#allocation162_spill] sm:$0xff] %v5755_v2  ;;  %v13251_v32 = vld [vmem:[#allocation21_spill] sm:$0xff]  ;;  %v5764_v44 = vmul.f32 0.2920817, %v667_v7  ;;  %v698_v7 = vrot.slane %v13197_v51, 6 }
 0x115   : > { %13249 = vst [vmem:[#allocation163_spill] sm:$0xff] %v5757_v39  ;;  %13250 = vst [vmem:[#allocation164_spill] sm:$0xff] %v5759_v25  ;;  %vm722_vm0 = vcmp.lt.s32.totalorder %v13251_v32, 2  ;;  %v5766_v58 = vmul.f32 0.2920817, %v668_v54  ;;  %v699_v54 = vrot.slane %v13205_v31, 6 }
 0x116   : > { %13252 = vst [vmem:[#allocation165_spill] sm:$0xff] %v5764_v44  ;;  %v5768_v45 = vmul.f32 0.2920817, %v669_v24  ;;  %v5772_v10 = vmul.f32 0.2920817, %v670_v48  ;;  %v700_v24 = vrot.slane %v13213_v16, 6 }
 0x117   : > { %13253 = vst [vmem:[#allocation166_spill] sm:$0xff] %v5766_v58  ;;  %v5774_v0 = vmul.f32 0.2920817, %v671_v3  ;;  %v5776_v17 = vmul.f32 0.2920817, %v672_v29  ;;  %v702_v48 = vrot.slane %v13224_v57, 6 }
 0x118   : > { %13254 = vst [vmem:[#allocation167_spill] sm:$0xff] %v5768_v45  ;;  %13255 = vst [vmem:[#allocation168_spill] sm:$0xff] %v5772_v10  ;;  %v5780_v25 = vmul.f32 0.2920817, %v673_v61  ;;  %v703_v3 = vrot.slane %v13226_v38, 6  ;;  %v704_v29 = vrot.slane %v5129_v27, 6 }
 0x119   : > { %13256 = vst [vmem:[#allocation169_spill] sm:$0xff] %v5774_v0  ;;  %13257 = vst [vmem:[#allocation170_spill] sm:$0xff] %v5776_v17  ;;  %v705_v46 = vrot.slane %v5150_v33, 6  ;;  %v706_v14 = vrot.slane %v5156_v35, 6  ;;  %v707_v61 = vrot.slane %v5177_v41, 6  ;;  %vm747_vm1 = vcmp.eq.s32.totalorder %v13251_v32, 0 }
 0x11a   : > { %13258 = vst [vmem:[#allocation171_spill] sm:$0xff] %v5780_v25  ;;  %v708_v25 = vrot.slane %v5198_v47, 6  ;;  %v709_v17 = vrot.slane %v13229_v1, 6  ;;  %v710_v0 = vrot.slane %v13201_v13, 6  ;;  %v711_v10 = vrot.slane %v13209_v18, 6 }
 0x11b   : > { %v712_v45 = vrot.slane %v13217_v60, 6  ;;  %v713_v58 = vrot.slane %v13223_v20, 6  ;;  %v714_v44 = vrot.slane %v13225_v52, 6  ;;  %v715_v39 = vrot.slane %v5126_v26, 6 }
 0x11c   : > { %v716_v2 = vrot.slane %v5132_v28, 6  ;;  %v717_v23 = vrot.slane %v5153_v34, 6  ;;  %v718_v12 = vrot.slane %v5174_v40, 6  ;;  %v719_v15 = vrot.slane %v5180_v42, 6 }
 0x11d   : > { %v720_v13 = vrot.slane %v13227_v4, 6  ;;  %v721_v18 = vrot.slane %v13231_v63, 6  ;;  %v5809_v60 = vsel %vm722_vm0, %v698_v7, %v710_v0  ;;  %v5813_v52 = vsel %vm722_vm0, %v699_v54, %v711_v10 }
 0x11e   : > { %13259 = vst [vmem:[#allocation172_spill] sm:$0xff] %v5809_v60  ;;  %v5817_v26 = vsel %vm722_vm0, %v700_v24, %v712_v45  ;;  %v5821_v28 = vsel %vm722_vm0, %v701_v30, %v713_v58  ;;  %v5825_v34 = vsel %vm722_vm0, %v702_v48, %v714_v44  ;;  %v5829_v40 = vsel %vm722_vm0, %v703_v3, %v715_v39 }
 0x11f   : > { %13260 = vst [vmem:[#allocation173_spill] sm:$0xff] %v5825_v34  ;;  %13261 = vst [vmem:[#allocation174_spill] sm:$0xff] %v5829_v40  ;;  %v5833_v42 = vsel %vm722_vm0, %v704_v29, %v716_v2  ;;  %v5837_v63 = vsel %vm722_vm0, %v705_v46, %v717_v23  ;;  %v5841_v4 = vsel %vm722_vm0, %v706_v14, %v718_v12  ;;  %vm821_vm2 = vcmp.eq.s32.totalorder %v13251_v32, 1  ;;  %v13359_v32 = vld [vmem:[#allocation49_spill] sm:$0xff] }
 0x120   : > { %13262 = vst [vmem:[#allocation175_spill] sm:$0xff] %v5833_v42  ;;  %13263 = vst [vmem:[#allocation176_spill] sm:$0xff] %v5837_v63  ;;  %v5845_v20 = vsel %vm722_vm0, %v707_v61, %v719_v15  ;;  %v5849_v19 = vsel %vm722_vm0, %v708_v25, %v720_v13  ;;  %v5854_v49 = vsel %vm722_vm0, %v709_v17, %v721_v18  ;;  %v13313_v63 = vld [vmem:[#allocation119_spill] sm:$0xff] }
 0x121   : > { %13264 = vst [vmem:[#allocation177_spill] sm:$0xff] %v5841_v4  ;;  %13265 = vst [vmem:[#allocation178_spill] sm:$0xff] %v5845_v20  ;;  %v735_v8 = vsel %vm722_vm0, %v710_v0, %v698_v7  ;;  %v736_v22 = vsel %vm722_vm0, %v711_v10, %v699_v54  ;;  %v737_v5 = vsel %vm722_vm0, %v712_v45, %v700_v24  ;;  %v13311_v20 = vld [vmem:[#allocation85_spill] sm:$0xff]  ;;  %v13312_v4 = vld [vmem:[#allocation87_spill] sm:$0xff] }
 0x122   : > { %13266 = vst [vmem:[#allocation179_spill] sm:$0xff] %v5849_v19  ;;  %13267 = vst [vmem:[#allocation180_spill] sm:$0xff] %v5854_v49  ;;  %v738_v9 = vsel %vm722_vm0, %v713_v58, %v701_v30  ;;  %v739_v6 = vsel %vm722_vm0, %v714_v44, %v702_v48  ;;  %v740_v21 = vsel %vm722_vm0, %v715_v39, %v703_v3  ;;  %v13309_v49 = vld [vmem:[#allocation80_spill] sm:$0xff]  ;;  %v13310_v19 = vld [vmem:[#allocation83_spill] sm:$0xff] }
 0x123   : > { %v741_v59 = vsel %vm722_vm0, %v716_v2, %v704_v29  ;;  %v742_v0 = vsel %vm722_vm0, %v717_v23, %v705_v46  ;;  %v743_v10 = vsel %vm722_vm0, %v718_v12, %v706_v14  ;;  %v744_v45 = vsel %vm722_vm0, %v719_v15, %v707_v61  ;;  %v13275_v61 = vld [vmem:[#allocation30_spill] sm:$0xff] }
 0x124   : > { %v780_v30 = vrot.slane %v5150_v33, %v13238_v53  ;;  %v745_v44 = vsel %vm722_vm0, %v720_v13, %v708_v25  ;;  %v746_v39 = vsel %vm722_vm0, %v721_v18, %v709_v17  ;;  %v784_v2 = vrot.slane %v5156_v35, %v13238_v53 }
 0x125   : > { %v788_v23 = vrot.slane %v5177_v41, %v13238_v53  ;;  %v792_v14 = vrot.slane %v5198_v47, %v13238_v53  ;;  %v796_v15 = vrot.slane %v13229_v1, %v13238_v53  ;;  %v13268_v12 = vrot.slane %v13197_v51, %v13238_v53 }
 0x126   : > { %v13269_v25 = vrot.slane %v13205_v31, %v13238_v53  ;;  %v13270_v17 = vrot.slane %v13213_v16, %v13238_v53  ;;  %v13271_v54 = vrot.slane %v13221_v37, %v13238_v53  ;;  %v5929_v13 = vrot.slane %v13197_v51, %v13275_v61 }
 0x127   : > { %v797_v46 = vsel %vm747_vm1, %v13268_v12, %v735_v8  ;;  %v13272_v8 = vrot.slane %v13224_v57, %v13238_v53  ;;  %v5941_v18 = vrot.slane %v13221_v37, %v13275_v61  ;;  %v5949_v51 = vrot.slane %v13226_v38, %v13275_v61 }
 0x128   : > { %v799_v58 = vsel %vm747_vm1, %v13269_v25, %v736_v22  ;;  %v801_v7 = vsel %vm747_vm1, %v13270_v17, %v737_v5  ;;  %v803_v24 = vsel %vm747_vm1, %v13271_v54, %v738_v9  ;;  %v13273_v22 = vrot.slane %v13226_v38, %v13238_v53  ;;  %13276 = vst [vmem:[#allocation30_spill] sm:$0xff] %v5929_v13  ;;  %v13296_v54 = vld [vmem:[#allocation75_spill] sm:$0xff] }
 0x129   : > { %v805_v48 = vsel %vm747_vm1, %v13272_v8, %v739_v6  ;;  %v13274_v5 = vrot.slane %v5129_v27, %v13238_v53  ;;  %v811_v9 = vsel %vm747_vm1, %v780_v30, %v742_v0  ;;  %v5933_v6 = vrot.slane %v13205_v31, %v13275_v61  ;;  %13279 = vst [vmem:[#allocation183_spill] sm:$0xff] %v5941_v18  ;;  %v13297_v8 = vld [vmem:[#allocation79_spill] sm:$0xff] }
 0x12a   : > { %v807_v3 = vsel %vm747_vm1, %v13273_v22, %v740_v21  ;;  %v5937_v21 = vrot.slane %v13213_v16, %v13275_v61  ;;  %13281 = vst [vmem:[#allocation185_spill] sm:$0xff] %v5949_v51  ;;  %v5953_v31 = vrot.slane %v5129_v27, %v13275_v61  ;;  %v5957_v16 = vrot.slane %v5150_v33, %v13275_v61  ;;  %v13298_v22 = vld [vmem:[#allocation82_spill] sm:$0xff] }
 0x12b   : > { %v809_v29 = vsel %vm747_vm1, %v13274_v5, %v741_v59  ;;  %13277 = vst [vmem:[#allocation181_spill] sm:$0xff] %v5933_v6  ;;  %v5945_v59 = vrot.slane %v13224_v57, %v13275_v61  ;;  %v5961_v37 = vrot.slane %v5156_v35, %v13275_v61  ;;  %v5965_v57 = vrot.slane %v5177_v41, %v13275_v61  ;;  %v13299_v5 = vld [vmem:[#allocation84_spill] sm:$0xff] }
 0x12c   : > { %13278 = vst [vmem:[#allocation182_spill] sm:$0xff] %v5937_v21  ;;  %13282 = vst [vmem:[#allocation186_spill] sm:$0xff] %v5953_v31  ;;  %v813_v38 = vsel %vm747_vm1, %v784_v2, %v743_v10  ;;  %v815_v0 = vsel %vm747_vm1, %v788_v23, %v744_v45  ;;  %v5973_v27 = vrot.slane %v5198_v47, %v13275_v61  ;;  %v896_v25 = vrot.slane %v5249_v62, 6 }
 0x12d   : > { %13280 = vst [vmem:[#allocation184_spill] sm:$0xff] %v5945_v59  ;;  %13283 = vst [vmem:[#allocation187_spill] sm:$0xff] %v5957_v16  ;;  %v5977_v33 = vrot.slane %v13229_v1, %v13275_v61  ;;  %v817_v35 = vsel %vm747_vm1, %v792_v14, %v745_v44  ;;  %v819_v41 = vsel %vm747_vm1, %v796_v15, %v746_v39  ;;  %v898_v17 = vrot.slane %v5271_v36, 6 }
 0x12e   : > { %13284 = vst [vmem:[#allocation188_spill] sm:$0xff] %v5961_v37  ;;  %13285 = vst [vmem:[#allocation189_spill] sm:$0xff] %v5965_v57  ;;  %v5986_v10 = vsel %vm821_vm2, %v5929_v13, %v797_v46  ;;  %v5991_v47 = vsel %vm821_vm2, %v5933_v6, %v799_v58  ;;  %v5996_v1 = vsel %vm821_vm2, %v5937_v21, %v801_v7  ;;  %v895_v46 = vrot.slane %v5225_v55, 6  ;;  %v13307_v21 = vld [vmem:[#allocation74_spill] sm:$0xff] }
 0x12f   : > { %13286 = vst [vmem:[#allocation190_spill] sm:$0xff] %v5973_v27  ;;  %13287 = vst [vmem:[#allocation191_spill] sm:$0xff] %v5977_v33  ;;  %v6001_v45 = vsel %vm821_vm2, %v5941_v18, %v803_v24  ;;  %v6006_v30 = vsel %vm821_vm2, %v5945_v59, %v805_v48  ;;  %v6011_v44 = vsel %vm821_vm2, %v5949_v51, %v807_v3  ;;  %v897_v58 = vrot.slane %v5228_v56, 6  ;;  %v13306_v59 = vld [vmem:[#allocation70_spill] sm:$0xff] }
 0x130   : > { %13288 = vst [vmem:[#allocation192_spill] sm:$0xff] %v5986_v10  ;;  %13289 = vst [vmem:[#allocation193_spill] sm:$0xff] %v6011_v44  ;;  %v6016_v39 = vsel %vm821_vm2, %v5953_v31, %v809_v29  ;;  %v6021_v2 = vsel %vm821_vm2, %v5957_v16, %v811_v9  ;;  %v6026_v23 = vsel %vm821_vm2, %v5961_v37, %v813_v38  ;;  %v899_v7 = vrot.slane %v5291_v11, 6  ;;  %v13300_v9 = vld [vmem:[#allocation86_spill] sm:$0xff]  ;;  %v13304_v37 = vld [vmem:[#allocation69_spill] sm:$0xff] }
 0x131   : > { %13290 = vst [vmem:[#allocation194_spill] sm:$0xff] %v6016_v39  ;;  %13291 = vst [vmem:[#allocation195_spill] sm:$0xff] %v6021_v2  ;;  %v6031_v14 = vsel %vm821_vm2, %v5965_v57, %v815_v0  ;;  %v6036_v15 = vsel %vm821_vm2, %v5973_v27, %v817_v35  ;;  %v6041_v12 = vsel %vm821_vm2, %v5977_v33, %v819_v41  ;;  %v900_v24 = vrot.slane %v13296_v54, 6  ;;  %v13301_v0 = vld [vmem:[#allocation118_spill] sm:$0xff]  ;;  %v13302_v41 = vld [vmem:[#allocation120_spill] sm:$0xff] }
 0x132   : > { %13292 = vst [vmem:[#allocation196_spill] sm:$0xff] %v6026_v23  ;;  %13293 = vst [vmem:[#allocation197_spill] sm:$0xff] %v6031_v14  ;;  %v901_v48 = vrot.slane %v13297_v8, 6  ;;  %v902_v3 = vrot.slane %v13298_v22, 6  ;;  %v903_v29 = vrot.slane %v13299_v5, 6  ;;  %v904_v38 = vrot.slane %v13300_v9, 6 }
 0x133   : > { %13294 = vst [vmem:[#allocation198_spill] sm:$0xff] %v6036_v15  ;;  %13295 = vst [vmem:[#allocation199_spill] sm:$0xff] %v6041_v12  ;;  %v905_v35 = vrot.slane %v13301_v0, 6  ;;  %v906_v33 = vrot.slane %v13302_v41, 6  ;;  %v13303_v27 = vld [vmem:[#allocation64_spill] sm:$0xff]  ;;  %v908_v16 = vrot.slane %v13304_v37, 6 }
 0x134   : > { %v907_v57 = vrot.slane %v13303_v27, 6  ;;  %v13305_v31 = vld [vmem:[#allocation65_spill] sm:$0xff]  ;;  %v910_v18 = vrot.slane %v13306_v59, 6  ;;  %v911_v6 = vrot.slane %v13307_v21, 6  ;;  %v13308_v13 = vld [vmem:[#allocation78_spill] sm:$0xff]  ;;  %v913_v12 = vrot.slane %v13309_v49, 6 }
 0x135   : > { %v909_v51 = vrot.slane %v13305_v31, 6  ;;  %v912_v50 = vrot.slane %v13308_v13, 6  ;;  %v914_v15 = vrot.slane %v13310_v19, 6  ;;  %v915_v14 = vrot.slane %v13311_v20, 6 }
 0x136   : > { %v916_v23 = vrot.slane %v13312_v4, 6  ;;  %v917_v27 = vrot.slane %v13313_v63, 6  ;;  %v918_v37 = vrot.slane %v13232_v43, 6  ;;  %v6069_v31 = vsel %vm722_vm0, %v895_v46, %v907_v57 }
 0x137   : > { %v6073_v21 = vsel %vm722_vm0, %v896_v25, %v908_v16  ;;  %v6077_v49 = vsel %vm722_vm0, %v897_v58, %v909_v51  ;;  %v6081_v19 = vsel %vm722_vm0, %v898_v17, %v910_v18  ;;  %v6085_v63 = vsel %vm722_vm0, %v899_v7, %v911_v6 }
 0x138   : > { %13314 = vst [vmem:[#allocation75_spill] sm:$0xff] %v6081_v19  ;;  %13315 = vst [vmem:[#allocation79_spill] sm:$0xff] %v6085_v63  ;;  %v6089_v43 = vsel %vm722_vm0, %v900_v24, %v912_v50  ;;  %v6093_v4 = vsel %vm722_vm0, %v901_v48, %v913_v12  ;;  %v6097_v20 = vsel %vm722_vm0, %v902_v3, %v914_v15 }
 0x139   : > { %13316 = vst [vmem:[#allocation82_spill] sm:$0xff] %v6089_v43  ;;  %13317 = vst [vmem:[#allocation84_spill] sm:$0xff] %v6093_v4  ;;  %v6101_v13 = vsel %vm722_vm0, %v903_v29, %v915_v14  ;;  %v6105_v59 = vsel %vm722_vm0, %v904_v38, %v916_v23  ;;  %v6109_v63 = vsel %vm722_vm0, %v905_v35, %v917_v27 }
 0x13a   : > { %13318 = vst [vmem:[#allocation86_spill] sm:$0xff] %v6097_v20  ;;  %13319 = vst [vmem:[#allocation118_spill] sm:$0xff] %v6101_v13  ;;  %v6113_v43 = vsel %vm722_vm0, %v906_v33, %v918_v37  ;;  %v931_v4 = vsel %vm722_vm0, %v907_v57, %v895_v46  ;;  %v932_v20 = vsel %vm722_vm0, %v908_v16, %v896_v25 }
 0x13b   : > { %13320 = vst [vmem:[#allocation120_spill] sm:$0xff] %v6105_v59  ;;  %13321 = vst [vmem:[#allocation64_spill] sm:$0xff] %v6109_v63  ;;  %v933_v13 = vsel %vm722_vm0, %v909_v51, %v897_v58  ;;  %v934_v59 = vsel %vm722_vm0, %v910_v18, %v898_v17  ;;  %v935_v19 = vsel %vm722_vm0, %v911_v6, %v899_v7 }
 0x13c   : > { %13322 = vst [vmem:[#allocation69_spill] sm:$0xff] %v6113_v43  ;;  %v936_v63 = vsel %vm722_vm0, %v912_v50, %v900_v24  ;;  %v937_v43 = vsel %vm722_vm0, %v913_v12, %v901_v48  ;;  %v938_v57 = vsel %vm722_vm0, %v914_v15, %v902_v3  ;;  %v946_v16 = vrot.slane %v5225_v55, %v13238_v53 }
 0x13d   : > { %v950_v51 = vrot.slane %v5249_v62, %v13238_v53  ;;  %v954_v18 = vrot.slane %v5228_v56, %v13238_v53  ;;  %v958_v6 = vrot.slane %v5271_v36, %v13238_v53  ;;  %v962_v50 = vrot.slane %v5291_v11, %v13238_v53 }
 0x13e   : > { %v966_v12 = vrot.slane %v13296_v54, %v13238_v53  ;;  %v939_v15 = vsel %vm722_vm0, %v915_v14, %v903_v29  ;;  %v940_v46 = vsel %vm722_vm0, %v916_v23, %v904_v38  ;;  %v970_v25 = vrot.slane %v13297_v8, %v13238_v53 }
 0x13f   : > { %v974_v58 = vrot.slane %v13298_v22, %v13238_v53  ;;  %v941_v17 = vsel %vm722_vm0, %v917_v27, %v905_v35  ;;  %v942_v7 = vsel %vm722_vm0, %v918_v37, %v906_v33  ;;  %v978_v24 = vrot.slane %v13299_v5, %v13238_v53 }
 0x140   : > { %v982_v14 = vrot.slane %v13300_v9, %v13238_v53  ;;  %v986_v23 = vrot.slane %v13301_v0, %v13238_v53  ;;  %v990_v48 = vrot.slane %v13302_v41, %v13238_v53  ;;  %v991_v3 = vsel %vm747_vm1, %v946_v16, %v931_v4 }
 0x141   : > { %v993_v29 = vsel %vm747_vm1, %v950_v51, %v932_v20  ;;  %v995_v33 = vsel %vm747_vm1, %v954_v18, %v933_v13  ;;  %v997_v38 = vsel %vm747_vm1, %v958_v6, %v934_v59  ;;  %v999_v35 = vsel %vm747_vm1, %v962_v50, %v935_v19 }
 0x142   : > { %v1001_v27 = vsel %vm747_vm1, %v966_v12, %v936_v63  ;;  %v1003_v53 = vsel %vm747_vm1, %v970_v25, %v937_v43  ;;  %v1005_v37 = vsel %vm747_vm1, %v974_v58, %v938_v57  ;;  %v6181_v4 = vrot.slane %v5225_v55, %v13275_v61 }
 0x143   : > { %v6185_v20 = vrot.slane %v5249_v62, %v13275_v61  ;;  %v1007_v19 = vsel %vm747_vm1, %v978_v24, %v939_v15  ;;  %v6191_v63 = vrot.slane %v5228_v56, %v13275_v61  ;;  %v6195_v43 = vrot.slane %v5271_v36, %v13275_v61 }
 0x144   : > { %13323 = vst [vmem:[#allocation65_spill] sm:$0xff] %v6181_v4  ;;  %v6199_v13 = vrot.slane %v5291_v11, %v13275_v61  ;;  %v1009_v55 = vsel %vm747_vm1, %v982_v14, %v940_v46  ;;  %v6205_v62 = vrot.slane %v13296_v54, %v13275_v61  ;;  %v6209_v59 = vrot.slane %v13297_v8, %v13275_v61 }
 0x145   : > { %13324 = vst [vmem:[#allocation70_spill] sm:$0xff] %v6185_v20  ;;  %13325 = vst [vmem:[#allocation74_spill] sm:$0xff] %v6191_v63  ;;  %v6213_v56 = vrot.slane %v13298_v22, %v13275_v61  ;;  %v1011_v36 = vsel %vm747_vm1, %v986_v23, %v941_v17  ;;  %v6219_v11 = vrot.slane %v13299_v5, %v13275_v61  ;;  %v1087_v16 = vmul.f32 0.120078385, %v5986_v10 }
 0x146   : > { %13326 = vst [vmem:[#allocation78_spill] sm:$0xff] %v6195_v43  ;;  %13327 = vst [vmem:[#allocation80_spill] sm:$0xff] %v6199_v13  ;;  %v6223_v57 = vrot.slane %v13300_v9, %v13275_v61  ;;  %v6227_v54 = vrot.slane %v13301_v0, %v13275_v61  ;;  %v1013_v8 = vsel %vm747_vm1, %v990_v48, %v942_v7  ;;  %v1088_v50 = vmul.f32 0.120078385, %v5809_v60 }
 0x147   : > { %13328 = vst [vmem:[#allocation83_spill] sm:$0xff] %v6205_v62  ;;  %13329 = vst [vmem:[#allocation85_spill] sm:$0xff] %v6209_v59  ;;  %v6233_v22 = vrot.slane %v13302_v41, %v13275_v61  ;;  %v6238_v5 = vsel %vm821_vm2, %v6181_v4, %v991_v3  ;;  %v6243_v9 = vsel %vm821_vm2, %v6185_v20, %v993_v29  ;;  %v1089_v25 = vmul.f32 0.120078385, %v5991_v47  ;;  %v13341_v3 = vld [vmem:[#allocation29_spill] sm:$0xff]  ;;  %v13358_v20 = vld [vmem:[#allocation199_spill] sm:$0xff] }
 0x148   : > { %13330 = vst [vmem:[#allocation87_spill] sm:$0xff] %v6213_v56  ;;  %13331 = vst [vmem:[#allocation119_spill] sm:$0xff] %v6219_v11  ;;  %v6248_v0 = vsel %vm821_vm2, %v6191_v63, %v995_v33  ;;  %v6253_v61 = vsel %vm821_vm2, %v6195_v43, %v997_v38  ;;  %v6258_v41 = vsel %vm821_vm2, %v6199_v13, %v999_v35  ;;  %v1090_v17 = vmul.f32 0.120078385, %v5813_v52  ;;  %v13354_v13 = vld [vmem:[#allocation45_spill] sm:$0xff] }
 0x149   : > { %13332 = vst [vmem:[#allocation200_spill] sm:$0xff] %v6223_v57  ;;  %13333 = vst [vmem:[#allocation201_spill] sm:$0xff] %v6227_v54  ;;  %v6264_v51 = vsel %vm821_vm2, %v6205_v62, %v1001_v27  ;;  %v6269_v18 = vsel %vm821_vm2, %v6209_v59, %v1003_v53  ;;  %v6274_v6 = vsel %vm821_vm2, %v6213_v56, %v1005_v37  ;;  %v1091_v7 = vmul.f32 0.120078385, %v5996_v1  ;;  %v13343_v27 = vld [vmem:[#allocation34_spill] sm:$0xff] }
 0x14a   : > { %13334 = vst [vmem:[#allocation202_spill] sm:$0xff] %v6233_v22  ;;  %13335 = vst [vmem:[#allocation203_spill] sm:$0xff] %v6274_v6  ;;  %v6280_v12 = vsel %vm821_vm2, %v6219_v11, %v1007_v19  ;;  %v6285_v15 = vsel %vm821_vm2, %v6223_v57, %v1009_v55  ;;  %v6290_v46 = vsel %vm821_vm2, %v6227_v54, %v1011_v36  ;;  %v1092_v14 = vmul.f32 0.120078385, %v5817_v26  ;;  %v13345_v36 = vld [vmem:[#allocation38_spill] sm:$0xff]  ;;  %v13349_v57 = vld [vmem:[#allocation41_spill] sm:$0xff] }
 0x14b   : > { %13336 = vst [vmem:[#allocation204_spill] sm:$0xff] %v6280_v12  ;;  %13337 = vst [vmem:[#allocation205_spill] sm:$0xff] %v6285_v15  ;;  %v6296_v58 = vsel %vm821_vm2, %v6233_v22, %v1013_v8  ;;  %v6302_v24 = vmul.f32 %v5986_v10, %v5986_v10  ;;  %v1093_v23 = vmul.f32 0.120078385, %v6001_v45  ;;  %v1094_v48 = vmul.f32 0.120078385, %v5821_v28 }
 0x14c   : > { %13338 = vst [vmem:[#allocation206_spill] sm:$0xff] %v6290_v46  ;;  %13339 = vst [vmem:[#allocation207_spill] sm:$0xff] %v6296_v58  ;;  %v6308_v29 = vadd.f32 %v1087_v16, %v13341_v3  ;;  %v1095_v33 = vmul.f32 0.120078385, %v6006_v30  ;;  %v1096_v38 = vmul.f32 0.120078385, %v5825_v34  ;;  %v6314_v53 = vadd.f32 %v1088_v50, %v13343_v27 }
 0x14d   : > { %13340 = vst [vmem:[#allocation208_spill] sm:$0xff] %v6302_v24  ;;  %v1097_v35 = vmul.f32 0.120078385, %v6011_v44  ;;  %v1098_v37 = vmul.f32 0.120078385, %v5829_v40  ;;  %v6320_v8 = vadd.f32 %v1089_v25, %v13345_v36  ;;  %v13347_v3 = vld [vmem:[#allocation176_spill] sm:$0xff]  ;;  %v6326_v11 = vadd.f32 %v1090_v17, %v13349_v57 }
 0x14e   : > { %13342 = vst [vmem:[#allocation29_spill] sm:$0xff] %v6308_v29  ;;  %13344 = vst [vmem:[#allocation34_spill] sm:$0xff] %v6314_v53  ;;  %v1099_v19 = vmul.f32 0.120078385, %v6016_v39  ;;  %v1100_v55 = vmul.f32 0.120078385, %v5833_v42  ;;  %v6332_v43 = vadd.f32 %v1091_v7, %v13354_v13  ;;  %v6338_v10 = vadd.f32 %v1092_v14, %v13359_v32 }
 0x14f   : > { %13346 = vst [vmem:[#allocation38_spill] sm:$0xff] %v6320_v8  ;;  %v1101_v16 = vmul.f32 0.120078385, %v6021_v2  ;;  %v1102_v29 = vmul.f32 0.120078385, %v13347_v3  ;;  %v13348_v22 = vld [vmem:[#allocation196_spill] sm:$0xff] }
 0x150   : > { %v1103_v54 = vmul.f32 0.120078385, %v13348_v22  ;;  %13350 = vst [vmem:[#allocation41_spill] sm:$0xff] %v6326_v11  ;;  %v13351_v50 = vld [vmem:[#allocation177_spill] sm:$0xff]  ;;  %v13353_v59 = vld [vmem:[#allocation178_spill] sm:$0xff]  ;;  %13355 = vst [vmem:[#allocation45_spill] sm:$0xff] %v6332_v43 }
 0x151   : > { %v1104_v27 = vmul.f32 0.120078385, %v13351_v50  ;;  %v13352_v53 = vld [vmem:[#allocation197_spill] sm:$0xff]  ;;  %v1106_v62 = vmul.f32 0.120078385, %v13353_v59  ;;  %v13356_v25 = vld [vmem:[#allocation198_spill] sm:$0xff] }
 0x152   : > { %v1105_v56 = vmul.f32 0.120078385, %v13352_v53  ;;  %v1107_v36 = vmul.f32 0.120078385, %v13356_v25  ;;  %v13357_v8 = vld [vmem:[#allocation179_spill] sm:$0xff]  ;;  %13360 = vst [vmem:[#allocation49_spill] sm:$0xff] %v6338_v10 }
 0x153   : > { %v1108_v63 = vmul.f32 0.120078385, %v13357_v8  ;;  %v1109_v4 = vmul.f32 0.120078385, %v13358_v20  ;;  %v13361_v57 = vld [vmem:[#allocation180_spill] sm:$0xff]  ;;  %v13362_v11 = vld [vmem:[#allocation55_spill] sm:$0xff] }
 0x154   : > { %v1110_v17 = vmul.f32 0.120078385, %v13361_v57  ;;  %v6342_v50 = vadd.f32 %v1093_v23, %v13362_v11  ;;  %v13364_v53 = vld [vmem:[#allocation60_spill] sm:$0xff]  ;;  %v13366_v59 = vld [vmem:[#allocation66_spill] sm:$0xff]  ;;  %v13370_v8 = vld [vmem:[#allocation81_spill] sm:$0xff] }
 0x155   : > { %v6345_v24 = vadd.f32 %v1094_v48, %v13364_v53  ;;  %v6348_v13 = vadd.f32 %v1095_v33, %v13366_v59  ;;  %v13368_v7 = vld [vmem:[#allocation76_spill] sm:$0xff]  ;;  %v6354_v25 = vadd.f32 %v1097_v35, %v13370_v8  ;;  %v13372_v20 = vld [vmem:[#allocation90_spill] sm:$0xff]  ;;  %v13374_v14 = vld [vmem:[#allocation91_spill] sm:$0xff] }
 0x156   : > { %13363 = vst [vmem:[#allocation55_spill] sm:$0xff] %v6342_v50  ;;  %v6351_v43 = vadd.f32 %v1096_v38, %v13368_v7  ;;  %v6357_v32 = vadd.f32 %v1098_v37, %v13372_v20  ;;  %v6360_v10 = vadd.f32 %v1099_v19, %v13374_v14  ;;  %v13376_v11 = vld [vmem:[#allocation92_spill] sm:$0xff]  ;;  %v13378_v48 = vld [vmem:[#allocation94_spill] sm:$0xff]  ;;  %v13380_v59 = vld [vmem:[#allocation95_spill] sm:$0xff]  ;;  %v1135_v38 = vmul.f32 0.120078385, %v6238_v5 }
 0x157   : > { %13365 = vst [vmem:[#allocation60_spill] sm:$0xff] %v6345_v24  ;;  %13367 = vst [vmem:[#allocation66_spill] sm:$0xff] %v6348_v13  ;;  %v6363_v23 = vadd.f32 %v1100_v55, %v13376_v11  ;;  %v6366_v53 = vadd.f32 %v1101_v16, %v13378_v48  ;;  %v6369_v33 = vadd.f32 %v1102_v29, %v13380_v59  ;;  %v13382_v7 = vld [vmem:[#allocation96_spill] sm:$0xff]  ;;  %v13384_v8 = vld [vmem:[#allocation98_spill] sm:$0xff]  ;;  %v1136_v55 = vmul.f32 0.120078385, %v6069_v31 }
 0x158   : > { %13369 = vst [vmem:[#allocation76_spill] sm:$0xff] %v6351_v43  ;;  %13371 = vst [vmem:[#allocation81_spill] sm:$0xff] %v6354_v25  ;;  %v6373_v35 = vadd.f32 %v1103_v54, %v13382_v7  ;;  %v6376_v20 = vadd.f32 %v1104_v27, %v13384_v8  ;;  %v13386_v37 = vld [vmem:[#allocation99_spill] sm:$0xff]  ;;  %v13388_v14 = vld [vmem:[#allocation100_spill] sm:$0xff]  ;;  %v1137_v54 = vmul.f32 0.120078385, %v6243_v9 }
 0x159   : > { %13373 = vst [vmem:[#allocation90_spill] sm:$0xff] %v6357_v32  ;;  %13375 = vst [vmem:[#allocation91_spill] sm:$0xff] %v6360_v10  ;;  %v6379_v19 = vadd.f32 %v1105_v56, %v13386_v37  ;;  %v6383_v11 = vadd.f32 %v1106_v62, %v13388_v14  ;;  %v13390_v16 = vld [vmem:[#allocation101_spill] sm:$0xff]  ;;  %v13392_v29 = vld [vmem:[#allocation102_spill] sm:$0xff]  ;;  %v1138_v56 = vmul.f32 0.120078385, %v6073_v21  ;;  %v6401_v62 = vmul.f32 %v5809_v60, %v5809_v60 }
 0x15a   : > { %13377 = vst [vmem:[#allocation92_spill] sm:$0xff] %v6363_v23  ;;  %13379 = vst [vmem:[#allocation94_spill] sm:$0xff] %v6366_v53  ;;  %v6386_v48 = vadd.f32 %v1107_v36, %v13390_v16  ;;  %v6389_v59 = vadd.f32 %v1108_v63, %v13392_v29  ;;  %v13394_v7 = vld [vmem:[#allocation103_spill] sm:$0xff]  ;;  %v13396_v27 = vld [vmem:[#allocation104_spill] sm:$0xff]  ;;  %v1139_v36 = vmul.f32 0.120078385, %v6248_v0 }
 0x15b   : > { %13381 = vst [vmem:[#allocation95_spill] sm:$0xff] %v6369_v33  ;;  %13383 = vst [vmem:[#allocation96_spill] sm:$0xff] %v6373_v35  ;;  %v6393_v35 = vadd.f32 %v1109_v4, %v13394_v7  ;;  %v6396_v8 = vadd.f32 %v1110_v17, %v13396_v27  ;;  %v1140_v37 = vmul.f32 0.120078385, %v6077_v49  ;;  %v1141_v63 = vmul.f32 0.120078385, %v6253_v61 }
 0x15c   : > { %13385 = vst [vmem:[#allocation98_spill] sm:$0xff] %v6376_v20  ;;  %13387 = vst [vmem:[#allocation99_spill] sm:$0xff] %v6379_v19  ;;  %v13398_v14 = vld [vmem:[#allocation105_spill] sm:$0xff]  ;;  %v13400_v4 = vld [vmem:[#allocation75_spill] sm:$0xff]  ;;  %v1143_v17 = vmul.f32 0.120078385, %v6258_v41 }
 0x15d   : > { %13389 = vst [vmem:[#allocation100_spill] sm:$0xff] %v6383_v11  ;;  %13391 = vst [vmem:[#allocation101_spill] sm:$0xff] %v6386_v48  ;;  %v6407_v16 = vadd.f32 %v1135_v38, %v13398_v14  ;;  %v1142_v29 = vmul.f32 0.120078385, %v13400_v4  ;;  %v13401_v7 = vld [vmem:[#allocation79_spill] sm:$0xff]  ;;  %v13404_v48 = vld [vmem:[#allocation82_spill] sm:$0xff] }
 0x15e   : > { %13393 = vst [vmem:[#allocation102_spill] sm:$0xff] %v6389_v59  ;;  %13395 = vst [vmem:[#allocation103_spill] sm:$0xff] %v6393_v35  ;;  %v1144_v27 = vmul.f32 0.120078385, %v13401_v7  ;;  %v1145_v59 = vmul.f32 0.120078385, %v6264_v51 }
 0x15f   : > { %13397 = vst [vmem:[#allocation104_spill] sm:$0xff] %v6396_v8  ;;  %13399 = vst [vmem:[#allocation105_spill] sm:$0xff] %v6407_v16  ;;  %v13402_v8 = vld [vmem:[#allocation106_spill] sm:$0xff]  ;;  %v1146_v11 = vmul.f32 0.120078385, %v13404_v48  ;;  %v13405_v20 = vld [vmem:[#allocation108_spill] sm:$0xff] }
 0x160   : > { %v6413_v35 = vadd.f32 %v1136_v55, %v13402_v8  ;;  %v1147_v19 = vmul.f32 0.120078385, %v6269_v18  ;;  %v6419_v33 = vadd.f32 %v1137_v54, %v13405_v20  ;;  %v13407_v38 = vld [vmem:[#allocation84_spill] sm:$0xff]  ;;  %v1149_v16 = vmul.f32 0.120078385, %v6274_v6  ;;  %v13408_v53 = vld [vmem:[#allocation86_spill] sm:$0xff] }
 0x161   : > { %v1148_v14 = vmul.f32 0.120078385, %v13407_v38  ;;  %v1150_v23 = vmul.f32 0.120078385, %v13408_v53  ;;  %v13409_v10 = vld [vmem:[#allocation109_spill] sm:$0xff]  ;;  %v13411_v8 = vld [vmem:[#allocation118_spill] sm:$0xff] }
 0x162   : > { %13403 = vst [vmem:[#allocation75_spill] sm:$0xff] %v6413_v35  ;;  %13406 = vst [vmem:[#allocation79_spill] sm:$0xff] %v6419_v33  ;;  %v6425_v32 = vadd.f32 %v1138_v56, %v13409_v10  ;;  %v1151_v55 = vmul.f32 0.120078385, %v6280_v12  ;;  %v1152_v35 = vmul.f32 0.120078385, %v13411_v8 }
 0x163   : > { %v1153_v25 = vmul.f32 0.120078385, %v6285_v15  ;;  %v13412_v43 = vld [vmem:[#allocation110_spill] sm:$0xff]  ;;  %v13414_v20 = vld [vmem:[#allocation120_spill] sm:$0xff]  ;;  %v1155_v33 = vmul.f32 0.120078385, %v6290_v46 }
 0x164   : > { %13410 = vst [vmem:[#allocation106_spill] sm:$0xff] %v6425_v32  ;;  %v6431_v13 = vadd.f32 %v1139_v36, %v13412_v43  ;;  %v1154_v54 = vmul.f32 0.120078385, %v13414_v20  ;;  %v13415_v24 = vld [vmem:[#allocation64_spill] sm:$0xff]  ;;  %v1157_v10 = vmul.f32 0.120078385, %v6296_v58 }
 0x165   : > { %v1156_v50 = vmul.f32 0.120078385, %v13415_v24  ;;  %v13416_v60 = vld [vmem:[#allocation112_spill] sm:$0xff]  ;;  %v13418_v56 = vld [vmem:[#allocation69_spill] sm:$0xff]  ;;  %v13421_v15 = vld [vmem:[#allocation114_spill] sm:$0xff] }
 0x166   : > { %13413 = vst [vmem:[#allocation82_spill] sm:$0xff] %v6431_v13  ;;  %v6437_v53 = vadd.f32 %v1140_v37, %v13416_v60  ;;  %v1158_v32 = vmul.f32 0.120078385, %v13418_v56  ;;  %v13419_v12 = vld [vmem:[#allocation113_spill] sm:$0xff]  ;;  %v6445_v6 = vadd.f32 %v1142_v29, %v13421_v15  ;;  %v13423_v43 = vld [vmem:[#allocation115_spill] sm:$0xff]  ;;  %v13425_v13 = vld [vmem:[#allocation116_spill] sm:$0xff] }
 0x167   : > { %v6442_v8 = vadd.f32 %v1141_v63, %v13419_v12  ;;  %v6448_v36 = vadd.f32 %v1143_v17, %v13423_v43  ;;  %v6451_v46 = vadd.f32 %v1144_v27, %v13425_v13  ;;  %v13427_v24 = vld [vmem:[#allocation117_spill] sm:$0xff]  ;;  %v13433_v12 = vld [vmem:[#allocation123_spill] sm:$0xff]  ;;  %v13435_v15 = vld [vmem:[#allocation126_spill] sm:$0xff] }
 0x168   : > { %13417 = vst [vmem:[#allocation108_spill] sm:$0xff] %v6437_v53  ;;  %13422 = vst [vmem:[#allocation109_spill] sm:$0xff] %v6445_v6  ;;  %v6454_v20 = vadd.f32 %v1145_v59, %v13427_v24  ;;  %v13429_v60 = vld [vmem:[#allocation121_spill] sm:$0xff]  ;;  %v13431_v53 = vld [vmem:[#allocation122_spill] sm:$0xff]  ;;  %v6463_v63 = vadd.f32 %v1148_v14, %v13433_v12  ;;  %v6466_v29 = vadd.f32 %v1149_v16, %v13435_v15 }
 0x169   : > { %13420 = vst [vmem:[#allocation84_spill] sm:$0xff] %v6442_v8  ;;  %13424 = vst [vmem:[#allocation110_spill] sm:$0xff] %v6448_v36  ;;  %v6457_v37 = vadd.f32 %v1146_v11, %v13429_v60  ;;  %v6460_v56 = vadd.f32 %v1147_v19, %v13431_v53  ;;  %v13437_v17 = vld [vmem:[#allocation127_spill] sm:$0xff]  ;;  %v13439_v13 = vld [vmem:[#allocation128_spill] sm:$0xff]  ;;  %v1206_v6 = vmul.f32 %v13361_v57, %v13361_v57 }
 0x16a   : > { %13426 = vst [vmem:[#allocation112_spill] sm:$0xff] %v6451_v46  ;;  %13428 = vst [vmem:[#allocation113_spill] sm:$0xff] %v6454_v20  ;;  %v6469_v43 = vadd.f32 %v1150_v23, %v13437_v17  ;;  %v6472_v27 = vadd.f32 %v1151_v55, %v13439_v13  ;;  %v13441_v24 = vld [vmem:[#allocation130_spill] sm:$0xff]  ;;  %v13443_v11 = vld [vmem:[#allocation131_spill] sm:$0xff] }
 0x16b   : > { %13430 = vst [vmem:[#allocation114_spill] sm:$0xff] %v6457_v37  ;;  %13432 = vst [vmem:[#allocation115_spill] sm:$0xff] %v6460_v56  ;;  %v6475_v59 = vadd.f32 %v1152_v35, %v13441_v24  ;;  %v6478_v60 = vadd.f32 %v1153_v25, %v13443_v11  ;;  %v13445_v53 = vld [vmem:[#allocation132_spill] sm:$0xff]  ;;  %v13447_v14 = vld [vmem:[#allocation134_spill] sm:$0xff]  ;;  %v1185_v35 = vmul.f32 %v5991_v47, %v5991_v47 }
 0x16c   : > { %13434 = vst [vmem:[#allocation116_spill] sm:$0xff] %v6463_v63  ;;  %13436 = vst [vmem:[#allocation117_spill] sm:$0xff] %v6466_v29  ;;  %v6481_v19 = vadd.f32 %v1154_v54, %v13445_v53  ;;  %v6484_v12 = vadd.f32 %v1155_v33, %v13447_v14  ;;  %v13449_v16 = vld [vmem:[#allocation135_spill] sm:$0xff]  ;;  %v13451_v23 = vld [vmem:[#allocation136_spill] sm:$0xff]  ;;  %v1186_v25 = vmul.f32 %v5813_v52, %v5813_v52  ;;  %v1208_v29 = vmul.f32 0.120078385, %v6401_v62 }
 0x16d   : > { %13438 = vst [vmem:[#allocation121_spill] sm:$0xff] %v6469_v43  ;;  %13440 = vst [vmem:[#allocation122_spill] sm:$0xff] %v6472_v27  ;;  %v6487_v15 = vadd.f32 %v1156_v50, %v13449_v16  ;;  %v6490_v17 = vadd.f32 %v1157_v10, %v13451_v23  ;;  %v13453_v55 = vld [vmem:[#allocation138_spill] sm:$0xff]  ;;  %v1187_v54 = vmul.f32 %v5996_v1, %v5996_v1  ;;  %v13460_v37 = vld [vmem:[#allocation179_spill] sm:$0xff]  ;;  %v1209_v36 = vmul.f32 0.120078385, %v1185_v35 }
 0x16e   : > { %13442 = vst [vmem:[#allocation123_spill] sm:$0xff] %v6475_v59  ;;  %13444 = vst [vmem:[#allocation126_spill] sm:$0xff] %v6478_v60  ;;  %v6493_v13 = vadd.f32 %v1158_v32, %v13453_v55  ;;  %v1188_v33 = vmul.f32 %v5817_v26, %v5817_v26  ;;  %v1189_v50 = vmul.f32 %v6001_v45, %v6001_v45  ;;  %v13457_v60 = vld [vmem:[#allocation197_spill] sm:$0xff]  ;;  %v13458_v27 = vld [vmem:[#allocation178_spill] sm:$0xff]  ;;  %v1210_v8 = vmul.f32 0.120078385, %v1186_v25 }
 0x16f   : > { %13446 = vst [vmem:[#allocation127_spill] sm:$0xff] %v6481_v19  ;;  %13448 = vst [vmem:[#allocation128_spill] sm:$0xff] %v6484_v12  ;;  %v1190_v10 = vmul.f32 %v5821_v28, %v5821_v28  ;;  %v1191_v32 = vmul.f32 %v6006_v30, %v6006_v30  ;;  %v1192_v24 = vmul.f32 %v5825_v34, %v5825_v34  ;;  %v13456_v12 = vld [vmem:[#allocation177_spill] sm:$0xff]  ;;  %v13459_v63 = vld [vmem:[#allocation198_spill] sm:$0xff] }
 0x170   : > { %13450 = vst [vmem:[#allocation130_spill] sm:$0xff] %v6487_v15  ;;  %13452 = vst [vmem:[#allocation131_spill] sm:$0xff] %v6490_v17  ;;  %v1193_v11 = vmul.f32 %v6011_v44, %v6011_v44  ;;  %v1194_v53 = vmul.f32 %v5829_v40, %v5829_v40  ;;  %v1195_v14 = vmul.f32 %v6016_v39, %v6016_v39  ;;  %v13455_v17 = vld [vmem:[#allocation208_spill] sm:$0xff]  ;;  %v13461_v46 = vld [vmem:[#allocation199_spill] sm:$0xff]  ;;  %v1213_v62 = vmul.f32 0.120078385, %v1189_v50 }
 0x171   : > { %13454 = vst [vmem:[#allocation132_spill] sm:$0xff] %v6493_v13  ;;  %v1196_v16 = vmul.f32 %v5833_v42, %v5833_v42  ;;  %v1197_v23 = vmul.f32 %v6021_v2, %v6021_v2  ;;  %v1198_v55 = vmul.f32 %v13347_v3, %v13347_v3  ;;  %v1199_v13 = vmul.f32 %v13348_v22, %v13348_v22  ;;  %v13462_v3 = vld [vmem:[#allocation139_spill] sm:$0xff]  ;;  %v13464_v39 = vld [vmem:[#allocation140_spill] sm:$0xff]  ;;  %v13466_v25 = vld [vmem:[#allocation141_spill] sm:$0xff] }
 0x172   : > { %v1207_v15 = vmul.f32 0.120078385, %v13455_v17  ;;  %v1200_v19 = vmul.f32 %v13456_v12, %v13456_v12  ;;  %v1201_v59 = vmul.f32 %v13457_v60, %v13457_v60  ;;  %v1202_v43 = vmul.f32 %v13458_v27, %v13458_v27  ;;  %v13468_v50 = vld [vmem:[#allocation142_spill] sm:$0xff] }
 0x173   : > { %v1203_v56 = vmul.f32 %v13459_v63, %v13459_v63  ;;  %v1204_v20 = vmul.f32 %v13460_v37, %v13460_v37  ;;  %v1205_v17 = vmul.f32 %v13461_v46, %v13461_v46  ;;  %v1211_v60 = vmul.f32 0.120078385, %v1187_v54 }
 0x174   : > { %v1255_v27 = vmul.f32 %v6238_v5, %v6238_v5  ;;  %v1212_v12 = vmul.f32 0.120078385, %v1188_v33  ;;  %v1214_v22 = vmul.f32 0.120078385, %v1190_v10  ;;  %v6544_v63 = vadd.f32 %v1207_v15, %v13462_v3 }
 0x175   : > { %v1215_v2 = vmul.f32 0.120078385, %v1191_v32  ;;  %v1216_v37 = vmul.f32 0.120078385, %v1192_v24  ;;  %v1217_v42 = vmul.f32 0.120078385, %v1193_v11  ;;  %v6547_v46 = vadd.f32 %v1208_v29, %v13464_v39 }
 0x176   : > { %13463 = vst [vmem:[#allocation134_spill] sm:$0xff] %v6544_v63  ;;  %v1218_v35 = vmul.f32 0.120078385, %v1194_v53  ;;  %v1219_v40 = vmul.f32 0.120078385, %v1195_v14  ;;  %v6550_v54 = vadd.f32 %v1209_v36, %v13466_v25  ;;  %v6553_v10 = vadd.f32 %v1210_v8, %v13468_v50  ;;  %v13470_v24 = vld [vmem:[#allocation143_spill] sm:$0xff] }
 0x177   : > { %13465 = vst [vmem:[#allocation135_spill] sm:$0xff] %v6547_v46  ;;  %v1220_v57 = vmul.f32 0.120078385, %v1196_v16  ;;  %v1221_v44 = vmul.f32 0.120078385, %v1197_v23  ;;  %v6556_v11 = vadd.f32 %v1211_v60, %v13470_v24  ;;  %v13472_v14 = vld [vmem:[#allocation39_spill] sm:$0xff] }
 0x178   : > { %13467 = vst [vmem:[#allocation136_spill] sm:$0xff] %v6550_v54  ;;  %v1222_v34 = vmul.f32 0.120078385, %v1198_v55  ;;  %v1223_v33 = vmul.f32 0.120078385, %v1199_v13  ;;  %13469 = vst [vmem:[#allocation138_spill] sm:$0xff] %v6553_v10  ;;  %v6559_v16 = vadd.f32 %v1212_v12, %v13472_v14 }
 0x179   : > { %v1224_v3 = vmul.f32 0.120078385, %v1200_v19  ;;  %v1225_v15 = vmul.f32 0.120078385, %v1201_v59  ;;  %v1226_v32 = vmul.f32 0.120078385, %v1202_v43 }
 0x17a   : > { %13471 = vst [vmem:[#allocation208_spill] sm:$0xff] %v6556_v11  ;;  %v1227_v39 = vmul.f32 0.120078385, %v1203_v56  ;;  %v1228_v29 = vmul.f32 0.120078385, %v1204_v20  ;;  %13473 = vst [vmem:[#allocation139_spill] sm:$0xff] %v6559_v16 }
 0x17b   : > { %v1229_v53 = vmul.f32 0.120078385, %v1205_v17  ;;  %v1230_v36 = vmul.f32 0.120078385, %v1206_v6  ;;  %v13474_v25 = vld [vmem:[#allocation40_spill] sm:$0xff]  ;;  %v13476_v13 = vld [vmem:[#allocation42_spill] sm:$0xff] }
 0x17c   : > { %v6562_v23 = vadd.f32 %v1213_v62, %v13474_v25  ;;  %v6565_v55 = vadd.f32 %v1214_v22, %v13476_v13  ;;  %v13478_v8 = vld [vmem:[#allocation43_spill] sm:$0xff]  ;;  %v13480_v43 = vld [vmem:[#allocation44_spill] sm:$0xff]  ;;  %v13482_v60 = vld [vmem:[#allocation46_spill] sm:$0xff] }
 0x17d   : > { %v6568_v19 = vadd.f32 %v1215_v2, %v13478_v8  ;;  %v6571_v59 = vadd.f32 %v1216_v37, %v13480_v43  ;;  %v6574_v56 = vadd.f32 %v1217_v42, %v13482_v60  ;;  %v13484_v20 = vld [vmem:[#allocation47_spill] sm:$0xff]  ;;  %v13486_v12 = vld [vmem:[#allocation48_spill] sm:$0xff]  ;;  %v13488_v62 = vld [vmem:[#allocation50_spill] sm:$0xff] }
 0x17e   : > { %13475 = vst [vmem:[#allocation140_spill] sm:$0xff] %v6562_v23  ;;  %13477 = vst [vmem:[#allocation141_spill] sm:$0xff] %v6565_v55  ;;  %v6577_v17 = vadd.f32 %v1218_v35, %v13484_v20  ;;  %v6580_v6 = vadd.f32 %v1219_v40, %v13486_v12  ;;  %v6583_v50 = vadd.f32 %v1220_v57, %v13488_v62  ;;  %v13490_v22 = vld [vmem:[#allocation51_spill] sm:$0xff]  ;;  %v13492_v2 = vld [vmem:[#allocation52_spill] sm:$0xff] }
 0x17f   : > { %13479 = vst [vmem:[#allocation142_spill] sm:$0xff] %v6568_v19  ;;  %13481 = vst [vmem:[#allocation143_spill] sm:$0xff] %v6571_v59  ;;  %v6586_v24 = vadd.f32 %v1221_v44, %v13490_v22  ;;  %v6589_v14 = vadd.f32 %v1222_v34, %v13492_v2  ;;  %v13494_v37 = vld [vmem:[#allocation56_spill] sm:$0xff]  ;;  %v13496_v42 = vld [vmem:[#allocation57_spill] sm:$0xff]  ;;  %v1263_v22 = vmul.f32 %v6258_v41, %v6258_v41 }
 0x180   : > { %13483 = vst [vmem:[#allocation39_spill] sm:$0xff] %v6574_v56  ;;  %13485 = vst [vmem:[#allocation40_spill] sm:$0xff] %v6577_v17  ;;  %v6592_v25 = vadd.f32 %v1223_v33, %v13494_v37  ;;  %v6595_v13 = vadd.f32 %v1224_v3, %v13496_v42  ;;  %v13498_v35 = vld [vmem:[#allocation58_spill] sm:$0xff]  ;;  %v13500_v40 = vld [vmem:[#allocation61_spill] sm:$0xff]  ;;  %v1256_v3 = vmul.f32 %v6069_v31, %v6069_v31 }
 0x181   : > { %13487 = vst [vmem:[#allocation42_spill] sm:$0xff] %v6580_v6  ;;  %13489 = vst [vmem:[#allocation43_spill] sm:$0xff] %v6583_v50  ;;  %v6598_v8 = vadd.f32 %v1225_v15, %v13498_v35  ;;  %v6601_v43 = vadd.f32 %v1226_v32, %v13500_v40  ;;  %v13502_v57 = vld [vmem:[#allocation62_spill] sm:$0xff]  ;;  %v13504_v44 = vld [vmem:[#allocation63_spill] sm:$0xff]  ;;  %v1257_v15 = vmul.f32 %v6243_v9, %v6243_v9 }
 0x182   : > { %13491 = vst [vmem:[#allocation44_spill] sm:$0xff] %v6586_v24  ;;  %13493 = vst [vmem:[#allocation46_spill] sm:$0xff] %v6589_v14  ;;  %v6604_v60 = vadd.f32 %v1227_v39, %v13502_v57  ;;  %v6607_v20 = vadd.f32 %v1228_v29, %v13504_v44  ;;  %v13506_v34 = vld [vmem:[#allocation67_spill] sm:$0xff]  ;;  %v13508_v33 = vld [vmem:[#allocation68_spill] sm:$0xff]  ;;  %v1258_v32 = vmul.f32 %v6073_v21, %v6073_v21  ;;  %v1280_v24 = vmul.f32 0.120078385, %v1256_v3 }
 0x183   : > { %13495 = vst [vmem:[#allocation47_spill] sm:$0xff] %v6592_v25  ;;  %13497 = vst [vmem:[#allocation48_spill] sm:$0xff] %v6595_v13  ;;  %v6610_v12 = vadd.f32 %v1229_v53, %v13506_v34  ;;  %v6613_v62 = vadd.f32 %v1230_v36, %v13508_v33  ;;  %v1259_v39 = vmul.f32 %v6248_v0, %v6248_v0  ;;  %v13510_v57 = vld [vmem:[#allocation203_spill] sm:$0xff]  ;;  %v13511_v34 = vld [vmem:[#allocation86_spill] sm:$0xff] }
 0x184   : > { %13499 = vst [vmem:[#allocation50_spill] sm:$0xff] %v6598_v8  ;;  %13501 = vst [vmem:[#allocation51_spill] sm:$0xff] %v6601_v43  ;;  %v1260_v29 = vmul.f32 %v6077_v49, %v6077_v49  ;;  %v1261_v53 = vmul.f32 %v6253_v61, %v6253_v61  ;;  %v1262_v36 = vmul.f32 %v13400_v4, %v13400_v4  ;;  %v13514_v8 = vld [vmem:[#allocation205_spill] sm:$0xff]  ;;  %v13515_v25 = vld [vmem:[#allocation120_spill] sm:$0xff]  ;;  %v1282_v23 = vmul.f32 0.120078385, %v1258_v32 }
 0x185   : > { %13503 = vst [vmem:[#allocation52_spill] sm:$0xff] %v6604_v60  ;;  %13505 = vst [vmem:[#allocation56_spill] sm:$0xff] %v6607_v20  ;;  %v1264_v2 = vmul.f32 %v13401_v7, %v13401_v7  ;;  %v1265_v37 = vmul.f32 %v6264_v51, %v6264_v51  ;;  %v1266_v42 = vmul.f32 %v13404_v48, %v13404_v48  ;;  %v1279_v20 = vmul.f32 0.120078385, %v1255_v27  ;;  %v13513_v60 = vld [vmem:[#allocation118_spill] sm:$0xff]  ;;  %v13517_v17 = vld [vmem:[#allocation64_spill] sm:$0xff] }
 0x186   : > { %13507 = vst [vmem:[#allocation57_spill] sm:$0xff] %v6610_v12  ;;  %13509 = vst [vmem:[#allocation58_spill] sm:$0xff] %v6613_v62  ;;  %v1267_v35 = vmul.f32 %v6269_v18, %v6269_v18  ;;  %v1268_v40 = vmul.f32 %v13407_v38, %v13407_v38  ;;  %v1269_v44 = vmul.f32 %v13510_v57, %v13510_v57  ;;  %v13512_v62 = vld [vmem:[#allocation204_spill] sm:$0xff]  ;;  %v13516_v50 = vld [vmem:[#allocation206_spill] sm:$0xff]  ;;  %v1281_v27 = vmul.f32 0.120078385, %v1257_v15 }
 0x187   : > { %v1270_v33 = vmul.f32 %v13511_v34, %v13511_v34  ;;  %v1271_v12 = vmul.f32 %v13512_v62, %v13512_v62  ;;  %v1272_v43 = vmul.f32 %v13513_v60, %v13513_v60  ;;  %v1273_v13 = vmul.f32 %v13514_v8, %v13514_v8  ;;  %v13518_v19 = vld [vmem:[#allocation69_spill] sm:$0xff]  ;;  %v13519_v11 = vld [vmem:[#allocation192_spill] sm:$0xff]  ;;  %v13520_v63 = vld [vmem:[#allocation71_spill] sm:$0xff] }
 0x188   : > { %v1274_v14 = vmul.f32 %v13515_v25, %v13515_v25  ;;  %v1275_v6 = vmul.f32 %v13516_v50, %v13516_v50  ;;  %v1276_v56 = vmul.f32 %v13517_v17, %v13517_v17  ;;  %v1277_v59 = vmul.f32 %v6296_v58, %v6296_v58  ;;  %v13522_v60 = vld [vmem:[#allocation72_spill] sm:$0xff]  ;;  %v13524_v32 = vld [vmem:[#allocation73_spill] sm:$0xff] }
 0x189   : > { %v1278_v55 = vmul.f32 %v13518_v19, %v13518_v19  ;;  %v1283_v16 = vmul.f32 0.120078385, %v1259_v39  ;;  %v1327_v10 = vmul.f32 %v6238_v5, %v13519_v11  ;;  %v1284_v54 = vmul.f32 0.120078385, %v1260_v29  ;;  %v13526_v29 = vld [vmem:[#allocation77_spill] sm:$0xff] }
 0x18a   : > { %v1285_v3 = vmul.f32 0.120078385, %v1261_v53  ;;  %v1286_v46 = vmul.f32 0.120078385, %v1262_v36  ;;  %v6664_v50 = vadd.f32 %v1279_v20, %v13520_v63  ;;  %v1287_v25 = vmul.f32 0.120078385, %v1263_v22 }
 0x18b   : > { %v1288_v17 = vmul.f32 0.120078385, %v1264_v2  ;;  %v1289_v8 = vmul.f32 0.120078385, %v1265_v37  ;;  %v6667_v58 = vadd.f32 %v1280_v24, %v13522_v60  ;;  %v1290_v15 = vmul.f32 0.120078385, %v1266_v42 }
 0x18c   : > { %13521 = vst [vmem:[#allocation61_spill] sm:$0xff] %v6664_v50  ;;  %v1291_v62 = vmul.f32 0.120078385, %v1267_v35  ;;  %v1292_v19 = vmul.f32 0.120078385, %v1268_v40  ;;  %v6670_v39 = vadd.f32 %v1281_v27, %v13524_v32  ;;  %v6673_v53 = vadd.f32 %v1282_v23, %v13526_v29  ;;  %v13528_v22 = vld [vmem:[#allocation144_spill] sm:$0xff] }
 0x18d   : > { %13523 = vst [vmem:[#allocation62_spill] sm:$0xff] %v6667_v58  ;;  %v1293_v34 = vmul.f32 0.120078385, %v1269_v44  ;;  %v1294_v5 = vmul.f32 0.120078385, %v1270_v33  ;;  %v6676_v2 = vadd.f32 %v1283_v16, %v13528_v22  ;;  %v13530_v42 = vld [vmem:[#allocation22_spill] sm:$0xff] }
 0x18e   : > { %13525 = vst [vmem:[#allocation63_spill] sm:$0xff] %v6670_v39  ;;  %v1295_v11 = vmul.f32 0.120078385, %v1271_v12  ;;  %13527 = vst [vmem:[#allocation67_spill] sm:$0xff] %v6673_v53  ;;  %v1296_v63 = vmul.f32 0.120078385, %v1272_v43  ;;  %v6679_v35 = vadd.f32 %v1284_v54, %v13530_v42 }
 0x18f   : > { %v1297_v20 = vmul.f32 0.120078385, %v1273_v13  ;;  %v1298_v36 = vmul.f32 0.120078385, %v1274_v14  ;;  %13529 = vst [vmem:[#allocation68_spill] sm:$0xff] %v6676_v2  ;;  %v13532_v27 = vld [vmem:[#allocation145_spill] sm:$0xff] }
 0x190   : > { %v1299_v24 = vmul.f32 0.120078385, %v1275_v6  ;;  %v1300_v60 = vmul.f32 0.120078385, %v1276_v56  ;;  %v1301_v37 = vmul.f32 0.120078385, %v1277_v59  ;;  %v6682_v44 = vadd.f32 %v1285_v3, %v13532_v27 }
 0x191   : > { %13531 = vst [vmem:[#allocation203_spill] sm:$0xff] %v6679_v35  ;;  %v1302_v40 = vmul.f32 0.120078385, %v1278_v55  ;;  %v13534_v12 = vld [vmem:[#allocation146_spill] sm:$0xff]  ;;  %v13536_v23 = vld [vmem:[#allocation23_spill] sm:$0xff]  ;;  %v13540_v16 = vld [vmem:[#allocation148_spill] sm:$0xff] }
 0x192   : > { %13533 = vst [vmem:[#allocation192_spill] sm:$0xff] %v6682_v44  ;;  %v6685_v33 = vadd.f32 %v1286_v46, %v13534_v12  ;;  %v6688_v43 = vadd.f32 %v1287_v25, %v13536_v23  ;;  %v13538_v14 = vld [vmem:[#allocation147_spill] sm:$0xff]  ;;  %v6694_v6 = vadd.f32 %v1289_v8, %v13540_v16  ;;  %v13542_v59 = vld [vmem:[#allocation26_spill] sm:$0xff]  ;;  %v13544_v54 = vld [vmem:[#allocation149_spill] sm:$0xff] }
 0x193   : > { %v6691_v13 = vadd.f32 %v1288_v17, %v13538_v14  ;;  %v6697_v56 = vadd.f32 %v1290_v15, %v13542_v59  ;;  %v6700_v55 = vadd.f32 %v1291_v62, %v13544_v54  ;;  %v13546_v3 = vld [vmem:[#allocation150_spill] sm:$0xff]  ;;  %v13548_v46 = vld [vmem:[#allocation27_spill] sm:$0xff]  ;;  %v13552_v17 = vld [vmem:[#allocation152_spill] sm:$0xff] }
 0x194   : > { %13535 = vst [vmem:[#allocation71_spill] sm:$0xff] %v6685_v33  ;;  %13537 = vst [vmem:[#allocation72_spill] sm:$0xff] %v6688_v43  ;;  %v6703_v32 = vadd.f32 %v1292_v19, %v13546_v3  ;;  %v6706_v29 = vadd.f32 %v1293_v34, %v13548_v46  ;;  %v13550_v25 = vld [vmem:[#allocation151_spill] sm:$0xff]  ;;  %v6712_v42 = vadd.f32 %v1295_v11, %v13552_v17  ;;  %v13554_v8 = vld [vmem:[#allocation28_spill] sm:$0xff] }
 0x195   : > { %13539 = vst [vmem:[#allocation73_spill] sm:$0xff] %v6691_v13  ;;  %13541 = vst [vmem:[#allocation77_spill] sm:$0xff] %v6694_v6  ;;  %v6709_v22 = vadd.f32 %v1294_v5, %v13550_v25  ;;  %v6715_v27 = vadd.f32 %v1296_v63, %v13554_v8  ;;  %v13556_v15 = vld [vmem:[#allocation153_spill] sm:$0xff]  ;;  %v13558_v62 = vld [vmem:[#allocation154_spill] sm:$0xff]  ;;  %v1351_v8 = vmul.f32 0.120078385, %v1327_v10 }
 0x196   : > { %13543 = vst [vmem:[#allocation144_spill] sm:$0xff] %v6697_v56  ;;  %13545 = vst [vmem:[#allocation22_spill] sm:$0xff] %v6700_v55  ;;  %v6718_v12 = vadd.f32 %v1297_v20, %v13556_v15  ;;  %v6721_v23 = vadd.f32 %v1298_v36, %v13558_v62  ;;  %v13560_v19 = vld [vmem:[#allocation31_spill] sm:$0xff]  ;;  %v13564_v5 = vld [vmem:[#allocation156_spill] sm:$0xff]  ;;  %v1329_v20 = vmul.f32 %v6243_v9, %v5991_v47 }
 0x197   : > { %13547 = vst [vmem:[#allocation145_spill] sm:$0xff] %v6703_v32  ;;  %13549 = vst [vmem:[#allocation146_spill] sm:$0xff] %v6706_v29  ;;  %v6724_v14 = vadd.f32 %v1299_v24, %v13560_v19  ;;  %v13562_v34 = vld [vmem:[#allocation155_spill] sm:$0xff]  ;;  %v6730_v59 = vadd.f32 %v1301_v37, %v13564_v5  ;;  %v13566_v11 = vld [vmem:[#allocation32_spill] sm:$0xff]  ;;  %v1330_v36 = vmul.f32 %v6073_v21, %v5813_v52 }
 0x198   : > { %13551 = vst [vmem:[#allocation23_spill] sm:$0xff] %v6709_v22  ;;  %13553 = vst [vmem:[#allocation147_spill] sm:$0xff] %v6712_v42  ;;  %v6727_v16 = vadd.f32 %v1300_v60, %v13562_v34  ;;  %v6733_v54 = vadd.f32 %v1302_v40, %v13566_v11  ;;  %v13568_v63 = vld [vmem:[#allocation172_spill] sm:$0xff]  ;;  %v1331_v24 = vmul.f32 %v6248_v0, %v5996_v1  ;;  %v13569_v46 = vld [vmem:[#allocation173_spill] sm:$0xff]  ;;  %v1353_v10 = vmul.f32 0.120078385, %v1329_v20 }
 0x199   : > { %13555 = vst [vmem:[#allocation148_spill] sm:$0xff] %v6715_v27  ;;  %13557 = vst [vmem:[#allocation26_spill] sm:$0xff] %v6718_v12  ;;  %v1328_v3 = vmul.f32 %v6069_v31, %v13568_v63  ;;  %v1332_v60 = vmul.f32 %v6077_v49, %v5817_v26  ;;  %v1333_v37 = vmul.f32 %v6253_v61, %v6001_v45  ;;  %v13570_v9 = vld [vmem:[#allocation193_spill] sm:$0xff]  ;;  %v13571_v21 = vld [vmem:[#allocation174_spill] sm:$0xff] }
 0x19a   : > { %13559 = vst [vmem:[#allocation149_spill] sm:$0xff] %v6721_v23  ;;  %13561 = vst [vmem:[#allocation150_spill] sm:$0xff] %v6724_v14  ;;  %v1334_v40 = vmul.f32 %v13400_v4, %v5821_v28  ;;  %v1335_v31 = vmul.f32 %v6258_v41, %v6006_v30  ;;  %v1336_v47 = vmul.f32 %v13401_v7, %v13569_v46  ;;  %v13572_v0 = vld [vmem:[#allocation194_spill] sm:$0xff]  ;;  %v13573_v49 = vld [vmem:[#allocation175_spill] sm:$0xff] }
 0x19b   : > { %13563 = vst [vmem:[#allocation27_spill] sm:$0xff] %v6727_v16  ;;  %13565 = vst [vmem:[#allocation151_spill] sm:$0xff] %v6730_v59  ;;  %v1337_v52 = vmul.f32 %v6264_v51, %v13570_v9  ;;  %v1338_v1 = vmul.f32 %v13404_v48, %v13571_v21  ;;  %v1339_v26 = vmul.f32 %v6269_v18, %v13572_v0  ;;  %v13574_v61 = vld [vmem:[#allocation195_spill] sm:$0xff]  ;;  %v13575_v4 = vld [vmem:[#allocation176_spill] sm:$0xff] }
 0x19c   : > { %13567 = vst [vmem:[#allocation152_spill] sm:$0xff] %v6733_v54  ;;  %v1340_v45 = vmul.f32 %v13407_v38, %v13573_v49  ;;  %v1341_v28 = vmul.f32 %v13510_v57, %v13574_v61  ;;  %v13576_v30 = vld [vmem:[#allocation86_spill] sm:$0xff]  ;;  %v13577_v25 = vld [vmem:[#allocation196_spill] sm:$0xff]  ;;  %v13579_v51 = vld [vmem:[#allocation177_spill] sm:$0xff]  ;;  %v1352_v38 = vmul.f32 0.120078385, %v1328_v3 }
 0x19d   : > { %v1342_v41 = vmul.f32 %v13576_v30, %v13575_v4  ;;  %v13578_v7 = vld [vmem:[#allocation204_spill] sm:$0xff]  ;;  %v13580_v15 = vld [vmem:[#allocation118_spill] sm:$0xff]  ;;  %v13581_v48 = vld [vmem:[#allocation197_spill] sm:$0xff]  ;;  %v1358_v54 = vmul.f32 0.120078385, %v1334_v40 }
 0x19e   : > { %v1343_v17 = vmul.f32 %v13578_v7, %v13577_v25  ;;  %v1344_v62 = vmul.f32 %v13580_v15, %v13579_v51  ;;  %v13582_v19 = vld [vmem:[#allocation205_spill] sm:$0xff]  ;;  %v13583_v18 = vld [vmem:[#allocation178_spill] sm:$0xff]  ;;  %v13584_v5 = vld [vmem:[#allocation120_spill] sm:$0xff]  ;;  %v1354_v51 = vmul.f32 0.120078385, %v1330_v36 }
 0x19f   : > { %v1345_v34 = vmul.f32 %v13582_v19, %v13581_v48  ;;  %v1346_v11 = vmul.f32 %v13584_v5, %v13583_v18  ;;  %v13585_v63 = vld [vmem:[#allocation198_spill] sm:$0xff]  ;;  %v13587_v9 = vld [vmem:[#allocation179_spill] sm:$0xff]  ;;  %v13588_v21 = vld [vmem:[#allocation64_spill] sm:$0xff]  ;;  %v1355_v15 = vmul.f32 0.120078385, %v1331_v24 }
 0x1a0   : > { %v13586_v46 = vld [vmem:[#allocation206_spill] sm:$0xff]  ;;  %v1348_v0 = vmul.f32 %v13588_v21, %v13587_v9  ;;  %v13589_v49 = vld [vmem:[#allocation199_spill] sm:$0xff]  ;;  %v13591_v30 = vld [vmem:[#allocation180_spill] sm:$0xff]  ;;  %v1356_v48 = vmul.f32 0.120078385, %v1332_v60 }
 0x1a1   : > { %v1347_v57 = vmul.f32 %v13586_v46, %v13585_v63  ;;  %v13590_v61 = vld [vmem:[#allocation207_spill] sm:$0xff]  ;;  %v13592_v25 = vld [vmem:[#allocation69_spill] sm:$0xff]  ;;  %v1357_v19 = vmul.f32 0.120078385, %v1333_v37  ;;  %v1359_v18 = vmul.f32 0.120078385, %v1335_v31 }
 0x1a2   : > { %v1349_v4 = vmul.f32 %v13590_v61, %v13589_v49  ;;  %v1350_v7 = vmul.f32 %v13592_v25, %v13591_v30  ;;  %v13593_v3 = vld [vmem:[#allocation33_spill] sm:$0xff]  ;;  %v1360_v63 = vmul.f32 0.120078385, %v1336_v47  ;;  %v1361_v46 = vmul.f32 0.120078385, %v1337_v52  ;;  %v13595_v9 = vld [vmem:[#allocation35_spill] sm:$0xff] }
 0x1a3   : > { %v6782_v5 = vadd.f32 %v1351_v8, %v13593_v3  ;;  %v1362_v59 = vmul.f32 0.120078385, %v1338_v1  ;;  %v6785_v21 = vadd.f32 %v1352_v38, %v13595_v9  ;;  %v1363_v49 = vmul.f32 0.120078385, %v1339_v26  ;;  %v13597_v16 = vld [vmem:[#allocation36_spill] sm:$0xff]  ;;  %v13599_v37 = vld [vmem:[#allocation37_spill] sm:$0xff] }
 0x1a4   : > { %v1364_v20 = vmul.f32 0.120078385, %v1340_v45  ;;  %v1365_v61 = vmul.f32 0.120078385, %v1341_v28  ;;  %v6788_v30 = vadd.f32 %v1353_v10, %v13597_v16  ;;  %v1366_v36 = vmul.f32 0.120078385, %v1342_v41 }
 0x1a5   : > { %13594 = vst [vmem:[#allocation28_spill] sm:$0xff] %v6782_v5  ;;  %13596 = vst [vmem:[#allocation153_spill] sm:$0xff] %v6785_v21  ;;  %v1367_v24 = vmul.f32 0.120078385, %v1343_v17  ;;  %v1368_v60 = vmul.f32 0.120078385, %v1344_v62  ;;  %v6791_v40 = vadd.f32 %v1354_v51, %v13599_v37 }
 0x1a6   : > { %13598 = vst [vmem:[#allocation154_spill] sm:$0xff] %v6788_v30  ;;  %v1369_v31 = vmul.f32 0.120078385, %v1345_v34  ;;  %v1370_v8 = vmul.f32 0.120078385, %v1346_v11  ;;  %v13601_v52 = vld [vmem:[#allocation53_spill] sm:$0xff] }
 0x1a7   : > { %13600 = vst [vmem:[#allocation31_spill] sm:$0xff] %v6791_v40  ;;  %v1371_v47 = vmul.f32 0.120078385, %v1347_v57  ;;  %v6794_v1 = vadd.f32 %v1355_v15, %v13601_v52  ;;  %v6796_v38 = vmul.f32 0.120078385, %v1348_v0  ;;  %v13603_v16 = vld [vmem:[#allocation54_spill] sm:$0xff] }
 0x1a8   : > { %v6798_v26 = vmul.f32 0.120078385, %v1349_v4  ;;  %v6800_v45 = vmul.f32 0.120078385, %v1350_v7  ;;  %v6803_v28 = vadd.f32 %v1356_v48, %v13603_v16  ;;  %v13605_v41 = vld [vmem:[#allocation59_spill] sm:$0xff]  ;;  %v13607_v62 = vld [vmem:[#allocation124_spill] sm:$0xff] }
 0x1a9   : > { %13602 = vst [vmem:[#allocation155_spill] sm:$0xff] %v6794_v1  ;;  %v6806_v17 = vadd.f32 %v1357_v19, %v13605_v41  ;;  %v6809_v34 = vadd.f32 %v1358_v54, %v13607_v62  ;;  %v13609_v11 = vld [vmem:[#allocation25_spill] sm:$0xff]  ;;  %v13613_v4 = vld [vmem:[#allocation158_spill] sm:$0xff]  ;;  %v13615_v7 = vld [vmem:[#allocation159_spill] sm:$0xff] }
 0x1aa   : > { %13604 = vst [vmem:[#allocation156_spill] sm:$0xff] %v6803_v28  ;;  %v6812_v57 = vadd.f32 %v1359_v18, %v13609_v11  ;;  %v13611_v0 = vld [vmem:[#allocation157_spill] sm:$0xff]  ;;  %v6818_v25 = vadd.f32 %v1361_v46, %v13613_v4  ;;  %v6821_v51 = vadd.f32 %v1362_v59, %v13615_v7  ;;  %v13617_v15 = vld [vmem:[#allocation160_spill] sm:$0xff]  ;;  %v13621_v3 = vld [vmem:[#allocation162_spill] sm:$0xff] }
 0x1ab   : > { %13606 = vst [vmem:[#allocation32_spill] sm:$0xff] %v6806_v17  ;;  %13608 = vst [vmem:[#allocation172_spill] sm:$0xff] %v6809_v34  ;;  %v6815_v10 = vadd.f32 %v1360_v63, %v13611_v0  ;;  %v6824_v48 = vadd.f32 %v1363_v49, %v13617_v15  ;;  %v13619_v54 = vld [vmem:[#allocation161_spill] sm:$0xff]  ;;  %v6830_v18 = vadd.f32 %v1365_v61, %v13621_v3  ;;  %v13623_v63 = vld [vmem:[#allocation163_spill] sm:$0xff] }
 0x1ac   : > { %13610 = vst [vmem:[#allocation173_spill] sm:$0xff] %v6812_v57  ;;  %13614 = vst [vmem:[#allocation174_spill] sm:$0xff] %v6818_v25  ;;  %v6827_v19 = vadd.f32 %v1364_v20, %v13619_v54  ;;  %v6833_v9 = vadd.f32 %v1366_v36, %v13623_v63  ;;  %v13625_v37 = vld [vmem:[#allocation164_spill] sm:$0xff]  ;;  %v13627_v59 = vld [vmem:[#allocation165_spill] sm:$0xff] }
 0x1ad   : > { %13612 = vst [vmem:[#allocation193_spill] sm:$0xff] %v6815_v10  ;;  %13616 = vst [vmem:[#allocation194_spill] sm:$0xff] %v6821_v51  ;;  %v6836_v46 = vadd.f32 %v1367_v24, %v13625_v37  ;;  %v6839_v52 = vadd.f32 %v1368_v60, %v13627_v59  ;;  %v13629_v16 = vld [vmem:[#allocation166_spill] sm:$0xff]  ;;  %v13631_v20 = vld [vmem:[#allocation167_spill] sm:$0xff] }
 0x1ae   : > { %13618 = vst [vmem:[#allocation175_spill] sm:$0xff] %v6824_v48  ;;  %13620 = vst [vmem:[#allocation195_spill] sm:$0xff] %v6827_v19  ;;  %v6842_v49 = vadd.f32 %v1369_v31, %v13629_v16  ;;  %v6845_v41 = vadd.f32 %v1370_v8, %v13631_v20  ;;  %v13633_v62 = vld [vmem:[#allocation168_spill] sm:$0xff]  ;;  %v6851_v36 = vld [vmem:[%s5017_s9] sm:$0xff] }
 0x1af   : > { %13622 = vst [vmem:[#allocation176_spill] sm:$0xff] %v6830_v18  ;;  %13624 = vst [vmem:[#allocation86_spill] sm:$0xff] %v6833_v9  ;;  %v6848_v61 = vadd.f32 %v1371_v47, %v13633_v62  ;;  %v6855_v11 = vld [vmem:[%s5017_s9 + $0x10] sm:$0xff]  ;;  %v6859_v0 = vld [vmem:[%s5017_s9 + $0x20] sm:$0xff]  ;;  %v13679_v28 = vrot.slane %v6851_v36, 7 }
 0x1b0   : > { %13626 = vst [vmem:[#allocation196_spill] sm:$0xff] %v6836_v46  ;;  %13628 = vst [vmem:[#allocation204_spill] sm:$0xff] %v6839_v52  ;;  %v1401_v31 = vrot.slane %v6859_v0, 7  ;;  %v6863_v8 = vld [vmem:[%s5017_s9 + $0x30] sm:$0xff]  ;;  %v6867_v4 = vld [vmem:[%s5017_s9 + $0x40] sm:$0xff]  ;;  %v13680_v40 = vrot.slane %v6855_v11, 7 }
 0x1b1   : > { %13630 = vst [vmem:[#allocation177_spill] sm:$0xff] %v6842_v49  ;;  %13632 = vst [vmem:[#allocation118_spill] sm:$0xff] %v6845_v41  ;;  %v1402_v47 = vrot.slane %v6863_v8, 7  ;;  %v1403_v7 = vrot.slane %v6867_v4, 7  ;;  %v6871_v15 = vld [vmem:[%s5017_s9 + $0x50] sm:$0xff]  ;;  %v6875_v3 = vld [vmem:[%s5017_s9 + $0x60] sm:$0xff] }
 0x1b2   : > { %13634 = vst [vmem:[#allocation197_spill] sm:$0xff] %v6848_v61  ;;  %13635 = vst [vmem:[#allocation205_spill] sm:$0xff] %v6851_v36  ;;  %v1404_v54 = vrot.slane %v6871_v15, 7  ;;  %v1405_v63 = vrot.slane %v6875_v3, 7  ;;  %v6879_v37 = vld [vmem:[%s5017_s9 + $0x70] sm:$0xff]  ;;  %v6883_v16 = vld [vmem:[%s5025_s30] sm:$0xff] }
 0x1b3   : > { %13636 = vst [vmem:[#allocation178_spill] sm:$0xff] %v6855_v11  ;;  %13637 = vst [vmem:[#allocation120_spill] sm:$0xff] %v6859_v0  ;;  %v1406_v59 = vrot.slane %v6879_v37, 7  ;;  %v1407_v20 = vrot.slane %v6883_v16, 7  ;;  %v6887_v62 = vld [vmem:[%s5025_s30 + $0x10] sm:$0xff]  ;;  %v6891_v24 = vld [vmem:[%s5025_s30 + $0x20] sm:$0xff] }
 0x1b4   : > { %13638 = vst [vmem:[#allocation198_spill] sm:$0xff] %v6863_v8  ;;  %13639 = vst [vmem:[#allocation206_spill] sm:$0xff] %v6867_v4  ;;  %v1408_v60 = vrot.slane %v6887_v62, 7  ;;  %v1409_v61 = vrot.slane %v6891_v24, 7  ;;  %v6903_v4 = vld [vmem:[%s5017_s9 + $0x28] sm:$0xff]  ;;  %v6907_v8 = vld [vmem:[%s5017_s9 + $0x38] sm:$0xff] }
 0x1b5   : > { %13640 = vst [vmem:[#allocation179_spill] sm:$0xff] %v6871_v15  ;;  %13641 = vst [vmem:[#allocation64_spill] sm:$0xff] %v6875_v3  ;;  %v6895_v3 = vld [vmem:[%s5017_s9 + $0x8] sm:$0xff]  ;;  %v13651_v41 = vld [vmem:[#allocation21_spill] sm:$0xff] }
 0x1b6   : > { %13642 = vst [vmem:[#allocation199_spill] sm:$0xff] %v6879_v37  ;;  %13643 = vst [vmem:[#allocation207_spill] sm:$0xff] %v6883_v16  ;;  %v1411_v15 = vrot.slane %v6895_v3, 7  ;;  %v6899_v37 = vld [vmem:[%s5017_s9 + $0x18] sm:$0xff]  ;;  %v6911_v0 = vld [vmem:[%s5017_s9 + $0x48] sm:$0xff]  ;;  %vm1423_vm3 = vcmp.lt.s32.totalorder %v13651_v41, 1 }
 0x1b7   : > { %13644 = vst [vmem:[#allocation180_spill] sm:$0xff] %v6887_v62  ;;  %13645 = vst [vmem:[#allocation69_spill] sm:$0xff] %v6891_v24  ;;  %v1412_v16 = vrot.slane %v6899_v37, 7  ;;  %v1413_v62 = vrot.slane %v6903_v4, 7  ;;  %v1414_v24 = vrot.slane %v6907_v8, 7  ;;  %v6916_v49 = vld [vmem:[%s5017_s9 + $0x58] sm:$0xff] }
 0x1b8   : > { %13646 = vst [vmem:[#allocation33_spill] sm:$0xff] %v6895_v3  ;;  %13647 = vst [vmem:[#allocation35_spill] sm:$0xff] %v6899_v37  ;;  %v1415_v3 = vrot.slane %v6911_v0, 7  ;;  %v1416_v37 = vrot.slane %v6916_v49, 7  ;;  %v6920_v52 = vld [vmem:[%s5017_s9 + $0x68] sm:$0xff]  ;;  %v6924_v46 = vld [vmem:[%s5017_s9 + $0x78] sm:$0xff]  ;;  %v1436_v1 = vsel %vm1423_vm3, %v1411_v15, %v13679_v28 }
 0x1b9   : > { %13648 = vst [vmem:[#allocation36_spill] sm:$0xff] %v6903_v4  ;;  %13649 = vst [vmem:[#allocation37_spill] sm:$0xff] %v6907_v8  ;;  %v1417_v4 = vrot.slane %v6920_v52, 7  ;;  %v1418_v8 = vrot.slane %v6924_v46, 7  ;;  %v6928_v9 = vld [vmem:[%s5025_s30 + $0x8] sm:$0xff]  ;;  %v6936_v48 = vld [vmem:[%s5025_s30 + $0x18] sm:$0xff]  ;;  %v1437_v30 = vsel %vm1423_vm3, %v1412_v16, %v13680_v40  ;;  %v1438_v21 = vsel %vm1423_vm3, %v1413_v62, %v1401_v31 }
 0x1ba   : > { %13650 = vst [vmem:[#allocation53_spill] sm:$0xff] %v6911_v0  ;;  %13652 = vst [vmem:[#allocation54_spill] sm:$0xff] %v6916_v49  ;;  %v1419_v18 = vrot.slane %v6928_v9, 7  ;;  %v6932_v0 = vld [vmem:[%s5025_s30 + $0x30] sm:$0xff]  ;;  %v1420_v49 = vrot.slane %v6936_v48, 7  ;;  %v6940_v51 = vld [vmem:[%s5025_s30 + $0x28] sm:$0xff]  ;;  %v1439_v5 = vsel %vm1423_vm3, %v1414_v24, %v1402_v47  ;;  %v1440_v14 = vsel %vm1423_vm3, %v1415_v3, %v1403_v7 }
 0x1bb   : > { %13653 = vst [vmem:[#allocation59_spill] sm:$0xff] %v6920_v52  ;;  %13654 = vst [vmem:[#allocation124_spill] sm:$0xff] %v6924_v46  ;;  %v1410_v19 = vrot.slane %v6932_v0, 7  ;;  %v1421_v52 = vrot.slane %v6940_v51, 7  ;;  %v6944_v25 = vld [vmem:[%s5025_s30 + $0x38] sm:$0xff]  ;;  %v13660_v10 = vld [vmem:[#allocation169_spill] sm:$0xff]  ;;  %v1442_v28 = vsel %vm1423_vm3, %v1417_v4, %v1405_v63 }
 0x1bc   : > { %13655 = vst [vmem:[#allocation25_spill] sm:$0xff] %v6928_v9  ;;  %13656 = vst [vmem:[#allocation157_spill] sm:$0xff] %v6932_v0  ;;  %v1422_v46 = vrot.slane %v6944_v25, 7  ;;  %v6949_v57 = vadd.f32 %v6796_v38, %v13660_v10  ;;  %v13662_v9 = vld [vmem:[#allocation170_spill] sm:$0xff]  ;;  %v13664_v0 = vld [vmem:[#allocation171_spill] sm:$0xff]  ;;  %v6981_v10 = vsel %vm1423_vm3, %v1403_v7, %v1415_v3  ;;  %v1444_v40 = vsel %vm1423_vm3, %v1419_v18, %v1407_v20 }
 0x1bd   : > { %13657 = vst [vmem:[#allocation158_spill] sm:$0xff] %v6936_v48  ;;  %13658 = vst [vmem:[#allocation159_spill] sm:$0xff] %v6940_v51  ;;  %v6953_v34 = vadd.f32 %v6798_v26, %v13662_v9  ;;  %v6957_v17 = vadd.f32 %v6800_v45, %v13664_v0  ;;  %v13666_v48 = vrot.slane %v6851_v36, 7  ;;  %v6973_v26 = vsel %vm1423_vm3, %v1401_v31, %v1413_v62  ;;  %v13681_v7 = vld [vmem:[#allocation30_spill] sm:$0xff]  ;;  %v13695_v3 = vld [vmem:[#allocation187_spill] sm:$0xff] }
 0x1be   : > { %13659 = vst [vmem:[#allocation160_spill] sm:$0xff] %v6944_v25  ;;  %13661 = vst [vmem:[#allocation161_spill] sm:$0xff] %v6949_v57  ;;  %v13668_v25 = vrot.slane %v6855_v11, 7  ;;  %v6977_v45 = vsel %vm1423_vm3, %v1402_v47, %v1414_v24  ;;  %v6993_v9 = vsel %vm1423_vm3, %v1406_v59, %v1418_v8  ;;  %v6997_v0 = vsel %vm1423_vm3, %v1407_v20, %v1419_v18  ;;  %v7093_v20 = vld [vmem:[%s5031_s28 + $0x20] sm:$0xff]  ;;  %v7141_v11 = vld [vmem:[%s5031_s28 + $0x38] sm:$0xff] }
 0x1bf   : > { %13663 = vst [vmem:[#allocation162_spill] sm:$0xff] %v6953_v34  ;;  %13665 = vst [vmem:[#allocation163_spill] sm:$0xff] %v6957_v17  ;;  %v6963_v51 = vsel %vm1423_vm3, %v13666_v48, %v1411_v15  ;;  %v6985_v48 = vsel %vm1423_vm3, %v1404_v54, %v1416_v37  ;;  %v7001_v17 = vsel %vm1423_vm3, %v1408_v60, %v1420_v49  ;;  %v1474_v62 = vrot.slane %v7093_v20, 7  ;;  %v7145_v23 = vld [vmem:[%s5031_s28 + $0x48] sm:$0xff]  ;;  %v7149_v12 = vld [vmem:[%s5031_s28 + $0x58] sm:$0xff] }
 0x1c0   : > { %13667 = vst [vmem:[#allocation164_spill] sm:$0xff] %v6963_v51  ;;  %v6969_v38 = vsel %vm1423_vm3, %v13668_v25, %v1412_v16  ;;  %13669 = vst [vmem:[#allocation165_spill] sm:$0xff] %v6973_v26  ;;  %v6989_v25 = vsel %vm1423_vm3, %v1405_v63, %v1417_v4  ;;  %v7005_v34 = vsel %vm1423_vm3, %v1409_v61, %v1421_v52  ;;  %v13697_v63 = vld [vmem:[#allocation188_spill] sm:$0xff]  ;;  %v1489_v27 = vrot.slane %v7149_v12, 7  ;;  %v7157_v22 = vld [vmem:[%s5031_s28 + $0x78] sm:$0xff] }
 0x1c1   : > { %13670 = vst [vmem:[#allocation166_spill] sm:$0xff] %v6977_v45  ;;  %13671 = vst [vmem:[#allocation167_spill] sm:$0xff] %v6981_v10  ;;  %v7009_v57 = vsel %vm1423_vm3, %v1410_v19, %v1422_v46  ;;  %v1441_v36 = vsel %vm1423_vm3, %v1416_v37, %v1404_v54  ;;  %v1443_v15 = vsel %vm1423_vm3, %v1418_v8, %v1406_v59  ;;  %v13683_v8 = vld [vmem:[#allocation181_spill] sm:$0xff]  ;;  %v13685_v54 = vld [vmem:[#allocation182_spill] sm:$0xff]  ;;  %v1557_v41 = vmul.f32 0.23388076, %v6989_v25 }
 0x1c2   : > { %13672 = vst [vmem:[#allocation168_spill] sm:$0xff] %v6985_v48  ;;  %13673 = vst [vmem:[#allocation169_spill] sm:$0xff] %v6989_v25  ;;  %v1445_v24 = vsel %vm1423_vm3, %v1420_v49, %v1408_v60  ;;  %v1446_v31 = vsel %vm1423_vm3, %v1421_v52, %v1409_v61  ;;  %v1447_v47 = vsel %vm1423_vm3, %v1422_v46, %v1410_v19  ;;  %v13687_v52 = vld [vmem:[#allocation183_spill] sm:$0xff]  ;;  %v13689_v46 = vld [vmem:[#allocation184_spill] sm:$0xff] }
 0x1c3   : > { %13674 = vst [vmem:[#allocation170_spill] sm:$0xff] %v6993_v9  ;;  %13675 = vst [vmem:[#allocation171_spill] sm:$0xff] %v6997_v0  ;;  %v7042_v4 = vsel %vm747_vm1, %v13681_v7, %v1436_v1  ;;  %v7047_v18 = vsel %vm747_vm1, %v13683_v8, %v1437_v30  ;;  %v7052_v49 = vsel %vm747_vm1, %v13685_v54, %v1438_v21  ;;  %v13691_v61 = vld [vmem:[#allocation185_spill] sm:$0xff]  ;;  %v13693_v60 = vld [vmem:[#allocation186_spill] sm:$0xff] }
 0x1c4   : > { %13676 = vst [vmem:[#allocation209_spill] sm:$0xff] %v7001_v17  ;;  %13677 = vst [vmem:[#allocation210_spill] sm:$0xff] %v7005_v34  ;;  %v7057_v19 = vsel %vm747_vm1, %v13687_v52, %v1439_v5  ;;  %v7062_v1 = vsel %vm747_vm1, %v13689_v46, %v1440_v14  ;;  %v7067_v30 = vsel %vm747_vm1, %v13691_v61, %v1441_v36  ;;  %v7085_v37 = vld [vmem:[%s5031_s28] sm:$0xff]  ;;  %v7089_v59 = vld [vmem:[%s5031_s28 + $0x10] sm:$0xff] }
 0x1c5   : > { %13678 = vst [vmem:[#allocation211_spill] sm:$0xff] %v7009_v57  ;;  %13682 = vst [vmem:[#allocation30_spill] sm:$0xff] %v7042_v4  ;;  %v7072_v21 = vsel %vm747_vm1, %v13693_v60, %v1442_v28  ;;  %v7077_v5 = vsel %vm747_vm1, %v13695_v3, %v1443_v15  ;;  %v7082_v14 = vsel %vm747_vm1, %v13697_v63, %v1444_v40  ;;  %v1473_v16 = vrot.slane %v7089_v59, 7  ;;  %v7097_v28 = vld [vmem:[%s5031_s28 + $0x30] sm:$0xff]  ;;  %v7101_v40 = vld [vmem:[%s5031_s28 + $0x40] sm:$0xff] }
 0x1c6   : > { %13684 = vst [vmem:[#allocation181_spill] sm:$0xff] %v7047_v18  ;;  %13686 = vst [vmem:[#allocation182_spill] sm:$0xff] %v7052_v49  ;;  %v1475_v15 = vrot.slane %v7097_v28, 7  ;;  %v1476_v7 = vrot.slane %v7101_v40, 7  ;;  %v7105_v8 = vld [vmem:[%s5031_s28 + $0x50] sm:$0xff]  ;;  %v7109_v52 = vld [vmem:[%s5031_s28 + $0x60] sm:$0xff] }
 0x1c7   : > { %13688 = vst [vmem:[#allocation183_spill] sm:$0xff] %v7057_v19  ;;  %13690 = vst [vmem:[#allocation184_spill] sm:$0xff] %v7062_v1  ;;  %v1477_v54 = vrot.slane %v7105_v8, 7  ;;  %v1478_v46 = vrot.slane %v7109_v52, 7  ;;  %v7113_v61 = vld [vmem:[%s5031_s28 + $0x70] sm:$0xff]  ;;  %v7117_v3 = vld [vmem:[%s5037_s13] sm:$0xff] }
 0x1c8   : > { %13692 = vst [vmem:[#allocation185_spill] sm:$0xff] %v7067_v30  ;;  %13694 = vst [vmem:[#allocation186_spill] sm:$0xff] %v7072_v21  ;;  %v1479_v60 = vrot.slane %v7113_v61, 7  ;;  %v1480_v63 = vrot.slane %v7117_v3, 7  ;;  %v7121_v36 = vld [vmem:[%s5037_s13 + $0x10] sm:$0xff]  ;;  %v7161_v29 = vld [vmem:[%s5037_s13 + $0x8] sm:$0xff] }
 0x1c9   : > { %13696 = vst [vmem:[#allocation187_spill] sm:$0xff] %v7077_v5  ;;  %13698 = vst [vmem:[#allocation188_spill] sm:$0xff] %v7082_v14  ;;  %v7165_v32 = vld [vmem:[%s5037_s13 + $0x30] sm:$0xff]  ;;  %v7169_v55 = vld [vmem:[%s5037_s13 + $0x18] sm:$0xff]  ;;  %v13734_v39 = vrot.slane %v7085_v37, 7 }
 0x1ca   : > { %13699 = vst [vmem:[#allocation212_spill] sm:$0xff] %v7085_v37  ;;  %13700 = vst [vmem:[#allocation213_spill] sm:$0xff] %v7089_v59  ;;  %v7137_v59 = vld [vmem:[%s5031_s28 + $0x28] sm:$0xff]  ;;  %v7177_v6 = vld [vmem:[%s5037_s13 + $0x38] sm:$0xff] }
 0x1cb   : > { %13701 = vst [vmem:[#allocation214_spill] sm:$0xff] %v7093_v20  ;;  %13702 = vst [vmem:[#allocation215_spill] sm:$0xff] %v7097_v28  ;;  %v7129_v28 = vld [vmem:[%s5031_s28 + $0x8] sm:$0xff]  ;;  %v7133_v20 = vld [vmem:[%s5031_s28 + $0x18] sm:$0xff] }
 0x1cc   : > { %13703 = vst [vmem:[#allocation216_spill] sm:$0xff] %v7101_v40  ;;  %13704 = vst [vmem:[#allocation217_spill] sm:$0xff] %v7105_v8  ;;  %v1481_v8 = vrot.slane %v7121_v36, 7  ;;  %v7125_v40 = vld [vmem:[%s5037_s13 + $0x20] sm:$0xff]  ;;  %v7173_v56 = vld [vmem:[%s5037_s13 + $0x28] sm:$0xff] }
 0x1cd   : > { %13705 = vst [vmem:[#allocation218_spill] sm:$0xff] %v7109_v52  ;;  %13706 = vst [vmem:[#allocation219_spill] sm:$0xff] %v7113_v61  ;;  %v1482_v52 = vrot.slane %v7125_v40, 7  ;;  %v1484_v61 = vrot.slane %v7129_v28, 7  ;;  %v13723_v13 = vld [vmem:[#allocation189_spill] sm:$0xff]  ;;  %v13725_v43 = vld [vmem:[#allocation190_spill] sm:$0xff] }
 0x1ce   : > { %13707 = vst [vmem:[#allocation220_spill] sm:$0xff] %v7117_v3  ;;  %13708 = vst [vmem:[#allocation221_spill] sm:$0xff] %v7121_v36  ;;  %v1485_v3 = vrot.slane %v7133_v20, 7  ;;  %v1486_v36 = vrot.slane %v7137_v59, 7  ;;  %v13727_v33 = vld [vmem:[#allocation191_spill] sm:$0xff] }
 0x1cf   : > { %13709 = vst [vmem:[#allocation222_spill] sm:$0xff] %v7125_v40  ;;  %13710 = vst [vmem:[#allocation223_spill] sm:$0xff] %v7129_v28  ;;  %v1487_v40 = vrot.slane %v7141_v11, 7  ;;  %v1488_v28 = vrot.slane %v7145_v23, 7  ;;  %v1508_v58 = vsel %vm1423_vm3, %v1484_v61, %v13734_v39 }
 0x1d0   : > { %13711 = vst [vmem:[#allocation224_spill] sm:$0xff] %v7133_v20  ;;  %13712 = vst [vmem:[#allocation225_spill] sm:$0xff] %v7137_v59  ;;  %v7153_v20 = vld [vmem:[%s5031_s28 + $0x68] sm:$0xff]  ;;  %v1491_v59 = vrot.slane %v7157_v22, 7  ;;  %v1509_v50 = vsel %vm1423_vm3, %v1485_v3, %v1473_v16 }
 0x1d1   : > { %13713 = vst [vmem:[#allocation226_spill] sm:$0xff] %v7141_v11  ;;  %13714 = vst [vmem:[#allocation227_spill] sm:$0xff] %v7145_v23  ;;  %v1490_v42 = vrot.slane %v7153_v20, 7  ;;  %v1492_v11 = vrot.slane %v7161_v29, 7  ;;  %v1483_v23 = vrot.slane %v7165_v32, 7 }
 0x1d2   : > { %13715 = vst [vmem:[#allocation228_spill] sm:$0xff] %v7149_v12  ;;  %13716 = vst [vmem:[#allocation229_spill] sm:$0xff] %v7153_v20  ;;  %v1493_v12 = vrot.slane %v7169_v55, 7  ;;  %v1494_v20 = vrot.slane %v7173_v56, 7  ;;  %v1515_v39 = vsel %vm1423_vm3, %v1491_v59, %v1479_v60 }
 0x1d3   : > { %13717 = vst [vmem:[#allocation230_spill] sm:$0xff] %v7157_v22  ;;  %13718 = vst [vmem:[#allocation231_spill] sm:$0xff] %v7161_v29  ;;  %v1495_v22 = vrot.slane %v7177_v6, 7  ;;  %v7183_v29 = vsel %vm747_vm1, %v13723_v13, %v1445_v24  ;;  %v7203_v13 = vsel %vm1423_vm3, %v1473_v16, %v1485_v3  ;;  %v7207_v24 = vsel %vm1423_vm3, %v1474_v62, %v1486_v36  ;;  %v13747_v3 = vld [vmem:[#allocation202_spill] sm:$0xff] }
 0x1d4   : > { %13719 = vst [vmem:[#allocation232_spill] sm:$0xff] %v7165_v32  ;;  %13720 = vst [vmem:[#allocation233_spill] sm:$0xff] %v7169_v55  ;;  %v7188_v32 = vsel %vm747_vm1, %v13725_v43, %v1446_v31  ;;  %v7193_v55 = vsel %vm747_vm1, %v13727_v33, %v1447_v47  ;;  %v7211_v43 = vsel %vm1423_vm3, %v1475_v15, %v1487_v40 }
 0x1d5   : > { %13721 = vst [vmem:[#allocation234_spill] sm:$0xff] %v7173_v56  ;;  %13722 = vst [vmem:[#allocation235_spill] sm:$0xff] %v7177_v6  ;;  %v13729_v56 = vrot.slane %v7085_v37, 7  ;;  %v7215_v33 = vsel %vm1423_vm3, %v1476_v7, %v1488_v28  ;;  %v7223_v31 = vsel %vm1423_vm3, %v1478_v46, %v1490_v42  ;;  %v7227_v47 = vsel %vm1423_vm3, %v1479_v60, %v1491_v59 }
 0x1d6   : > { %13724 = vst [vmem:[#allocation189_spill] sm:$0xff] %v7183_v29  ;;  %13726 = vst [vmem:[#allocation190_spill] sm:$0xff] %v7188_v32  ;;  %v7231_v44 = vsel %vm1423_vm3, %v1480_v63, %v1492_v11  ;;  %v7235_v35 = vsel %vm1423_vm3, %v1481_v8, %v1493_v12  ;;  %v7239_v2 = vsel %vm1423_vm3, %v1482_v52, %v1494_v20  ;;  %v1545_v60 = vmul.f32 0.23388076, %v6963_v51 }
 0x1d7   : > { %13728 = vst [vmem:[#allocation191_spill] sm:$0xff] %v7193_v55  ;;  %v7199_v6 = vsel %vm1423_vm3, %v13729_v56, %v1484_v61  ;;  %v7219_v56 = vsel %vm1423_vm3, %v1477_v54, %v1489_v27  ;;  %13730 = vst [vmem:[#allocation236_spill] sm:$0xff] %v7231_v44  ;;  %v7243_v53 = vsel %vm1423_vm3, %v1483_v23, %v1495_v22  ;;  %v13745_v61 = vld [vmem:[#allocation201_spill] sm:$0xff] }
 0x1d8   : > { %13731 = vst [vmem:[#allocation237_spill] sm:$0xff] %v7235_v35  ;;  %13732 = vst [vmem:[#allocation238_spill] sm:$0xff] %v7239_v2  ;;  %v1510_v44 = vsel %vm1423_vm3, %v1486_v36, %v1474_v62  ;;  %v1511_v35 = vsel %vm1423_vm3, %v1487_v40, %v1475_v15  ;;  %v1512_v2 = vsel %vm1423_vm3, %v1488_v28, %v1476_v7  ;;  %v13735_v15 = vld [vmem:[#allocation65_spill] sm:$0xff]  ;;  %v13738_v40 = vld [vmem:[#allocation78_spill] sm:$0xff] }
 0x1d9   : > { %13733 = vst [vmem:[#allocation239_spill] sm:$0xff] %v7243_v53  ;;  %v1513_v53 = vsel %vm1423_vm3, %v1489_v27, %v1477_v54  ;;  %v1514_v37 = vsel %vm1423_vm3, %v1490_v42, %v1478_v46  ;;  %v1516_v16 = vsel %vm1423_vm3, %v1492_v11, %v1480_v63  ;;  %v1517_v36 = vsel %vm1423_vm3, %v1493_v12, %v1481_v8  ;;  %v13736_v42 = vld [vmem:[#allocation70_spill] sm:$0xff]  ;;  %v13741_v7 = vld [vmem:[#allocation85_spill] sm:$0xff]  ;;  %v13742_v8 = vld [vmem:[#allocation87_spill] sm:$0xff] }
 0x1da   : > { %v1518_v62 = vsel %vm1423_vm3, %v1494_v20, %v1482_v52  ;;  %v1519_v28 = vsel %vm1423_vm3, %v1495_v22, %v1483_v23  ;;  %v7274_v27 = vsel %vm747_vm1, %v13735_v15, %v1508_v58  ;;  %v7279_v59 = vsel %vm747_vm1, %v13736_v42, %v1509_v50  ;;  %v13737_v11 = vld [vmem:[#allocation74_spill] sm:$0xff]  ;;  %v13739_v22 = vld [vmem:[#allocation80_spill] sm:$0xff]  ;;  %v13740_v23 = vld [vmem:[#allocation83_spill] sm:$0xff] }
 0x1db   : > { %v7284_v12 = vsel %vm747_vm1, %v13737_v11, %v1510_v44  ;;  %v7289_v20 = vsel %vm747_vm1, %v13738_v40, %v1511_v35  ;;  %v7294_v58 = vsel %vm747_vm1, %v13739_v22, %v1512_v2  ;;  %v7299_v50 = vsel %vm747_vm1, %v13740_v23, %v1513_v53  ;;  %v13743_v52 = vld [vmem:[#allocation119_spill] sm:$0xff]  ;;  %v13744_v46 = vld [vmem:[#allocation200_spill] sm:$0xff]  ;;  %v13751_v23 = vld [vmem:[#allocation29_spill] sm:$0xff] }
 0x1dc   : > { %v7304_v44 = vsel %vm747_vm1, %v13741_v7, %v1514_v37  ;;  %v7309_v35 = vsel %vm747_vm1, %v13742_v8, %v1515_v39  ;;  %v1544_v54 = vmul.f32 0.23388076, %v7042_v4  ;;  %v7315_v2 = vsel %vm747_vm1, %v13743_v52, %v1516_v16 }
 0x1dd   : > { %v7320_v53 = vsel %vm747_vm1, %v13744_v46, %v1517_v36  ;;  %v7325_v37 = vsel %vm747_vm1, %v13745_v61, %v1518_v62  ;;  %v7331_v63 = vsel %vm747_vm1, %v13747_v3, %v1519_v28  ;;  %v1546_v39 = vmul.f32 0.23388076, %v7047_v18  ;;  %v13753_v61 = vld [vmem:[#allocation34_spill] sm:$0xff] }
 0x1de   : > { %13746 = vst [vmem:[#allocation65_spill] sm:$0xff] %v7325_v37  ;;  %13748 = vst [vmem:[#allocation70_spill] sm:$0xff] %v7331_v63  ;;  %v1547_v16 = vmul.f32 0.23388076, %v6969_v38  ;;  %v7337_v36 = vmul.f32 %v7042_v4, %v7042_v4  ;;  %v1548_v15 = vmul.f32 0.23388076, %v7052_v49  ;;  %v7344_v11 = vmul.f32 %v6963_v51, %v6963_v51 }
 0x1df   : > { %v1549_v62 = vmul.f32 0.23388076, %v6973_v26  ;;  %v1550_v42 = vmul.f32 0.23388076, %v7057_v19  ;;  %v1551_v28 = vmul.f32 0.23388076, %v6977_v45  ;;  %v7350_v7 = vadd.f32 %v1544_v54, %v13751_v23 }
 0x1e0   : > { %13749 = vst [vmem:[#allocation74_spill] sm:$0xff] %v7337_v36  ;;  %13750 = vst [vmem:[#allocation78_spill] sm:$0xff] %v7344_v11  ;;  %v1552_v40 = vmul.f32 0.23388076, %v7062_v1  ;;  %v1553_v22 = vmul.f32 0.23388076, %v6981_v10  ;;  %v7356_v3 = vadd.f32 %v1545_v60, %v13753_v61 }
 0x1e1   : > { %13752 = vst [vmem:[#allocation80_spill] sm:$0xff] %v7350_v7  ;;  %v1554_v8 = vmul.f32 0.23388076, %v7067_v30  ;;  %v1555_v52 = vmul.f32 0.23388076, %v6985_v48  ;;  %v13755_v11 = vld [vmem:[#allocation38_spill] sm:$0xff] }
 0x1e2   : > { %v1556_v46 = vmul.f32 0.23388076, %v7072_v21  ;;  %13754 = vst [vmem:[#allocation83_spill] sm:$0xff] %v7356_v3  ;;  %v1558_v51 = vmul.f32 0.23388076, %v7077_v5  ;;  %v7362_v36 = vadd.f32 %v1546_v39, %v13755_v11  ;;  %v13757_v48 = vld [vmem:[#allocation41_spill] sm:$0xff] }
 0x1e3   : > { %v1559_v4 = vmul.f32 0.23388076, %v6993_v9  ;;  %v1560_v54 = vmul.f32 0.23388076, %v7082_v14  ;;  %v1561_v23 = vmul.f32 0.23388076, %v6997_v0  ;;  %v7368_v21 = vadd.f32 %v1547_v16, %v13757_v48 }
 0x1e4   : > { %13756 = vst [vmem:[#allocation85_spill] sm:$0xff] %v7362_v36  ;;  %v1562_v7 = vmul.f32 0.23388076, %v7183_v29  ;;  %v1563_v60 = vmul.f32 0.23388076, %v7001_v17  ;;  %v13759_v5 = vld [vmem:[#allocation45_spill] sm:$0xff] }
 0x1e5   : > { %13758 = vst [vmem:[#allocation87_spill] sm:$0xff] %v7368_v21  ;;  %v1564_v61 = vmul.f32 0.23388076, %v7188_v32  ;;  %v1565_v3 = vmul.f32 0.23388076, %v7005_v34  ;;  %v7374_v9 = vadd.f32 %v1548_v15, %v13759_v5  ;;  %v13761_v36 = vld [vmem:[#allocation49_spill] sm:$0xff] }
 0x1e6   : > { %v1566_v39 = vmul.f32 0.23388076, %v7193_v55  ;;  %v1567_v11 = vmul.f32 0.23388076, %v7009_v57  ;;  %v7379_v0 = vadd.f32 %v1549_v62, %v13761_v36  ;;  %v13763_v29 = vld [vmem:[#allocation55_spill] sm:$0xff]  ;;  %v13765_v48 = vld [vmem:[#allocation60_spill] sm:$0xff] }
 0x1e7   : > { %13760 = vst [vmem:[#allocation119_spill] sm:$0xff] %v7374_v9  ;;  %v7382_v14 = vadd.f32 %v1550_v42, %v13763_v29  ;;  %v7385_v16 = vadd.f32 %v1551_v28, %v13765_v48  ;;  %v13767_v21 = vld [vmem:[#allocation66_spill] sm:$0xff]  ;;  %v13769_v34 = vld [vmem:[#allocation76_spill] sm:$0xff]  ;;  %v13771_v5 = vld [vmem:[#allocation81_spill] sm:$0xff] }
 0x1e8   : > { %13762 = vst [vmem:[#allocation200_spill] sm:$0xff] %v7379_v0  ;;  %v7388_v32 = vadd.f32 %v1552_v40, %v13767_v21  ;;  %v7391_v17 = vadd.f32 %v1553_v22, %v13769_v34  ;;  %v7394_v15 = vadd.f32 %v1554_v8, %v13771_v5  ;;  %v13773_v9 = vld [vmem:[#allocation90_spill] sm:$0xff]  ;;  %v13775_v36 = vld [vmem:[#allocation91_spill] sm:$0xff]  ;;  %v13777_v29 = vld [vmem:[#allocation92_spill] sm:$0xff] }
 0x1e9   : > { %13764 = vst [vmem:[#allocation201_spill] sm:$0xff] %v7382_v14  ;;  %13766 = vst [vmem:[#allocation202_spill] sm:$0xff] %v7385_v16  ;;  %v7397_v57 = vadd.f32 %v1555_v52, %v13773_v9  ;;  %v7400_v62 = vadd.f32 %v1556_v46, %v13775_v36  ;;  %v7403_v42 = vadd.f32 %v1557_v41, %v13777_v29  ;;  %v13779_v28 = vld [vmem:[#allocation94_spill] sm:$0xff]  ;;  %v13781_v21 = vld [vmem:[#allocation95_spill] sm:$0xff]  ;;  %v1592_v9 = vmul.f32 0.23388076, %v7274_v27 }
 0x1ea   : > { %13768 = vst [vmem:[#allocation29_spill] sm:$0xff] %v7388_v32  ;;  %13770 = vst [vmem:[#allocation34_spill] sm:$0xff] %v7391_v17  ;;  %v7406_v48 = vadd.f32 %v1558_v51, %v13779_v28  ;;  %v7409_v40 = vadd.f32 %v1559_v4, %v13781_v21  ;;  %v13783_v34 = vld [vmem:[#allocation96_spill] sm:$0xff]  ;;  %v13785_v8 = vld [vmem:[#allocation98_spill] sm:$0xff]  ;;  %v1593_v4 = vmul.f32 0.23388076, %v7199_v6 }
 0x1eb   : > { %13772 = vst [vmem:[#allocation38_spill] sm:$0xff] %v7394_v15  ;;  %13774 = vst [vmem:[#allocation41_spill] sm:$0xff] %v7397_v57  ;;  %v7412_v22 = vadd.f32 %v1560_v54, %v13783_v34  ;;  %v7415_v5 = vadd.f32 %v1561_v23, %v13785_v8  ;;  %v13787_v52 = vld [vmem:[#allocation99_spill] sm:$0xff]  ;;  %v13789_v36 = vld [vmem:[#allocation100_spill] sm:$0xff] }
 0x1ec   : > { %13776 = vst [vmem:[#allocation45_spill] sm:$0xff] %v7400_v62  ;;  %13778 = vst [vmem:[#allocation49_spill] sm:$0xff] %v7403_v42  ;;  %v7419_v46 = vadd.f32 %v1562_v7, %v13787_v52  ;;  %v7422_v41 = vadd.f32 %v1563_v60, %v13789_v36  ;;  %v13791_v29 = vld [vmem:[#allocation101_spill] sm:$0xff]  ;;  %v13793_v28 = vld [vmem:[#allocation102_spill] sm:$0xff]  ;;  %v1594_v7 = vmul.f32 0.23388076, %v7279_v59  ;;  %v7443_v36 = vmul.f32 %v7047_v18, %v7047_v18 }
 0x1ed   : > { %13780 = vst [vmem:[#allocation55_spill] sm:$0xff] %v7406_v48  ;;  %13782 = vst [vmem:[#allocation60_spill] sm:$0xff] %v7409_v40  ;;  %v7425_v51 = vadd.f32 %v1564_v61, %v13791_v29  ;;  %v7429_v21 = vadd.f32 %v1565_v3, %v13793_v28  ;;  %v13795_v54 = vld [vmem:[#allocation103_spill] sm:$0xff]  ;;  %v13797_v23 = vld [vmem:[#allocation104_spill] sm:$0xff]  ;;  %v1595_v52 = vmul.f32 0.23388076, %v7203_v13 }
 0x1ee   : > { %13784 = vst [vmem:[#allocation66_spill] sm:$0xff] %v7412_v22  ;;  %13786 = vst [vmem:[#allocation76_spill] sm:$0xff] %v7415_v5  ;;  %v7432_v34 = vadd.f32 %v1566_v39, %v13795_v54  ;;  %v7435_v8 = vadd.f32 %v1567_v11, %v13797_v23  ;;  %v1596_v60 = vmul.f32 0.23388076, %v7284_v12  ;;  %v1597_v61 = vmul.f32 0.23388076, %v7207_v24 }
 0x1ef   : > { %13788 = vst [vmem:[#allocation81_spill] sm:$0xff] %v7419_v46  ;;  %13790 = vst [vmem:[#allocation90_spill] sm:$0xff] %v7422_v41  ;;  %v1598_v3 = vmul.f32 0.23388076, %v7289_v20  ;;  %v1599_v39 = vmul.f32 0.23388076, %v7211_v43 }
 0x1f0   : > { %13792 = vst [vmem:[#allocation91_spill] sm:$0xff] %v7425_v51  ;;  %13794 = vst [vmem:[#allocation92_spill] sm:$0xff] %v7429_v21  ;;  %v1600_v29 = vmul.f32 0.23388076, %v7294_v58  ;;  %v13799_v11 = vld [vmem:[#allocation105_spill] sm:$0xff]  ;;  %v13803_v5 = vld [vmem:[#allocation79_spill] sm:$0xff] }
 0x1f1   : > { %13796 = vst [vmem:[#allocation94_spill] sm:$0xff] %v7432_v34  ;;  %13798 = vst [vmem:[#allocation95_spill] sm:$0xff] %v7435_v8  ;;  %v7449_v28 = vadd.f32 %v1592_v9, %v13799_v11  ;;  %v1601_v54 = vmul.f32 0.23388076, %v7215_v33  ;;  %v1602_v23 = vmul.f32 0.23388076, %v7299_v50  ;;  %v7461_v22 = vadd.f32 %v1594_v7, %v13803_v5 }
 0x1f2   : > { %v1603_v8 = vmul.f32 0.23388076, %v7219_v56  ;;  %v13801_v34 = vld [vmem:[#allocation75_spill] sm:$0xff]  ;;  %v1604_v51 = vmul.f32 0.23388076, %v7304_v44  ;;  %v13806_v48 = vld [vmem:[#allocation106_spill] sm:$0xff] }
 0x1f3   : > { %13800 = vst [vmem:[#allocation96_spill] sm:$0xff] %v7449_v28  ;;  %v7455_v21 = vadd.f32 %v1593_v4, %v13801_v34  ;;  %v1605_v41 = vmul.f32 0.23388076, %v7223_v31  ;;  %v1606_v46 = vmul.f32 0.23388076, %v7309_v35  ;;  %13804 = vst [vmem:[#allocation99_spill] sm:$0xff] %v7461_v22  ;;  %v7467_v42 = vadd.f32 %v1595_v52, %v13806_v48 }
 0x1f4   : > { %v1607_v9 = vmul.f32 0.23388076, %v7227_v47  ;;  %v1608_v11 = vmul.f32 0.23388076, %v7315_v2  ;;  %v13805_v28 = vld [vmem:[#allocation236_spill] sm:$0xff]  ;;  %v13808_v34 = vld [vmem:[#allocation237_spill] sm:$0xff] }
 0x1f5   : > { %13802 = vst [vmem:[#allocation98_spill] sm:$0xff] %v7455_v21  ;;  %v1609_v40 = vmul.f32 0.23388076, %v13805_v28  ;;  %13807 = vst [vmem:[#allocation100_spill] sm:$0xff] %v7467_v42  ;;  %v1610_v4 = vmul.f32 0.23388076, %v7320_v53 }
 0x1f6   : > { %v1611_v21 = vmul.f32 0.23388076, %v13808_v34  ;;  %v1612_v62 = vmul.f32 0.23388076, %v7325_v37  ;;  %v13809_v57 = vld [vmem:[#allocation82_spill] sm:$0xff]  ;;  %v13812_v17 = vld [vmem:[#allocation239_spill] sm:$0xff] }
 0x1f7   : > { %v7473_v15 = vadd.f32 %v1596_v60, %v13809_v57  ;;  %v13811_v5 = vld [vmem:[#allocation238_spill] sm:$0xff]  ;;  %v1614_v22 = vmul.f32 0.23388076, %v7331_v63  ;;  %v1615_v32 = vmul.f32 0.23388076, %v13812_v17  ;;  %v13813_v16 = vld [vmem:[#allocation108_spill] sm:$0xff] }
 0x1f8   : > { %v1613_v7 = vmul.f32 0.23388076, %v13811_v5  ;;  %v7479_v14 = vadd.f32 %v1597_v61, %v13813_v16  ;;  %v13815_v48 = vld [vmem:[#allocation84_spill] sm:$0xff]  ;;  %v13817_v42 = vld [vmem:[#allocation109_spill] sm:$0xff]  ;;  %v13819_v18 = vld [vmem:[#allocation110_spill] sm:$0xff] }
 0x1f9   : > { %13810 = vst [vmem:[#allocation101_spill] sm:$0xff] %v7473_v15  ;;  %v7482_v52 = vadd.f32 %v1598_v3, %v13815_v48  ;;  %v7485_v0 = vadd.f32 %v1599_v39, %v13817_v42  ;;  %v7488_v37 = vadd.f32 %v1600_v29, %v13819_v18  ;;  %v13821_v57 = vld [vmem:[#allocation112_spill] sm:$0xff]  ;;  %v13823_v15 = vld [vmem:[#allocation113_spill] sm:$0xff]  ;;  %v13825_v63 = vld [vmem:[#allocation114_spill] sm:$0xff] }
 0x1fa   : > { %13814 = vst [vmem:[#allocation102_spill] sm:$0xff] %v7479_v14  ;;  %v7491_v60 = vadd.f32 %v1601_v54, %v13821_v57  ;;  %v7494_v5 = vadd.f32 %v1602_v23, %v13823_v15  ;;  %v7497_v17 = vadd.f32 %v1603_v8, %v13825_v63  ;;  %v13827_v16 = vld [vmem:[#allocation115_spill] sm:$0xff]  ;;  %v13829_v3 = vld [vmem:[#allocation116_spill] sm:$0xff]  ;;  %v13831_v42 = vld [vmem:[#allocation117_spill] sm:$0xff] }
 0x1fb   : > { %13816 = vst [vmem:[#allocation103_spill] sm:$0xff] %v7482_v52  ;;  %13818 = vst [vmem:[#allocation104_spill] sm:$0xff] %v7485_v0  ;;  %v7500_v61 = vadd.f32 %v1604_v51, %v13827_v16  ;;  %v7503_v48 = vadd.f32 %v1605_v41, %v13829_v3  ;;  %v7506_v39 = vadd.f32 %v1606_v46, %v13831_v42  ;;  %v13833_v18 = vld [vmem:[#allocation121_spill] sm:$0xff]  ;;  %v13835_v54 = vld [vmem:[#allocation122_spill] sm:$0xff] }
 0x1fc   : > { %13820 = vst [vmem:[#allocation105_spill] sm:$0xff] %v7488_v37  ;;  %13822 = vst [vmem:[#allocation75_spill] sm:$0xff] %v7491_v60  ;;  %v7509_v29 = vadd.f32 %v1607_v9, %v13833_v18  ;;  %v7512_v57 = vadd.f32 %v1608_v11, %v13835_v54  ;;  %v13837_v15 = vld [vmem:[#allocation123_spill] sm:$0xff]  ;;  %v13839_v63 = vld [vmem:[#allocation126_spill] sm:$0xff]  ;;  %v1662_v52 = vmul.f32 %v7193_v55, %v7193_v55 }
 0x1fd   : > { %13824 = vst [vmem:[#allocation79_spill] sm:$0xff] %v7494_v5  ;;  %13826 = vst [vmem:[#allocation236_spill] sm:$0xff] %v7497_v17  ;;  %v7515_v23 = vadd.f32 %v1609_v40, %v13837_v15  ;;  %v7518_v8 = vadd.f32 %v1610_v4, %v13839_v63  ;;  %v13841_v51 = vld [vmem:[#allocation127_spill] sm:$0xff]  ;;  %v13843_v41 = vld [vmem:[#allocation128_spill] sm:$0xff]  ;;  %v1643_v40 = vmul.f32 %v6969_v38, %v6969_v38 }
 0x1fe   : > { %13828 = vst [vmem:[#allocation106_spill] sm:$0xff] %v7500_v61  ;;  %13830 = vst [vmem:[#allocation237_spill] sm:$0xff] %v7503_v48  ;;  %v7521_v16 = vadd.f32 %v1611_v21, %v13841_v51  ;;  %v7524_v3 = vadd.f32 %v1612_v62, %v13843_v41  ;;  %v13845_v46 = vld [vmem:[#allocation130_spill] sm:$0xff]  ;;  %v13847_v9 = vld [vmem:[#allocation131_spill] sm:$0xff]  ;;  %v1644_v4 = vmul.f32 %v7052_v49, %v7052_v49 }
 0x1ff   : > { %13832 = vst [vmem:[#allocation82_spill] sm:$0xff] %v7506_v39  ;;  %13834 = vst [vmem:[#allocation108_spill] sm:$0xff] %v7509_v29  ;;  %v7527_v42 = vadd.f32 %v1613_v7, %v13845_v46  ;;  %v7530_v18 = vadd.f32 %v1614_v22, %v13847_v9  ;;  %v13849_v11 = vld [vmem:[#allocation132_spill] sm:$0xff]  ;;  %v1645_v21 = vmul.f32 %v6973_v26, %v6973_v26  ;;  %v13852_v41 = vld [vmem:[#allocation186_spill] sm:$0xff] }
 0x200   : > { %13836 = vst [vmem:[#allocation84_spill] sm:$0xff] %v7512_v57  ;;  %13838 = vst [vmem:[#allocation109_spill] sm:$0xff] %v7515_v23  ;;  %v7533_v54 = vadd.f32 %v1615_v32, %v13849_v11  ;;  %v1646_v62 = vmul.f32 %v7057_v19, %v7057_v19  ;;  %v1647_v7 = vmul.f32 %v6977_v45, %v6977_v45  ;;  %v13851_v63 = vld [vmem:[#allocation168_spill] sm:$0xff]  ;;  %v13853_v11 = vld [vmem:[#allocation187_spill] sm:$0xff] }
 0x201   : > { %13840 = vst [vmem:[#allocation110_spill] sm:$0xff] %v7518_v8  ;;  %13842 = vst [vmem:[#allocation112_spill] sm:$0xff] %v7521_v16  ;;  %v1648_v22 = vmul.f32 %v7062_v1, %v7062_v1  ;;  %v1649_v32 = vmul.f32 %v6981_v10, %v6981_v10  ;;  %v1650_v15 = vmul.f32 %v7067_v30, %v7067_v30  ;;  %v13856_v8 = vld [vmem:[#allocation171_spill] sm:$0xff]  ;;  %v13857_v57 = vld [vmem:[#allocation189_spill] sm:$0xff] }
 0x202   : > { %13844 = vst [vmem:[#allocation113_spill] sm:$0xff] %v7524_v3  ;;  %13846 = vst [vmem:[#allocation114_spill] sm:$0xff] %v7527_v42  ;;  %v1651_v51 = vmul.f32 %v13851_v63, %v13851_v63  ;;  %v1652_v46 = vmul.f32 %v13852_v41, %v13852_v41  ;;  %v1653_v9 = vmul.f32 %v6989_v25, %v6989_v25  ;;  %v13855_v3 = vld [vmem:[#allocation188_spill] sm:$0xff]  ;;  %v13858_v39 = vld [vmem:[#allocation209_spill] sm:$0xff]  ;;  %v1670_v25 = vmul.f32 0.23388076, %v1646_v62 }
 0x203   : > { %13848 = vst [vmem:[#allocation115_spill] sm:$0xff] %v7530_v18  ;;  %13850 = vst [vmem:[#allocation116_spill] sm:$0xff] %v7533_v54  ;;  %v1654_v54 = vmul.f32 %v13853_v11, %v13853_v11  ;;  %v13854_v18 = vld [vmem:[#allocation170_spill] sm:$0xff]  ;;  %v1656_v16 = vmul.f32 %v13855_v3, %v13855_v3  ;;  %v1657_v23 = vmul.f32 %v13856_v8, %v13856_v8  ;;  %v13863_v8 = vld [vmem:[#allocation211_spill] sm:$0xff]  ;;  %v1667_v11 = vmul.f32 0.23388076, %v1643_v40 }
 0x204   : > { %v1655_v42 = vmul.f32 %v13854_v18, %v13854_v18  ;;  %v1658_v29 = vmul.f32 %v13857_v57, %v13857_v57  ;;  %v1659_v48 = vmul.f32 %v13858_v39, %v13858_v39  ;;  %v13859_v61 = vld [vmem:[#allocation74_spill] sm:$0xff]  ;;  %v1663_v18 = vmul.f32 %v13863_v8, %v13863_v8  ;;  %v13866_v10 = vld [vmem:[#allocation135_spill] sm:$0xff]  ;;  %v13868_v62 = vld [vmem:[#allocation136_spill] sm:$0xff] }
 0x205   : > { %v1664_v17 = vmul.f32 0.23388076, %v13859_v61  ;;  %v13860_v5 = vld [vmem:[#allocation190_spill] sm:$0xff]  ;;  %v1666_v57 = vmul.f32 0.23388076, %v7443_v36  ;;  %v7582_v61 = vmul.f32 %v7274_v27, %v7274_v27 }
 0x206   : > { %v1660_v60 = vmul.f32 %v13860_v5, %v13860_v5  ;;  %v13861_v37 = vld [vmem:[#allocation210_spill] sm:$0xff]  ;;  %v1668_v39 = vmul.f32 0.23388076, %v1644_v4  ;;  %v1669_v5 = vmul.f32 0.23388076, %v1645_v21 }
 0x207   : > { %v1661_v0 = vmul.f32 %v13861_v37, %v13861_v37  ;;  %v13862_v14 = vld [vmem:[#allocation78_spill] sm:$0xff]  ;;  %v7586_v37 = vmul.f32 %v7199_v6, %v7199_v6  ;;  %v1671_v55 = vmul.f32 0.23388076, %v1647_v7  ;;  %v1672_v41 = vmul.f32 0.23388076, %v1648_v22 }
 0x208   : > { %v1665_v3 = vmul.f32 0.23388076, %v13862_v14  ;;  %v1673_v14 = vmul.f32 0.23388076, %v1649_v32  ;;  %v13864_v63 = vld [vmem:[#allocation134_spill] sm:$0xff]  ;;  %v7595_v19 = vadd.f32 %v1666_v57, %v13868_v62 }
 0x209   : > { %v7589_v30 = vadd.f32 %v1664_v17, %v13864_v63  ;;  %v1674_v8 = vmul.f32 0.23388076, %v1650_v15  ;;  %v1675_v36 = vmul.f32 0.23388076, %v1651_v51  ;;  %v1676_v40 = vmul.f32 0.23388076, %v1652_v46 }
 0x20a   : > { %v7592_v1 = vadd.f32 %v1665_v3, %v13866_v10  ;;  %v1677_v45 = vmul.f32 0.23388076, %v1653_v9  ;;  %v1678_v4 = vmul.f32 0.23388076, %v1654_v54  ;;  %v1679_v21 = vmul.f32 0.23388076, %v1655_v42 }
 0x20b   : > { %13865 = vst [vmem:[#allocation117_spill] sm:$0xff] %v7589_v30  ;;  %13869 = vst [vmem:[#allocation122_spill] sm:$0xff] %v7595_v19  ;;  %v1680_v26 = vmul.f32 0.23388076, %v1656_v16  ;;  %v1681_v49 = vmul.f32 0.23388076, %v1657_v23 }
 0x20c   : > { %13867 = vst [vmem:[#allocation121_spill] sm:$0xff] %v7592_v1  ;;  %v1682_v7 = vmul.f32 0.23388076, %v1658_v29  ;;  %v13870_v22 = vld [vmem:[#allocation138_spill] sm:$0xff]  ;;  %v1683_v17 = vmul.f32 0.23388076, %v1659_v48 }
 0x20d   : > { %v7598_v32 = vadd.f32 %v1667_v11, %v13870_v22  ;;  %v1684_v63 = vmul.f32 0.23388076, %v1660_v60  ;;  %v1685_v15 = vmul.f32 0.23388076, %v1661_v0  ;;  %v13872_v51 = vld [vmem:[#allocation208_spill] sm:$0xff]  ;;  %v13874_v9 = vld [vmem:[#allocation139_spill] sm:$0xff] }
 0x20e   : > { %v7601_v46 = vadd.f32 %v1668_v39, %v13872_v51  ;;  %v1686_v10 = vmul.f32 0.23388076, %v1662_v52  ;;  %v1687_v3 = vmul.f32 0.23388076, %v1663_v18  ;;  %v7604_v54 = vadd.f32 %v1669_v5, %v13874_v9  ;;  %v13876_v42 = vld [vmem:[#allocation140_spill] sm:$0xff]  ;;  %v13878_v16 = vld [vmem:[#allocation141_spill] sm:$0xff] }
 0x20f   : > { %13871 = vst [vmem:[#allocation123_spill] sm:$0xff] %v7598_v32  ;;  %v7607_v57 = vadd.f32 %v1670_v25, %v13876_v42  ;;  %v7610_v23 = vadd.f32 %v1671_v55, %v13878_v16  ;;  %v13880_v29 = vld [vmem:[#allocation142_spill] sm:$0xff]  ;;  %v13882_v48 = vld [vmem:[#allocation143_spill] sm:$0xff]  ;;  %v13886_v52 = vld [vmem:[#allocation40_spill] sm:$0xff] }
 0x210   : > { %13873 = vst [vmem:[#allocation126_spill] sm:$0xff] %v7601_v46  ;;  %13875 = vst [vmem:[#allocation127_spill] sm:$0xff] %v7604_v54  ;;  %v7613_v11 = vadd.f32 %v1672_v41, %v13880_v29  ;;  %v7616_v60 = vadd.f32 %v1673_v14, %v13882_v48  ;;  %v13884_v0 = vld [vmem:[#allocation39_spill] sm:$0xff]  ;;  %v7622_v18 = vadd.f32 %v1675_v36, %v13886_v52  ;;  %v13888_v5 = vld [vmem:[#allocation42_spill] sm:$0xff] }
 0x211   : > { %13877 = vst [vmem:[#allocation128_spill] sm:$0xff] %v7607_v57  ;;  %13879 = vst [vmem:[#allocation130_spill] sm:$0xff] %v7610_v23  ;;  %v7619_v39 = vadd.f32 %v1674_v8, %v13884_v0  ;;  %v7625_v62 = vadd.f32 %v1676_v40, %v13888_v5  ;;  %v13890_v25 = vld [vmem:[#allocation43_spill] sm:$0xff]  ;;  %v13892_v55 = vld [vmem:[#allocation44_spill] sm:$0xff] }
 0x212   : > { %13881 = vst [vmem:[#allocation131_spill] sm:$0xff] %v7613_v11  ;;  %13883 = vst [vmem:[#allocation132_spill] sm:$0xff] %v7616_v60  ;;  %v7628_v22 = vadd.f32 %v1677_v45, %v13890_v25  ;;  %v7631_v51 = vadd.f32 %v1678_v4, %v13892_v55  ;;  %v13894_v41 = vld [vmem:[#allocation46_spill] sm:$0xff]  ;;  %v13896_v14 = vld [vmem:[#allocation47_spill] sm:$0xff]  ;;  %v1721_v55 = vmul.f32 %v7215_v33, %v7215_v33 }
 0x213   : > { %13885 = vst [vmem:[#allocation74_spill] sm:$0xff] %v7619_v39  ;;  %13887 = vst [vmem:[#allocation78_spill] sm:$0xff] %v7622_v18  ;;  %v7634_v9 = vadd.f32 %v1679_v21, %v13894_v41  ;;  %v7637_v42 = vadd.f32 %v1680_v26, %v13896_v14  ;;  %v13898_v8 = vld [vmem:[#allocation48_spill] sm:$0xff]  ;;  %v13900_v36 = vld [vmem:[#allocation50_spill] sm:$0xff]  ;;  %v1722_v41 = vmul.f32 %v7299_v50, %v7299_v50 }
 0x214   : > { %13889 = vst [vmem:[#allocation134_spill] sm:$0xff] %v7625_v62  ;;  %13891 = vst [vmem:[#allocation135_spill] sm:$0xff] %v7628_v22  ;;  %v7640_v16 = vadd.f32 %v1681_v49, %v13898_v8  ;;  %v7643_v29 = vadd.f32 %v1682_v7, %v13900_v36  ;;  %v13902_v40 = vld [vmem:[#allocation51_spill] sm:$0xff]  ;;  %v13904_v45 = vld [vmem:[#allocation52_spill] sm:$0xff]  ;;  %v1714_v49 = vmul.f32 %v7279_v59, %v7279_v59  ;;  %v1745_v19 = vmul.f32 0.23388076, %v1721_v55 }
 0x215   : > { %13893 = vst [vmem:[#allocation136_spill] sm:$0xff] %v7631_v51  ;;  %13895 = vst [vmem:[#allocation138_spill] sm:$0xff] %v7634_v9  ;;  %v7646_v48 = vadd.f32 %v1683_v17, %v13902_v40  ;;  %v7649_v0 = vadd.f32 %v1684_v63, %v13904_v45  ;;  %v13906_v4 = vld [vmem:[#allocation56_spill] sm:$0xff]  ;;  %v13908_v21 = vld [vmem:[#allocation57_spill] sm:$0xff]  ;;  %v1715_v7 = vmul.f32 %v7203_v13, %v7203_v13  ;;  %v1737_v9 = vmul.f32 0.23388076, %v7586_v37 }
 0x216   : > { %13897 = vst [vmem:[#allocation208_spill] sm:$0xff] %v7637_v42  ;;  %13899 = vst [vmem:[#allocation139_spill] sm:$0xff] %v7640_v16  ;;  %v7652_v52 = vadd.f32 %v1685_v15, %v13906_v4  ;;  %v7655_v5 = vadd.f32 %v1686_v10, %v13908_v21  ;;  %v13910_v26 = vld [vmem:[#allocation58_spill] sm:$0xff]  ;;  %v1716_v17 = vmul.f32 %v7284_v12, %v7284_v12  ;;  %v13915_v51 = vld [vmem:[#allocation239_spill] sm:$0xff]  ;;  %v1738_v62 = vmul.f32 0.23388076, %v1714_v49 }
 0x217   : > { %13901 = vst [vmem:[#allocation140_spill] sm:$0xff] %v7643_v29  ;;  %13903 = vst [vmem:[#allocation141_spill] sm:$0xff] %v7646_v48  ;;  %v7658_v25 = vadd.f32 %v1687_v3, %v13910_v26  ;;  %v1717_v63 = vmul.f32 %v7207_v24, %v7207_v24  ;;  %v1718_v15 = vmul.f32 %v7289_v20, %v7289_v20  ;;  %v13913_v48 = vld [vmem:[#allocation238_spill] sm:$0xff]  ;;  %v1739_v18 = vmul.f32 0.23388076, %v1715_v7  ;;  %v13917_v57 = vld [vmem:[#allocation164_spill] sm:$0xff] }
 0x218   : > { %13905 = vst [vmem:[#allocation142_spill] sm:$0xff] %v7649_v0  ;;  %13907 = vst [vmem:[#allocation143_spill] sm:$0xff] %v7652_v52  ;;  %v1719_v10 = vmul.f32 %v7211_v43, %v7211_v43  ;;  %v1720_v3 = vmul.f32 %v7294_v58, %v7294_v58  ;;  %v1723_v14 = vmul.f32 %v7219_v56, %v7219_v56  ;;  %v13912_v52 = vld [vmem:[#allocation65_spill] sm:$0xff]  ;;  %v13914_v16 = vld [vmem:[#allocation70_spill] sm:$0xff]  ;;  %v1746_v30 = vmul.f32 0.23388076, %v1722_v41 }
 0x219   : > { %13909 = vst [vmem:[#allocation39_spill] sm:$0xff] %v7655_v5  ;;  %13911 = vst [vmem:[#allocation40_spill] sm:$0xff] %v7658_v25  ;;  %v1724_v8 = vmul.f32 %v7304_v44, %v7304_v44  ;;  %v1725_v36 = vmul.f32 %v7223_v31, %v7223_v31  ;;  %v1726_v40 = vmul.f32 %v7309_v35, %v7309_v35  ;;  %v1736_v5 = vmul.f32 0.23388076, %v7582_v61  ;;  %v13916_v39 = vld [vmem:[#allocation30_spill] sm:$0xff]  ;;  %v13918_v37 = vld [vmem:[#allocation61_spill] sm:$0xff] }
 0x21a   : > { %v1727_v45 = vmul.f32 %v7227_v47, %v7227_v47  ;;  %v1728_v4 = vmul.f32 %v7315_v2, %v7315_v2  ;;  %v1729_v21 = vmul.f32 %v13805_v28, %v13805_v28  ;;  %v1730_v26 = vmul.f32 %v7320_v53, %v7320_v53 }
 0x21b   : > { %v1731_v25 = vmul.f32 %v13808_v34, %v13808_v34  ;;  %v1732_v0 = vmul.f32 %v13912_v52, %v13912_v52  ;;  %v1733_v29 = vmul.f32 %v13913_v48, %v13913_v48  ;;  %v1734_v42 = vmul.f32 %v13914_v16, %v13914_v16 }
 0x21c   : > { %v1735_v22 = vmul.f32 %v13915_v51, %v13915_v51  ;;  %v7708_v60 = vmul.f32 %v7274_v27, %v13916_v39  ;;  %v1740_v61 = vmul.f32 0.23388076, %v1716_v17  ;;  %v1741_v11 = vmul.f32 0.23388076, %v1717_v63  ;;  %v13920_v51 = vld [vmem:[#allocation62_spill] sm:$0xff]  ;;  %v13922_v63 = vld [vmem:[#allocation63_spill] sm:$0xff] }
 0x21d   : > { %v1742_v23 = vmul.f32 0.23388076, %v1718_v15  ;;  %v7712_v54 = vmul.f32 %v7199_v6, %v13917_v57  ;;  %v1743_v46 = vmul.f32 0.23388076, %v1719_v10  ;;  %v1744_v32 = vmul.f32 0.23388076, %v1720_v3 }
 0x21e   : > { %v7715_v1 = vadd.f32 %v1736_v5, %v13918_v37  ;;  %v1747_v49 = vmul.f32 0.23388076, %v1723_v14  ;;  %v1748_v7 = vmul.f32 0.23388076, %v1724_v8  ;;  %v7718_v16 = vadd.f32 %v1737_v9, %v13920_v51  ;;  %v13924_v3 = vld [vmem:[#allocation67_spill] sm:$0xff]  ;;  %v13926_v14 = vld [vmem:[#allocation68_spill] sm:$0xff] }
 0x21f   : > { %v1749_v27 = vmul.f32 0.23388076, %v1725_v36  ;;  %v1750_v39 = vmul.f32 0.23388076, %v1726_v40  ;;  %v1751_v17 = vmul.f32 0.23388076, %v1727_v45  ;;  %v7721_v15 = vadd.f32 %v1738_v62, %v13922_v63 }
 0x220   : > { %13919 = vst [vmem:[#allocation42_spill] sm:$0xff] %v7715_v1  ;;  %13921 = vst [vmem:[#allocation43_spill] sm:$0xff] %v7718_v16  ;;  %v1752_v6 = vmul.f32 0.23388076, %v1728_v4  ;;  %v1753_v57 = vmul.f32 0.23388076, %v1729_v21  ;;  %v7724_v55 = vadd.f32 %v1739_v18, %v13924_v3  ;;  %v7727_v8 = vadd.f32 %v1740_v61, %v13926_v14 }
 0x221   : > { %13923 = vst [vmem:[#allocation44_spill] sm:$0xff] %v7721_v15  ;;  %v1754_v10 = vmul.f32 0.23388076, %v1730_v26  ;;  %v1755_v5 = vmul.f32 0.23388076, %v1731_v25  ;;  %v13928_v36 = vld [vmem:[#allocation203_spill] sm:$0xff] }
 0x222   : > { %13925 = vst [vmem:[#allocation46_spill] sm:$0xff] %v7724_v55  ;;  %v1756_v37 = vmul.f32 0.23388076, %v1732_v0  ;;  %v1757_v41 = vmul.f32 0.23388076, %v1733_v29  ;;  %13927 = vst [vmem:[#allocation47_spill] sm:$0xff] %v7727_v8  ;;  %v7730_v40 = vadd.f32 %v1741_v11, %v13928_v36 }
 0x223   : > { %v1758_v51 = vmul.f32 0.23388076, %v1734_v42  ;;  %v1759_v9 = vmul.f32 0.23388076, %v1735_v22  ;;  %v13930_v45 = vld [vmem:[#allocation192_spill] sm:$0xff]  ;;  %v13932_v4 = vld [vmem:[#allocation71_spill] sm:$0xff] }
 0x224   : > { %13929 = vst [vmem:[#allocation48_spill] sm:$0xff] %v7730_v40  ;;  %v7733_v62 = vadd.f32 %v1742_v23, %v13930_v45  ;;  %v7736_v21 = vadd.f32 %v1743_v46, %v13932_v4  ;;  %v13934_v26 = vld [vmem:[#allocation72_spill] sm:$0xff]  ;;  %v13936_v25 = vld [vmem:[#allocation73_spill] sm:$0xff]  ;;  %v13942_v11 = vld [vmem:[#allocation22_spill] sm:$0xff] }
 0x225   : > { %v7739_v18 = vadd.f32 %v1744_v32, %v13934_v26  ;;  %v7742_v0 = vadd.f32 %v1745_v19, %v13936_v25  ;;  %v13938_v29 = vld [vmem:[#allocation77_spill] sm:$0xff]  ;;  %v13940_v42 = vld [vmem:[#allocation144_spill] sm:$0xff]  ;;  %v7751_v63 = vadd.f32 %v1748_v7, %v13942_v11  ;;  %v13946_v46 = vld [vmem:[#allocation146_spill] sm:$0xff] }
 0x226   : > { %13931 = vst [vmem:[#allocation50_spill] sm:$0xff] %v7733_v62  ;;  %13933 = vst [vmem:[#allocation51_spill] sm:$0xff] %v7736_v21  ;;  %v7745_v61 = vadd.f32 %v1746_v30, %v13938_v29  ;;  %v7748_v22 = vadd.f32 %v1747_v49, %v13940_v42  ;;  %v13944_v23 = vld [vmem:[#allocation145_spill] sm:$0xff]  ;;  %v7757_v14 = vadd.f32 %v1750_v39, %v13946_v46  ;;  %v13948_v32 = vld [vmem:[#allocation23_spill] sm:$0xff] }
 0x227   : > { %13935 = vst [vmem:[#allocation52_spill] sm:$0xff] %v7739_v18  ;;  %13937 = vst [vmem:[#allocation56_spill] sm:$0xff] %v7742_v0  ;;  %v7754_v3 = vadd.f32 %v1749_v27, %v13944_v23  ;;  %v7760_v36 = vadd.f32 %v1751_v17, %v13948_v32  ;;  %v13950_v19 = vld [vmem:[#allocation147_spill] sm:$0xff]  ;;  %v13952_v30 = vld [vmem:[#allocation148_spill] sm:$0xff] }
 0x228   : > { %13939 = vst [vmem:[#allocation57_spill] sm:$0xff] %v7745_v61  ;;  %13941 = vst [vmem:[#allocation58_spill] sm:$0xff] %v7748_v22  ;;  %v7763_v45 = vadd.f32 %v1752_v6, %v13950_v19  ;;  %v7766_v4 = vadd.f32 %v1753_v57, %v13952_v30  ;;  %v13954_v49 = vld [vmem:[#allocation26_spill] sm:$0xff]  ;;  %v13956_v7 = vld [vmem:[#allocation149_spill] sm:$0xff] }
 0x229   : > { %13943 = vst [vmem:[#allocation65_spill] sm:$0xff] %v7751_v63  ;;  %13945 = vst [vmem:[#allocation238_spill] sm:$0xff] %v7754_v3  ;;  %v7769_v26 = vadd.f32 %v1754_v10, %v13954_v49  ;;  %v7772_v25 = vadd.f32 %v1755_v5, %v13956_v7  ;;  %v13958_v27 = vld [vmem:[#allocation150_spill] sm:$0xff]  ;;  %v13960_v39 = vld [vmem:[#allocation27_spill] sm:$0xff]  ;;  %v1787_v10 = vmul.f32 %v7203_v13, %v6969_v38 }
 0x22a   : > { %13947 = vst [vmem:[#allocation30_spill] sm:$0xff] %v7757_v14  ;;  %13949 = vst [vmem:[#allocation164_spill] sm:$0xff] %v7760_v36  ;;  %v7775_v29 = vadd.f32 %v1756_v37, %v13958_v27  ;;  %v7778_v42 = vadd.f32 %v1757_v41, %v13960_v39  ;;  %v13962_v17 = vld [vmem:[#allocation151_spill] sm:$0xff]  ;;  %v13964_v6 = vld [vmem:[#allocation152_spill] sm:$0xff] }
 0x22b   : > { %13951 = vst [vmem:[#allocation61_spill] sm:$0xff] %v7763_v45  ;;  %13953 = vst [vmem:[#allocation62_spill] sm:$0xff] %v7766_v4  ;;  %v7781_v11 = vadd.f32 %v1758_v51, %v13962_v17  ;;  %v7784_v23 = vadd.f32 %v1759_v9, %v13964_v6  ;;  %v13966_v57 = vld [vmem:[#allocation181_spill] sm:$0xff]  ;;  %v13967_v5 = vld [vmem:[#allocation182_spill] sm:$0xff] }
 0x22c   : > { %13955 = vst [vmem:[#allocation63_spill] sm:$0xff] %v7769_v26  ;;  %13957 = vst [vmem:[#allocation67_spill] sm:$0xff] %v7772_v25  ;;  %v1786_v46 = vmul.f32 %v7279_v59, %v13966_v57  ;;  %v1788_v32 = vmul.f32 %v7284_v12, %v13967_v5  ;;  %v13968_v37 = vld [vmem:[#allocation165_spill] sm:$0xff]  ;;  %v13969_v41 = vld [vmem:[#allocation183_spill] sm:$0xff] }
 0x22d   : > { %13959 = vst [vmem:[#allocation68_spill] sm:$0xff] %v7775_v29  ;;  %13961 = vst [vmem:[#allocation203_spill] sm:$0xff] %v7778_v42  ;;  %v1789_v19 = vmul.f32 %v7207_v24, %v13968_v37  ;;  %v1790_v30 = vmul.f32 %v7289_v20, %v13969_v41  ;;  %v13970_v51 = vld [vmem:[#allocation166_spill] sm:$0xff]  ;;  %v13971_v9 = vld [vmem:[#allocation184_spill] sm:$0xff] }
 0x22e   : > { %13963 = vst [vmem:[#allocation192_spill] sm:$0xff] %v7781_v11  ;;  %13965 = vst [vmem:[#allocation71_spill] sm:$0xff] %v7784_v23  ;;  %v1791_v49 = vmul.f32 %v7211_v43, %v13970_v51  ;;  %v1792_v7 = vmul.f32 %v7294_v58, %v13971_v9  ;;  %v13972_v27 = vld [vmem:[#allocation167_spill] sm:$0xff]  ;;  %v13973_v39 = vld [vmem:[#allocation185_spill] sm:$0xff] }
 0x22f   : > { %v1793_v59 = vmul.f32 %v7215_v33, %v13972_v27  ;;  %v1794_v38 = vmul.f32 %v7299_v50, %v13973_v39  ;;  %v13974_v13 = vld [vmem:[#allocation168_spill] sm:$0xff]  ;;  %v13975_v17 = vld [vmem:[#allocation186_spill] sm:$0xff]  ;;  %v13976_v6 = vld [vmem:[#allocation169_spill] sm:$0xff] }
 0x230   : > { %v1795_v12 = vmul.f32 %v7219_v56, %v13974_v13  ;;  %v1796_v24 = vmul.f32 %v7304_v44, %v13975_v17  ;;  %v1797_v20 = vmul.f32 %v7223_v31, %v13976_v6  ;;  %v13977_v57 = vld [vmem:[#allocation187_spill] sm:$0xff]  ;;  %v13978_v5 = vld [vmem:[#allocation170_spill] sm:$0xff]  ;;  %v13979_v37 = vld [vmem:[#allocation188_spill] sm:$0xff]  ;;  %v1808_v31 = vmul.f32 0.23388076, %v7708_v60 }
 0x231   : > { %v1798_v43 = vmul.f32 %v7309_v35, %v13977_v57  ;;  %v1799_v58 = vmul.f32 %v7227_v47, %v13978_v5  ;;  %v1800_v33 = vmul.f32 %v7315_v2, %v13979_v37  ;;  %v13980_v41 = vld [vmem:[#allocation171_spill] sm:$0xff]  ;;  %v13981_v51 = vld [vmem:[#allocation189_spill] sm:$0xff]  ;;  %v13983_v27 = vld [vmem:[#allocation190_spill] sm:$0xff]  ;;  %v1809_v13 = vmul.f32 0.23388076, %v7712_v54 }
 0x232   : > { %v1801_v50 = vmul.f32 %v13805_v28, %v13980_v41  ;;  %v1802_v56 = vmul.f32 %v7320_v53, %v13981_v51  ;;  %v13982_v9 = vld [vmem:[#allocation209_spill] sm:$0xff]  ;;  %v1804_v35 = vmul.f32 %v13912_v52, %v13983_v27  ;;  %v13984_v39 = vld [vmem:[#allocation210_spill] sm:$0xff]  ;;  %v1810_v2 = vmul.f32 0.23388076, %v1786_v46  ;;  %v13985_v17 = vld [vmem:[#allocation191_spill] sm:$0xff] }
 0x233   : > { %v1803_v44 = vmul.f32 %v13808_v34, %v13982_v9  ;;  %v1805_v47 = vmul.f32 %v13913_v48, %v13984_v39  ;;  %v13986_v6 = vld [vmem:[#allocation70_spill] sm:$0xff]  ;;  %v1811_v57 = vmul.f32 0.23388076, %v1787_v10  ;;  %v1812_v5 = vmul.f32 0.23388076, %v1788_v32  ;;  %v13987_v37 = vld [vmem:[#allocation211_spill] sm:$0xff] }
 0x234   : > { %v1806_v28 = vmul.f32 %v13986_v6, %v13985_v17  ;;  %v1813_v53 = vmul.f32 0.23388076, %v1789_v19  ;;  %v13988_v41 = vld [vmem:[#allocation239_spill] sm:$0xff]  ;;  %v1814_v51 = vmul.f32 0.23388076, %v1790_v30  ;;  %v13989_v11 = vld [vmem:[#allocation28_spill] sm:$0xff] }
 0x235   : > { %v1807_v34 = vmul.f32 %v13988_v41, %v13987_v37  ;;  %v1815_v60 = vmul.f32 0.23388076, %v1791_v49  ;;  %v1816_v9 = vmul.f32 0.23388076, %v1792_v7  ;;  %v1817_v23 = vmul.f32 0.23388076, %v1793_v59 }
 0x236   : > { %v1818_v52 = vmul.f32 0.23388076, %v1794_v38  ;;  %v1819_v27 = vmul.f32 0.23388076, %v1795_v12  ;;  %v7833_v48 = vadd.f32 %v1808_v31, %v13989_v11  ;;  %v1820_v54 = vmul.f32 0.23388076, %v1796_v24 }
 0x237   : > { %v1821_v46 = vmul.f32 0.23388076, %v1797_v20  ;;  %v1822_v39 = vmul.f32 0.23388076, %v1798_v43  ;;  %v13991_v42 = vld [vmem:[#allocation153_spill] sm:$0xff]  ;;  %v13993_v6 = vld [vmem:[#allocation154_spill] sm:$0xff] }
 0x238   : > { %13990 = vst [vmem:[#allocation72_spill] sm:$0xff] %v7833_v48  ;;  %v7836_v17 = vadd.f32 %v1809_v13, %v13991_v42  ;;  %v1823_v10 = vmul.f32 0.23388076, %v1799_v58  ;;  %v1824_v32 = vmul.f32 0.23388076, %v1800_v33  ;;  %v7839_v37 = vadd.f32 %v1810_v2, %v13993_v6  ;;  %v13995_v59 = vld [vmem:[#allocation31_spill] sm:$0xff] }
 0x239   : > { %v1825_v19 = vmul.f32 0.23388076, %v1801_v50  ;;  %v1826_v30 = vmul.f32 0.23388076, %v1802_v56  ;;  %v1827_v49 = vmul.f32 0.23388076, %v1803_v44  ;;  %v7842_v38 = vadd.f32 %v1811_v57, %v13995_v59 }
 0x23a   : > { %13992 = vst [vmem:[#allocation73_spill] sm:$0xff] %v7836_v17  ;;  %13994 = vst [vmem:[#allocation77_spill] sm:$0xff] %v7839_v37  ;;  %v1828_v7 = vmul.f32 0.23388076, %v1804_v35  ;;  %v1829_v11 = vmul.f32 0.23388076, %v1805_v47 }
 0x23b   : > { %13996 = vst [vmem:[#allocation144_spill] sm:$0xff] %v7842_v38  ;;  %v1830_v12 = vmul.f32 0.23388076, %v1806_v28  ;;  %v1831_v24 = vmul.f32 0.23388076, %v1807_v34  ;;  %v13997_v20 = vld [vmem:[#allocation155_spill] sm:$0xff] }
 0x23c   : > { %v7845_v43 = vadd.f32 %v1812_v5, %v13997_v20  ;;  %v13999_v42 = vld [vmem:[#allocation156_spill] sm:$0xff]  ;;  %v14005_v56 = vld [vmem:[#allocation173_spill] sm:$0xff]  ;;  %v14009_v47 = vld [vmem:[#allocation174_spill] sm:$0xff] }
 0x23d   : > { %v7848_v31 = vadd.f32 %v1813_v53, %v13999_v42  ;;  %v14001_v58 = vld [vmem:[#allocation32_spill] sm:$0xff]  ;;  %v7857_v44 = vadd.f32 %v1816_v9, %v14005_v56  ;;  %v14007_v35 = vld [vmem:[#allocation193_spill] sm:$0xff]  ;;  %v7863_v28 = vadd.f32 %v1818_v52, %v14009_v47  ;;  %v14011_v57 = vld [vmem:[#allocation194_spill] sm:$0xff] }
 0x23e   : > { %13998 = vst [vmem:[#allocation22_spill] sm:$0xff] %v7845_v43  ;;  %v7851_v33 = vadd.f32 %v1814_v51, %v14001_v58  ;;  %v14003_v50 = vld [vmem:[#allocation172_spill] sm:$0xff]  ;;  %v7860_v2 = vadd.f32 %v1817_v23, %v14007_v35  ;;  %v7866_v5 = vadd.f32 %v1819_v27, %v14011_v57  ;;  %v14013_v53 = vld [vmem:[#allocation175_spill] sm:$0xff]  ;;  %v14019_v9 = vld [vmem:[#allocation86_spill] sm:$0xff] }
 0x23f   : > { %14000 = vst [vmem:[#allocation145_spill] sm:$0xff] %v7848_v31  ;;  %v7854_v13 = vadd.f32 %v1815_v60, %v14003_v50  ;;  %14006 = vst [vmem:[#allocation147_spill] sm:$0xff] %v7857_v44  ;;  %v7869_v41 = vadd.f32 %v1820_v54, %v14013_v53  ;;  %v14015_v34 = vld [vmem:[#allocation195_spill] sm:$0xff]  ;;  %v14017_v60 = vld [vmem:[#allocation176_spill] sm:$0xff]  ;;  %v7878_v59 = vadd.f32 %v1823_v10, %v14019_v9 }
 0x240   : > { %14002 = vst [vmem:[#allocation146_spill] sm:$0xff] %v7851_v33  ;;  %14008 = vst [vmem:[#allocation148_spill] sm:$0xff] %v7860_v2  ;;  %v7872_v51 = vadd.f32 %v1821_v46, %v14015_v34  ;;  %v7875_v6 = vadd.f32 %v1822_v39, %v14017_v60  ;;  %v14021_v23 = vld [vmem:[#allocation196_spill] sm:$0xff]  ;;  %v14025_v27 = vld [vmem:[#allocation177_spill] sm:$0xff] }
 0x241   : > { %14004 = vst [vmem:[#allocation23_spill] sm:$0xff] %v7854_v13  ;;  %14010 = vst [vmem:[#allocation26_spill] sm:$0xff] %v7863_v28  ;;  %v7881_v20 = vadd.f32 %v1824_v32, %v14021_v23  ;;  %v14023_v52 = vld [vmem:[#allocation204_spill] sm:$0xff]  ;;  %v7887_v58 = vadd.f32 %v1826_v30, %v14025_v27  ;;  %v14027_v54 = vld [vmem:[#allocation118_spill] sm:$0xff] }
 0x242   : > { %14012 = vst [vmem:[#allocation149_spill] sm:$0xff] %v7866_v5  ;;  %14014 = vst [vmem:[#allocation150_spill] sm:$0xff] %v7869_v41  ;;  %v7884_v42 = vadd.f32 %v1825_v19, %v14023_v52  ;;  %v7890_v50 = vadd.f32 %v1827_v49, %v14027_v54  ;;  %v14029_v46 = vld [vmem:[#allocation205_spill] sm:$0xff]  ;;  %v14030_v35 = vld [vmem:[#allocation178_spill] sm:$0xff] }
 0x243   : > { %14016 = vst [vmem:[#allocation27_spill] sm:$0xff] %v7872_v51  ;;  %14018 = vst [vmem:[#allocation151_spill] sm:$0xff] %v7875_v6  ;;  %v1856_v56 = vrot.slane %v14029_v46, 1  ;;  %v1857_v39 = vrot.slane %v14030_v35, 1  ;;  %v14031_v47 = vld [vmem:[#allocation120_spill] sm:$0xff]  ;;  %v14032_v10 = vld [vmem:[#allocation198_spill] sm:$0xff] }
 0x244   : > { %14020 = vst [vmem:[#allocation152_spill] sm:$0xff] %v7878_v59  ;;  %14022 = vst [vmem:[#allocation181_spill] sm:$0xff] %v7881_v20  ;;  %v1858_v57 = vrot.slane %v14031_v47, 1  ;;  %v1859_v53 = vrot.slane %v14032_v10, 1  ;;  %v14033_v34 = vld [vmem:[#allocation206_spill] sm:$0xff]  ;;  %v14034_v60 = vld [vmem:[#allocation179_spill] sm:$0xff] }
 0x245   : > { %14024 = vst [vmem:[#allocation182_spill] sm:$0xff] %v7884_v42  ;;  %14026 = vst [vmem:[#allocation165_spill] sm:$0xff] %v7887_v58  ;;  %v1860_v32 = vrot.slane %v14033_v34, 1  ;;  %v1861_v9 = vrot.slane %v14034_v60, 1  ;;  %v14035_v19 = vld [vmem:[#allocation64_spill] sm:$0xff]  ;;  %v14036_v52 = vld [vmem:[#allocation199_spill] sm:$0xff] }
 0x246   : > { %14028 = vst [vmem:[#allocation183_spill] sm:$0xff] %v7890_v50  ;;  %v1862_v23 = vrot.slane %v14035_v19, 1  ;;  %v1863_v30 = vrot.slane %v14036_v52, 1  ;;  %v14037_v27 = vld [vmem:[#allocation207_spill] sm:$0xff]  ;;  %v14038_v49 = vld [vmem:[#allocation180_spill] sm:$0xff]  ;;  %v14039_v50 = vld [vmem:[#allocation69_spill] sm:$0xff] }
 0x247   : > { %v1864_v58 = vrot.slane %v14037_v27, 1  ;;  %v1865_v54 = vrot.slane %v14038_v49, 1  ;;  %v1866_v46 = vrot.slane %v14039_v50, 1  ;;  %v14040_v42 = vld [vmem:[#allocation157_spill] sm:$0xff]  ;;  %v14042_v59 = vld [vmem:[#allocation35_spill] sm:$0xff]  ;;  %v14043_v6 = vld [vmem:[#allocation36_spill] sm:$0xff] }
 0x248   : > { %v1867_v35 = vrot.slane %v14040_v42, 1  ;;  %v14041_v20 = vld [vmem:[#allocation33_spill] sm:$0xff]  ;;  %v1869_v10 = vrot.slane %v14042_v59, 1  ;;  %v1870_v34 = vrot.slane %v14043_v6, 1  ;;  %v14046_v5 = vld [vmem:[#allocation54_spill] sm:$0xff]  ;;  %v14047_v28 = vld [vmem:[#allocation59_spill] sm:$0xff] }
 0x249   : > { %v1868_v47 = vrot.slane %v14041_v20, 1  ;;  %v14044_v51 = vld [vmem:[#allocation37_spill] sm:$0xff]  ;;  %v1873_v52 = vrot.slane %v14046_v5, 1  ;;  %v1874_v27 = vrot.slane %v14047_v28, 1  ;;  %v14048_v2 = vld [vmem:[#allocation124_spill] sm:$0xff]  ;;  %v14051_v13 = vld [vmem:[#allocation158_spill] sm:$0xff] }
 0x24a   : > { %v1871_v60 = vrot.slane %v14044_v51, 1  ;;  %v14045_v41 = vld [vmem:[#allocation53_spill] sm:$0xff]  ;;  %v1875_v49 = vrot.slane %v14048_v2, 1  ;;  %v1877_v33 = vrot.slane %v14051_v13, 1  ;;  %v14052_v31 = vld [vmem:[#allocation159_spill] sm:$0xff]  ;;  %v14053_v38 = vld [vmem:[#allocation160_spill] sm:$0xff] }
 0x24b   : > { %v1872_v19 = vrot.slane %v14045_v41, 1  ;;  %v14049_v44 = vld [vmem:[#allocation21_spill] sm:$0xff]  ;;  %v1878_v43 = vrot.slane %v14052_v31, 1  ;;  %v1879_v37 = vrot.slane %v14053_v38, 1  ;;  %v14058_v26 = vld [vmem:[#allocation162_spill] sm:$0xff]  ;;  %v14060_v45 = vld [vmem:[#allocation163_spill] sm:$0xff] }
 0x24c   : > { %vm1880_vm4 = vcmp.lt.s32.totalorder %v14049_v44, 7  ;;  %v14050_v50 = vld [vmem:[#allocation25_spill] sm:$0xff]  ;;  %v7924_v4 = vadd.f32 %v1830_v12, %v14058_v26  ;;  %v7927_v36 = vadd.f32 %v1831_v24, %v14060_v45  ;;  %v14063_v26 = vld [vmem:[#allocation24_spill] sm:$0xff]  ;;  %v7985_v61 = vsub.s32 6, %v14049_v44  ;;  %v14106_v40 = vld [vmem:[#allocation230_spill] sm:$0xff] }
 0x24d   : > { %v1876_v42 = vrot.slane %v14050_v50, 1  ;;  %v14054_v17 = vld [vmem:[#allocation197_spill] sm:$0xff]  ;;  %v7931_v14 = vsel %vm1880_vm4, %v1856_v56, %v1868_v47  ;;  %v7935_v3 = vsel %vm1880_vm4, %v1857_v39, %v1869_v10  ;;  %vm1906_vm5 = vcmp.eq.s32.totalorder %v14063_v26, 15  ;;  %v14107_v8 = vld [vmem:[#allocation231_spill] sm:$0xff]  ;;  %v14109_v15 = vld [vmem:[#allocation234_spill] sm:$0xff] }
 0x24e   : > { %v7918_v48 = vadd.f32 %v1828_v7, %v14054_v17  ;;  %v14056_v29 = vld [vmem:[#allocation161_spill] sm:$0xff]  ;;  %14059 = vst [vmem:[#allocation167_spill] sm:$0xff] %v7924_v4  ;;  %14061 = vst [vmem:[#allocation185_spill] sm:$0xff] %v7927_v36  ;;  %v7939_v17 = vsel %vm1880_vm4, %v1858_v57, %v1870_v34  ;;  %v7948_v45 = vsel %vm1880_vm4, %v1860_v32, %v1872_v19  ;;  %v2001_v16 = vrot.slane %v14109_v15, 1  ;;  %v14161_v44 = vld [vmem:[#allocation200_spill] sm:$0xff] }
 0x24f   : > { %v7921_v25 = vadd.f32 %v1829_v11, %v14056_v29  ;;  %14062 = vst [vmem:[#allocation168_spill] sm:$0xff] %v7931_v14  ;;  %v7943_v29 = vsel %vm1880_vm4, %v1859_v53, %v1871_v60  ;;  %v7952_v7 = vsel %vm1880_vm4, %v1861_v9, %v1873_v52  ;;  %v7956_v11 = vsel %vm1880_vm4, %v1862_v23, %v1874_v27  ;;  %v14105_v62 = vld [vmem:[#allocation229_spill] sm:$0xff] }
 0x250   : > { %14055 = vst [vmem:[#allocation166_spill] sm:$0xff] %v7918_v48  ;;  %14064 = vst [vmem:[#allocation186_spill] sm:$0xff] %v7952_v7  ;;  %v7960_v12 = vsel %vm1880_vm4, %v1863_v30, %v1875_v49  ;;  %v7964_v24 = vsel %vm1880_vm4, %v1864_v58, %v1876_v42  ;;  %v7968_v36 = vsel %vm1880_vm4, %v1865_v54, %v1877_v33  ;;  %v14108_v55 = vld [vmem:[#allocation233_spill] sm:$0xff] }
 0x251   : > { %14057 = vst [vmem:[#allocation184_spill] sm:$0xff] %v7921_v25  ;;  %14065 = vst [vmem:[#allocation169_spill] sm:$0xff] %v7956_v11  ;;  %v7972_v4 = vsel %vm1880_vm4, %v1866_v46, %v1878_v43  ;;  %v7976_v25 = vsel %vm1880_vm4, %v1867_v35, %v1879_v37  ;;  %v1893_v48 = vsel %vm1880_vm4, %v1868_v47, %v1856_v56 }
 0x252   : > { %14066 = vst [vmem:[#allocation187_spill] sm:$0xff] %v7960_v12  ;;  %14067 = vst [vmem:[#allocation170_spill] sm:$0xff] %v7964_v24  ;;  %v1894_v63 = vsel %vm1880_vm4, %v1869_v10, %v1857_v39  ;;  %v1895_v22 = vsel %vm1880_vm4, %v1870_v34, %v1858_v57  ;;  %v1896_v0 = vsel %vm1880_vm4, %v1871_v60, %v1859_v53  ;;  %v14071_v10 = vld [vmem:[#allocation212_spill] sm:$0xff]  ;;  %v14072_v34 = vld [vmem:[#allocation213_spill] sm:$0xff] }
 0x253   : > { %14068 = vst [vmem:[#allocation188_spill] sm:$0xff] %v7968_v36  ;;  %14069 = vst [vmem:[#allocation171_spill] sm:$0xff] %v7972_v4  ;;  %v1897_v18 = vsel %vm1880_vm4, %v1872_v19, %v1860_v32  ;;  %v1898_v21 = vsel %vm1880_vm4, %v1873_v52, %v1861_v9  ;;  %v1899_v56 = vsel %vm1880_vm4, %v1874_v27, %v1862_v23  ;;  %v1979_v9 = vrot.slane %v14071_v10, 1  ;;  %v14073_v23 = vld [vmem:[#allocation214_spill] sm:$0xff]  ;;  %v14085_v52 = vld [vmem:[#allocation217_spill] sm:$0xff] }
 0x254   : > { %14070 = vst [vmem:[#allocation189_spill] sm:$0xff] %v7976_v25  ;;  %v1900_v39 = vsel %vm1880_vm4, %v1875_v49, %v1863_v30  ;;  %v1901_v57 = vsel %vm1880_vm4, %v1876_v42, %v1864_v58  ;;  %v1902_v47 = vsel %vm1880_vm4, %v1877_v33, %v1865_v54  ;;  %v1903_v53 = vsel %vm1880_vm4, %v1878_v43, %v1866_v46  ;;  %v14083_v54 = vld [vmem:[#allocation215_spill] sm:$0xff]  ;;  %v14089_v49 = vld [vmem:[#allocation218_spill] sm:$0xff]  ;;  %v14112_v4 = vld [vmem:[#allocation232_spill] sm:$0xff] }
 0x255   : > { %v1904_v32 = vsel %vm1880_vm4, %v1879_v37, %v1867_v35  ;;  %v1980_v60 = vrot.slane %v14072_v34, 1  ;;  %v1981_v19 = vrot.slane %v14073_v23, 1  ;;  %v8010_v30 = vrot.slane %v14041_v20, %v7985_v61  ;;  %v14095_v10 = vld [vmem:[#allocation219_spill] sm:$0xff]  ;;  %v14096_v23 = vld [vmem:[#allocation220_spill] sm:$0xff] }
 0x256   : > { %v8014_v58 = vrot.slane %v14042_v59, %v7985_v61  ;;  %v8018_v43 = vrot.slane %v14043_v6, %v7985_v61  ;;  %v8022_v37 = vrot.slane %v14044_v51, %v7985_v61  ;;  %v8026_v33 = vrot.slane %v14045_v41, %v7985_v61  ;;  %v14084_v41 = vld [vmem:[#allocation216_spill] sm:$0xff] }
 0x257   : > { %14074 = vst [vmem:[#allocation209_spill] sm:$0xff] %v8010_v30  ;;  %v8030_v20 = vrot.slane %v14046_v5, %v7985_v61  ;;  %v8034_v59 = vrot.slane %v14047_v28, %v7985_v61  ;;  %v8038_v6 = vrot.slane %v14048_v2, %v7985_v61  ;;  %v8042_v51 = vrot.slane %v14050_v50, %v7985_v61 }
 0x258   : > { %14075 = vst [vmem:[#allocation190_spill] sm:$0xff] %v8014_v58  ;;  %14076 = vst [vmem:[#allocation210_spill] sm:$0xff] %v8018_v43  ;;  %v1982_v46 = vrot.slane %v14083_v54, 1  ;;  %v1983_v35 = vrot.slane %v14084_v41, 1  ;;  %v1984_v27 = vrot.slane %v14085_v52, 1  ;;  %v8049_v5 = vrot.slane %v14051_v13, %v7985_v61  ;;  %v14097_v54 = vld [vmem:[#allocation221_spill] sm:$0xff] }
 0x259   : > { %14077 = vst [vmem:[#allocation191_spill] sm:$0xff] %v8022_v37  ;;  %14078 = vst [vmem:[#allocation70_spill] sm:$0xff] %v8026_v33  ;;  %v8053_v28 = vrot.slane %v14052_v31, %v7985_v61  ;;  %v8057_v2 = vrot.slane %v14053_v38, %v7985_v61  ;;  %v1985_v50 = vrot.slane %v14089_v49, 1  ;;  %v8063_v42 = vsel %vm1906_vm5, %v8010_v30, %v1893_v48  ;;  %v14098_v52 = vld [vmem:[#allocation222_spill] sm:$0xff] }
 0x25a   : > { %14079 = vst [vmem:[#allocation211_spill] sm:$0xff] %v8030_v20  ;;  %14080 = vst [vmem:[#allocation239_spill] sm:$0xff] %v8034_v59  ;;  %v8068_v13 = vsel %vm1906_vm5, %v8014_v58, %v1894_v63  ;;  %v8073_v31 = vsel %vm1906_vm5, %v8018_v43, %v1895_v22  ;;  %v8078_v38 = vsel %vm1906_vm5, %v8022_v37, %v1896_v0  ;;  %v1986_v34 = vrot.slane %v14095_v10, 1  ;;  %v14101_v37 = vld [vmem:[#allocation225_spill] sm:$0xff]  ;;  %v14103_v58 = vld [vmem:[#allocation227_spill] sm:$0xff] }
 0x25b   : > { %14081 = vst [vmem:[#allocation28_spill] sm:$0xff] %v8038_v6  ;;  %14082 = vst [vmem:[#allocation153_spill] sm:$0xff] %v8042_v51  ;;  %v8083_v48 = vsel %vm1906_vm5, %v8026_v33, %v1897_v18  ;;  %v8088_v63 = vsel %vm1906_vm5, %v8030_v20, %v1898_v21  ;;  %v8093_v22 = vsel %vm1906_vm5, %v8034_v59, %v1899_v56  ;;  %v1987_v21 = vrot.slane %v14096_v23, 1  ;;  %v14099_v56 = vld [vmem:[#allocation223_spill] sm:$0xff]  ;;  %v14100_v20 = vld [vmem:[#allocation224_spill] sm:$0xff] }
 0x25c   : > { %14086 = vst [vmem:[#allocation154_spill] sm:$0xff] %v8049_v5  ;;  %14087 = vst [vmem:[#allocation31_spill] sm:$0xff] %v8053_v28  ;;  %v8098_v0 = vsel %vm1906_vm5, %v8038_v6, %v1900_v39  ;;  %v8103_v18 = vsel %vm1906_vm5, %v8042_v51, %v1901_v57  ;;  %v1988_v41 = vrot.slane %v14097_v54, 1  ;;  %v1989_v49 = vrot.slane %v14098_v52, 1  ;;  %v14102_v6 = vld [vmem:[#allocation226_spill] sm:$0xff]  ;;  %v14104_v57 = vld [vmem:[#allocation228_spill] sm:$0xff] }
 0x25d   : > { %14088 = vst [vmem:[#allocation155_spill] sm:$0xff] %v8057_v2  ;;  %14090 = vst [vmem:[#allocation156_spill] sm:$0xff] %v8063_v42  ;;  %v1991_v59 = vrot.slane %v14099_v56, 1  ;;  %v1992_v33 = vrot.slane %v14100_v20, 1  ;;  %v1993_v39 = vrot.slane %v14101_v37, 1  ;;  %v1994_v43 = vrot.slane %v14102_v6, 1 }
 0x25e   : > { %14091 = vst [vmem:[#allocation32_spill] sm:$0xff] %v8088_v63  ;;  %14092 = vst [vmem:[#allocation172_spill] sm:$0xff] %v8093_v22  ;;  %v1995_v30 = vrot.slane %v14103_v58, 1  ;;  %v1996_v51 = vrot.slane %v14104_v57, 1  ;;  %v1997_v10 = vrot.slane %v14105_v62, 1  ;;  %v1998_v23 = vrot.slane %v14106_v40, 1 }
 0x25f   : > { %14093 = vst [vmem:[#allocation173_spill] sm:$0xff] %v8098_v0  ;;  %14094 = vst [vmem:[#allocation193_spill] sm:$0xff] %v8103_v18  ;;  %v1999_v54 = vrot.slane %v14107_v8, 1  ;;  %v2000_v52 = vrot.slane %v14108_v55, 1  ;;  %v8123_v1 = vsel %vm1906_vm5, %v8049_v5, %v1902_v47  ;;  %v8128_v25 = vsel %vm1906_vm5, %v8053_v28, %v1903_v53  ;;  %v14113_v18 = vld [vmem:[#allocation235_spill] sm:$0xff] }
 0x260   : > { %14110 = vst [vmem:[#allocation174_spill] sm:$0xff] %v8123_v1  ;;  %14111 = vst [vmem:[#allocation194_spill] sm:$0xff] %v8128_v25  ;;  %v1990_v36 = vrot.slane %v14112_v4, 1  ;;  %v2002_v24 = vrot.slane %v14113_v18, 1  ;;  %v8135_v0 = vsel %vm1906_vm5, %v8057_v2, %v1904_v32  ;;  %v8139_v12 = vsel %vm1880_vm4, %v1979_v9, %v1991_v59 }
 0x261   : > { %14114 = vst [vmem:[#allocation175_spill] sm:$0xff] %v8135_v0  ;;  %v8143_v47 = vsel %vm1880_vm4, %v1980_v60, %v1992_v33  ;;  %v8147_v53 = vsel %vm1880_vm4, %v1981_v19, %v1993_v39  ;;  %v8151_v4 = vsel %vm1880_vm4, %v1982_v46, %v1994_v43  ;;  %v8155_v32 = vsel %vm1880_vm4, %v1983_v35, %v1995_v30 }
 0x262   : > { %14115 = vst [vmem:[#allocation195_spill] sm:$0xff] %v8143_v47  ;;  %14116 = vst [vmem:[#allocation176_spill] sm:$0xff] %v8147_v53  ;;  %v8159_v2 = vsel %vm1880_vm4, %v1984_v27, %v1996_v51  ;;  %v8163_v28 = vsel %vm1880_vm4, %v1985_v50, %v1997_v10  ;;  %v8167_v5 = vsel %vm1880_vm4, %v1986_v34, %v1998_v23  ;;  %v2122_v26 = vmul.f32 0.23388076, %v8135_v0 }
 0x263   : > { %14117 = vst [vmem:[#allocation86_spill] sm:$0xff] %v8151_v4  ;;  %14118 = vst [vmem:[#allocation196_spill] sm:$0xff] %v8155_v32  ;;  %v8171_v53 = vsel %vm1880_vm4, %v1987_v21, %v1999_v54  ;;  %v8175_v4 = vsel %vm1880_vm4, %v1988_v41, %v2000_v52  ;;  %v8179_v32 = vsel %vm1880_vm4, %v1989_v49, %v2001_v16 }
 0x264   : > { %14119 = vst [vmem:[#allocation204_spill] sm:$0xff] %v8159_v2  ;;  %14120 = vst [vmem:[#allocation177_spill] sm:$0xff] %v8163_v28  ;;  %v8183_v2 = vsel %vm1880_vm4, %v1990_v36, %v2002_v24  ;;  %v2015_v28 = vsel %vm1880_vm4, %v1991_v59, %v1979_v9  ;;  %v2019_v47 = vsel %vm1880_vm4, %v1995_v30, %v1983_v35 }
 0x265   : > { %14121 = vst [vmem:[#allocation118_spill] sm:$0xff] %v8167_v5  ;;  %14122 = vst [vmem:[#allocation205_spill] sm:$0xff] %v8171_v53  ;;  %v2016_v5 = vsel %vm1880_vm4, %v1992_v33, %v1980_v60  ;;  %v2017_v53 = vsel %vm1880_vm4, %v1993_v39, %v1981_v19  ;;  %v2022_v9 = vsel %vm1880_vm4, %v1998_v23, %v1986_v34  ;;  %v2104_v39 = vmul.f32 0.23388076, %v8073_v31 }
 0x266   : > { %14123 = vst [vmem:[#allocation178_spill] sm:$0xff] %v8175_v4  ;;  %14124 = vst [vmem:[#allocation120_spill] sm:$0xff] %v8179_v32  ;;  %v2018_v4 = vsel %vm1880_vm4, %v1994_v43, %v1982_v46  ;;  %v2020_v32 = vsel %vm1880_vm4, %v1996_v51, %v1984_v27  ;;  %v8203_v60 = vrot.slane %v14099_v56, %v7985_v61  ;;  %v2103_v56 = vmul.f32 0.23388076, %v7939_v17 }
 0x267   : > { %14125 = vst [vmem:[#allocation198_spill] sm:$0xff] %v8183_v2  ;;  %v2021_v2 = vsel %vm1880_vm4, %v1997_v10, %v1985_v50  ;;  %v8207_v19 = vrot.slane %v14100_v20, %v7985_v61  ;;  %v8211_v30 = vrot.slane %v14101_v37, %v7985_v61  ;;  %v2023_v43 = vsel %vm1880_vm4, %v1999_v54, %v1987_v21 }
 0x268   : > { %14126 = vst [vmem:[#allocation206_spill] sm:$0xff] %v8203_v60  ;;  %v8217_v33 = vrot.slane %v14102_v6, %v7985_v61  ;;  %v8221_v59 = vrot.slane %v14103_v58, %v7985_v61  ;;  %v8225_v51 = vrot.slane %v14104_v57, %v7985_v61  ;;  %v2024_v20 = vsel %vm1880_vm4, %v2000_v52, %v1988_v41  ;;  %v14144_v52 = vld [vmem:[#allocation80_spill] sm:$0xff] }
 0x269   : > { %14127 = vst [vmem:[#allocation179_spill] sm:$0xff] %v8207_v19  ;;  %14128 = vst [vmem:[#allocation64_spill] sm:$0xff] %v8211_v30  ;;  %v8231_v37 = vrot.slane %v14105_v62, %v7985_v61  ;;  %v8235_v46 = vrot.slane %v14106_v40, %v7985_v61  ;;  %v8239_v6 = vrot.slane %v14107_v8, %v7985_v61  ;;  %v2101_v41 = vmul.f32 0.23388076, %v7935_v3 }
 0x26a   : > { %14129 = vst [vmem:[#allocation199_spill] sm:$0xff] %v8217_v33  ;;  %14130 = vst [vmem:[#allocation207_spill] sm:$0xff] %v8221_v59  ;;  %v2025_v58 = vsel %vm1880_vm4, %v2001_v16, %v1989_v49  ;;  %v8245_v35 = vrot.slane %v14108_v55, %v7985_v61  ;;  %v8249_v27 = vrot.slane %v14109_v15, %v7985_v61  ;;  %v2102_v49 = vmul.f32 0.23388076, %v8068_v13 }
 0x26b   : > { %14131 = vst [vmem:[#allocation180_spill] sm:$0xff] %v8225_v51  ;;  %14132 = vst [vmem:[#allocation69_spill] sm:$0xff] %v8231_v37  ;;  %v8253_v62 = vrot.slane %v14113_v18, %v7985_v61  ;;  %v2026_v40 = vsel %vm1880_vm4, %v2002_v24, %v1990_v36  ;;  %v8260_v8 = vsel %vm1906_vm5, %v8203_v60, %v2015_v28  ;;  %v2099_v24 = vmul.f32 0.23388076, %v7931_v14 }
 0x26c   : > { %14133 = vst [vmem:[#allocation157_spill] sm:$0xff] %v8235_v46  ;;  %14134 = vst [vmem:[#allocation33_spill] sm:$0xff] %v8239_v6  ;;  %v8265_v16 = vsel %vm1906_vm5, %v8207_v19, %v2016_v5  ;;  %v8270_v15 = vsel %vm1906_vm5, %v8211_v30, %v2017_v53  ;;  %v8275_v55 = vsel %vm1906_vm5, %v8217_v33, %v2018_v4  ;;  %v2100_v18 = vmul.f32 0.23388076, %v8063_v42  ;;  %v14157_v33 = vld [vmem:[#allocation171_spill] sm:$0xff] }
 0x26d   : > { %14135 = vst [vmem:[#allocation35_spill] sm:$0xff] %v8245_v35  ;;  %14136 = vst [vmem:[#allocation36_spill] sm:$0xff] %v8249_v27  ;;  %v8280_v61 = vsel %vm1906_vm5, %v8221_v59, %v2019_v47  ;;  %v8285_v36 = vsel %vm1906_vm5, %v8225_v51, %v2020_v32  ;;  %v8291_v5 = vsel %vm1906_vm5, %v8231_v37, %v2021_v2  ;;  %v2105_v10 = vmul.f32 0.23388076, %v7943_v29  ;;  %v14154_v51 = vld [vmem:[#allocation87_spill] sm:$0xff] }
 0x26e   : > { %14137 = vst [vmem:[#allocation37_spill] sm:$0xff] %v8253_v62  ;;  %14138 = vst [vmem:[#allocation53_spill] sm:$0xff] %v8291_v5  ;;  %v8296_v28 = vsel %vm1906_vm5, %v8235_v46, %v2022_v9  ;;  %v8301_v50 = vsel %vm1906_vm5, %v8239_v6, %v2023_v43  ;;  %v8307_v34 = vsel %vm1906_vm5, %v8245_v35, %v2024_v20  ;;  %v2106_v23 = vmul.f32 0.23388076, %v8078_v38  ;;  %v14146_v9 = vld [vmem:[#allocation83_spill] sm:$0xff]  ;;  %v14153_v46 = vld [vmem:[#allocation193_spill] sm:$0xff] }
 0x26f   : > { %14139 = vst [vmem:[#allocation54_spill] sm:$0xff] %v8296_v28  ;;  %14140 = vst [vmem:[#allocation59_spill] sm:$0xff] %v8301_v50  ;;  %v8312_v2 = vsel %vm1906_vm5, %v8249_v27, %v2025_v58  ;;  %v8317_v21 = vsel %vm1906_vm5, %v8253_v62, %v2026_v40  ;;  %v8325_v57 = vmul.f32 %v7931_v14, %v7931_v14  ;;  %v2107_v54 = vmul.f32 0.23388076, %v7948_v45  ;;  %v14148_v40 = vld [vmem:[#allocation187_spill] sm:$0xff]  ;;  %v14149_v27 = vld [vmem:[#allocation85_spill] sm:$0xff] }
 0x270   : > { %14141 = vst [vmem:[#allocation124_spill] sm:$0xff] %v8307_v34  ;;  %14142 = vst [vmem:[#allocation25_spill] sm:$0xff] %v8312_v2  ;;  %v8331_v47 = vadd.f32 %v2099_v24, %v14144_v52  ;;  %v2108_v53 = vmul.f32 0.23388076, %v8083_v48  ;;  %v2109_v4 = vmul.f32 0.23388076, %v7952_v7  ;;  %v8337_v43 = vadd.f32 %v2100_v18, %v14146_v9 }
 0x271   : > { %14143 = vst [vmem:[#allocation158_spill] sm:$0xff] %v8317_v21  ;;  %v2110_v32 = vmul.f32 0.23388076, %v8088_v63  ;;  %v2111_v20 = vmul.f32 0.23388076, %v7956_v11  ;;  %v8343_v35 = vadd.f32 %v2101_v41, %v14149_v27  ;;  %v14151_v24 = vld [vmem:[#allocation173_spill] sm:$0xff]  ;;  %v8349_v59 = vadd.f32 %v2102_v49, %v14154_v51 }
 0x272   : > { %14145 = vst [vmem:[#allocation159_spill] sm:$0xff] %v8331_v47  ;;  %14147 = vst [vmem:[#allocation160_spill] sm:$0xff] %v8337_v43  ;;  %v2112_v58 = vmul.f32 0.23388076, %v8093_v22  ;;  %v2113_v62 = vmul.f32 0.23388076, %v14148_v40  ;;  %v8361_v14 = vadd.f32 %v2104_v39, %v14161_v44 }
 0x273   : > { %14150 = vst [vmem:[#allocation197_spill] sm:$0xff] %v8343_v35  ;;  %v2114_v52 = vmul.f32 0.23388076, %v14151_v24  ;;  %v14152_v47 = vld [vmem:[#allocation170_spill] sm:$0xff]  ;;  %v2116_v37 = vmul.f32 0.23388076, %v14153_v46 }
 0x274   : > { %v2115_v6 = vmul.f32 0.23388076, %v14152_v47  ;;  %14155 = vst [vmem:[#allocation161_spill] sm:$0xff] %v8349_v59  ;;  %v14156_v18 = vld [vmem:[#allocation188_spill] sm:$0xff]  ;;  %v2118_v43 = vmul.f32 0.23388076, %v8123_v1 }
 0x275   : > { %v2117_v9 = vmul.f32 0.23388076, %v14156_v18  ;;  %v2119_v30 = vmul.f32 0.23388076, %v14157_v33  ;;  %v14158_v19 = vld [vmem:[#allocation119_spill] sm:$0xff]  ;;  %v14160_v41 = vld [vmem:[#allocation189_spill] sm:$0xff] }
 0x276   : > { %v8355_v60 = vadd.f32 %v2103_v56, %v14158_v19  ;;  %v2120_v27 = vmul.f32 0.23388076, %v8128_v25  ;;  %v2121_v35 = vmul.f32 0.23388076, %v14160_v41  ;;  %14162 = vst [vmem:[#allocation163_spill] sm:$0xff] %v8361_v14  ;;  %v14163_v51 = vld [vmem:[#allocation201_spill] sm:$0xff] }
 0x277   : > { %v8364_v49 = vadd.f32 %v2105_v10, %v14163_v51  ;;  %v14165_v59 = vld [vmem:[#allocation202_spill] sm:$0xff]  ;;  %v14167_v1 = vld [vmem:[#allocation29_spill] sm:$0xff] }
 0x278   : > { %14159 = vst [vmem:[#allocation162_spill] sm:$0xff] %v8355_v60  ;;  %v8367_v18 = vadd.f32 %v2106_v23, %v14165_v59  ;;  %v8370_v33 = vadd.f32 %v2107_v54, %v14167_v1  ;;  %v14169_v19 = vld [vmem:[#allocation34_spill] sm:$0xff]  ;;  %v14173_v41 = vld [vmem:[#allocation41_spill] sm:$0xff]  ;;  %v14179_v59 = vld [vmem:[#allocation55_spill] sm:$0xff] }
 0x279   : > { %14164 = vst [vmem:[#allocation212_spill] sm:$0xff] %v8364_v49  ;;  %v8373_v56 = vadd.f32 %v2108_v53, %v14169_v19  ;;  %v14171_v60 = vld [vmem:[#allocation38_spill] sm:$0xff]  ;;  %v8379_v0 = vadd.f32 %v2110_v32, %v14173_v41  ;;  %v14175_v44 = vld [vmem:[#allocation45_spill] sm:$0xff]  ;;  %v8388_v23 = vadd.f32 %v2113_v62, %v14179_v59  ;;  %v14181_v1 = vld [vmem:[#allocation60_spill] sm:$0xff]  ;;  %v2148_v62 = vmul.f32 0.23388076, %v8260_v8 }
 0x27a   : > { %14166 = vst [vmem:[#allocation213_spill] sm:$0xff] %v8367_v18  ;;  %14168 = vst [vmem:[#allocation214_spill] sm:$0xff] %v8370_v33  ;;  %v8376_v25 = vadd.f32 %v2109_v4, %v14171_v60  ;;  %v8382_v39 = vadd.f32 %v2111_v20, %v14175_v44  ;;  %v14177_v10 = vld [vmem:[#allocation49_spill] sm:$0xff]  ;;  %v8391_v54 = vadd.f32 %v2114_v52, %v14181_v1  ;;  %v14183_v53 = vld [vmem:[#allocation66_spill] sm:$0xff]  ;;  %v2147_v60 = vmul.f32 0.23388076, %v8139_v12 }
 0x27b   : > { %14170 = vst [vmem:[#allocation215_spill] sm:$0xff] %v8373_v56  ;;  %14174 = vst [vmem:[#allocation217_spill] sm:$0xff] %v8379_v0  ;;  %v8385_v51 = vadd.f32 %v2112_v58, %v14177_v10  ;;  %v8394_v19 = vadd.f32 %v2115_v6, %v14183_v53  ;;  %v14185_v4 = vld [vmem:[#allocation76_spill] sm:$0xff]  ;;  %v14187_v41 = vld [vmem:[#allocation81_spill] sm:$0xff]  ;;  %v2166_v49 = vmul.f32 0.23388076, %v8307_v34 }
 0x27c   : > { %14172 = vst [vmem:[#allocation216_spill] sm:$0xff] %v8376_v25  ;;  %14176 = vst [vmem:[#allocation218_spill] sm:$0xff] %v8382_v39  ;;  %v8398_v32 = vadd.f32 %v2116_v37, %v14185_v4  ;;  %v8401_v20 = vadd.f32 %v2117_v9, %v14187_v41  ;;  %v14189_v44 = vld [vmem:[#allocation90_spill] sm:$0xff]  ;;  %v14191_v10 = vld [vmem:[#allocation91_spill] sm:$0xff]  ;;  %v2150_v9 = vmul.f32 0.23388076, %v8265_v16 }
 0x27d   : > { %14178 = vst [vmem:[#allocation219_spill] sm:$0xff] %v8385_v51  ;;  %14180 = vst [vmem:[#allocation220_spill] sm:$0xff] %v8388_v23  ;;  %v8404_v58 = vadd.f32 %v2118_v43, %v14189_v44  ;;  %v8408_v59 = vadd.f32 %v2119_v30, %v14191_v10  ;;  %v14193_v52 = vld [vmem:[#allocation92_spill] sm:$0xff]  ;;  %v14195_v6 = vld [vmem:[#allocation94_spill] sm:$0xff]  ;;  %v8424_v44 = vmul.f32 %v8063_v42, %v8063_v42  ;;  %v2152_v30 = vmul.f32 0.23388076, %v8270_v15 }
 0x27e   : > { %14182 = vst [vmem:[#allocation221_spill] sm:$0xff] %v8391_v54  ;;  %14184 = vst [vmem:[#allocation222_spill] sm:$0xff] %v8394_v19  ;;  %v8411_v1 = vadd.f32 %v2120_v27, %v14193_v52  ;;  %v8414_v53 = vadd.f32 %v2121_v35, %v14195_v6  ;;  %v14197_v19 = vld [vmem:[#allocation195_spill] sm:$0xff]  ;;  %v14200_v43 = vld [vmem:[#allocation176_spill] sm:$0xff]  ;;  %v2154_v35 = vmul.f32 0.23388076, %v8275_v55 }
 0x27f   : > { %14186 = vst [vmem:[#allocation223_spill] sm:$0xff] %v8398_v32  ;;  %14188 = vst [vmem:[#allocation224_spill] sm:$0xff] %v8401_v20  ;;  %v2149_v37 = vmul.f32 0.23388076, %v14197_v19  ;;  %v14198_v4 = vld [vmem:[#allocation95_spill] sm:$0xff]  ;;  %v14201_v27 = vld [vmem:[#allocation86_spill] sm:$0xff] }
 0x280   : > { %14190 = vst [vmem:[#allocation225_spill] sm:$0xff] %v8404_v58  ;;  %14192 = vst [vmem:[#allocation226_spill] sm:$0xff] %v8408_v59  ;;  %v8418_v32 = vadd.f32 %v2122_v26, %v14198_v4  ;;  %v2151_v41 = vmul.f32 0.23388076, %v14200_v43  ;;  %v2153_v10 = vmul.f32 0.23388076, %v14201_v27 }
 0x281   : > { %14194 = vst [vmem:[#allocation227_spill] sm:$0xff] %v8411_v1  ;;  %14196 = vst [vmem:[#allocation228_spill] sm:$0xff] %v8414_v53  ;;  %v14202_v52 = vld [vmem:[#allocation96_spill] sm:$0xff]  ;;  %v2156_v4 = vmul.f32 0.23388076, %v8280_v61  ;;  %v14206_v59 = vld [vmem:[#allocation98_spill] sm:$0xff] }
 0x282   : > { %14199 = vst [vmem:[#allocation229_spill] sm:$0xff] %v8418_v32  ;;  %v8430_v6 = vadd.f32 %v2147_v60, %v14202_v52  ;;  %v14204_v53 = vld [vmem:[#allocation196_spill] sm:$0xff]  ;;  %v8436_v58 = vadd.f32 %v2148_v62, %v14206_v59  ;;  %v2158_v20 = vmul.f32 0.23388076, %v8285_v36  ;;  %v14208_v54 = vld [vmem:[#allocation177_spill] sm:$0xff]  ;;  %v14209_v39 = vld [vmem:[#allocation99_spill] sm:$0xff] }
 0x283   : > { %v2155_v26 = vmul.f32 0.23388076, %v14204_v53  ;;  %v14205_v32 = vld [vmem:[#allocation204_spill] sm:$0xff]  ;;  %v2159_v23 = vmul.f32 0.23388076, %v14208_v54  ;;  %v8442_v0 = vadd.f32 %v2149_v37, %v14209_v39  ;;  %v14211_v60 = vld [vmem:[#allocation118_spill] sm:$0xff] }
 0x284   : > { %14203 = vst [vmem:[#allocation230_spill] sm:$0xff] %v8430_v6  ;;  %v2157_v1 = vmul.f32 0.23388076, %v14205_v32  ;;  %14207 = vst [vmem:[#allocation231_spill] sm:$0xff] %v8436_v58  ;;  %v2160_v51 = vmul.f32 0.23388076, %v8291_v5 }
 0x285   : > { %14210 = vst [vmem:[#allocation233_spill] sm:$0xff] %v8442_v0  ;;  %v2161_v52 = vmul.f32 0.23388076, %v14211_v60  ;;  %v2162_v6 = vmul.f32 0.23388076, %v8296_v28  ;;  %v14212_v25 = vld [vmem:[#allocation205_spill] sm:$0xff] }
 0x286   : > { %v2163_v56 = vmul.f32 0.23388076, %v14212_v25  ;;  %v14213_v33 = vld [vmem:[#allocation100_spill] sm:$0xff]  ;;  %v2164_v62 = vmul.f32 0.23388076, %v8301_v50  ;;  %v14215_v59 = vld [vmem:[#allocation178_spill] sm:$0xff] }
 0x287   : > { %v8448_v18 = vadd.f32 %v2150_v9, %v14213_v33  ;;  %v2165_v58 = vmul.f32 0.23388076, %v14215_v59  ;;  %v14216_v14 = vld [vmem:[#allocation101_spill] sm:$0xff]  ;;  %v14218_v39 = vld [vmem:[#allocation120_spill] sm:$0xff]  ;;  %v2168_v0 = vmul.f32 0.23388076, %v8312_v2 }
 0x288   : > { %v8454_v42 = vadd.f32 %v2151_v41, %v14216_v14  ;;  %v2167_v37 = vmul.f32 0.23388076, %v14218_v39  ;;  %v14219_v60 = vld [vmem:[#allocation198_spill] sm:$0xff]  ;;  %v2170_v33 = vmul.f32 0.23388076, %v8317_v21  ;;  %v14222_v9 = vld [vmem:[#allocation103_spill] sm:$0xff] }
 0x289   : > { %14214 = vst [vmem:[#allocation234_spill] sm:$0xff] %v8448_v18  ;;  %v2169_v28 = vmul.f32 0.23388076, %v14219_v60  ;;  %v14220_v5 = vld [vmem:[#allocation102_spill] sm:$0xff]  ;;  %v8464_v18 = vadd.f32 %v2153_v10, %v14222_v9  ;;  %v14224_v59 = vld [vmem:[#allocation104_spill] sm:$0xff]  ;;  %v14226_v34 = vld [vmem:[#allocation105_spill] sm:$0xff] }
 0x28a   : > { %14217 = vst [vmem:[#allocation232_spill] sm:$0xff] %v8454_v42  ;;  %v8460_v25 = vadd.f32 %v2152_v30, %v14220_v5  ;;  %v8467_v50 = vadd.f32 %v2154_v35, %v14224_v59  ;;  %v8470_v14 = vadd.f32 %v2155_v26, %v14226_v34  ;;  %v14228_v41 = vld [vmem:[#allocation75_spill] sm:$0xff]  ;;  %v14232_v60 = vld [vmem:[#allocation236_spill] sm:$0xff]  ;;  %v14234_v30 = vld [vmem:[#allocation106_spill] sm:$0xff] }
 0x28b   : > { %14223 = vst [vmem:[#allocation80_spill] sm:$0xff] %v8464_v18  ;;  %v8473_v42 = vadd.f32 %v2156_v4, %v14228_v41  ;;  %v14230_v2 = vld [vmem:[#allocation79_spill] sm:$0xff]  ;;  %v8479_v5 = vadd.f32 %v2158_v20, %v14232_v60  ;;  %v14236_v10 = vld [vmem:[#allocation237_spill] sm:$0xff]  ;;  %v14238_v35 = vld [vmem:[#allocation82_spill] sm:$0xff] }
 0x28c   : > { %14221 = vst [vmem:[#allocation235_spill] sm:$0xff] %v8460_v25  ;;  %14225 = vst [vmem:[#allocation83_spill] sm:$0xff] %v8467_v50  ;;  %v8476_v39 = vadd.f32 %v2157_v1, %v14230_v2  ;;  %v8482_v25 = vadd.f32 %v2159_v23, %v14234_v30  ;;  %v8485_v9 = vadd.f32 %v2160_v51, %v14236_v10  ;;  %v14240_v34 = vld [vmem:[#allocation108_spill] sm:$0xff]  ;;  %v14244_v2 = vld [vmem:[#allocation109_spill] sm:$0xff] }
 0x28d   : > { %14227 = vst [vmem:[#allocation85_spill] sm:$0xff] %v8470_v14  ;;  %14229 = vst [vmem:[#allocation87_spill] sm:$0xff] %v8473_v42  ;;  %v8488_v59 = vadd.f32 %v2161_v52, %v14238_v35  ;;  %v8491_v26 = vadd.f32 %v2162_v6, %v14240_v34  ;;  %v14242_v4 = vld [vmem:[#allocation84_spill] sm:$0xff]  ;;  %v8497_v1 = vadd.f32 %v2164_v62, %v14244_v2  ;;  %v14246_v20 = vld [vmem:[#allocation110_spill] sm:$0xff] }
 0x28e   : > { %14231 = vst [vmem:[#allocation119_spill] sm:$0xff] %v8476_v39  ;;  %14233 = vst [vmem:[#allocation200_spill] sm:$0xff] %v8479_v5  ;;  %v8494_v41 = vadd.f32 %v2163_v56, %v14242_v4  ;;  %v8500_v60 = vadd.f32 %v2165_v58, %v14246_v20  ;;  %v14248_v23 = vld [vmem:[#allocation112_spill] sm:$0xff]  ;;  %v14250_v51 = vld [vmem:[#allocation113_spill] sm:$0xff]  ;;  %v2197_v62 = vmul.f32 %v7935_v3, %v7935_v3 }
 0x28f   : > { %14235 = vst [vmem:[#allocation201_spill] sm:$0xff] %v8482_v25  ;;  %14237 = vst [vmem:[#allocation202_spill] sm:$0xff] %v8485_v9  ;;  %v8503_v30 = vadd.f32 %v2166_v49, %v14248_v23  ;;  %v8506_v10 = vadd.f32 %v2167_v37, %v14250_v51  ;;  %v14252_v52 = vld [vmem:[#allocation114_spill] sm:$0xff]  ;;  %v14254_v6 = vld [vmem:[#allocation115_spill] sm:$0xff]  ;;  %v2198_v58 = vmul.f32 %v8068_v13, %v8068_v13 }
 0x290   : > { %14239 = vst [vmem:[#allocation29_spill] sm:$0xff] %v8488_v59  ;;  %14241 = vst [vmem:[#allocation34_spill] sm:$0xff] %v8491_v26  ;;  %v8509_v35 = vadd.f32 %v2168_v0, %v14252_v52  ;;  %v8512_v34 = vadd.f32 %v2169_v28, %v14254_v6  ;;  %v14256_v56 = vld [vmem:[#allocation116_spill] sm:$0xff]  ;;  %v2199_v49 = vmul.f32 %v7939_v17, %v7939_v17  ;;  %v2220_v59 = vmul.f32 0.23388076, %v8424_v44  ;;  %v14261_v9 = vld [vmem:[#allocation194_spill] sm:$0xff] }
 0x291   : > { %14243 = vst [vmem:[#allocation38_spill] sm:$0xff] %v8494_v41  ;;  %14245 = vst [vmem:[#allocation41_spill] sm:$0xff] %v8497_v1  ;;  %v8515_v4 = vadd.f32 %v2170_v33, %v14256_v56  ;;  %v2200_v37 = vmul.f32 %v8073_v31, %v8073_v31  ;;  %v2201_v0 = vmul.f32 %v7943_v29, %v7943_v29  ;;  %v14260_v41 = vld [vmem:[#allocation171_spill] sm:$0xff]  ;;  %v14262_v5 = vld [vmem:[#allocation189_spill] sm:$0xff]  ;;  %v2221_v14 = vmul.f32 0.23388076, %v2197_v62 }
 0x292   : > { %14247 = vst [vmem:[#allocation45_spill] sm:$0xff] %v8500_v60  ;;  %14249 = vst [vmem:[#allocation49_spill] sm:$0xff] %v8503_v30  ;;  %v2202_v28 = vmul.f32 %v8078_v38, %v8078_v38  ;;  %v2203_v33 = vmul.f32 %v7948_v45, %v7948_v45  ;;  %v2204_v2 = vmul.f32 %v8083_v48, %v8083_v48  ;;  %v14259_v60 = vld [vmem:[#allocation174_spill] sm:$0xff]  ;;  %v14263_v42 = vld [vmem:[#allocation175_spill] sm:$0xff]  ;;  %v2222_v50 = vmul.f32 0.23388076, %v2198_v58 }
 0x293   : > { %14251 = vst [vmem:[#allocation55_spill] sm:$0xff] %v8506_v10  ;;  %14253 = vst [vmem:[#allocation60_spill] sm:$0xff] %v8509_v35  ;;  %v2205_v20 = vmul.f32 %v7952_v7, %v7952_v7  ;;  %v2206_v23 = vmul.f32 %v8088_v63, %v8088_v63  ;;  %v2207_v51 = vmul.f32 %v7956_v11, %v7956_v11  ;;  %v2219_v35 = vmul.f32 0.23388076, %v8325_v57  ;;  %v14258_v10 = vld [vmem:[#allocation188_spill] sm:$0xff]  ;;  %v14264_v44 = vld [vmem:[#allocation117_spill] sm:$0xff] }
 0x294   : > { %14255 = vst [vmem:[#allocation66_spill] sm:$0xff] %v8512_v34  ;;  %14257 = vst [vmem:[#allocation76_spill] sm:$0xff] %v8515_v4  ;;  %v2208_v52 = vmul.f32 %v8093_v22, %v8093_v22  ;;  %v2209_v6 = vmul.f32 %v14148_v40, %v14148_v40  ;;  %v2210_v56 = vmul.f32 %v14151_v24, %v14151_v24  ;;  %v2223_v18 = vmul.f32 0.23388076, %v2199_v49  ;;  %v14268_v49 = vld [vmem:[#allocation122_spill] sm:$0xff] }
 0x295   : > { %v2211_v4 = vmul.f32 %v14152_v47, %v14152_v47  ;;  %v2212_v34 = vmul.f32 %v14153_v46, %v14153_v46  ;;  %v2213_v30 = vmul.f32 %v14258_v10, %v14258_v10  ;;  %v2214_v1 = vmul.f32 %v14259_v60, %v14259_v60 }
 0x296   : > { %v2215_v26 = vmul.f32 %v14260_v41, %v14260_v41  ;;  %v2216_v25 = vmul.f32 %v14261_v9, %v14261_v9  ;;  %v2217_v39 = vmul.f32 %v14262_v5, %v14262_v5  ;;  %v2218_v57 = vmul.f32 %v14263_v42, %v14263_v42  ;;  %v14266_v5 = vld [vmem:[#allocation121_spill] sm:$0xff] }
 0x297   : > { %v2224_v10 = vmul.f32 0.23388076, %v2200_v37  ;;  %v2267_v60 = vmul.f32 %v8139_v12, %v8139_v12  ;;  %v2225_v46 = vmul.f32 0.23388076, %v2201_v0  ;;  %v2226_v41 = vmul.f32 0.23388076, %v2202_v28 }
 0x298   : > { %v2227_v47 = vmul.f32 0.23388076, %v2203_v33  ;;  %v8566_v24 = vadd.f32 %v2219_v35, %v14264_v44  ;;  %v2228_v9 = vmul.f32 0.23388076, %v2204_v2  ;;  %v2229_v40 = vmul.f32 0.23388076, %v2205_v20 }
 0x299   : > { %v2230_v22 = vmul.f32 0.23388076, %v2206_v23  ;;  %v8569_v11 = vadd.f32 %v2220_v59, %v14266_v5  ;;  %v2231_v42 = vmul.f32 0.23388076, %v2207_v51  ;;  %v2232_v62 = vmul.f32 0.23388076, %v2208_v52 }
 0x29a   : > { %14265 = vst [vmem:[#allocation81_spill] sm:$0xff] %v8566_v24  ;;  %v2233_v58 = vmul.f32 0.23388076, %v2209_v6  ;;  %v8572_v37 = vadd.f32 %v2221_v14, %v14268_v49  ;;  %v2234_v63 = vmul.f32 0.23388076, %v2210_v56  ;;  %v14270_v28 = vld [vmem:[#allocation123_spill] sm:$0xff] }
 0x29b   : > { %14267 = vst [vmem:[#allocation90_spill] sm:$0xff] %v8569_v11  ;;  %v2235_v7 = vmul.f32 0.23388076, %v2211_v4  ;;  %v2236_v0 = vmul.f32 0.23388076, %v2212_v34  ;;  %v8575_v33 = vadd.f32 %v2222_v50, %v14270_v28  ;;  %v14272_v20 = vld [vmem:[#allocation126_spill] sm:$0xff] }
 0x29c   : > { %14269 = vst [vmem:[#allocation91_spill] sm:$0xff] %v8572_v37  ;;  %v2237_v35 = vmul.f32 0.23388076, %v2213_v30  ;;  %v2238_v44 = vmul.f32 0.23388076, %v2214_v1  ;;  %v8578_v23 = vadd.f32 %v2223_v18, %v14272_v20  ;;  %v14274_v52 = vld [vmem:[#allocation127_spill] sm:$0xff] }
 0x29d   : > { %14271 = vst [vmem:[#allocation92_spill] sm:$0xff] %v8575_v33  ;;  %v2239_v2 = vmul.f32 0.23388076, %v2215_v26  ;;  %v2240_v5 = vmul.f32 0.23388076, %v2216_v25  ;;  %v8581_v6 = vadd.f32 %v2224_v10, %v14274_v52  ;;  %v14276_v14 = vld [vmem:[#allocation128_spill] sm:$0xff] }
 0x29e   : > { %14273 = vst [vmem:[#allocation94_spill] sm:$0xff] %v8578_v23  ;;  %v2241_v59 = vmul.f32 0.23388076, %v2217_v39  ;;  %v2242_v51 = vmul.f32 0.23388076, %v2218_v57  ;;  %v8584_v49 = vadd.f32 %v2225_v46, %v14276_v14  ;;  %v14278_v4 = vld [vmem:[#allocation130_spill] sm:$0xff] }
 0x29f   : > { %14275 = vst [vmem:[#allocation195_spill] sm:$0xff] %v8581_v6  ;;  %v8587_v34 = vadd.f32 %v2226_v41, %v14278_v4  ;;  %v14280_v50 = vld [vmem:[#allocation131_spill] sm:$0xff]  ;;  %v14282_v1 = vld [vmem:[#allocation132_spill] sm:$0xff]  ;;  %v14284_v18 = vld [vmem:[#allocation74_spill] sm:$0xff] }
 0x2a0   : > { %14277 = vst [vmem:[#allocation95_spill] sm:$0xff] %v8584_v49  ;;  %v8590_v56 = vadd.f32 %v2227_v47, %v14280_v50  ;;  %v8593_v26 = vadd.f32 %v2228_v9, %v14282_v1  ;;  %v8596_v30 = vadd.f32 %v2229_v40, %v14284_v18  ;;  %v14286_v25 = vld [vmem:[#allocation78_spill] sm:$0xff]  ;;  %v14290_v46 = vld [vmem:[#allocation135_spill] sm:$0xff]  ;;  %v14292_v41 = vld [vmem:[#allocation136_spill] sm:$0xff]  ;;  %v2290_v49 = vmul.f32 %v8317_v21, %v8317_v21 }
 0x2a1   : > { %14279 = vst [vmem:[#allocation176_spill] sm:$0xff] %v8587_v34  ;;  %v8599_v39 = vadd.f32 %v2230_v22, %v14286_v25  ;;  %v14288_v10 = vld [vmem:[#allocation134_spill] sm:$0xff]  ;;  %v8605_v28 = vadd.f32 %v2232_v62, %v14290_v46  ;;  %v8608_v20 = vadd.f32 %v2233_v58, %v14292_v41  ;;  %v14296_v9 = vld [vmem:[#allocation208_spill] sm:$0xff]  ;;  %v14298_v40 = vld [vmem:[#allocation139_spill] sm:$0xff]  ;;  %v2275_v41 = vmul.f32 %v14204_v53, %v14204_v53 }
 0x2a2   : > { %14281 = vst [vmem:[#allocation86_spill] sm:$0xff] %v8590_v56  ;;  %14283 = vst [vmem:[#allocation96_spill] sm:$0xff] %v8593_v26  ;;  %v8602_v57 = vadd.f32 %v2231_v42, %v14288_v10  ;;  %v14294_v47 = vld [vmem:[#allocation138_spill] sm:$0xff]  ;;  %v8614_v14 = vadd.f32 %v2235_v7, %v14296_v9  ;;  %v8617_v4 = vadd.f32 %v2236_v0, %v14298_v40  ;;  %v14300_v22 = vld [vmem:[#allocation140_spill] sm:$0xff] }
 0x2a3   : > { %14285 = vst [vmem:[#allocation196_spill] sm:$0xff] %v8596_v30  ;;  %14287 = vst [vmem:[#allocation204_spill] sm:$0xff] %v8599_v39  ;;  %v8611_v52 = vadd.f32 %v2234_v63, %v14294_v47  ;;  %v8620_v50 = vadd.f32 %v2237_v35, %v14300_v22  ;;  %v14302_v42 = vld [vmem:[#allocation141_spill] sm:$0xff]  ;;  %v14304_v62 = vld [vmem:[#allocation142_spill] sm:$0xff]  ;;  %v2268_v0 = vmul.f32 %v8260_v8, %v8260_v8 }
 0x2a4   : > { %14289 = vst [vmem:[#allocation98_spill] sm:$0xff] %v8602_v57  ;;  %14291 = vst [vmem:[#allocation177_spill] sm:$0xff] %v8605_v28  ;;  %v8623_v1 = vadd.f32 %v2238_v44, %v14302_v42  ;;  %v8626_v18 = vadd.f32 %v2239_v2, %v14304_v62  ;;  %v14306_v58 = vld [vmem:[#allocation143_spill] sm:$0xff]  ;;  %v14310_v7 = vld [vmem:[#allocation40_spill] sm:$0xff]  ;;  %v2269_v35 = vmul.f32 %v14197_v19, %v14197_v19 }
 0x2a5   : > { %14293 = vst [vmem:[#allocation99_spill] sm:$0xff] %v8608_v20  ;;  %14295 = vst [vmem:[#allocation100_spill] sm:$0xff] %v8611_v52  ;;  %v8629_v25 = vadd.f32 %v2240_v5, %v14306_v58  ;;  %v14308_v63 = vld [vmem:[#allocation39_spill] sm:$0xff]  ;;  %v8635_v46 = vadd.f32 %v2242_v51, %v14310_v7  ;;  %v2270_v44 = vmul.f32 %v8265_v16, %v8265_v16  ;;  %v14312_v42 = vld [vmem:[#allocation53_spill] sm:$0xff]  ;;  %v2292_v39 = vmul.f32 0.23388076, %v2268_v0 }
 0x2a6   : > { %14297 = vst [vmem:[#allocation101_spill] sm:$0xff] %v8614_v14  ;;  %14299 = vst [vmem:[#allocation102_spill] sm:$0xff] %v8617_v4  ;;  %v8632_v10 = vadd.f32 %v2241_v59, %v14308_v63  ;;  %v2271_v2 = vmul.f32 %v14200_v43, %v14200_v43  ;;  %v2272_v5 = vmul.f32 %v8270_v15, %v8270_v15  ;;  %v14313_v58 = vld [vmem:[#allocation118_spill] sm:$0xff]  ;;  %v14318_v52 = vld [vmem:[#allocation124_spill] sm:$0xff] }
 0x2a7   : > { %14301 = vst [vmem:[#allocation103_spill] sm:$0xff] %v8620_v50  ;;  %14303 = vst [vmem:[#allocation104_spill] sm:$0xff] %v8623_v1  ;;  %v2273_v59 = vmul.f32 %v14201_v27, %v14201_v27  ;;  %v2274_v51 = vmul.f32 %v8275_v55, %v8275_v55  ;;  %v2276_v47 = vmul.f32 %v8280_v61, %v8280_v61  ;;  %v14314_v7 = vld [vmem:[#allocation54_spill] sm:$0xff]  ;;  %v2291_v50 = vmul.f32 0.23388076, %v2267_v60  ;;  %v14319_v28 = vld [vmem:[#allocation120_spill] sm:$0xff] }
 0x2a8   : > { %14305 = vst [vmem:[#allocation105_spill] sm:$0xff] %v8626_v18  ;;  %14307 = vst [vmem:[#allocation75_spill] sm:$0xff] %v8629_v25  ;;  %v2277_v9 = vmul.f32 %v14205_v32, %v14205_v32  ;;  %v2278_v40 = vmul.f32 %v8285_v36, %v8285_v36  ;;  %v2279_v22 = vmul.f32 %v14208_v54, %v14208_v54  ;;  %v14316_v18 = vld [vmem:[#allocation59_spill] sm:$0xff]  ;;  %v14317_v4 = vld [vmem:[#allocation178_spill] sm:$0xff]  ;;  %v2293_v60 = vmul.f32 0.23388076, %v2269_v35 }
 0x2a9   : > { %14309 = vst [vmem:[#allocation79_spill] sm:$0xff] %v8632_v10  ;;  %14311 = vst [vmem:[#allocation236_spill] sm:$0xff] %v8635_v46  ;;  %v2280_v62 = vmul.f32 %v14312_v42, %v14312_v42  ;;  %v2281_v63 = vmul.f32 %v14313_v58, %v14313_v58  ;;  %v2282_v46 = vmul.f32 %v14314_v7, %v14314_v7  ;;  %v14315_v10 = vld [vmem:[#allocation205_spill] sm:$0xff]  ;;  %v14321_v56 = vld [vmem:[#allocation198_spill] sm:$0xff]  ;;  %v2294_v6 = vmul.f32 0.23388076, %v2270_v44 }
 0x2aa   : > { %v2283_v25 = vmul.f32 %v14315_v10, %v14315_v10  ;;  %v2284_v1 = vmul.f32 %v14316_v18, %v14316_v18  ;;  %v2285_v14 = vmul.f32 %v14317_v4, %v14317_v4  ;;  %v2286_v20 = vmul.f32 %v14318_v52, %v14318_v52  ;;  %v14320_v30 = vld [vmem:[#allocation25_spill] sm:$0xff]  ;;  %v14322_v37 = vld [vmem:[#allocation168_spill] sm:$0xff]  ;;  %v14323_v0 = vld [vmem:[#allocation42_spill] sm:$0xff] }
 0x2ab   : > { %v2287_v57 = vmul.f32 %v14319_v28, %v14319_v28  ;;  %v2288_v26 = vmul.f32 %v14320_v30, %v14320_v30  ;;  %v2289_v34 = vmul.f32 %v14321_v56, %v14321_v56  ;;  %v2295_v23 = vmul.f32 0.23388076, %v2271_v2  ;;  %v14325_v56 = vld [vmem:[#allocation43_spill] sm:$0xff]  ;;  %v14327_v2 = vld [vmem:[#allocation44_spill] sm:$0xff] }
 0x2ac   : > { %v2296_v33 = vmul.f32 0.23388076, %v2272_v5  ;;  %v2339_v11 = vmul.f32 %v8139_v12, %v14322_v37  ;;  %v2297_v24 = vmul.f32 0.23388076, %v2273_v59  ;;  %v2298_v52 = vmul.f32 0.23388076, %v2274_v51 }
 0x2ad   : > { %v2299_v28 = vmul.f32 0.23388076, %v2275_v41  ;;  %v8686_v4 = vadd.f32 %v2291_v50, %v14323_v0  ;;  %v2300_v30 = vmul.f32 0.23388076, %v2276_v47  ;;  %v2301_v18 = vmul.f32 0.23388076, %v2277_v9 }
 0x2ae   : > { %v2302_v10 = vmul.f32 0.23388076, %v2278_v40  ;;  %v8689_v7 = vadd.f32 %v2292_v39, %v14325_v56  ;;  %v2303_v21 = vmul.f32 0.23388076, %v2279_v22  ;;  %v2304_v35 = vmul.f32 0.23388076, %v2280_v62 }
 0x2af   : > { %14324 = vst [vmem:[#allocation106_spill] sm:$0xff] %v8686_v4  ;;  %v2305_v44 = vmul.f32 0.23388076, %v2281_v63  ;;  %v8692_v5 = vadd.f32 %v2293_v60, %v14327_v2  ;;  %v2306_v58 = vmul.f32 0.23388076, %v2282_v46  ;;  %v14329_v59 = vld [vmem:[#allocation46_spill] sm:$0xff] }
 0x2b0   : > { %14326 = vst [vmem:[#allocation237_spill] sm:$0xff] %v8689_v7  ;;  %v2307_v12 = vmul.f32 0.23388076, %v2283_v25  ;;  %v2308_v37 = vmul.f32 0.23388076, %v2284_v1  ;;  %v8695_v51 = vadd.f32 %v2294_v6, %v14329_v59  ;;  %v14331_v9 = vld [vmem:[#allocation47_spill] sm:$0xff] }
 0x2b1   : > { %14328 = vst [vmem:[#allocation82_spill] sm:$0xff] %v8692_v5  ;;  %v2309_v50 = vmul.f32 0.23388076, %v2285_v14  ;;  %v2310_v41 = vmul.f32 0.23388076, %v2286_v20  ;;  %v8698_v40 = vadd.f32 %v2295_v23, %v14331_v9  ;;  %v14333_v62 = vld [vmem:[#allocation48_spill] sm:$0xff] }
 0x2b2   : > { %14330 = vst [vmem:[#allocation108_spill] sm:$0xff] %v8695_v51  ;;  %v2311_v47 = vmul.f32 0.23388076, %v2287_v57  ;;  %v2312_v56 = vmul.f32 0.23388076, %v2288_v26  ;;  %v8701_v63 = vadd.f32 %v2296_v33, %v14333_v62  ;;  %v14335_v60 = vld [vmem:[#allocation50_spill] sm:$0xff] }
 0x2b3   : > { %14332 = vst [vmem:[#allocation84_spill] sm:$0xff] %v8698_v40  ;;  %v2313_v39 = vmul.f32 0.23388076, %v2289_v34  ;;  %v2314_v22 = vmul.f32 0.23388076, %v2290_v49  ;;  %v8704_v0 = vadd.f32 %v2297_v24, %v14335_v60  ;;  %v14337_v25 = vld [vmem:[#allocation51_spill] sm:$0xff] }
 0x2b4   : > { %14334 = vst [vmem:[#allocation109_spill] sm:$0xff] %v8701_v63  ;;  %v8707_v1 = vadd.f32 %v2298_v52, %v14337_v25  ;;  %v14339_v6 = vld [vmem:[#allocation52_spill] sm:$0xff]  ;;  %v14343_v23 = vld [vmem:[#allocation57_spill] sm:$0xff]  ;;  %v14345_v34 = vld [vmem:[#allocation58_spill] sm:$0xff] }
 0x2b5   : > { %14336 = vst [vmem:[#allocation110_spill] sm:$0xff] %v8704_v0  ;;  %v8710_v46 = vadd.f32 %v2299_v28, %v14339_v6  ;;  %v14341_v20 = vld [vmem:[#allocation56_spill] sm:$0xff]  ;;  %v8716_v14 = vadd.f32 %v2301_v18, %v14343_v23  ;;  %v8719_v49 = vadd.f32 %v2302_v10, %v14345_v34  ;;  %v14347_v33 = vld [vmem:[#allocation65_spill] sm:$0xff]  ;;  %v14349_v24 = vld [vmem:[#allocation238_spill] sm:$0xff] }
 0x2b6   : > { %14338 = vst [vmem:[#allocation112_spill] sm:$0xff] %v8707_v1  ;;  %v8713_v57 = vadd.f32 %v2300_v30, %v14341_v20  ;;  %v8722_v26 = vadd.f32 %v2303_v21, %v14347_v33  ;;  %v8725_v2 = vadd.f32 %v2304_v35, %v14349_v24  ;;  %v14351_v52 = vld [vmem:[#allocation30_spill] sm:$0xff]  ;;  %v14353_v28 = vld [vmem:[#allocation164_spill] sm:$0xff]  ;;  %v14355_v30 = vld [vmem:[#allocation61_spill] sm:$0xff] }
 0x2b7   : > { %14340 = vst [vmem:[#allocation113_spill] sm:$0xff] %v8710_v46  ;;  %14344 = vst [vmem:[#allocation115_spill] sm:$0xff] %v8716_v14  ;;  %v8728_v59 = vadd.f32 %v2305_v44, %v14351_v52  ;;  %v8731_v9 = vadd.f32 %v2306_v58, %v14353_v28  ;;  %v8734_v62 = vadd.f32 %v2307_v12, %v14355_v30  ;;  %v14357_v18 = vld [vmem:[#allocation62_spill] sm:$0xff]  ;;  %v14359_v10 = vld [vmem:[#allocation63_spill] sm:$0xff] }
 0x2b8   : > { %14342 = vst [vmem:[#allocation114_spill] sm:$0xff] %v8713_v57  ;;  %14346 = vst [vmem:[#allocation116_spill] sm:$0xff] %v8719_v49  ;;  %v8737_v60 = vadd.f32 %v2308_v37, %v14357_v18  ;;  %v8740_v25 = vadd.f32 %v2309_v50, %v14359_v10  ;;  %v14361_v21 = vld [vmem:[#allocation67_spill] sm:$0xff]  ;;  %v14363_v35 = vld [vmem:[#allocation68_spill] sm:$0xff]  ;;  %v2341_v50 = vmul.f32 %v14197_v19, %v7935_v3  ;;  %v2363_v10 = vmul.f32 0.23388076, %v2339_v11 }
 0x2b9   : > { %14348 = vst [vmem:[#allocation117_spill] sm:$0xff] %v8722_v26  ;;  %14350 = vst [vmem:[#allocation121_spill] sm:$0xff] %v8725_v2  ;;  %v8743_v6 = vadd.f32 %v2310_v41, %v14361_v21  ;;  %v8746_v20 = vadd.f32 %v2311_v47, %v14363_v35  ;;  %v14365_v44 = vld [vmem:[#allocation203_spill] sm:$0xff]  ;;  %v14367_v58 = vld [vmem:[#allocation192_spill] sm:$0xff]  ;;  %v2342_v41 = vmul.f32 %v8265_v16, %v8068_v13 }
 0x2ba   : > { %14352 = vst [vmem:[#allocation122_spill] sm:$0xff] %v8728_v59  ;;  %14354 = vst [vmem:[#allocation123_spill] sm:$0xff] %v8731_v9  ;;  %v8749_v23 = vadd.f32 %v2312_v56, %v14365_v44  ;;  %v8752_v34 = vadd.f32 %v2313_v39, %v14367_v58  ;;  %v14369_v12 = vld [vmem:[#allocation71_spill] sm:$0xff]  ;;  %v14371_v37 = vld [vmem:[#allocation156_spill] sm:$0xff]  ;;  %v2343_v47 = vmul.f32 %v14200_v43, %v7939_v17 }
 0x2bb   : > { %14356 = vst [vmem:[#allocation126_spill] sm:$0xff] %v8734_v62  ;;  %14358 = vst [vmem:[#allocation127_spill] sm:$0xff] %v8737_v60  ;;  %v8755_v33 = vadd.f32 %v2314_v22, %v14369_v12  ;;  %v2340_v24 = vmul.f32 %v8260_v8, %v14371_v37  ;;  %v2344_v56 = vmul.f32 %v8270_v15, %v8073_v31  ;;  %v14372_v19 = vld [vmem:[#allocation186_spill] sm:$0xff]  ;;  %v14373_v16 = vld [vmem:[#allocation32_spill] sm:$0xff] }
 0x2bc   : > { %14360 = vst [vmem:[#allocation128_spill] sm:$0xff] %v8740_v25  ;;  %14362 = vst [vmem:[#allocation130_spill] sm:$0xff] %v8743_v6  ;;  %v2345_v39 = vmul.f32 %v14201_v27, %v7943_v29  ;;  %v2346_v22 = vmul.f32 %v8275_v55, %v8078_v38  ;;  %v2347_v8 = vmul.f32 %v14204_v53, %v7948_v45  ;;  %v14374_v43 = vld [vmem:[#allocation169_spill] sm:$0xff]  ;;  %v14375_v15 = vld [vmem:[#allocation172_spill] sm:$0xff] }
 0x2bd   : > { %14364 = vst [vmem:[#allocation131_spill] sm:$0xff] %v8746_v20  ;;  %14366 = vst [vmem:[#allocation132_spill] sm:$0xff] %v8749_v23  ;;  %v2348_v3 = vmul.f32 %v8280_v61, %v8083_v48  ;;  %v2349_v13 = vmul.f32 %v14205_v32, %v14372_v19  ;;  %v2350_v17 = vmul.f32 %v8285_v36, %v14373_v16  ;;  %v14376_v27 = vld [vmem:[#allocation187_spill] sm:$0xff]  ;;  %v14377_v38 = vld [vmem:[#allocation118_spill] sm:$0xff]  ;;  %v2364_v19 = vmul.f32 0.23388076, %v2340_v24 }
 0x2be   : > { %14368 = vst [vmem:[#allocation74_spill] sm:$0xff] %v8752_v34  ;;  %14370 = vst [vmem:[#allocation78_spill] sm:$0xff] %v8755_v33  ;;  %v2351_v31 = vmul.f32 %v14208_v54, %v14374_v43  ;;  %v2352_v29 = vmul.f32 %v14312_v42, %v14375_v15  ;;  %v2353_v55 = vmul.f32 %v14377_v38, %v14376_v27  ;;  %v14378_v52 = vld [vmem:[#allocation173_spill] sm:$0xff]  ;;  %v14379_v45 = vld [vmem:[#allocation54_spill] sm:$0xff]  ;;  %v2370_v33 = vmul.f32 0.23388076, %v2346_v22 }
 0x2bf   : > { %v2354_v53 = vmul.f32 %v14379_v45, %v14378_v52  ;;  %v14380_v28 = vld [vmem:[#allocation170_spill] sm:$0xff]  ;;  %v14381_v48 = vld [vmem:[#allocation205_spill] sm:$0xff]  ;;  %v14383_v32 = vld [vmem:[#allocation59_spill] sm:$0xff]  ;;  %v2365_v45 = vmul.f32 0.23388076, %v2341_v50 }
 0x2c0   : > { %v2355_v61 = vmul.f32 %v14381_v48, %v14380_v28  ;;  %v14382_v30 = vld [vmem:[#allocation193_spill] sm:$0xff]  ;;  %v14384_v36 = vld [vmem:[#allocation188_spill] sm:$0xff]  ;;  %v14385_v21 = vld [vmem:[#allocation178_spill] sm:$0xff]  ;;  %v2366_v28 = vmul.f32 0.23388076, %v2342_v41 }
 0x2c1   : > { %v2356_v18 = vmul.f32 %v14383_v32, %v14382_v30  ;;  %v2357_v35 = vmul.f32 %v14385_v21, %v14384_v36  ;;  %v14386_v54 = vld [vmem:[#allocation174_spill] sm:$0xff]  ;;  %v14387_v44 = vld [vmem:[#allocation124_spill] sm:$0xff]  ;;  %v14388_v42 = vld [vmem:[#allocation171_spill] sm:$0xff]  ;;  %v2367_v32 = vmul.f32 0.23388076, %v2343_v47 }
 0x2c2   : > { %v2358_v58 = vmul.f32 %v14387_v44, %v14386_v54  ;;  %v14389_v12 = vld [vmem:[#allocation120_spill] sm:$0xff]  ;;  %v14390_v16 = vld [vmem:[#allocation194_spill] sm:$0xff]  ;;  %v14391_v43 = vld [vmem:[#allocation25_spill] sm:$0xff]  ;;  %v2368_v36 = vmul.f32 0.23388076, %v2344_v56 }
 0x2c3   : > { %v2359_v37 = vmul.f32 %v14389_v12, %v14388_v42  ;;  %v2360_v15 = vmul.f32 %v14391_v43, %v14390_v16  ;;  %v14392_v27 = vld [vmem:[#allocation189_spill] sm:$0xff]  ;;  %v14393_v38 = vld [vmem:[#allocation198_spill] sm:$0xff]  ;;  %v14394_v48 = vld [vmem:[#allocation175_spill] sm:$0xff]  ;;  %v2369_v21 = vmul.f32 0.23388076, %v2345_v39 }
 0x2c4   : > { %v2361_v52 = vmul.f32 %v14393_v38, %v14392_v27  ;;  %v14395_v11 = vld [vmem:[#allocation158_spill] sm:$0xff]  ;;  %v2371_v54 = vmul.f32 0.23388076, %v2347_v8  ;;  %v2372_v44 = vmul.f32 0.23388076, %v2348_v3  ;;  %v14396_v34 = vld [vmem:[#allocation72_spill] sm:$0xff] }
 0x2c5   : > { %v2362_v30 = vmul.f32 %v14395_v11, %v14394_v48  ;;  %v8804_v42 = vadd.f32 %v2363_v10, %v14396_v34  ;;  %v2373_v24 = vmul.f32 0.23388076, %v2349_v13  ;;  %v2374_v12 = vmul.f32 0.23388076, %v2350_v17  ;;  %v14398_v43 = vld [vmem:[#allocation73_spill] sm:$0xff]  ;;  %v14402_v22 = vld [vmem:[#allocation144_spill] sm:$0xff] }
 0x2c6   : > { %v2375_v16 = vmul.f32 0.23388076, %v2351_v31  ;;  %v8807_v23 = vadd.f32 %v2364_v19, %v14398_v43  ;;  %v2376_v50 = vmul.f32 0.23388076, %v2352_v29  ;;  %v2377_v41 = vmul.f32 0.23388076, %v2353_v55 }
 0x2c7   : > { %14397 = vst [vmem:[#allocation134_spill] sm:$0xff] %v8804_v42  ;;  %v2378_v27 = vmul.f32 0.23388076, %v2354_v53  ;;  %v14400_v38 = vld [vmem:[#allocation77_spill] sm:$0xff]  ;;  %v2379_v47 = vmul.f32 0.23388076, %v2355_v61  ;;  %v8813_v8 = vadd.f32 %v2366_v28, %v14402_v22 }
 0x2c8   : > { %14399 = vst [vmem:[#allocation135_spill] sm:$0xff] %v8807_v23  ;;  %v8810_v48 = vadd.f32 %v2365_v45, %v14400_v38  ;;  %v2380_v56 = vmul.f32 0.23388076, %v2356_v18  ;;  %v2381_v39 = vmul.f32 0.23388076, %v2357_v35  ;;  %v14404_v17 = vld [vmem:[#allocation22_spill] sm:$0xff] }
 0x2c9   : > { %14403 = vst [vmem:[#allocation138_spill] sm:$0xff] %v8813_v8  ;;  %v2382_v34 = vmul.f32 0.23388076, %v2358_v58  ;;  %v2383_v3 = vmul.f32 0.23388076, %v2359_v37  ;;  %v8816_v31 = vadd.f32 %v2367_v32, %v14404_v17  ;;  %v14406_v29 = vld [vmem:[#allocation145_spill] sm:$0xff] }
 0x2ca   : > { %14401 = vst [vmem:[#allocation136_spill] sm:$0xff] %v8810_v48  ;;  %v2384_v13 = vmul.f32 0.23388076, %v2360_v15  ;;  %v2385_v10 = vmul.f32 0.23388076, %v2361_v52  ;;  %v8819_v55 = vadd.f32 %v2368_v36, %v14406_v29  ;;  %v14408_v53 = vld [vmem:[#allocation146_spill] sm:$0xff] }
 0x2cb   : > { %14405 = vst [vmem:[#allocation208_spill] sm:$0xff] %v8816_v31  ;;  %v2386_v19 = vmul.f32 0.23388076, %v2362_v30  ;;  %v8822_v45 = vadd.f32 %v2369_v21, %v14408_v53  ;;  %v14410_v61 = vld [vmem:[#allocation23_spill] sm:$0xff]  ;;  %v14414_v58 = vld [vmem:[#allocation148_spill] sm:$0xff]  ;;  %v14416_v15 = vld [vmem:[#allocation26_spill] sm:$0xff] }
 0x2cc   : > { %14407 = vst [vmem:[#allocation139_spill] sm:$0xff] %v8819_v55  ;;  %v8825_v18 = vadd.f32 %v2370_v33, %v14410_v61  ;;  %v14412_v35 = vld [vmem:[#allocation147_spill] sm:$0xff]  ;;  %v8831_v37 = vadd.f32 %v2372_v44, %v14414_v58  ;;  %v8834_v11 = vadd.f32 %v2373_v24, %v14416_v15  ;;  %v14418_v52 = vld [vmem:[#allocation149_spill] sm:$0xff]  ;;  %v14420_v32 = vld [vmem:[#allocation150_spill] sm:$0xff] }
 0x2cd   : > { %14409 = vst [vmem:[#allocation140_spill] sm:$0xff] %v8822_v45  ;;  %v8828_v28 = vadd.f32 %v2371_v54, %v14412_v35  ;;  %v8837_v30 = vadd.f32 %v2374_v12, %v14418_v52  ;;  %v8840_v36 = vadd.f32 %v2375_v16, %v14420_v32  ;;  %v14422_v21 = vld [vmem:[#allocation27_spill] sm:$0xff]  ;;  %v14426_v38 = vld [vmem:[#allocation152_spill] sm:$0xff]  ;;  %v14428_v24 = vld [vmem:[#allocation181_spill] sm:$0xff] }
 0x2ce   : > { %14411 = vst [vmem:[#allocation141_spill] sm:$0xff] %v8825_v18  ;;  %14415 = vst [vmem:[#allocation143_spill] sm:$0xff] %v8831_v37  ;;  %v8843_v33 = vadd.f32 %v2376_v50, %v14422_v21  ;;  %v14424_v54 = vld [vmem:[#allocation151_spill] sm:$0xff]  ;;  %v8849_v44 = vadd.f32 %v2378_v27, %v14426_v38  ;;  %v8852_v22 = vadd.f32 %v2379_v47, %v14428_v24  ;;  %v14430_v17 = vld [vmem:[#allocation182_spill] sm:$0xff] }
 0x2cf   : > { %14413 = vst [vmem:[#allocation142_spill] sm:$0xff] %v8828_v28  ;;  %14417 = vst [vmem:[#allocation39_spill] sm:$0xff] %v8834_v11  ;;  %v8846_v43 = vadd.f32 %v2377_v41, %v14424_v54  ;;  %v8855_v12 = vadd.f32 %v2380_v56, %v14430_v17  ;;  %v14432_v16 = vld [vmem:[#allocation165_spill] sm:$0xff]  ;;  %v14434_v53 = vld [vmem:[#allocation183_spill] sm:$0xff] }
 0x2d0   : > { %14419 = vst [vmem:[#allocation40_spill] sm:$0xff] %v8837_v30  ;;  %14421 = vst [vmem:[#allocation53_spill] sm:$0xff] %v8840_v36  ;;  %v8858_v29 = vadd.f32 %v2381_v39, %v14432_v16  ;;  %v8861_v50 = vadd.f32 %v2382_v34, %v14434_v53  ;;  %v14436_v41 = vld [vmem:[#allocation166_spill] sm:$0xff]  ;;  %v14438_v35 = vld [vmem:[#allocation184_spill] sm:$0xff] }
 0x2d1   : > { %14423 = vst [vmem:[#allocation168_spill] sm:$0xff] %v8843_v33  ;;  %14425 = vst [vmem:[#allocation42_spill] sm:$0xff] %v8846_v43  ;;  %v8864_v61 = vadd.f32 %v2383_v3, %v14436_v41  ;;  %v8867_v27 = vadd.f32 %v2384_v13, %v14438_v35  ;;  %v14440_v47 = vld [vmem:[#allocation167_spill] sm:$0xff]  ;;  %v14442_v15 = vld [vmem:[#allocation185_spill] sm:$0xff] }
 0x2d2   : > { %14427 = vst [vmem:[#allocation43_spill] sm:$0xff] %v8849_v44  ;;  %14429 = vst [vmem:[#allocation44_spill] sm:$0xff] %v8852_v22  ;;  %v8870_v58 = vadd.f32 %v2385_v10, %v14440_v47  ;;  %v8873_v56 = vadd.f32 %v2386_v19, %v14442_v15  ;;  %v8876_v39 = vld [vmem:[%s5017_s9] sm:$0xff]  ;;  %v8880_v52 = vld [vmem:[%s5017_s9 + $0x10] sm:$0xff] }
 0x2d3   : > { %14431 = vst [vmem:[#allocation46_spill] sm:$0xff] %v8855_v12  ;;  %14433 = vst [vmem:[#allocation47_spill] sm:$0xff] %v8858_v29  ;;  %v2411_v34 = vrot.slane %v8876_v39, 2  ;;  %v2412_v3 = vrot.slane %v8880_v52, 2  ;;  %v4443_v32 = vld [vmem:[%s5017_s9 + $0x20] sm:$0xff]  ;;  %v4444_v21 = vld [vmem:[%s5017_s9 + $0x30] sm:$0xff] }
 0x2d4   : > { %14435 = vst [vmem:[#allocation48_spill] sm:$0xff] %v8861_v50  ;;  %14437 = vst [vmem:[#allocation50_spill] sm:$0xff] %v8864_v61  ;;  %v2413_v13 = vrot.slane %v4443_v32, 2  ;;  %v2414_v10 = vrot.slane %v4444_v21, 2  ;;  %v4445_v54 = vld [vmem:[%s5017_s9 + $0x40] sm:$0xff]  ;;  %v4446_v38 = vld [vmem:[%s5017_s9 + $0x50] sm:$0xff] }
 0x2d5   : > { %14439 = vst [vmem:[#allocation51_spill] sm:$0xff] %v8867_v27  ;;  %14441 = vst [vmem:[#allocation52_spill] sm:$0xff] %v8870_v58  ;;  %v2415_v19 = vrot.slane %v4445_v54, 2  ;;  %v2416_v24 = vrot.slane %v4446_v38, 2  ;;  %v4447_v17 = vld [vmem:[%s5017_s9 + $0x60] sm:$0xff]  ;;  %v4448_v53 = vld [vmem:[%s5017_s9 + $0x70] sm:$0xff] }
 0x2d6   : > { %14443 = vst [vmem:[#allocation56_spill] sm:$0xff] %v8873_v56  ;;  %v2417_v16 = vrot.slane %v4447_v17, 2  ;;  %v2418_v41 = vrot.slane %v4448_v53, 2  ;;  %v4449_v35 = vld [vmem:[%s5025_s30] sm:$0xff]  ;;  %v4450_v15 = vld [vmem:[%s5025_s30 + $0x10] sm:$0xff]  ;;  %v8894_v56 = vld [vmem:[%s5017_s9 + $0x8] sm:$0xff] }
 0x2d7   : > { %v2419_v47 = vrot.slane %v4449_v35, 2  ;;  %v2420_v39 = vrot.slane %v4450_v15, 2  ;;  %v4451_v52 = vld [vmem:[%s5025_s30 + $0x20] sm:$0xff]  ;;  %v4452_v21 = vld [vmem:[%s5025_s30 + $0x30] sm:$0xff]  ;;  %v2423_v38 = vrot.slane %v8894_v56, 2  ;;  %v8898_v17 = vld [vmem:[%s5017_s9 + $0x18] sm:$0xff] }
 0x2d8   : > { %v2421_v32 = vrot.slane %v4451_v52, 2  ;;  %v2422_v54 = vrot.slane %v4452_v21, 2  ;;  %v2424_v53 = vrot.slane %v8898_v17, 2  ;;  %v8902_v35 = vld [vmem:[%s5017_s9 + $0x28] sm:$0xff]  ;;  %v8906_v58 = vld [vmem:[%s5017_s9 + $0x38] sm:$0xff]  ;;  %v14444_v11 = vld [vmem:[#allocation21_spill] sm:$0xff] }
 0x2d9   : > { %v2425_v15 = vrot.slane %v8902_v35, 2  ;;  %v2426_v52 = vrot.slane %v8906_v58, 2  ;;  %v8910_v21 = vld [vmem:[%s5017_s9 + $0x48] sm:$0xff]  ;;  %v8914_v61 = vld [vmem:[%s5017_s9 + $0x58] sm:$0xff]  ;;  %vm2435_vm6 = vcmp.lt.s32.totalorder %v14444_v11, 6 }
 0x2da   : > { %v2427_v27 = vrot.slane %v8910_v21, 2  ;;  %v2428_v50 = vrot.slane %v8914_v61, 2  ;;  %v8918_v29 = vld [vmem:[%s5017_s9 + $0x68] sm:$0xff]  ;;  %v8922_v22 = vld [vmem:[%s5017_s9 + $0x78] sm:$0xff]  ;;  %v8944_v55 = vsel %vm2435_vm6, %v2411_v34, %v2423_v38  ;;  %v8949_v8 = vsel %vm2435_vm6, %v2412_v3, %v2424_v53  ;;  %s4607_s9 = sshll.u32 %s4737_s18, 4  ;;  %s4608_s9 = int_to_ptr.vmem [resolvable:$false] %s4607_s9 }
 0x2db   : > { %v2429_v12 = vrot.slane %v8918_v29, 2  ;;  %v2430_v44 = vrot.slane %v8922_v22, 2  ;;  %v8926_v43 = vld [vmem:[%s5025_s30 + $0x8] sm:$0xff]  ;;  %v8930_v36 = vld [vmem:[%s5025_s30 + $0x18] sm:$0xff]  ;;  %14445 = vst [vmem:[#allocation57_spill] sm:$0xff] %v8944_v55  ;;  %v8953_v48 = vsel %vm2435_vm6, %v2413_v13, %v2425_v15  ;;  %v8957_v23 = vsel %vm2435_vm6, %v2414_v10, %v2426_v52  ;;  %s4609_s8 = scalar_lea.vmem %s4608_s9, 256  ;;  %p4610_p13 = scmp.lt.s32.totalorder %s12296_s6, %s4608_s9 }
 0x2dc   : > { %v2431_v33 = vrot.slane %v8926_v43, 2  ;;  %v2432_v30 = vrot.slane %v8930_v36, 2  ;;  %v8935_v37 = vld [vmem:[%s5025_s30 + $0x28] sm:$0xff]  ;;  %v8939_v18 = vld [vmem:[%s5025_s30 + $0x38] sm:$0xff]  ;;  %v8961_v42 = vsel %vm2435_vm6, %v2415_v19, %v2427_v27  ;;  %v8965_v20 = vsel %vm2435_vm6, %v2416_v24, %v2428_v50  ;;  %p4611_p2 = scmp.lt.s32.totalorder %s4609_s8, %s4603_s21 }
 0x2dd   : > { %v2433_v28 = vrot.slane %v8935_v37, 2  ;;  %v2434_v45 = vrot.slane %v8939_v18, 2  ;;  %v14446_v31 = vld [vmem:[#allocation24_spill] sm:$0xff]  ;;  %v8969_v6 = vsel %vm2435_vm6, %v2417_v16, %v2429_v12  ;;  %v8973_v25 = vsel %vm2435_vm6, %v2418_v41, %v2430_v44  ;;  %v9196_v0 = vld [vmem:[%s5037_s13 + $0x18] sm:$0xff] }
 0x2de   : > { %vm2461_vm7 = vcmp.eq.s32.totalorder %v14446_v31, 14  ;;  %14447 = vst [vmem:[#allocation58_spill] sm:$0xff] %v8969_v6  ;;  %14448 = vst [vmem:[#allocation65_spill] sm:$0xff] %v8973_v25  ;;  %v8977_v60 = vsel %vm2435_vm6, %v2419_v47, %v2431_v33  ;;  %v8981_v62 = vsel %vm2435_vm6, %v2420_v39, %v2432_v30  ;;  %v2448_v2 = vsel %vm2435_vm6, %v2423_v38, %v2411_v34  ;;  %v14462_v38 = vld [vmem:[#allocation154_spill] sm:$0xff]  ;;  %v9200_v40 = vld [vmem:[%s5037_s13 + $0x28] sm:$0xff]  ;;  %p4612_p1 = por %p4611_p2, %p4610_p13 }
 0x2df   : > { %14449 = vst [vmem:[#allocation238_spill] sm:$0xff] %v8977_v60  ;;  %14450 = vst [vmem:[#allocation30_spill] sm:$0xff] %v8981_v62  ;;  %v8985_v9 = vsel %vm2435_vm6, %v2421_v32, %v2433_v28  ;;  %v8989_v59 = vsel %vm2435_vm6, %v2422_v54, %v2434_v45  ;;  %v2449_v26 = vsel %vm2435_vm6, %v2424_v53, %v2412_v3  ;;  %v14463_v53 = vld [vmem:[#allocation31_spill] sm:$0xff]  ;;  %v2579_v63 = vrot.slane %v9196_v0, 2  ;;  %v9204_v5 = vld [vmem:[%s5037_s13 + $0x38] sm:$0xff] }
 0x2e0   : > { %14451 = vst [vmem:[#allocation164_spill] sm:$0xff] %v8985_v9  ;;  %14452 = vst [vmem:[#allocation61_spill] sm:$0xff] %v8989_v59  ;;  %v2450_v49 = vsel %vm2435_vm6, %v2425_v15, %v2413_v13  ;;  %v2451_v14 = vsel %vm2435_vm6, %v2426_v52, %v2414_v10  ;;  %v2452_v57 = vsel %vm2435_vm6, %v2427_v27, %v2415_v19  ;;  %v14454_v19 = vld [vmem:[#allocation190_spill] sm:$0xff]  ;;  %v14464_v15 = vld [vmem:[#allocation155_spill] sm:$0xff]  ;;  %v2580_v51 = vrot.slane %v9200_v40, 2  ;;  %p4613_p0 = pnand %p4612_p1, %p4606_p7 }
 0x2e1   : > { %v2453_v46 = vsel %vm2435_vm6, %v2428_v50, %v2416_v24  ;;  %v2454_v1 = vsel %vm2435_vm6, %v2429_v12, %v2417_v16  ;;  %v2455_v34 = vsel %vm2435_vm6, %v2430_v44, %v2418_v41  ;;  %v2456_v3 = vsel %vm2435_vm6, %v2431_v33, %v2419_v47  ;;  %v14453_v12 = vld [vmem:[#allocation209_spill] sm:$0xff]  ;;  %v14456_v24 = vld [vmem:[#allocation191_spill] sm:$0xff]  ;;  %v14457_v16 = vld [vmem:[#allocation70_spill] sm:$0xff] }
 0x2e2   : > { %v2457_v13 = vsel %vm2435_vm6, %v2432_v30, %v2420_v39  ;;  %v2458_v10 = vsel %vm2435_vm6, %v2433_v28, %v2421_v32  ;;  %v2459_v27 = vsel %vm2435_vm6, %v2434_v45, %v2422_v54  ;;  %v9016_v50 = vsub.s32 5, %v14444_v11  ;;  %v14455_v30 = vld [vmem:[#allocation210_spill] sm:$0xff]  ;;  %v14458_v47 = vld [vmem:[#allocation211_spill] sm:$0xff]  ;;  %v14460_v32 = vld [vmem:[#allocation28_spill] sm:$0xff] }
 0x2e3   : > { %v2463_v44 = vsel %vm2461_vm7, %v14453_v12, %v2448_v2  ;;  %v2465_v33 = vsel %vm2461_vm7, %v14454_v19, %v2449_v26  ;;  %v2467_v28 = vsel %vm2461_vm7, %v14455_v30, %v2450_v49  ;;  %v2469_v45 = vsel %vm2461_vm7, %v14456_v24, %v2451_v14  ;;  %v14459_v39 = vld [vmem:[#allocation239_spill] sm:$0xff]  ;;  %v14461_v54 = vld [vmem:[#allocation153_spill] sm:$0xff] }
 0x2e4   : > { %v2471_v41 = vsel %vm2461_vm7, %v14457_v16, %v2452_v57  ;;  %v2473_v2 = vsel %vm2461_vm7, %v14458_v47, %v2453_v46  ;;  %v2475_v26 = vsel %vm2461_vm7, %v14459_v39, %v2454_v1  ;;  %v2477_v49 = vsel %vm2461_vm7, %v14460_v32, %v2455_v34  ;;  %v9057_v34 = vld [vmem:[%s5031_s28] sm:$0xff]  ;;  %v9091_v32 = vld [vmem:[%s5031_s28 + $0x30] sm:$0xff] }
 0x2e5   : > { %v2479_v14 = vsel %vm2461_vm7, %v14461_v54, %v2456_v3  ;;  %v2481_v57 = vsel %vm2461_vm7, %v14462_v38, %v2457_v13  ;;  %v2483_v46 = vsel %vm2461_vm7, %v14463_v53, %v2458_v10  ;;  %v2485_v1 = vsel %vm2461_vm7, %v14464_v15, %v2459_v27  ;;  %v9061_v3 = vld [vmem:[%s5031_s28 + $0x10] sm:$0xff]  ;;  %v9065_v19 = vld [vmem:[%s5031_s28 + $0x20] sm:$0xff]  ;;  %v9192_v13 = vld [vmem:[%s5037_s13 + $0x8] sm:$0xff] }
 0x2e6   : > { %v2489_v52 = vrot.slane %v8894_v56, %v9016_v50  ;;  %v2493_v27 = vrot.slane %v8898_v17, %v9016_v50  ;;  %v2497_v56 = vrot.slane %v8902_v35, %v9016_v50  ;;  %v2501_v30 = vrot.slane %v8906_v58, %v9016_v50  ;;  %v9107_v54 = vld [vmem:[%s5031_s28 + $0x60] sm:$0xff] }
 0x2e7   : > { %v2505_v24 = vrot.slane %v8910_v21, %v9016_v50  ;;  %v2509_v16 = vrot.slane %v8914_v61, %v9016_v50  ;;  %v2513_v47 = vrot.slane %v8918_v29, %v9016_v50  ;;  %v2517_v17 = vrot.slane %v8922_v22, %v9016_v50  ;;  %v9099_v22 = vld [vmem:[%s5031_s28 + $0x40] sm:$0xff]  ;;  %v9188_v61 = vld [vmem:[%s5031_s28 + $0x78] sm:$0xff] }
 0x2e8   : > { %v2521_v39 = vrot.slane %v8926_v43, %v9016_v50  ;;  %v2525_v35 = vrot.slane %v8930_v36, %v9016_v50  ;;  %v2529_v58 = vrot.slane %v8935_v37, %v9016_v50  ;;  %v2533_v21 = vrot.slane %v8939_v18, %v9016_v50  ;;  %v9103_v36 = vld [vmem:[%s5031_s28 + $0x50] sm:$0xff]  ;;  %v9184_v37 = vld [vmem:[%s5031_s28 + $0x68] sm:$0xff] }
 0x2e9   : > { %v9096_v29 = vsel %vm1906_vm5, %v2489_v52, %v2463_v44  ;;  %v9112_v38 = vsel %vm1906_vm5, %v2493_v27, %v2465_v33  ;;  %v9116_v44 = vsel %vm1906_vm5, %v2497_v56, %v2467_v28  ;;  %v9120_v53 = vsel %vm1906_vm5, %v2501_v30, %v2469_v45  ;;  %v4473_v56 = vld [vmem:[%s5037_s13] sm:$0xff]  ;;  %v4474_v30 = vld [vmem:[%s5037_s13 + $0x10] sm:$0xff] }
 0x2ea   : > { %14465 = vst [vmem:[#allocation62_spill] sm:$0xff] %v9096_v29  ;;  %v9124_v15 = vsel %vm1906_vm5, %v2505_v24, %v2471_v41  ;;  %v9128_v52 = vsel %vm1906_vm5, %v2509_v16, %v2473_v2  ;;  %v9132_v33 = vsel %vm1906_vm5, %v2513_v47, %v2475_v26  ;;  %v9136_v28 = vsel %vm1906_vm5, %v2517_v17, %v2477_v49  ;;  %v4472_v49 = vld [vmem:[%s5031_s28 + $0x70] sm:$0xff]  ;;  %v9160_v17 = vld [vmem:[%s5031_s28 + $0x8] sm:$0xff] }
 0x2eb   : > { %14466 = vst [vmem:[#allocation63_spill] sm:$0xff] %v9132_v33  ;;  %14467 = vst [vmem:[#allocation67_spill] sm:$0xff] %v9136_v28  ;;  %v9140_v45 = vsel %vm1906_vm5, %v2521_v39, %v2479_v14  ;;  %v9144_v41 = vsel %vm1906_vm5, %v2525_v35, %v2481_v57  ;;  %v9148_v2 = vsel %vm1906_vm5, %v2529_v58, %v2483_v46  ;;  %v2565_v27 = vrot.slane %v4472_v49, 2  ;;  %v4475_v57 = vld [vmem:[%s5037_s13 + $0x20] sm:$0xff]  ;;  %v4476_v47 = vld [vmem:[%s5037_s13 + $0x30] sm:$0xff] }
 0x2ec   : > { %14468 = vst [vmem:[#allocation68_spill] sm:$0xff] %v9140_v45  ;;  %14469 = vst [vmem:[#allocation203_spill] sm:$0xff] %v9144_v41  ;;  %v9152_v26 = vsel %vm1906_vm5, %v2533_v21, %v2485_v1  ;;  %v2566_v14 = vrot.slane %v4473_v56, 2  ;;  %v2567_v24 = vrot.slane %v4474_v30, 2  ;;  %v2568_v16 = vrot.slane %v4475_v57, 2  ;;  %v9164_v39 = vld [vmem:[%s5031_s28 + $0x18] sm:$0xff] }
 0x2ed   : > { %14470 = vst [vmem:[#allocation192_spill] sm:$0xff] %v9148_v2  ;;  %14471 = vst [vmem:[#allocation71_spill] sm:$0xff] %v9152_v26  ;;  %v2569_v46 = vrot.slane %v4476_v47, 2  ;;  %v2570_v1 = vrot.slane %v9160_v17, 2  ;;  %v2571_v35 = vrot.slane %v9164_v39, 2  ;;  %v9168_v58 = vld [vmem:[%s5031_s28 + $0x28] sm:$0xff] }
 0x2ee   : > { %v2572_v21 = vrot.slane %v9168_v58, 2  ;;  %v9172_v49 = vld [vmem:[%s5031_s28 + $0x38] sm:$0xff]  ;;  %v9176_v30 = vld [vmem:[%s5031_s28 + $0x48] sm:$0xff]  ;;  %v2576_v43 = vrot.slane %v9184_v37, 2  ;;  %v2577_v10 = vrot.slane %v9188_v61, 2  ;;  %v2578_v12 = vrot.slane %v9192_v13, 2 }
 0x2ef   : > { %v2573_v56 = vrot.slane %v9172_v49, 2  ;;  %v2574_v57 = vrot.slane %v9176_v30, 2  ;;  %v9180_v47 = vld [vmem:[%s5031_s28 + $0x58] sm:$0xff]  ;;  %v2581_v7 = vrot.slane %v9204_v5, 2  ;;  %v14472_v4 = vrot.slane %v9057_v34, 2 }
 0x2f0   : > { %v2575_v18 = vrot.slane %v9180_v47, 2  ;;  %v14474_v59 = vrot.slane %v9061_v3, 2  ;;  %v14476_v9 = vrot.slane %v9065_v19, 2  ;;  %v14478_v62 = vrot.slane %v9091_v32, 2 }
 0x2f1   : > { %v9211_v26 = vsel %vm2435_vm6, %v14472_v4, %v2570_v1  ;;  %v14480_v4 = vrot.slane %v9099_v22, 2  ;;  %v2710_v31 = vmul.f32 0.120078385, %v8961_v42 }
 0x2f2   : > { %14473 = vst [vmem:[#allocation156_spill] sm:$0xff] %v9211_v26  ;;  %v9217_v2 = vsel %vm2435_vm6, %v14474_v59, %v2571_v35  ;;  %v9223_v41 = vsel %vm2435_vm6, %v14476_v9, %v2572_v21  ;;  %v9229_v45 = vsel %vm2435_vm6, %v14478_v62, %v2573_v56  ;;  %v14482_v59 = vrot.slane %v9103_v36, 2 }
 0x2f3   : > { %14475 = vst [vmem:[#allocation186_spill] sm:$0xff] %v9217_v2  ;;  %14477 = vst [vmem:[#allocation32_spill] sm:$0xff] %v9223_v41  ;;  %v9235_v26 = vsel %vm2435_vm6, %v14480_v4, %v2574_v57  ;;  %v14484_v9 = vrot.slane %v9107_v54, 2  ;;  %v9251_v62 = vsel %vm2435_vm6, %v2565_v27, %v2577_v10  ;;  %v9255_v4 = vsel %vm2435_vm6, %v2566_v14, %v2578_v12 }
 0x2f4   : > { %14479 = vst [vmem:[#allocation169_spill] sm:$0xff] %v9229_v45  ;;  %14481 = vst [vmem:[#allocation172_spill] sm:$0xff] %v9235_v26  ;;  %v9241_v2 = vsel %vm2435_vm6, %v14482_v59, %v2575_v18  ;;  %v9259_v26 = vsel %vm2435_vm6, %v2567_v24, %v2579_v63  ;;  %v9263_v59 = vsel %vm2435_vm6, %v2568_v16, %v2580_v51  ;;  %v14533_v11 = vld [vmem:[#allocation71_spill] sm:$0xff] }
 0x2f5   : > { %14483 = vst [vmem:[#allocation187_spill] sm:$0xff] %v9241_v2  ;;  %v9247_v41 = vsel %vm2435_vm6, %v14484_v9, %v2576_v43  ;;  %14486 = vst [vmem:[#allocation173_spill] sm:$0xff] %v9251_v62  ;;  %v9267_v9 = vsel %vm2435_vm6, %v2569_v46, %v2581_v7  ;;  %v14492_v2 = vrot.slane %v9061_v3, 2  ;;  %v14496_v3 = vrot.slane %v9103_v36, 2 }
 0x2f6   : > { %14485 = vst [vmem:[#allocation118_spill] sm:$0xff] %v9247_v41  ;;  %14487 = vst [vmem:[#allocation54_spill] sm:$0xff] %v9255_v4  ;;  %v14491_v41 = vrot.slane %v9057_v34, 2  ;;  %v14495_v34 = vrot.slane %v9099_v22, 2  ;;  %v2603_v22 = vsel %vm2435_vm6, %v2579_v63, %v2567_v24  ;;  %v2604_v36 = vsel %vm2435_vm6, %v2580_v51, %v2568_v16  ;;  %v14502_v51 = vld [vmem:[#allocation207_spill] sm:$0xff]  ;;  %v14503_v24 = vld [vmem:[#allocation180_spill] sm:$0xff] }
 0x2f7   : > { %14488 = vst [vmem:[#allocation170_spill] sm:$0xff] %v9259_v26  ;;  %14489 = vst [vmem:[#allocation205_spill] sm:$0xff] %v9263_v59  ;;  %v2595_v4 = vsel %vm2435_vm6, %v2571_v35, %v14492_v2  ;;  %v14493_v26 = vrot.slane %v9065_v19, 2  ;;  %v14494_v59 = vrot.slane %v9091_v32, 2  ;;  %v2599_v2 = vsel %vm2435_vm6, %v2575_v18, %v14496_v3  ;;  %v14498_v35 = vld [vmem:[#allocation206_spill] sm:$0xff] }
 0x2f8   : > { %14490 = vst [vmem:[#allocation193_spill] sm:$0xff] %v9267_v9  ;;  %v2594_v62 = vsel %vm2435_vm6, %v2570_v1, %v14491_v41  ;;  %v2598_v41 = vsel %vm2435_vm6, %v2574_v57, %v14495_v34  ;;  %v14497_v19 = vrot.slane %v9107_v54, 2  ;;  %v2601_v32 = vsel %vm2435_vm6, %v2577_v10, %v2565_v27  ;;  %v14500_v27 = vld [vmem:[#allocation64_spill] sm:$0xff] }
 0x2f9   : > { %v2596_v45 = vsel %vm2435_vm6, %v2572_v21, %v14493_v26  ;;  %v2597_v9 = vsel %vm2435_vm6, %v2573_v56, %v14494_v59  ;;  %v2602_v1 = vsel %vm2435_vm6, %v2578_v12, %v2566_v14  ;;  %v2605_v18 = vsel %vm2435_vm6, %v2581_v7, %v2569_v46  ;;  %v14501_v14 = vld [vmem:[#allocation199_spill] sm:$0xff]  ;;  %v14504_v46 = vld [vmem:[#allocation69_spill] sm:$0xff] }
 0x2fa   : > { %v2600_v26 = vsel %vm2435_vm6, %v2576_v43, %v14497_v19  ;;  %v2607_v54 = vsel %vm2461_vm7, %v14498_v35, %v2594_v62  ;;  %v14499_v43 = vld [vmem:[#allocation179_spill] sm:$0xff]  ;;  %v2611_v12 = vsel %vm2461_vm7, %v14500_v27, %v2596_v45  ;;  %v2613_v63 = vsel %vm2461_vm7, %v14501_v14, %v2597_v9  ;;  %v14505_v56 = vld [vmem:[#allocation157_spill] sm:$0xff] }
 0x2fb   : > { %v2609_v10 = vsel %vm2461_vm7, %v14499_v43, %v2595_v4  ;;  %v2615_v7 = vsel %vm2461_vm7, %v14502_v51, %v2598_v41  ;;  %v2617_v16 = vsel %vm2461_vm7, %v14503_v24, %v2599_v2  ;;  %v2619_v21 = vsel %vm2461_vm7, %v14504_v46, %v2600_v26  ;;  %v14506_v9 = vld [vmem:[#allocation33_spill] sm:$0xff] }
 0x2fc   : > { %v2621_v45 = vsel %vm2461_vm7, %v14505_v56, %v2601_v32  ;;  %v2633_v57 = vrot.slane %v9160_v17, %v9016_v50  ;;  %v2637_v62 = vrot.slane %v9164_v39, %v9016_v50  ;;  %v2641_v4 = vrot.slane %v9168_v58, %v9016_v50  ;;  %v14507_v39 = vld [vmem:[#allocation35_spill] sm:$0xff]  ;;  %v14509_v26 = vld [vmem:[#allocation37_spill] sm:$0xff] }
 0x2fd   : > { %v2645_v59 = vrot.slane %v9172_v49, %v9016_v50  ;;  %v2623_v34 = vsel %vm2461_vm7, %v14506_v9, %v2602_v1  ;;  %v2649_v41 = vrot.slane %v9176_v30, %v9016_v50  ;;  %v2653_v3 = vrot.slane %v9180_v47, %v9016_v50  ;;  %v14508_v30 = vld [vmem:[#allocation36_spill] sm:$0xff] }
 0x2fe   : > { %v2657_v17 = vrot.slane %v9184_v37, %v9016_v50  ;;  %v2625_v58 = vsel %vm2461_vm7, %v14507_v39, %v2603_v22  ;;  %v2661_v49 = vrot.slane %v9188_v61, %v9016_v50  ;;  %v2665_v2 = vrot.slane %v9192_v13, %v9016_v50 }
 0x2ff   : > { %v2669_v19 = vrot.slane %v9196_v0, %v9016_v50  ;;  %v2627_v47 = vsel %vm2461_vm7, %v14508_v30, %v2604_v36  ;;  %v2629_v37 = vsel %vm2461_vm7, %v14509_v26, %v2605_v18  ;;  %v2673_v32 = vrot.slane %v9200_v40, %v9016_v50  ;;  %v14525_v30 = vld [vmem:[#allocation161_spill] sm:$0xff]  ;;  %v14527_v26 = vld [vmem:[#allocation203_spill] sm:$0xff] }
 0x300   : > { %v2677_v61 = vrot.slane %v9204_v5, %v9016_v50  ;;  %v9369_v13 = vsel %vm1906_vm5, %v2633_v57, %v2607_v54  ;;  %v9373_v0 = vsel %vm1906_vm5, %v2637_v62, %v2609_v10  ;;  %v9377_v1 = vsel %vm1906_vm5, %v2641_v4, %v2611_v12  ;;  %v14519_v4 = vld [vmem:[#allocation160_spill] sm:$0xff] }
 0x301   : > { %v9381_v22 = vsel %vm1906_vm5, %v2645_v59, %v2613_v63  ;;  %v9385_v40 = vsel %vm1906_vm5, %v2649_v41, %v2615_v7  ;;  %v9389_v5 = vsel %vm1906_vm5, %v2653_v3, %v2617_v16  ;;  %v9393_v50 = vsel %vm1906_vm5, %v2657_v17, %v2619_v21  ;;  %v14517_v21 = vld [vmem:[#allocation159_spill] sm:$0xff]  ;;  %v14521_v3 = vld [vmem:[#allocation197_spill] sm:$0xff] }
 0x302   : > { %14510 = vst [vmem:[#allocation59_spill] sm:$0xff] %v9393_v50  ;;  %v2702_v36 = vmul.f32 0.120078385, %v8944_v55  ;;  %v9398_v18 = vsel %vm1906_vm5, %v2661_v49, %v2621_v45  ;;  %v9402_v35 = vsel %vm1906_vm5, %v2665_v2, %v2623_v34  ;;  %v9406_v54 = vsel %vm1906_vm5, %v2669_v19, %v2625_v58  ;;  %v14523_v58 = vld [vmem:[#allocation68_spill] sm:$0xff]  ;;  %v14524_v2 = vld [vmem:[#allocation30_spill] sm:$0xff] }
 0x303   : > { %14511 = vst [vmem:[#allocation188_spill] sm:$0xff] %v9398_v18  ;;  %14512 = vst [vmem:[#allocation178_spill] sm:$0xff] %v9402_v35  ;;  %v2703_v43 = vmul.f32 0.120078385, %v9096_v29  ;;  %v9411_v10 = vsel %vm1906_vm5, %v2673_v32, %v2627_v47  ;;  %v9415_v27 = vsel %vm1906_vm5, %v2677_v61, %v2629_v37  ;;  %v2704_v12 = vmul.f32 0.120078385, %v8949_v8 }
 0x304   : > { %14513 = vst [vmem:[#allocation174_spill] sm:$0xff] %v9406_v54  ;;  %14514 = vst [vmem:[#allocation124_spill] sm:$0xff] %v9411_v10  ;;  %v2705_v14 = vmul.f32 0.120078385, %v9112_v38  ;;  %v2706_v63 = vmul.f32 0.120078385, %v8953_v48  ;;  %v9424_v24 = vmul.f32 %v8944_v55, %v8944_v55  ;;  %v9430_v56 = vadd.f32 %v2702_v36, %v14517_v21 }
 0x305   : > { %14515 = vst [vmem:[#allocation171_spill] sm:$0xff] %v9415_v27  ;;  %v2707_v51 = vmul.f32 0.120078385, %v9116_v44  ;;  %v2708_v7 = vmul.f32 0.120078385, %v8957_v23  ;;  %v9436_v59 = vadd.f32 %v2703_v43, %v14519_v4  ;;  %v9442_v17 = vadd.f32 %v2704_v12, %v14521_v3  ;;  %v14528_v32 = vld [vmem:[#allocation164_spill] sm:$0xff] }
 0x306   : > { %14516 = vst [vmem:[#allocation120_spill] sm:$0xff] %v9424_v24  ;;  %v2709_v16 = vmul.f32 0.120078385, %v9120_v53  ;;  %v2711_v46 = vmul.f32 0.120078385, %v9124_v15  ;;  %14518 = vst [vmem:[#allocation194_spill] sm:$0xff] %v9430_v56  ;;  %v9448_v47 = vadd.f32 %v2705_v14, %v14525_v30 }
 0x307   : > { %v2712_v45 = vmul.f32 0.120078385, %v8965_v20  ;;  %v2713_v57 = vmul.f32 0.120078385, %v9128_v52  ;;  %v2714_v62 = vmul.f32 0.120078385, %v8969_v6 }
 0x308   : > { %14520 = vst [vmem:[#allocation25_spill] sm:$0xff] %v9436_v59  ;;  %v2715_v9 = vmul.f32 0.120078385, %v9132_v33  ;;  %v2716_v34 = vmul.f32 0.120078385, %v8973_v25  ;;  %14522 = vst [vmem:[#allocation189_spill] sm:$0xff] %v9442_v17 }
 0x309   : > { %v2717_v41 = vmul.f32 0.120078385, %v9136_v28  ;;  %v2718_v39 = vmul.f32 0.120078385, %v8977_v60  ;;  %v2719_v49 = vmul.f32 0.120078385, %v14523_v58 }
 0x30a   : > { %v2720_v19 = vmul.f32 0.120078385, %v14524_v2  ;;  %14526 = vst [vmem:[#allocation198_spill] sm:$0xff] %v9448_v47  ;;  %v2721_v37 = vmul.f32 0.120078385, %v14527_v26  ;;  %v14529_v36 = vld [vmem:[#allocation192_spill] sm:$0xff] }
 0x30b   : > { %v2722_v61 = vmul.f32 0.120078385, %v14528_v32  ;;  %v2723_v43 = vmul.f32 0.120078385, %v14529_v36  ;;  %v14530_v21 = vld [vmem:[#allocation162_spill] sm:$0xff]  ;;  %v14532_v12 = vld [vmem:[#allocation61_spill] sm:$0xff] }
 0x30c   : > { %v9454_v4 = vadd.f32 %v2706_v63, %v14530_v21  ;;  %v2724_v3 = vmul.f32 0.120078385, %v14532_v12  ;;  %v2725_v17 = vmul.f32 0.120078385, %v14533_v11  ;;  %v14534_v59 = vld [vmem:[#allocation163_spill] sm:$0xff]  ;;  %v14536_v55 = vld [vmem:[#allocation212_spill] sm:$0xff] }
 0x30d   : > { %v9459_v56 = vadd.f32 %v2707_v51, %v14534_v59  ;;  %v9462_v24 = vadd.f32 %v2708_v7, %v14536_v55  ;;  %v14538_v14 = vld [vmem:[#allocation213_spill] sm:$0xff]  ;;  %v14540_v47 = vld [vmem:[#allocation214_spill] sm:$0xff]  ;;  %v14542_v36 = vld [vmem:[#allocation215_spill] sm:$0xff] }
 0x30e   : > { %14531 = vst [vmem:[#allocation175_spill] sm:$0xff] %v9454_v4  ;;  %v9465_v30 = vadd.f32 %v2709_v16, %v14538_v14  ;;  %v9468_v32 = vadd.f32 %v2710_v31, %v14540_v47  ;;  %v9471_v26 = vadd.f32 %v2711_v46, %v14542_v36  ;;  %v14544_v63 = vld [vmem:[#allocation216_spill] sm:$0xff]  ;;  %v14546_v4 = vld [vmem:[#allocation217_spill] sm:$0xff]  ;;  %v14548_v51 = vld [vmem:[#allocation218_spill] sm:$0xff] }
 0x30f   : > { %14535 = vst [vmem:[#allocation158_spill] sm:$0xff] %v9459_v56  ;;  %14537 = vst [vmem:[#allocation72_spill] sm:$0xff] %v9462_v24  ;;  %v9474_v21 = vadd.f32 %v2712_v45, %v14544_v63  ;;  %v9477_v11 = vadd.f32 %v2713_v57, %v14546_v4  ;;  %v9480_v59 = vadd.f32 %v2714_v62, %v14548_v51  ;;  %v14550_v55 = vld [vmem:[#allocation219_spill] sm:$0xff]  ;;  %v14552_v16 = vld [vmem:[#allocation220_spill] sm:$0xff] }
 0x310   : > { %14539 = vst [vmem:[#allocation73_spill] sm:$0xff] %v9465_v30  ;;  %14541 = vst [vmem:[#allocation77_spill] sm:$0xff] %v9468_v32  ;;  %v9483_v7 = vadd.f32 %v2715_v9, %v14550_v55  ;;  %v9486_v14 = vadd.f32 %v2716_v34, %v14552_v16  ;;  %v14554_v31 = vld [vmem:[#allocation221_spill] sm:$0xff]  ;;  %v14556_v46 = vld [vmem:[#allocation222_spill] sm:$0xff]  ;;  %v2767_v30 = vmul.f32 0.120078385, %v9402_v35 }
 0x311   : > { %14543 = vst [vmem:[#allocation144_spill] sm:$0xff] %v9471_v26  ;;  %14545 = vst [vmem:[#allocation22_spill] sm:$0xff] %v9474_v21  ;;  %v9489_v47 = vadd.f32 %v2717_v41, %v14554_v31  ;;  %v9492_v36 = vadd.f32 %v2718_v39, %v14556_v46  ;;  %v14558_v45 = vld [vmem:[#allocation223_spill] sm:$0xff]  ;;  %v14560_v57 = vld [vmem:[#allocation156_spill] sm:$0xff]  ;;  %v2751_v41 = vmul.f32 0.120078385, %v9369_v13 }
 0x312   : > { %14547 = vst [vmem:[#allocation145_spill] sm:$0xff] %v9477_v11  ;;  %14549 = vst [vmem:[#allocation146_spill] sm:$0xff] %v9480_v59  ;;  %v9495_v63 = vadd.f32 %v2719_v49, %v14558_v45  ;;  %v2750_v4 = vmul.f32 0.120078385, %v14560_v57  ;;  %v14561_v11 = vld [vmem:[#allocation224_spill] sm:$0xff]  ;;  %v14563_v51 = vld [vmem:[#allocation225_spill] sm:$0xff] }
 0x313   : > { %14551 = vst [vmem:[#allocation23_spill] sm:$0xff] %v9483_v7  ;;  %14553 = vst [vmem:[#allocation147_spill] sm:$0xff] %v9486_v14  ;;  %v9499_v62 = vadd.f32 %v2720_v19, %v14561_v11  ;;  %v9502_v9 = vadd.f32 %v2721_v37, %v14563_v51  ;;  %v14565_v55 = vld [vmem:[#allocation226_spill] sm:$0xff]  ;;  %v14567_v16 = vld [vmem:[#allocation227_spill] sm:$0xff]  ;;  %v2753_v19 = vmul.f32 0.120078385, %v9373_v0 }
 0x314   : > { %14555 = vst [vmem:[#allocation148_spill] sm:$0xff] %v9489_v47  ;;  %14557 = vst [vmem:[#allocation26_spill] sm:$0xff] %v9492_v36  ;;  %v9505_v34 = vadd.f32 %v2722_v61, %v14565_v55  ;;  %v9509_v31 = vadd.f32 %v2723_v43, %v14567_v16  ;;  %v14569_v39 = vld [vmem:[#allocation228_spill] sm:$0xff]  ;;  %v14571_v49 = vld [vmem:[#allocation229_spill] sm:$0xff]  ;;  %v2755_v61 = vmul.f32 0.120078385, %v9377_v1  ;;  %v9523_v55 = vmul.f32 %v9096_v29, %v9096_v29 }
 0x315   : > { %14559 = vst [vmem:[#allocation149_spill] sm:$0xff] %v9495_v63  ;;  %14562 = vst [vmem:[#allocation150_spill] sm:$0xff] %v9499_v62  ;;  %v9512_v46 = vadd.f32 %v2724_v3, %v14569_v39  ;;  %v9515_v45 = vadd.f32 %v2725_v17, %v14571_v49  ;;  %v14573_v63 = vld [vmem:[#allocation186_spill] sm:$0xff]  ;;  %v14574_v37 = vld [vmem:[#allocation32_spill] sm:$0xff]  ;;  %v2757_v3 = vmul.f32 0.120078385, %v9381_v22 }
 0x316   : > { %14564 = vst [vmem:[#allocation27_spill] sm:$0xff] %v9502_v9  ;;  %14566 = vst [vmem:[#allocation151_spill] sm:$0xff] %v9505_v34  ;;  %v2752_v11 = vmul.f32 0.120078385, %v14573_v63  ;;  %v2754_v51 = vmul.f32 0.120078385, %v14574_v37 }
 0x317   : > { %14568 = vst [vmem:[#allocation152_spill] sm:$0xff] %v9509_v31  ;;  %14570 = vst [vmem:[#allocation181_spill] sm:$0xff] %v9512_v46  ;;  %v14575_v43 = vld [vmem:[#allocation169_spill] sm:$0xff]  ;;  %v14576_v39 = vld [vmem:[#allocation172_spill] sm:$0xff]  ;;  %v2761_v9 = vmul.f32 0.120078385, %v9389_v5 }
 0x318   : > { %14572 = vst [vmem:[#allocation182_spill] sm:$0xff] %v9515_v45  ;;  %v2756_v16 = vmul.f32 0.120078385, %v14575_v43  ;;  %v2758_v46 = vmul.f32 0.120078385, %v14576_v39  ;;  %v14577_v17 = vld [vmem:[#allocation230_spill] sm:$0xff] }
 0x319   : > { %v9529_v49 = vadd.f32 %v2750_v4, %v14577_v17  ;;  %v2759_v45 = vmul.f32 0.120078385, %v9385_v40  ;;  %v14579_v31 = vld [vmem:[#allocation187_spill] sm:$0xff]  ;;  %v14582_v47 = vld [vmem:[#allocation118_spill] sm:$0xff]  ;;  %v2763_v7 = vmul.f32 0.120078385, %v9393_v50 }
 0x31a   : > { %v2760_v34 = vmul.f32 0.120078385, %v14579_v31  ;;  %v14580_v62 = vld [vmem:[#allocation231_spill] sm:$0xff]  ;;  %v2762_v14 = vmul.f32 0.120078385, %v14582_v47  ;;  %v14583_v59 = vld [vmem:[#allocation173_spill] sm:$0xff] }
 0x31b   : > { %14578 = vst [vmem:[#allocation165_spill] sm:$0xff] %v9529_v49  ;;  %v9535_v36 = vadd.f32 %v2751_v41, %v14580_v62  ;;  %v2764_v21 = vmul.f32 0.120078385, %v14583_v59  ;;  %v14584_v26 = vld [vmem:[#allocation233_spill] sm:$0xff]  ;;  %v2765_v4 = vmul.f32 0.120078385, %v9398_v18 }
 0x31c   : > { %v9541_v32 = vadd.f32 %v2752_v11, %v14584_v26  ;;  %v14586_v17 = vld [vmem:[#allocation54_spill] sm:$0xff]  ;;  %v14590_v29 = vld [vmem:[#allocation205_spill] sm:$0xff]  ;;  %v14591_v47 = vld [vmem:[#allocation232_spill] sm:$0xff]  ;;  %v2771_v26 = vmul.f32 0.120078385, %v9411_v10 }
 0x31d   : > { %14581 = vst [vmem:[#allocation183_spill] sm:$0xff] %v9535_v36  ;;  %v2766_v49 = vmul.f32 0.120078385, %v14586_v17  ;;  %v14587_v24 = vld [vmem:[#allocation234_spill] sm:$0xff]  ;;  %v2769_v36 = vmul.f32 0.120078385, %v9406_v54  ;;  %v9553_v59 = vadd.f32 %v2754_v51, %v14591_v47 }
 0x31e   : > { %14585 = vst [vmem:[#allocation166_spill] sm:$0xff] %v9541_v32  ;;  %v9547_v56 = vadd.f32 %v2753_v19, %v14587_v24  ;;  %v14589_v62 = vld [vmem:[#allocation170_spill] sm:$0xff]  ;;  %v2770_v50 = vmul.f32 0.120078385, %v14590_v29  ;;  %v14593_v11 = vld [vmem:[#allocation193_spill] sm:$0xff]  ;;  %v14594_v18 = vld [vmem:[#allocation235_spill] sm:$0xff] }
 0x31f   : > { %v2768_v41 = vmul.f32 0.120078385, %v14589_v62  ;;  %14592 = vst [vmem:[#allocation167_spill] sm:$0xff] %v9553_v59  ;;  %v2772_v32 = vmul.f32 0.120078385, %v14593_v11  ;;  %v9559_v35 = vadd.f32 %v2755_v61, %v14594_v18  ;;  %v14596_v24 = vld [vmem:[#allocation80_spill] sm:$0xff] }
 0x320   : > { %14588 = vst [vmem:[#allocation184_spill] sm:$0xff] %v9547_v56  ;;  %v2773_v17 = vmul.f32 0.120078385, %v9415_v27  ;;  %v9562_v19 = vadd.f32 %v2756_v16, %v14596_v24  ;;  %v14598_v56 = vld [vmem:[#allocation83_spill] sm:$0xff]  ;;  %v14600_v54 = vld [vmem:[#allocation85_spill] sm:$0xff]  ;;  %v14606_v11 = vld [vmem:[#allocation200_spill] sm:$0xff] }
 0x321   : > { %14595 = vst [vmem:[#allocation185_spill] sm:$0xff] %v9559_v35  ;;  %v9565_v62 = vadd.f32 %v2757_v3, %v14598_v56  ;;  %v9568_v29 = vadd.f32 %v2758_v46, %v14600_v54  ;;  %v14602_v47 = vld [vmem:[#allocation87_spill] sm:$0xff]  ;;  %v9577_v27 = vadd.f32 %v2761_v9, %v14606_v11  ;;  %v14608_v18 = vld [vmem:[#allocation201_spill] sm:$0xff]  ;;  %v14610_v16 = vld [vmem:[#allocation202_spill] sm:$0xff] }
 0x322   : > { %14597 = vst [vmem:[#allocation24_spill] sm:$0xff] %v9562_v19  ;;  %v9571_v51 = vadd.f32 %v2759_v45, %v14602_v47  ;;  %v14604_v59 = vld [vmem:[#allocation119_spill] sm:$0xff]  ;;  %v9580_v61 = vadd.f32 %v2762_v14, %v14608_v18  ;;  %v9583_v24 = vadd.f32 %v2763_v7, %v14610_v16  ;;  %v14612_v56 = vld [vmem:[#allocation29_spill] sm:$0xff]  ;;  %v14614_v54 = vld [vmem:[#allocation34_spill] sm:$0xff] }
 0x323   : > { %14599 = vst [vmem:[#allocation209_spill] sm:$0xff] %v9565_v62  ;;  %14601 = vst [vmem:[#allocation190_spill] sm:$0xff] %v9568_v29  ;;  %v9574_v10 = vadd.f32 %v2760_v34, %v14604_v59  ;;  %v9586_v3 = vadd.f32 %v2764_v21, %v14612_v56  ;;  %v9589_v46 = vadd.f32 %v2765_v4, %v14614_v54  ;;  %v14616_v45 = vld [vmem:[#allocation38_spill] sm:$0xff]  ;;  %v14618_v59 = vld [vmem:[#allocation41_spill] sm:$0xff] }
 0x324   : > { %14603 = vst [vmem:[#allocation210_spill] sm:$0xff] %v9571_v51  ;;  %14607 = vst [vmem:[#allocation70_spill] sm:$0xff] %v9577_v27  ;;  %v9592_v47 = vadd.f32 %v2766_v49, %v14616_v45  ;;  %v9595_v34 = vadd.f32 %v2767_v30, %v14618_v59  ;;  %v14620_v9 = vld [vmem:[#allocation45_spill] sm:$0xff]  ;;  %v14624_v7 = vld [vmem:[#allocation55_spill] sm:$0xff]  ;;  %v2800_v30 = vmul.f32 %v8949_v8, %v8949_v8 }
 0x325   : > { %14605 = vst [vmem:[#allocation191_spill] sm:$0xff] %v9574_v10  ;;  %14609 = vst [vmem:[#allocation211_spill] sm:$0xff] %v9580_v61  ;;  %v9598_v11 = vadd.f32 %v2768_v41, %v14620_v9  ;;  %v14622_v14 = vld [vmem:[#allocation49_spill] sm:$0xff]  ;;  %v9604_v16 = vadd.f32 %v2770_v50, %v14624_v7  ;;  %v14626_v21 = vld [vmem:[#allocation60_spill] sm:$0xff]  ;;  %v2801_v41 = vmul.f32 %v9112_v38, %v9112_v38  ;;  %v2823_v61 = vmul.f32 0.120078385, %v9523_v55 }
 0x326   : > { %14611 = vst [vmem:[#allocation239_spill] sm:$0xff] %v9583_v24  ;;  %14613 = vst [vmem:[#allocation28_spill] sm:$0xff] %v9586_v3  ;;  %v9601_v18 = vadd.f32 %v2769_v36, %v14622_v14  ;;  %v9607_v56 = vadd.f32 %v2771_v26, %v14626_v21  ;;  %v14628_v4 = vld [vmem:[#allocation66_spill] sm:$0xff]  ;;  %v14630_v49 = vld [vmem:[#allocation76_spill] sm:$0xff]  ;;  %v2802_v36 = vmul.f32 %v8953_v48, %v8953_v48  ;;  %v2824_v29 = vmul.f32 0.120078385, %v2800_v30 }
 0x327   : > { %14615 = vst [vmem:[#allocation153_spill] sm:$0xff] %v9589_v46  ;;  %14617 = vst [vmem:[#allocation154_spill] sm:$0xff] %v9592_v47  ;;  %v9610_v54 = vadd.f32 %v2772_v32, %v14628_v4  ;;  %v9613_v45 = vadd.f32 %v2773_v17, %v14630_v49  ;;  %v2803_v50 = vmul.f32 %v9116_v44, %v9116_v44  ;;  %v14634_v47 = vld [vmem:[#allocation164_spill] sm:$0xff]  ;;  %v14636_v10 = vld [vmem:[#allocation71_spill] sm:$0xff]  ;;  %v2825_v62 = vmul.f32 0.120078385, %v2801_v41 }
 0x328   : > { %14619 = vst [vmem:[#allocation31_spill] sm:$0xff] %v9595_v34  ;;  %14621 = vst [vmem:[#allocation155_spill] sm:$0xff] %v9598_v11  ;;  %v2804_v26 = vmul.f32 %v8957_v23, %v8957_v23  ;;  %v2805_v32 = vmul.f32 %v9120_v53, %v9120_v53  ;;  %v2806_v17 = vmul.f32 %v8961_v42, %v8961_v42  ;;  %v14633_v11 = vld [vmem:[#allocation203_spill] sm:$0xff]  ;;  %v14635_v3 = vld [vmem:[#allocation192_spill] sm:$0xff] }
 0x329   : > { %14623 = vst [vmem:[#allocation206_spill] sm:$0xff] %v9601_v18  ;;  %14625 = vst [vmem:[#allocation179_spill] sm:$0xff] %v9604_v16  ;;  %v2807_v59 = vmul.f32 %v9124_v15, %v9124_v15  ;;  %v2808_v9 = vmul.f32 %v8965_v20, %v8965_v20  ;;  %v2809_v14 = vmul.f32 %v9128_v52, %v9128_v52  ;;  %v14632_v16 = vld [vmem:[#allocation120_spill] sm:$0xff]  ;;  %v2827_v19 = vmul.f32 0.120078385, %v2803_v50  ;;  %v14641_v50 = vld [vmem:[#allocation91_spill] sm:$0xff] }
 0x32a   : > { %14627 = vst [vmem:[#allocation64_spill] sm:$0xff] %v9607_v56  ;;  %14629 = vst [vmem:[#allocation199_spill] sm:$0xff] %v9610_v54  ;;  %v2810_v7 = vmul.f32 %v8969_v6, %v8969_v6  ;;  %v2811_v21 = vmul.f32 %v9132_v33, %v9132_v33  ;;  %v2812_v4 = vmul.f32 %v8973_v25, %v8973_v25  ;;  %v2822_v18 = vmul.f32 0.120078385, %v14632_v16  ;;  %v14639_v25 = vld [vmem:[#allocation90_spill] sm:$0xff] }
 0x32b   : > { %14631 = vst [vmem:[#allocation207_spill] sm:$0xff] %v9613_v45  ;;  %v2813_v49 = vmul.f32 %v9136_v28, %v9136_v28  ;;  %v2814_v45 = vmul.f32 %v8977_v60, %v8977_v60  ;;  %v2815_v54 = vmul.f32 %v14523_v58, %v14523_v58  ;;  %v2816_v56 = vmul.f32 %v14524_v2, %v14524_v2 }
 0x32c   : > { %v2817_v34 = vmul.f32 %v14633_v11, %v14633_v11  ;;  %v2818_v46 = vmul.f32 %v14634_v47, %v14634_v47  ;;  %v2819_v24 = vmul.f32 %v14635_v3, %v14635_v3  ;;  %v2820_v27 = vmul.f32 %v14532_v12, %v14532_v12  ;;  %v14637_v3 = vld [vmem:[#allocation81_spill] sm:$0xff] }
 0x32d   : > { %v2821_v51 = vmul.f32 %v14636_v10, %v14636_v10  ;;  %v2826_v16 = vmul.f32 0.120078385, %v2802_v36  ;;  %v2828_v35 = vmul.f32 0.120078385, %v2804_v26  ;;  %v2870_v11 = vmul.f32 %v14560_v57, %v14560_v57 }
 0x32e   : > { %v2829_v47 = vmul.f32 0.120078385, %v2805_v32  ;;  %v2830_v2 = vmul.f32 0.120078385, %v2806_v17  ;;  %v2831_v58 = vmul.f32 0.120078385, %v2807_v59  ;;  %v9664_v60 = vadd.f32 %v2822_v18, %v14637_v3 }
 0x32f   : > { %v2832_v55 = vmul.f32 0.120078385, %v2808_v9  ;;  %v2833_v28 = vmul.f32 0.120078385, %v2809_v14  ;;  %v2834_v12 = vmul.f32 0.120078385, %v2810_v7  ;;  %v9667_v33 = vadd.f32 %v2823_v61, %v14639_v25 }
 0x330   : > { %14638 = vst [vmem:[#allocation180_spill] sm:$0xff] %v9664_v60  ;;  %v2835_v30 = vmul.f32 0.120078385, %v2811_v21  ;;  %v2836_v41 = vmul.f32 0.120078385, %v2812_v4  ;;  %v9670_v26 = vadd.f32 %v2824_v29, %v14641_v50  ;;  %v14643_v17 = vld [vmem:[#allocation92_spill] sm:$0xff] }
 0x331   : > { %14640 = vst [vmem:[#allocation69_spill] sm:$0xff] %v9667_v33  ;;  %v2837_v36 = vmul.f32 0.120078385, %v2813_v49  ;;  %v2838_v10 = vmul.f32 0.120078385, %v2814_v45  ;;  %v9673_v59 = vadd.f32 %v2825_v62, %v14643_v17  ;;  %v14645_v14 = vld [vmem:[#allocation94_spill] sm:$0xff] }
 0x332   : > { %14642 = vst [vmem:[#allocation157_spill] sm:$0xff] %v9670_v26  ;;  %v2839_v6 = vmul.f32 0.120078385, %v2815_v54  ;;  %v2840_v32 = vmul.f32 0.120078385, %v2816_v56  ;;  %v9676_v7 = vadd.f32 %v2826_v16, %v14645_v14  ;;  %v14647_v21 = vld [vmem:[#allocation195_spill] sm:$0xff] }
 0x333   : > { %14644 = vst [vmem:[#allocation33_spill] sm:$0xff] %v9673_v59  ;;  %v2841_v3 = vmul.f32 0.120078385, %v2817_v34  ;;  %v2842_v18 = vmul.f32 0.120078385, %v2818_v46  ;;  %v9679_v4 = vadd.f32 %v2827_v19, %v14647_v21  ;;  %v14649_v49 = vld [vmem:[#allocation95_spill] sm:$0xff] }
 0x334   : > { %v2843_v9 = vmul.f32 0.120078385, %v2819_v24  ;;  %14646 = vst [vmem:[#allocation35_spill] sm:$0xff] %v9676_v7  ;;  %v2844_v25 = vmul.f32 0.120078385, %v2820_v27  ;;  %v9682_v29 = vadd.f32 %v2828_v35, %v14649_v49  ;;  %v14651_v45 = vld [vmem:[#allocation176_spill] sm:$0xff] }
 0x335   : > { %v2845_v61 = vmul.f32 0.120078385, %v2821_v51  ;;  %14648 = vst [vmem:[#allocation36_spill] sm:$0xff] %v9679_v4  ;;  %v9685_v54 = vadd.f32 %v2829_v47, %v14651_v45  ;;  %v14653_v56 = vld [vmem:[#allocation86_spill] sm:$0xff]  ;;  %v14655_v34 = vld [vmem:[#allocation96_spill] sm:$0xff]  ;;  %v14663_v35 = vld [vmem:[#allocation177_spill] sm:$0xff] }
 0x336   : > { %14650 = vst [vmem:[#allocation37_spill] sm:$0xff] %v9682_v29  ;;  %v9688_v62 = vadd.f32 %v2830_v2, %v14653_v56  ;;  %v9691_v46 = vadd.f32 %v2831_v58, %v14655_v34  ;;  %v14657_v24 = vld [vmem:[#allocation196_spill] sm:$0xff]  ;;  %v14661_v19 = vld [vmem:[#allocation98_spill] sm:$0xff]  ;;  %v9703_v17 = vadd.f32 %v2835_v30, %v14663_v35  ;;  %v14665_v47 = vld [vmem:[#allocation99_spill] sm:$0xff] }
 0x337   : > { %14652 = vst [vmem:[#allocation159_spill] sm:$0xff] %v9685_v54  ;;  %v9694_v16 = vadd.f32 %v2832_v55, %v14657_v24  ;;  %v14659_v27 = vld [vmem:[#allocation204_spill] sm:$0xff]  ;;  %v9700_v50 = vadd.f32 %v2834_v12, %v14661_v19  ;;  %v9706_v14 = vadd.f32 %v2836_v41, %v14665_v47  ;;  %v14669_v58 = vld [vmem:[#allocation101_spill] sm:$0xff]  ;;  %v14671_v55 = vld [vmem:[#allocation102_spill] sm:$0xff]  ;;  %v2878_v47 = vmul.f32 %v14576_v39, %v14576_v39 }
 0x338   : > { %14654 = vst [vmem:[#allocation160_spill] sm:$0xff] %v9688_v62  ;;  %14656 = vst [vmem:[#allocation197_spill] sm:$0xff] %v9691_v46  ;;  %v9697_v51 = vadd.f32 %v2833_v28, %v14659_v27  ;;  %v14667_v2 = vld [vmem:[#allocation100_spill] sm:$0xff]  ;;  %v9712_v49 = vadd.f32 %v2838_v10, %v14669_v58  ;;  %v9715_v45 = vadd.f32 %v2839_v6, %v14671_v55  ;;  %v14673_v28 = vld [vmem:[#allocation103_spill] sm:$0xff] }
 0x339   : > { %14658 = vst [vmem:[#allocation161_spill] sm:$0xff] %v9694_v16  ;;  %14662 = vst [vmem:[#allocation163_spill] sm:$0xff] %v9700_v50  ;;  %v9709_v21 = vadd.f32 %v2837_v36, %v14667_v2  ;;  %v9718_v56 = vadd.f32 %v2840_v32, %v14673_v28  ;;  %v14675_v12 = vld [vmem:[#allocation104_spill] sm:$0xff]  ;;  %v14677_v30 = vld [vmem:[#allocation105_spill] sm:$0xff]  ;;  %v2871_v6 = vmul.f32 %v9369_v13, %v9369_v13 }
 0x33a   : > { %14660 = vst [vmem:[#allocation162_spill] sm:$0xff] %v9697_v51  ;;  %14664 = vst [vmem:[#allocation212_spill] sm:$0xff] %v9703_v17  ;;  %v9721_v34 = vadd.f32 %v2841_v3, %v14675_v12  ;;  %v9724_v24 = vadd.f32 %v2842_v18, %v14677_v30  ;;  %v14679_v41 = vld [vmem:[#allocation75_spill] sm:$0xff]  ;;  %v14683_v10 = vld [vmem:[#allocation236_spill] sm:$0xff]  ;;  %v2872_v32 = vmul.f32 %v14573_v63, %v14573_v63 }
 0x33b   : > { %14666 = vst [vmem:[#allocation213_spill] sm:$0xff] %v9706_v14  ;;  %14668 = vst [vmem:[#allocation214_spill] sm:$0xff] %v9709_v21  ;;  %v9727_v27 = vadd.f32 %v2843_v9, %v14679_v41  ;;  %v14681_v36 = vld [vmem:[#allocation79_spill] sm:$0xff]  ;;  %v9733_v35 = vadd.f32 %v2845_v61, %v14683_v10  ;;  %v2873_v3 = vmul.f32 %v9373_v0, %v9373_v0  ;;  %v14685_v28 = vld [vmem:[#allocation118_spill] sm:$0xff]  ;;  %v2894_v21 = vmul.f32 0.120078385, %v2870_v11 }
 0x33c   : > { %14670 = vst [vmem:[#allocation215_spill] sm:$0xff] %v9712_v49  ;;  %14672 = vst [vmem:[#allocation216_spill] sm:$0xff] %v9715_v45  ;;  %v9730_v19 = vadd.f32 %v2844_v25, %v14681_v36  ;;  %v2874_v18 = vmul.f32 %v14574_v37, %v14574_v37  ;;  %v2875_v9 = vmul.f32 %v9377_v1, %v9377_v1  ;;  %v14686_v30 = vld [vmem:[#allocation59_spill] sm:$0xff]  ;;  %v14687_v36 = vld [vmem:[#allocation173_spill] sm:$0xff]  ;;  %v2895_v62 = vmul.f32 0.120078385, %v2871_v6 }
 0x33d   : > { %14674 = vst [vmem:[#allocation217_spill] sm:$0xff] %v9718_v56  ;;  %14676 = vst [vmem:[#allocation218_spill] sm:$0xff] %v9721_v34  ;;  %v2876_v25 = vmul.f32 %v14575_v43, %v14575_v43  ;;  %v2877_v61 = vmul.f32 %v9381_v22, %v9381_v22  ;;  %v2879_v2 = vmul.f32 %v9385_v40, %v9385_v40  ;;  %v14690_v34 = vld [vmem:[#allocation178_spill] sm:$0xff]  ;;  %v14693_v50 = vld [vmem:[#allocation205_spill] sm:$0xff]  ;;  %v2896_v59 = vmul.f32 0.120078385, %v2872_v32 }
 0x33e   : > { %14678 = vst [vmem:[#allocation219_spill] sm:$0xff] %v9724_v24  ;;  %14680 = vst [vmem:[#allocation220_spill] sm:$0xff] %v9727_v27  ;;  %v2880_v58 = vmul.f32 %v14579_v31, %v14579_v31  ;;  %v2881_v55 = vmul.f32 %v9389_v5, %v9389_v5  ;;  %v2882_v12 = vmul.f32 %v14685_v28, %v14685_v28  ;;  %v14689_v27 = vld [vmem:[#allocation54_spill] sm:$0xff]  ;;  %v14694_v16 = vld [vmem:[#allocation124_spill] sm:$0xff]  ;;  %v2897_v26 = vmul.f32 0.120078385, %v2873_v3 }
 0x33f   : > { %14682 = vst [vmem:[#allocation221_spill] sm:$0xff] %v9730_v19  ;;  %14684 = vst [vmem:[#allocation222_spill] sm:$0xff] %v9733_v35  ;;  %v2883_v41 = vmul.f32 %v14686_v30, %v14686_v30  ;;  %v2884_v10 = vmul.f32 %v14687_v36, %v14687_v36  ;;  %v14688_v35 = vld [vmem:[#allocation188_spill] sm:$0xff]  ;;  %v2886_v24 = vmul.f32 %v14689_v27, %v14689_v27  ;;  %v14691_v45 = vld [vmem:[#allocation170_spill] sm:$0xff]  ;;  %v2898_v33 = vmul.f32 0.120078385, %v2874_v18 }
 0x340   : > { %v2885_v19 = vmul.f32 %v14688_v35, %v14688_v35  ;;  %v2887_v56 = vmul.f32 %v14690_v34, %v14690_v34  ;;  %v2888_v49 = vmul.f32 %v14691_v45, %v14691_v45  ;;  %v14692_v14 = vld [vmem:[#allocation174_spill] sm:$0xff]  ;;  %v2890_v51 = vmul.f32 %v14693_v50, %v14693_v50  ;;  %v14695_v54 = vld [vmem:[#allocation193_spill] sm:$0xff]  ;;  %v14696_v4 = vld [vmem:[#allocation171_spill] sm:$0xff] }
 0x341   : > { %v2889_v17 = vmul.f32 %v14692_v14, %v14692_v14  ;;  %v2891_v46 = vmul.f32 %v14694_v16, %v14694_v16  ;;  %v2892_v29 = vmul.f32 %v14695_v54, %v14695_v54  ;;  %v2893_v7 = vmul.f32 %v14696_v4, %v14696_v4  ;;  %v14697_v45 = vld [vmem:[#allocation57_spill] sm:$0xff]  ;;  %v14698_v35 = vld [vmem:[#allocation106_spill] sm:$0xff] }
 0x342   : > { %v2899_v11 = vmul.f32 0.120078385, %v2875_v9  ;;  %v2900_v60 = vmul.f32 0.120078385, %v2876_v25  ;;  %v2942_v14 = vmul.f32 %v14560_v57, %v14697_v45  ;;  %v2901_v34 = vmul.f32 0.120078385, %v2877_v61 }
 0x343   : > { %v2902_v50 = vmul.f32 0.120078385, %v2878_v47  ;;  %v2903_v27 = vmul.f32 0.120078385, %v2879_v2  ;;  %v9784_v16 = vadd.f32 %v2894_v21, %v14698_v35  ;;  %v2904_v6 = vmul.f32 0.120078385, %v2880_v58 }
 0x344   : > { %v2905_v36 = vmul.f32 0.120078385, %v2881_v55  ;;  %v2906_v54 = vmul.f32 0.120078385, %v2882_v12  ;;  %v14699_v30 = vld [vmem:[#allocation237_spill] sm:$0xff]  ;;  %v14700_v9 = vld [vmem:[#allocation82_spill] sm:$0xff] }
 0x345   : > { %v9787_v28 = vadd.f32 %v2895_v62, %v14699_v30  ;;  %v2907_v32 = vmul.f32 0.120078385, %v2883_v41  ;;  %v2908_v3 = vmul.f32 0.120078385, %v2884_v10  ;;  %v2909_v18 = vmul.f32 0.120078385, %v2885_v19 }
 0x346   : > { %v9790_v25 = vadd.f32 %v2896_v59, %v14700_v9  ;;  %v9792_v4 = vmul.f32 0.120078385, %v2886_v24  ;;  %v9794_v57 = vmul.f32 0.120078385, %v2887_v56  ;;  %v9796_v45 = vmul.f32 0.120078385, %v2888_v49 }
 0x347   : > { %v14701_v21 = vld [vmem:[#allocation108_spill] sm:$0xff]  ;;  %v9801_v61 = vmul.f32 0.120078385, %v2889_v17  ;;  %v9803_v47 = vmul.f32 0.120078385, %v2890_v51  ;;  %v14703_v56 = vld [vmem:[#allocation109_spill] sm:$0xff] }
 0x348   : > { %v9799_v35 = vadd.f32 %v2897_v26, %v14701_v21  ;;  %v9805_v62 = vmul.f32 0.120078385, %v2891_v46  ;;  %v14702_v2 = vld [vmem:[#allocation84_spill] sm:$0xff]  ;;  %v9810_v59 = vmul.f32 0.120078385, %v2892_v29  ;;  %v9815_v58 = vadd.f32 %v2899_v11, %v14703_v56  ;;  %v14705_v49 = vld [vmem:[#allocation110_spill] sm:$0xff] }
 0x349   : > { %v9808_v19 = vadd.f32 %v2898_v33, %v14702_v2  ;;  %v9812_v24 = vmul.f32 0.120078385, %v2893_v7  ;;  %v9818_v55 = vadd.f32 %v2900_v60, %v14705_v49  ;;  %v14707_v26 = vld [vmem:[#allocation112_spill] sm:$0xff]  ;;  %v14709_v51 = vld [vmem:[#allocation113_spill] sm:$0xff]  ;;  %v14711_v46 = vld [vmem:[#allocation114_spill] sm:$0xff] }
 0x34a   : > { %14704 = vst [vmem:[#allocation223_spill] sm:$0xff] %v9815_v58  ;;  %v9821_v17 = vadd.f32 %v2901_v34, %v14707_v26  ;;  %v9824_v12 = vadd.f32 %v2902_v50, %v14709_v51  ;;  %v9827_v30 = vadd.f32 %v2903_v27, %v14711_v46  ;;  %v14713_v33 = vld [vmem:[#allocation115_spill] sm:$0xff]  ;;  %v14715_v7 = vld [vmem:[#allocation116_spill] sm:$0xff]  ;;  %v14717_v10 = vld [vmem:[#allocation117_spill] sm:$0xff]  ;;  %v2944_v50 = vmul.f32 %v14573_v63, %v8949_v8 }
 0x34b   : > { %14706 = vst [vmem:[#allocation156_spill] sm:$0xff] %v9818_v55  ;;  %v9830_v29 = vadd.f32 %v2904_v6, %v14713_v33  ;;  %v9833_v41 = vadd.f32 %v2905_v36, %v14715_v7  ;;  %v9836_v11 = vadd.f32 %v2906_v54, %v14717_v10  ;;  %v14719_v60 = vld [vmem:[#allocation121_spill] sm:$0xff]  ;;  %v14721_v34 = vld [vmem:[#allocation62_spill] sm:$0xff]  ;;  %v2945_v27 = vmul.f32 %v9373_v0, %v9112_v38  ;;  %v14724_v63 = vld [vmem:[#allocation63_spill] sm:$0xff] }
 0x34c   : > { %14708 = vst [vmem:[#allocation224_spill] sm:$0xff] %v9821_v17  ;;  %14710 = vst [vmem:[#allocation225_spill] sm:$0xff] %v9824_v12  ;;  %v9839_v9 = vadd.f32 %v2907_v32, %v14719_v60  ;;  %v2943_v21 = vmul.f32 %v9369_v13, %v14721_v34  ;;  %v2946_v6 = vmul.f32 %v14574_v37, %v8953_v48  ;;  %v14722_v0 = vld [vmem:[#allocation58_spill] sm:$0xff]  ;;  %v14728_v2 = vld [vmem:[#allocation67_spill] sm:$0xff]  ;;  %v2966_v7 = vmul.f32 0.120078385, %v2942_v14 }
 0x34d   : > { %14712 = vst [vmem:[#allocation226_spill] sm:$0xff] %v9827_v30  ;;  %14714 = vst [vmem:[#allocation227_spill] sm:$0xff] %v9830_v29  ;;  %v2947_v36 = vmul.f32 %v9377_v1, %v9116_v44  ;;  %v2948_v54 = vmul.f32 %v14575_v43, %v8957_v23  ;;  %v2949_v32 = vmul.f32 %v9381_v22, %v9120_v53  ;;  %v14723_v44 = vld [vmem:[#allocation118_spill] sm:$0xff]  ;;  %v14725_v23 = vld [vmem:[#allocation59_spill] sm:$0xff] }
 0x34e   : > { %14716 = vst [vmem:[#allocation228_spill] sm:$0xff] %v9833_v41  ;;  %14718 = vst [vmem:[#allocation229_spill] sm:$0xff] %v9836_v11  ;;  %v2950_v13 = vmul.f32 %v14576_v39, %v8961_v42  ;;  %v2951_v8 = vmul.f32 %v9385_v40, %v9124_v15  ;;  %v2952_v38 = vmul.f32 %v14579_v31, %v8965_v20  ;;  %v14726_v43 = vld [vmem:[#allocation65_spill] sm:$0xff]  ;;  %v14729_v42 = vld [vmem:[#allocation188_spill] sm:$0xff]  ;;  %v2967_v10 = vmul.f32 0.120078385, %v2943_v21 }
 0x34f   : > { %14720 = vst [vmem:[#allocation186_spill] sm:$0xff] %v9839_v9  ;;  %v2953_v48 = vmul.f32 %v9389_v5, %v9128_v52  ;;  %v2954_v1 = vmul.f32 %v14723_v44, %v14722_v0  ;;  %v2955_v37 = vmul.f32 %v14725_v23, %v14724_v63  ;;  %v14727_v53 = vld [vmem:[#allocation173_spill] sm:$0xff]  ;;  %v2957_v39 = vmul.f32 %v14729_v42, %v14728_v2  ;;  %v14730_v56 = vld [vmem:[#allocation238_spill] sm:$0xff]  ;;  %v14732_v49 = vld [vmem:[#allocation68_spill] sm:$0xff] }
 0x350   : > { %v2956_v22 = vmul.f32 %v14727_v53, %v14726_v43  ;;  %v14731_v15 = vld [vmem:[#allocation54_spill] sm:$0xff]  ;;  %v14736_v51 = vld [vmem:[#allocation203_spill] sm:$0xff]  ;;  %v14738_v60 = vld [vmem:[#allocation164_spill] sm:$0xff]  ;;  %v9881_v44 = vmul.f32 0.120078385, %v2944_v50 }
 0x351   : > { %v2958_v40 = vmul.f32 %v14731_v15, %v14730_v56  ;;  %v14733_v20 = vld [vmem:[#allocation178_spill] sm:$0xff]  ;;  %v14739_v34 = vld [vmem:[#allocation205_spill] sm:$0xff]  ;;  %v9883_v63 = vmul.f32 0.120078385, %v2945_v27  ;;  %v9885_v23 = vmul.f32 0.120078385, %v2946_v6 }
 0x352   : > { %v2959_v31 = vmul.f32 %v14733_v20, %v14732_v49  ;;  %v14734_v26 = vld [vmem:[#allocation30_spill] sm:$0xff]  ;;  %v2962_v0 = vmul.f32 %v14739_v34, %v14738_v60  ;;  %v14740_v43 = vld [vmem:[#allocation192_spill] sm:$0xff]  ;;  %v9889_v42 = vmul.f32 0.120078385, %v2947_v36  ;;  %v9891_v56 = vmul.f32 0.120078385, %v2948_v54 }
 0x353   : > { %v14735_v52 = vld [vmem:[#allocation170_spill] sm:$0xff]  ;;  %v14741_v53 = vld [vmem:[#allocation124_spill] sm:$0xff]  ;;  %v9893_v15 = vmul.f32 0.120078385, %v2949_v32  ;;  %v14742_v14 = vld [vmem:[#allocation61_spill] sm:$0xff] }
 0x354   : > { %v2960_v5 = vmul.f32 %v14735_v52, %v14734_v26  ;;  %v14737_v46 = vld [vmem:[#allocation174_spill] sm:$0xff]  ;;  %v2963_v2 = vmul.f32 %v14741_v53, %v14740_v43  ;;  %v14743_v21 = vld [vmem:[#allocation193_spill] sm:$0xff]  ;;  %v9897_v20 = vmul.f32 0.120078385, %v2950_v13  ;;  %v9899_v50 = vmul.f32 0.120078385, %v2951_v8 }
 0x355   : > { %v2961_v33 = vmul.f32 %v14737_v46, %v14736_v51  ;;  %v2964_v49 = vmul.f32 %v14743_v21, %v14742_v14  ;;  %v9901_v27 = vmul.f32 0.120078385, %v2952_v38  ;;  %v14744_v6 = vld [vmem:[#allocation71_spill] sm:$0xff]  ;;  %v9905_v51 = vmul.f32 0.120078385, %v2953_v48  ;;  %v14746_v32 = vld [vmem:[#allocation122_spill] sm:$0xff] }
 0x356   : > { %v14745_v26 = vld [vmem:[#allocation171_spill] sm:$0xff]  ;;  %v9907_v36 = vmul.f32 0.120078385, %v2954_v1  ;;  %v9909_v54 = vmul.f32 0.120078385, %v2955_v37  ;;  %v9912_v46 = vadd.f32 %v2908_v3, %v14746_v32  ;;  %v14750_v37 = vld [vmem:[#allocation126_spill] sm:$0xff] }
 0x357   : > { %v2965_v52 = vmul.f32 %v14745_v26, %v14744_v6  ;;  %v9914_v60 = vmul.f32 0.120078385, %v2956_v22  ;;  %v9916_v13 = vmul.f32 0.120078385, %v2957_v39  ;;  %v9918_v8 = vmul.f32 0.120078385, %v2958_v40 }
 0x358   : > { %14747 = vst [vmem:[#allocation32_spill] sm:$0xff] %v9912_v46  ;;  %v14748_v38 = vld [vmem:[#allocation123_spill] sm:$0xff]  ;;  %v9923_v43 = vmul.f32 0.120078385, %v2959_v31  ;;  %v9925_v48 = vmul.f32 0.120078385, %v2960_v5  ;;  %v9931_v53 = vadd.f32 %v9792_v4, %v14750_v37 }
 0x359   : > { %v9921_v34 = vadd.f32 %v2909_v18, %v14748_v38  ;;  %v9927_v1 = vmul.f32 0.120078385, %v2961_v33  ;;  %v9933_v3 = vmul.f32 0.120078385, %v2962_v0  ;;  %v9935_v22 = vmul.f32 0.120078385, %v2963_v2 }
 0x35a   : > { %14751 = vst [vmem:[#allocation172_spill] sm:$0xff] %v9931_v53  ;;  %v9937_v39 = vmul.f32 0.120078385, %v2964_v49  ;;  %v14752_v40 = vld [vmem:[#allocation127_spill] sm:$0xff]  ;;  %v9943_v31 = vmul.f32 0.120078385, %v2965_v52 }
 0x35b   : > { %14749 = vst [vmem:[#allocation169_spill] sm:$0xff] %v9921_v34  ;;  %v9941_v18 = vadd.f32 %v9794_v57, %v14752_v40  ;;  %v14755_v5 = vld [vmem:[#allocation194_spill] sm:$0xff]  ;;  %v14757_v33 = vld [vmem:[#allocation25_spill] sm:$0xff]  ;;  %v14759_v4 = vld [vmem:[#allocation128_spill] sm:$0xff] }
 0x35c   : > { %14754 = vst [vmem:[#allocation187_spill] sm:$0xff] %v9943_v31  ;;  %v9946_v14 = vmul.f32 0.120078385, %v14755_v5  ;;  %v9949_v21 = vmul.f32 0.120078385, %v14757_v33  ;;  %v9953_v0 = vadd.f32 %v9796_v45, %v14759_v4  ;;  %v14761_v2 = vld [vmem:[#allocation189_spill] sm:$0xff] }
 0x35d   : > { %14753 = vst [vmem:[#allocation230_spill] sm:$0xff] %v9941_v18  ;;  %v9956_v6 = vmul.f32 0.120078385, %v14761_v2  ;;  %v14763_v49 = vld [vmem:[#allocation198_spill] sm:$0xff]  ;;  %v14765_v57 = vld [vmem:[#allocation175_spill] sm:$0xff]  ;;  %v14771_v5 = vld [vmem:[#allocation72_spill] sm:$0xff] }
 0x35e   : > { %14756 = vst [vmem:[#allocation231_spill] sm:$0xff] %v9946_v14  ;;  %14758 = vst [vmem:[#allocation233_spill] sm:$0xff] %v9949_v21  ;;  %v9959_v26 = vmul.f32 0.120078385, %v14763_v49  ;;  %v9962_v32 = vmul.f32 0.120078385, %v14765_v57 }
 0x35f   : > { %14760 = vst [vmem:[#allocation234_spill] sm:$0xff] %v9953_v0  ;;  %14762 = vst [vmem:[#allocation232_spill] sm:$0xff] %v9956_v6  ;;  %v14767_v52 = vld [vmem:[#allocation130_spill] sm:$0xff]  ;;  %v9972_v33 = vmul.f32 0.120078385, %v14771_v5  ;;  %v14773_v45 = vld [vmem:[#allocation73_spill] sm:$0xff] }
 0x360   : > { %14764 = vst [vmem:[#allocation235_spill] sm:$0xff] %v9959_v26  ;;  %14766 = vst [vmem:[#allocation80_spill] sm:$0xff] %v9962_v32  ;;  %v9966_v38 = vadd.f32 %v9801_v61, %v14767_v52  ;;  %v14769_v37 = vld [vmem:[#allocation158_spill] sm:$0xff]  ;;  %v9975_v4 = vmul.f32 0.120078385, %v14773_v45  ;;  %v14775_v0 = vld [vmem:[#allocation131_spill] sm:$0xff] }
 0x361   : > { %v9969_v40 = vmul.f32 0.120078385, %v14769_v37  ;;  %14772 = vst [vmem:[#allocation87_spill] sm:$0xff] %v9972_v33  ;;  %v9979_v18 = vadd.f32 %v9803_v47, %v14775_v0  ;;  %v14777_v53 = vld [vmem:[#allocation77_spill] sm:$0xff]  ;;  %v14779_v32 = vld [vmem:[#allocation144_spill] sm:$0xff]  ;;  %v14781_v61 = vld [vmem:[#allocation22_spill] sm:$0xff] }
 0x362   : > { %14768 = vst [vmem:[#allocation83_spill] sm:$0xff] %v9966_v38  ;;  %14774 = vst [vmem:[#allocation119_spill] sm:$0xff] %v9975_v4  ;;  %v9982_v26 = vmul.f32 0.120078385, %v14777_v53  ;;  %v9985_v6 = vmul.f32 0.120078385, %v14779_v32 }
 0x363   : > { %14770 = vst [vmem:[#allocation85_spill] sm:$0xff] %v9969_v40  ;;  %14776 = vst [vmem:[#allocation200_spill] sm:$0xff] %v9979_v18  ;;  %v9988_v52 = vmul.f32 0.120078385, %v14781_v61  ;;  %v14783_v38 = vld [vmem:[#allocation132_spill] sm:$0xff]  ;;  %v14785_v33 = vld [vmem:[#allocation145_spill] sm:$0xff] }
 0x364   : > { %14778 = vst [vmem:[#allocation201_spill] sm:$0xff] %v9982_v26  ;;  %14780 = vst [vmem:[#allocation202_spill] sm:$0xff] %v9985_v6  ;;  %v9992_v40 = vadd.f32 %v9805_v62, %v14783_v38  ;;  %v9995_v21 = vmul.f32 0.120078385, %v14785_v33  ;;  %v14787_v4 = vld [vmem:[#allocation146_spill] sm:$0xff]  ;;  %v14789_v47 = vld [vmem:[#allocation23_spill] sm:$0xff] }
 0x365   : > { %14782 = vst [vmem:[#allocation29_spill] sm:$0xff] %v9988_v52  ;;  %v9998_v14 = vmul.f32 0.120078385, %v14787_v4  ;;  %v10001_v0 = vmul.f32 0.120078385, %v14789_v47  ;;  %v14791_v18 = vld [vmem:[#allocation74_spill] sm:$0xff] }
 0x366   : > { %14784 = vst [vmem:[#allocation34_spill] sm:$0xff] %v9992_v40  ;;  %14786 = vst [vmem:[#allocation38_spill] sm:$0xff] %v9995_v21  ;;  %v10005_v26 = vadd.f32 %v9810_v59, %v14791_v18  ;;  %v14793_v6 = vld [vmem:[#allocation147_spill] sm:$0xff]  ;;  %v14795_v52 = vld [vmem:[#allocation148_spill] sm:$0xff] }
 0x367   : > { %14788 = vst [vmem:[#allocation41_spill] sm:$0xff] %v9998_v14  ;;  %14790 = vst [vmem:[#allocation45_spill] sm:$0xff] %v10001_v0  ;;  %v10008_v31 = vmul.f32 0.120078385, %v14793_v6  ;;  %v10011_v61 = vmul.f32 0.120078385, %v14795_v52 }
 0x368   : > { %14792 = vst [vmem:[#allocation49_spill] sm:$0xff] %v10005_v26  ;;  %v14797_v62 = vld [vmem:[#allocation165_spill] sm:$0xff]  ;;  %v14799_v40 = vld [vmem:[#allocation78_spill] sm:$0xff]  ;;  %v14801_v14 = vld [vmem:[#allocation183_spill] sm:$0xff] }
 0x369   : > { %14794 = vst [vmem:[#allocation55_spill] sm:$0xff] %v10008_v31  ;;  %14796 = vst [vmem:[#allocation60_spill] sm:$0xff] %v10011_v61  ;;  %v10014_v38 = vmul.f32 0.120078385, %v14797_v62  ;;  %v10018_v21 = vadd.f32 %v9812_v24, %v14799_v40  ;;  %v10021_v47 = vmul.f32 0.120078385, %v14801_v14 }
 0x36a   : > { %v14803_v0 = vld [vmem:[#allocation166_spill] sm:$0xff]  ;;  %v14805_v59 = vld [vmem:[#allocation184_spill] sm:$0xff]  ;;  %v14808_v52 = vld [vmem:[#allocation167_spill] sm:$0xff] }
 0x36b   : > { %14798 = vst [vmem:[#allocation66_spill] sm:$0xff] %v10014_v38  ;;  %14800 = vst [vmem:[#allocation76_spill] sm:$0xff] %v10018_v21  ;;  %v10024_v4 = vmul.f32 0.120078385, %v14803_v0  ;;  %v10027_v18 = vmul.f32 0.120078385, %v14805_v59 }
 0x36c   : > { %14802 = vst [vmem:[#allocation120_spill] sm:$0xff] %v10021_v47  ;;  %v14807_v26 = vld [vmem:[#allocation134_spill] sm:$0xff]  ;;  %v10031_v61 = vmul.f32 0.120078385, %v14808_v52  ;;  %v14810_v62 = vld [vmem:[#allocation185_spill] sm:$0xff]  ;;  %v14812_v6 = vld [vmem:[#allocation24_spill] sm:$0xff] }
 0x36d   : > { %14804 = vst [vmem:[#allocation81_spill] sm:$0xff] %v10024_v4  ;;  %14806 = vst [vmem:[#allocation90_spill] sm:$0xff] %v10027_v18  ;;  %v2990_v31 = vadd.f32 %v2966_v7, %v14807_v26  ;;  %v10034_v38 = vmul.f32 0.120078385, %v14810_v62  ;;  %v10037_v24 = vmul.f32 0.120078385, %v14812_v6 }
 0x36e   : > { %14809 = vst [vmem:[#allocation91_spill] sm:$0xff] %v10031_v61  ;;  %v14814_v40 = vld [vmem:[#allocation135_spill] sm:$0xff]  ;;  %v14815_v21 = vld [vmem:[#allocation209_spill] sm:$0xff]  ;;  %v14817_v4 = vld [vmem:[#allocation190_spill] sm:$0xff] }
 0x36f   : > { %14811 = vst [vmem:[#allocation92_spill] sm:$0xff] %v10034_v38  ;;  %14813 = vst [vmem:[#allocation94_spill] sm:$0xff] %v10037_v24  ;;  %v2991_v14 = vadd.f32 %v2967_v10, %v14814_v40  ;;  %v10041_v47 = vmul.f32 0.120078385, %v14815_v21  ;;  %v10044_v0 = vmul.f32 0.120078385, %v14817_v4 }
 0x370   : > { %v14819_v18 = vld [vmem:[#allocation210_spill] sm:$0xff]  ;;  %v14821_v7 = vld [vmem:[#allocation136_spill] sm:$0xff]  ;;  %v14822_v61 = vld [vmem:[#allocation191_spill] sm:$0xff] }
 0x371   : > { %14816 = vst [vmem:[#allocation195_spill] sm:$0xff] %v10041_v47  ;;  %14818 = vst [vmem:[#allocation95_spill] sm:$0xff] %v10044_v0  ;;  %v10047_v59 = vmul.f32 0.120078385, %v14819_v18  ;;  %v10051_v26 = vadd.f32 %v9881_v44, %v14821_v7  ;;  %v10054_v38 = vmul.f32 0.120078385, %v14822_v61 }
 0x372   : > { %v14824_v6 = vld [vmem:[#allocation70_spill] sm:$0xff]  ;;  %v14826_v10 = vld [vmem:[#allocation211_spill] sm:$0xff]  ;;  %v14833_v44 = vld [vmem:[#allocation153_spill] sm:$0xff] }
 0x373   : > { %14820 = vst [vmem:[#allocation176_spill] sm:$0xff] %v10047_v59  ;;  %14823 = vst [vmem:[#allocation86_spill] sm:$0xff] %v10054_v38  ;;  %v10057_v24 = vmul.f32 0.120078385, %v14824_v6  ;;  %v10060_v40 = vmul.f32 0.120078385, %v14826_v10 }
 0x374   : > { %v14828_v47 = vld [vmem:[#allocation138_spill] sm:$0xff]  ;;  %v14829_v0 = vld [vmem:[#allocation239_spill] sm:$0xff]  ;;  %v14831_v59 = vld [vmem:[#allocation28_spill] sm:$0xff]  ;;  %v10073_v7 = vmul.f32 0.120078385, %v14833_v44 }
 0x375   : > { %14825 = vst [vmem:[#allocation96_spill] sm:$0xff] %v10057_v24  ;;  %14827 = vst [vmem:[#allocation196_spill] sm:$0xff] %v10060_v40  ;;  %v10064_v4 = vadd.f32 %v9883_v63, %v14828_v47  ;;  %v10067_v18 = vmul.f32 0.120078385, %v14829_v0  ;;  %v10070_v21 = vmul.f32 0.120078385, %v14831_v59 }
 0x376   : > { %14834 = vst [vmem:[#allocation177_spill] sm:$0xff] %v10073_v7  ;;  %v14835_v38 = vld [vmem:[#allocation208_spill] sm:$0xff]  ;;  %v14839_v40 = vld [vmem:[#allocation69_spill] sm:$0xff]  ;;  %v14847_v7 = vld [vmem:[#allocation35_spill] sm:$0xff] }
 0x377   : > { %14830 = vst [vmem:[#allocation204_spill] sm:$0xff] %v10067_v18  ;;  %14832 = vst [vmem:[#allocation98_spill] sm:$0xff] %v10070_v21  ;;  %v10077_v6 = vadd.f32 %v9885_v23, %v14835_v38  ;;  %v14837_v24 = vld [vmem:[#allocation180_spill] sm:$0xff]  ;;  %v10083_v61 = vmul.f32 0.120078385, %v14839_v40  ;;  %v14841_v63 = vld [vmem:[#allocation157_spill] sm:$0xff] }
 0x378   : > { %v10080_v10 = vmul.f32 0.120078385, %v14837_v24  ;;  %v10086_v47 = vmul.f32 0.120078385, %v14841_v63  ;;  %v14843_v18 = vld [vmem:[#allocation139_spill] sm:$0xff]  ;;  %v14845_v21 = vld [vmem:[#allocation33_spill] sm:$0xff] }
 0x379   : > { %14836 = vst [vmem:[#allocation99_spill] sm:$0xff] %v10077_v6  ;;  %14840 = vst [vmem:[#allocation101_spill] sm:$0xff] %v10083_v61  ;;  %v10090_v59 = vadd.f32 %v9889_v42, %v14843_v18  ;;  %v10093_v44 = vmul.f32 0.120078385, %v14845_v21  ;;  %v10096_v0 = vmul.f32 0.120078385, %v14847_v7 }
 0x37a   : > { %14838 = vst [vmem:[#allocation100_spill] sm:$0xff] %v10080_v10  ;;  %14842 = vst [vmem:[#allocation102_spill] sm:$0xff] %v10086_v47  ;;  %v14849_v23 = vld [vmem:[#allocation36_spill] sm:$0xff]  ;;  %v14853_v61 = vld [vmem:[#allocation37_spill] sm:$0xff] }
 0x37b   : > { %14844 = vst [vmem:[#allocation103_spill] sm:$0xff] %v10090_v59  ;;  %14846 = vst [vmem:[#allocation104_spill] sm:$0xff] %v10093_v44  ;;  %v10099_v38 = vmul.f32 0.120078385, %v14849_v23  ;;  %v14851_v24 = vld [vmem:[#allocation140_spill] sm:$0xff]  ;;  %v14855_v47 = vld [vmem:[#allocation159_spill] sm:$0xff] }
 0x37c   : > { %14848 = vst [vmem:[#allocation105_spill] sm:$0xff] %v10096_v0  ;;  %v10103_v40 = vadd.f32 %v9891_v56, %v14851_v24  ;;  %v10106_v10 = vmul.f32 0.120078385, %v14853_v61  ;;  %v10109_v63 = vmul.f32 0.120078385, %v14855_v47  ;;  %v14857_v42 = vld [vmem:[#allocation160_spill] sm:$0xff] }
 0x37d   : > { %14850 = vst [vmem:[#allocation75_spill] sm:$0xff] %v10099_v38  ;;  %v10112_v18 = vmul.f32 0.120078385, %v14857_v42  ;;  %v14859_v44 = vld [vmem:[#allocation141_spill] sm:$0xff]  ;;  %v14865_v56 = vld [vmem:[#allocation162_spill] sm:$0xff] }
 0x37e   : > { %14852 = vst [vmem:[#allocation79_spill] sm:$0xff] %v10103_v40  ;;  %14854 = vst [vmem:[#allocation236_spill] sm:$0xff] %v10106_v10  ;;  %v10116_v7 = vadd.f32 %v9893_v15, %v14859_v44  ;;  %v14861_v0 = vld [vmem:[#allocation197_spill] sm:$0xff]  ;;  %v10125_v24 = vmul.f32 0.120078385, %v14865_v56  ;;  %v14867_v10 = vld [vmem:[#allocation142_spill] sm:$0xff] }
 0x37f   : > { %14856 = vst [vmem:[#allocation57_spill] sm:$0xff] %v10109_v63  ;;  %14858 = vst [vmem:[#allocation106_spill] sm:$0xff] %v10112_v18  ;;  %v10119_v23 = vmul.f32 0.120078385, %v14861_v0  ;;  %v14863_v38 = vld [vmem:[#allocation161_spill] sm:$0xff]  ;;  %v10129_v47 = vadd.f32 %v9897_v20, %v14867_v10  ;;  %v14869_v63 = vld [vmem:[#allocation163_spill] sm:$0xff] }
 0x380   : > { %14860 = vst [vmem:[#allocation237_spill] sm:$0xff] %v10116_v7  ;;  %v10122_v21 = vmul.f32 0.120078385, %v14863_v38  ;;  %14866 = vst [vmem:[#allocation84_spill] sm:$0xff] %v10125_v24  ;;  %v10132_v42 = vmul.f32 0.120078385, %v14869_v63 }
 0x381   : > { %14862 = vst [vmem:[#allocation82_spill] sm:$0xff] %v10119_v23  ;;  %14868 = vst [vmem:[#allocation109_spill] sm:$0xff] %v10129_v47  ;;  %v14871_v18 = vld [vmem:[#allocation212_spill] sm:$0xff]  ;;  %v14873_v15 = vld [vmem:[#allocation213_spill] sm:$0xff]  ;;  %v10148_v24 = vmul.f32 0.120078385, %v9784_v16 }
 0x382   : > { %14864 = vst [vmem:[#allocation108_spill] sm:$0xff] %v10122_v21  ;;  %14870 = vst [vmem:[#allocation110_spill] sm:$0xff] %v10132_v42  ;;  %v10135_v61 = vmul.f32 0.120078385, %v14871_v18  ;;  %v10138_v44 = vmul.f32 0.120078385, %v14873_v15 }
 0x383   : > { %v14875_v23 = vld [vmem:[#allocation143_spill] sm:$0xff]  ;;  %v14877_v21 = vld [vmem:[#allocation214_spill] sm:$0xff]  ;;  %v10151_v20 = vmul.f32 0.120078385, %v9787_v28  ;;  %v10171_v28 = vmul.f32 0.120078385, %v9815_v58 }
 0x384   : > { %14872 = vst [vmem:[#allocation112_spill] sm:$0xff] %v10135_v61  ;;  %14874 = vst [vmem:[#allocation113_spill] sm:$0xff] %v10138_v44  ;;  %v10142_v38 = vadd.f32 %v9899_v50, %v14875_v23  ;;  %v10145_v56 = vmul.f32 0.120078385, %v14877_v21  ;;  %v14880_v10 = vld [vmem:[#allocation39_spill] sm:$0xff]  ;;  %v14885_v23 = vld [vmem:[#allocation40_spill] sm:$0xff] }
 0x385   : > { %14879 = vst [vmem:[#allocation116_spill] sm:$0xff] %v10151_v20  ;;  %v10155_v42 = vadd.f32 %v9901_v27, %v14880_v10  ;;  %v10158_v61 = vmul.f32 0.120078385, %v9790_v25  ;;  %v10161_v44 = vmul.f32 0.120078385, %v9799_v35  ;;  %v10168_v16 = vadd.f32 %v9905_v51, %v14885_v23  ;;  %14887 = vst [vmem:[#allocation63_spill] sm:$0xff] %v10171_v28 }
 0x386   : > { %14876 = vst [vmem:[#allocation114_spill] sm:$0xff] %v10142_v38  ;;  %14878 = vst [vmem:[#allocation115_spill] sm:$0xff] %v10145_v56  ;;  %v10164_v50 = vmul.f32 0.120078385, %v9808_v19  ;;  %v10174_v20 = vmul.f32 0.120078385, %v9818_v55 }
 0x387   : > { %14881 = vst [vmem:[#allocation117_spill] sm:$0xff] %v10155_v42  ;;  %14882 = vst [vmem:[#allocation121_spill] sm:$0xff] %v10158_v61  ;;  %v10177_v27 = vmul.f32 0.120078385, %v9821_v17  ;;  %v14890_v10 = vld [vmem:[#allocation53_spill] sm:$0xff]  ;;  %v14895_v23 = vld [vmem:[#allocation168_spill] sm:$0xff] }
 0x388   : > { %14883 = vst [vmem:[#allocation62_spill] sm:$0xff] %v10161_v44  ;;  %14884 = vst [vmem:[#allocation58_spill] sm:$0xff] %v10164_v50  ;;  %v10181_v61 = vadd.f32 %v9907_v36, %v14890_v10  ;;  %v10184_v44 = vmul.f32 0.120078385, %v9824_v12  ;;  %v10187_v50 = vmul.f32 0.120078385, %v9827_v30  ;;  %v10194_v28 = vadd.f32 %v9909_v54, %v14895_v23 }
 0x389   : > { %14886 = vst [vmem:[#allocation118_spill] sm:$0xff] %v10168_v16  ;;  %14888 = vst [vmem:[#allocation59_spill] sm:$0xff] %v10174_v20  ;;  %v10190_v51 = vmul.f32 0.120078385, %v9830_v29  ;;  %v10197_v20 = vmul.f32 0.120078385, %v9833_v41 }
 0x38a   : > { %14889 = vst [vmem:[#allocation65_spill] sm:$0xff] %v10177_v27  ;;  %14891 = vst [vmem:[#allocation173_spill] sm:$0xff] %v10181_v61  ;;  %v10200_v27 = vmul.f32 0.120078385, %v9836_v11  ;;  %v10203_v36 = vmul.f32 0.120078385, %v9839_v9 }
 0x38b   : > { %14892 = vst [vmem:[#allocation67_spill] sm:$0xff] %v10184_v44  ;;  %14893 = vst [vmem:[#allocation188_spill] sm:$0xff] %v10187_v50  ;;  %v14900_v10 = vld [vmem:[#allocation42_spill] sm:$0xff]  ;;  %v10210_v50 = vmul.f32 0.120078385, %v9912_v46  ;;  %v14905_v23 = vld [vmem:[#allocation43_spill] sm:$0xff] }
 0x38c   : > { %14894 = vst [vmem:[#allocation238_spill] sm:$0xff] %v10190_v51  ;;  %14896 = vst [vmem:[#allocation54_spill] sm:$0xff] %v10194_v28  ;;  %v10207_v44 = vadd.f32 %v9914_v60, %v14900_v10  ;;  %v10213_v51 = vmul.f32 0.120078385, %v9921_v34  ;;  %v10215_v54 = vmul.f32 0.120078385, %v2990_v31 }
 0x38d   : > { %14897 = vst [vmem:[#allocation68_spill] sm:$0xff] %v10197_v20  ;;  %14898 = vst [vmem:[#allocation178_spill] sm:$0xff] %v10200_v27  ;;  %v10219_v20 = vadd.f32 %v9916_v13, %v14905_v23  ;;  %v10221_v27 = vmul.f32 0.120078385, %v2991_v14  ;;  %v10227_v60 = vmul.f32 0.120078385, %v10064_v4 }
 0x38e   : > { %14899 = vst [vmem:[#allocation30_spill] sm:$0xff] %v10203_v36  ;;  %14901 = vst [vmem:[#allocation170_spill] sm:$0xff] %v10207_v44  ;;  %v10224_v36 = vmul.f32 0.120078385, %v10051_v26  ;;  %v14910_v10 = vld [vmem:[#allocation44_spill] sm:$0xff]  ;;  %v14915_v14 = vld [vmem:[#allocation46_spill] sm:$0xff] }
 0x38f   : > { %14902 = vst [vmem:[#allocation203_spill] sm:$0xff] %v10210_v50  ;;  %14903 = vst [vmem:[#allocation174_spill] sm:$0xff] %v10213_v51  ;;  %v10231_v50 = vadd.f32 %v9918_v8, %v14910_v10  ;;  %v10234_v51 = vmul.f32 0.120078385, %v10077_v6  ;;  %v10237_v31 = vmul.f32 0.120078385, %v10090_v59  ;;  %v10244_v23 = vadd.f32 %v9923_v43, %v14915_v14 }
 0x390   : > { %14904 = vst [vmem:[#allocation164_spill] sm:$0xff] %v10215_v54  ;;  %14906 = vst [vmem:[#allocation205_spill] sm:$0xff] %v10219_v20  ;;  %v10240_v13 = vmul.f32 0.120078385, %v10103_v40  ;;  %v10253_v8 = vmul.f32 0.120078385, %v10142_v38 }
 0x391   : > { %14907 = vst [vmem:[#allocation192_spill] sm:$0xff] %v10221_v27  ;;  %14908 = vst [vmem:[#allocation124_spill] sm:$0xff] %v10224_v36  ;;  %v10247_v36 = vmul.f32 0.120078385, %v10116_v7  ;;  %v14920_v10 = vld [vmem:[#allocation47_spill] sm:$0xff]  ;;  %v14925_v14 = vld [vmem:[#allocation48_spill] sm:$0xff] }
 0x392   : > { %14909 = vst [vmem:[#allocation61_spill] sm:$0xff] %v10227_v60  ;;  %14911 = vst [vmem:[#allocation193_spill] sm:$0xff] %v10231_v50  ;;  %v10250_v60 = vmul.f32 0.120078385, %v10129_v47  ;;  %v10266_v43 = vmul.f32 0.120078385, %v10181_v61 }
 0x393   : > { %14912 = vst [vmem:[#allocation71_spill] sm:$0xff] %v10234_v51  ;;  %14913 = vst [vmem:[#allocation171_spill] sm:$0xff] %v10237_v31  ;;  %v10257_v51 = vadd.f32 %v9925_v48, %v14920_v10  ;;  %v10260_v31 = vmul.f32 0.120078385, %v10155_v42  ;;  %v10279_v48 = vmul.f32 0.120078385, %v10219_v20 }
 0x394   : > { %14914 = vst [vmem:[#allocation122_spill] sm:$0xff] %v10240_v13  ;;  %14916 = vst [vmem:[#allocation123_spill] sm:$0xff] %v10244_v23  ;;  %v10263_v13 = vmul.f32 0.120078385, %v10168_v16  ;;  %v14930_v10 = vld [vmem:[#allocation50_spill] sm:$0xff] }
 0x395   : > { %14917 = vst [vmem:[#allocation126_spill] sm:$0xff] %v10247_v36  ;;  %14918 = vst [vmem:[#allocation127_spill] sm:$0xff] %v10250_v60  ;;  %v10270_v36 = vadd.f32 %v9927_v1, %v14925_v14  ;;  %v10273_v60 = vmul.f32 0.120078385, %v10194_v28  ;;  %v3096_v1 = vmul.f32 0.23388076, %v14765_v57 }
 0x396   : > { %14919 = vst [vmem:[#allocation194_spill] sm:$0xff] %v10253_v8  ;;  %14921 = vst [vmem:[#allocation25_spill] sm:$0xff] %v10257_v51  ;;  %v10276_v8 = vmul.f32 0.120078385, %v10207_v44  ;;  %v10283_v51 = vadd.f32 %v9933_v3, %v14930_v10  ;;  %v14932_v14 = vld [vmem:[#allocation51_spill] sm:$0xff]  ;;  %v14936_v3 = vld [vmem:[#allocation52_spill] sm:$0xff] }
 0x397   : > { %14922 = vst [vmem:[#allocation128_spill] sm:$0xff] %v10260_v31  ;;  %14923 = vst [vmem:[#allocation189_spill] sm:$0xff] %v10263_v13  ;;  %v3094_v13 = vmul.f32 0.23388076, %v14761_v2  ;;  %v10301_v10 = vadd.f32 %v9937_v39, %v14936_v3  ;;  %v10304_v2 = vmul.f32 0.23388076, %v14777_v53 }
 0x398   : > { %14924 = vst [vmem:[#allocation198_spill] sm:$0xff] %v10266_v43  ;;  %14926 = vst [vmem:[#allocation130_spill] sm:$0xff] %v10270_v36  ;;  %v3095_v43 = vmul.f32 0.23388076, %v14763_v49  ;;  %v10290_v36 = vadd.f32 %v9935_v22, %v14932_v14  ;;  %v10307_v49 = vmul.f32 0.23388076, %v14779_v32 }
 0x399   : > { %14927 = vst [vmem:[#allocation131_spill] sm:$0xff] %v10273_v60  ;;  %14928 = vst [vmem:[#allocation132_spill] sm:$0xff] %v10276_v8  ;;  %v3097_v60 = vmul.f32 0.23388076, %v14769_v37  ;;  %v10294_v8 = vmul.f32 0.23388076, %v14771_v5 }
 0x39a   : > { %14929 = vst [vmem:[#allocation74_spill] sm:$0xff] %v10279_v48  ;;  %14931 = vst [vmem:[#allocation165_spill] sm:$0xff] %v10283_v51  ;;  %v10297_v48 = vmul.f32 0.23388076, %v14773_v45  ;;  %v14940_v22 = vld [vmem:[#allocation22_spill] sm:$0xff]  ;;  %v14943_v51 = vld [vmem:[#allocation187_spill] sm:$0xff] }
 0x39b   : > { %14933 = vst [vmem:[#allocation78_spill] sm:$0xff] %v10290_v36  ;;  %14934 = vst [vmem:[#allocation183_spill] sm:$0xff] %v10294_v8  ;;  %v10310_v14 = vmul.f32 0.23388076, %v14940_v22  ;;  %v14942_v36 = vld [vmem:[#allocation56_spill] sm:$0xff]  ;;  %v14946_v37 = vld [vmem:[#allocation146_spill] sm:$0xff] }
 0x39c   : > { %14935 = vst [vmem:[#allocation134_spill] sm:$0xff] %v10297_v48  ;;  %14937 = vst [vmem:[#allocation135_spill] sm:$0xff] %v10301_v10  ;;  %v10314_v5 = vadd.f32 %v14943_v51, %v14942_v36  ;;  %v10317_v45 = vmul.f32 0.23388076, %v14785_v33  ;;  %v10320_v57 = vmul.f32 0.23388076, %v14946_v37 }
 0x39d   : > { %14938 = vst [vmem:[#allocation136_spill] sm:$0xff] %v10304_v2  ;;  %14939 = vst [vmem:[#allocation138_spill] sm:$0xff] %v10307_v49  ;;  %v14948_v39 = vld [vmem:[#allocation23_spill] sm:$0xff]  ;;  %v14952_v32 = vld [vmem:[#allocation148_spill] sm:$0xff] }
 0x39e   : > { %14941 = vst [vmem:[#allocation208_spill] sm:$0xff] %v10310_v14  ;;  %14944 = vst [vmem:[#allocation180_spill] sm:$0xff] %v10314_v5  ;;  %v10323_v3 = vmul.f32 0.23388076, %v14948_v39  ;;  %v14950_v10 = vld [vmem:[#allocation147_spill] sm:$0xff]  ;;  %v14956_v51 = vld [vmem:[#allocation233_spill] sm:$0xff] }
 0x39f   : > { %14945 = vst [vmem:[#allocation69_spill] sm:$0xff] %v10317_v45  ;;  %14947 = vst [vmem:[#allocation139_spill] sm:$0xff] %v10320_v57  ;;  %v10326_v53 = vmul.f32 0.23388076, %v14950_v10  ;;  %v10329_v31 = vmul.f32 0.23388076, %v14952_v32  ;;  %v10335_v36 = vadd.f32 %v3095_v43, %v14956_v51 }
 0x3a0   : > { %14949 = vst [vmem:[#allocation140_spill] sm:$0xff] %v10323_v3  ;;  %v14954_v22 = vld [vmem:[#allocation231_spill] sm:$0xff]  ;;  %v14958_v5 = vld [vmem:[#allocation26_spill] sm:$0xff]  ;;  %v14960_v37 = vld [vmem:[#allocation149_spill] sm:$0xff] }
 0x3a1   : > { %14951 = vst [vmem:[#allocation141_spill] sm:$0xff] %v10326_v53  ;;  %14953 = vst [vmem:[#allocation142_spill] sm:$0xff] %v10329_v31  ;;  %v10332_v23 = vadd.f32 %v3094_v13, %v14954_v22  ;;  %v10338_v33 = vmul.f32 0.23388076, %v14958_v5  ;;  %v10341_v50 = vmul.f32 0.23388076, %v14960_v37 }
 0x3a2   : > { %14957 = vst [vmem:[#allocation214_spill] sm:$0xff] %v10335_v36  ;;  %v14962_v39 = vld [vmem:[#allocation232_spill] sm:$0xff]  ;;  %v14964_v10 = vld [vmem:[#allocation235_spill] sm:$0xff]  ;;  %v14968_v13 = vld [vmem:[#allocation85_spill] sm:$0xff] }
 0x3a3   : > { %14955 = vst [vmem:[#allocation143_spill] sm:$0xff] %v10332_v23  ;;  %14959 = vst [vmem:[#allocation39_spill] sm:$0xff] %v10338_v33  ;;  %v10344_v27 = vadd.f32 %v3096_v1, %v14962_v39  ;;  %v10347_v54 = vadd.f32 %v3097_v60, %v14964_v10  ;;  %v14966_v32 = vld [vmem:[#allocation80_spill] sm:$0xff]  ;;  %v10355_v43 = vadd.f32 %v10297_v48, %v14968_v13  ;;  %v14970_v22 = vld [vmem:[#allocation87_spill] sm:$0xff] }
 0x3a4   : > { %14961 = vst [vmem:[#allocation40_spill] sm:$0xff] %v10341_v50  ;;  %v10351_v20 = vadd.f32 %v10294_v8, %v14966_v32  ;;  %v10359_v51 = vadd.f32 %v10304_v2, %v14970_v22  ;;  %v14972_v36 = vld [vmem:[#allocation119_spill] sm:$0xff]  ;;  %v14974_v1 = vld [vmem:[#allocation201_spill] sm:$0xff]  ;;  %v14976_v10 = vld [vmem:[#allocation202_spill] sm:$0xff] }
 0x3a5   : > { %14963 = vst [vmem:[#allocation53_spill] sm:$0xff] %v10344_v27  ;;  %14965 = vst [vmem:[#allocation168_spill] sm:$0xff] %v10347_v54  ;;  %v10363_v23 = vadd.f32 %v10307_v49, %v14972_v36  ;;  %v10367_v60 = vadd.f32 %v10310_v14, %v14974_v1  ;;  %v10371_v32 = vadd.f32 %v10317_v45, %v14976_v10  ;;  %v14978_v39 = vld [vmem:[#allocation29_spill] sm:$0xff]  ;;  %v14980_v48 = vld [vmem:[#allocation38_spill] sm:$0xff] }
 0x3a6   : > { %14967 = vst [vmem:[#allocation42_spill] sm:$0xff] %v10351_v20  ;;  %14969 = vst [vmem:[#allocation43_spill] sm:$0xff] %v10355_v43  ;;  %v10375_v13 = vadd.f32 %v10320_v57, %v14978_v39  ;;  %v10379_v22 = vadd.f32 %v10323_v3, %v14980_v48  ;;  %v14982_v2 = vld [vmem:[#allocation41_spill] sm:$0xff]  ;;  %v14984_v49 = vld [vmem:[#allocation166_spill] sm:$0xff]  ;;  %v3129_v39 = vmul.f32 0.23388076, %v14810_v62 }
 0x3a7   : > { %14971 = vst [vmem:[#allocation44_spill] sm:$0xff] %v10359_v51  ;;  %14973 = vst [vmem:[#allocation46_spill] sm:$0xff] %v10363_v23  ;;  %v10383_v36 = vadd.f32 %v10326_v53, %v14982_v2  ;;  %v3126_v8 = vmul.f32 0.23388076, %v14984_v49  ;;  %v14985_v1 = vld [vmem:[#allocation184_spill] sm:$0xff]  ;;  %v14986_v10 = vld [vmem:[#allocation45_spill] sm:$0xff] }
 0x3a8   : > { %14975 = vst [vmem:[#allocation47_spill] sm:$0xff] %v10367_v60  ;;  %14977 = vst [vmem:[#allocation48_spill] sm:$0xff] %v10371_v32  ;;  %v3127_v14 = vmul.f32 0.23388076, %v14985_v1  ;;  %v3128_v60 = vmul.f32 0.23388076, %v14808_v52  ;;  %v10390_v45 = vadd.f32 %v10329_v31, %v14986_v10 }
 0x3a9   : > { %14979 = vst [vmem:[#allocation50_spill] sm:$0xff] %v10375_v13  ;;  %14981 = vst [vmem:[#allocation51_spill] sm:$0xff] %v10379_v22  ;;  %v14988_v57 = vld [vmem:[#allocation24_spill] sm:$0xff]  ;;  %v14990_v48 = vld [vmem:[#allocation209_spill] sm:$0xff] }
 0x3aa   : > { %14983 = vst [vmem:[#allocation52_spill] sm:$0xff] %v10383_v36  ;;  %14987 = vst [vmem:[#allocation56_spill] sm:$0xff] %v10390_v45  ;;  %v10394_v13 = vmul.f32 0.23388076, %v14988_v57  ;;  %v10397_v3 = vmul.f32 0.23388076, %v14990_v48 }
 0x3ab   : > { %v14992_v2 = vld [vmem:[#allocation55_spill] sm:$0xff]  ;;  %v14994_v49 = vld [vmem:[#allocation190_spill] sm:$0xff]  ;;  %v15000_v62 = vld [vmem:[#allocation60_spill] sm:$0xff] }
 0x3ac   : > { %14989 = vst [vmem:[#allocation187_spill] sm:$0xff] %v10394_v13  ;;  %14991 = vst [vmem:[#allocation231_spill] sm:$0xff] %v10397_v3  ;;  %v10401_v53 = vadd.f32 %v10338_v33, %v14992_v2  ;;  %v10404_v1 = vmul.f32 0.23388076, %v14994_v49  ;;  %v14996_v52 = vld [vmem:[#allocation210_spill] sm:$0xff]  ;;  %v14998_v10 = vld [vmem:[#allocation191_spill] sm:$0xff]  ;;  %v10414_v57 = vadd.f32 %v10341_v50, %v15000_v62 }
 0x3ad   : > { %v10407_v36 = vmul.f32 0.23388076, %v14996_v52  ;;  %v10410_v31 = vmul.f32 0.23388076, %v14998_v10  ;;  %v15002_v45 = vld [vmem:[#allocation70_spill] sm:$0xff]  ;;  %v15004_v22 = vld [vmem:[#allocation211_spill] sm:$0xff] }
 0x3ae   : > { %14993 = vst [vmem:[#allocation233_spill] sm:$0xff] %v10401_v53  ;;  %14995 = vst [vmem:[#allocation232_spill] sm:$0xff] %v10404_v1  ;;  %v10417_v48 = vmul.f32 0.23388076, %v15002_v45  ;;  %v10420_v32 = vmul.f32 0.23388076, %v15004_v22 }
 0x3af   : > { %14997 = vst [vmem:[#allocation235_spill] sm:$0xff] %v10407_v36  ;;  %14999 = vst [vmem:[#allocation80_spill] sm:$0xff] %v10410_v31  ;;  %v15006_v2 = vld [vmem:[#allocation239_spill] sm:$0xff]  ;;  %v15008_v49 = vld [vmem:[#allocation28_spill] sm:$0xff] }
 0x3b0   : > { %15001 = vst [vmem:[#allocation85_spill] sm:$0xff] %v10414_v57  ;;  %15003 = vst [vmem:[#allocation87_spill] sm:$0xff] %v10417_v48  ;;  %v10423_v33 = vmul.f32 0.23388076, %v15006_v2  ;;  %v10426_v53 = vmul.f32 0.23388076, %v15008_v49 }
 0x3b1   : > { %15005 = vst [vmem:[#allocation119_spill] sm:$0xff] %v10420_v32  ;;  %v15010_v52 = vld [vmem:[#allocation153_spill] sm:$0xff]  ;;  %v15012_v10 = vld [vmem:[#allocation66_spill] sm:$0xff]  ;;  %v15013_v62 = vld [vmem:[#allocation120_spill] sm:$0xff] }
 0x3b2   : > { %15007 = vst [vmem:[#allocation166_spill] sm:$0xff] %v10423_v33  ;;  %15009 = vst [vmem:[#allocation184_spill] sm:$0xff] %v10426_v53  ;;  %v10429_v23 = vmul.f32 0.23388076, %v15010_v52  ;;  %v10432_v51 = vadd.f32 %v3126_v8, %v15012_v10  ;;  %v10435_v50 = vadd.f32 %v3127_v14, %v15013_v62  ;;  %v15015_v45 = vld [vmem:[#allocation154_spill] sm:$0xff]  ;;  %v15017_v22 = vld [vmem:[#allocation31_spill] sm:$0xff] }
 0x3b3   : > { %v10438_v57 = vmul.f32 0.23388076, %v15015_v45  ;;  %v10441_v43 = vmul.f32 0.23388076, %v15017_v22  ;;  %v15019_v2 = vld [vmem:[#allocation81_spill] sm:$0xff]  ;;  %v15020_v49 = vld [vmem:[#allocation90_spill] sm:$0xff] }
 0x3b4   : > { %15011 = vst [vmem:[#allocation240_spill] sm:$0xff] %v10429_v23  ;;  %15014 = vst [vmem:[#allocation66_spill] sm:$0xff] %v10435_v50  ;;  %v10444_v20 = vadd.f32 %v3128_v60, %v15019_v2  ;;  %v10447_v54 = vadd.f32 %v3129_v39, %v15020_v49  ;;  %v15021_v52 = vld [vmem:[#allocation91_spill] sm:$0xff]  ;;  %v15022_v8 = vld [vmem:[#allocation92_spill] sm:$0xff] }
 0x3b5   : > { %15016 = vst [vmem:[#allocation120_spill] sm:$0xff] %v10438_v57  ;;  %15018 = vst [vmem:[#allocation241_spill] sm:$0xff] %v10441_v43  ;;  %v10451_v27 = vadd.f32 %v10394_v13, %v15021_v52  ;;  %v10455_v62 = vadd.f32 %v10397_v3, %v15022_v8  ;;  %v15023_v14 = vld [vmem:[#allocation94_spill] sm:$0xff]  ;;  %v15025_v50 = vld [vmem:[#allocation195_spill] sm:$0xff] }
 0x3b6   : > { %v10459_v10 = vadd.f32 %v10404_v1, %v15023_v14  ;;  %v10463_v22 = vadd.f32 %v10407_v36, %v15025_v50  ;;  %v15027_v2 = vld [vmem:[#allocation95_spill] sm:$0xff]  ;;  %v15029_v39 = vld [vmem:[#allocation176_spill] sm:$0xff]  ;;  %v15031_v49 = vld [vmem:[#allocation86_spill] sm:$0xff] }
 0x3b7   : > { %v10467_v60 = vadd.f32 %v10410_v31, %v15027_v2  ;;  %v10471_v52 = vadd.f32 %v10417_v48, %v15029_v39  ;;  %v10475_v8 = vadd.f32 %v10420_v32, %v15031_v49  ;;  %v15033_v3 = vld [vmem:[#allocation96_spill] sm:$0xff]  ;;  %v15037_v36 = vld [vmem:[#allocation157_spill] sm:$0xff] }
 0x3b8   : > { %15024 = vst [vmem:[#allocation81_spill] sm:$0xff] %v10459_v10  ;;  %15026 = vst [vmem:[#allocation90_spill] sm:$0xff] %v10463_v22  ;;  %v10479_v14 = vadd.f32 %v10423_v33, %v15033_v3  ;;  %v15035_v1 = vld [vmem:[#allocation196_spill] sm:$0xff]  ;;  %v3158_v13 = vmul.f32 0.23388076, %v15037_v36  ;;  %v15038_v2 = vld [vmem:[#allocation33_spill] sm:$0xff] }
 0x3b9   : > { %15028 = vst [vmem:[#allocation91_spill] sm:$0xff] %v10467_v60  ;;  %15030 = vst [vmem:[#allocation92_spill] sm:$0xff] %v10471_v52  ;;  %v10483_v50 = vadd.f32 %v10426_v53, %v15035_v1  ;;  %v3159_v31 = vmul.f32 0.23388076, %v15038_v2  ;;  %v15039_v60 = vld [vmem:[#allocation35_spill] sm:$0xff]  ;;  %v15040_v39 = vld [vmem:[#allocation204_spill] sm:$0xff] }
 0x3ba   : > { %15032 = vst [vmem:[#allocation94_spill] sm:$0xff] %v10475_v8  ;;  %15034 = vst [vmem:[#allocation195_spill] sm:$0xff] %v10479_v14  ;;  %v3160_v22 = vmul.f32 0.23388076, %v15039_v60  ;;  %v10490_v48 = vadd.f32 %v10429_v23, %v15040_v39  ;;  %v15042_v49 = vld [vmem:[#allocation36_spill] sm:$0xff]  ;;  %v15043_v8 = vld [vmem:[#allocation37_spill] sm:$0xff] }
 0x3bb   : > { %15036 = vst [vmem:[#allocation242_spill] sm:$0xff] %v10483_v50  ;;  %v3161_v32 = vmul.f32 0.23388076, %v15042_v49  ;;  %v10494_v52 = vmul.f32 0.23388076, %v15043_v8  ;;  %v15045_v3 = vld [vmem:[#allocation159_spill] sm:$0xff] }
 0x3bc   : > { %15041 = vst [vmem:[#allocation157_spill] sm:$0xff] %v10490_v48  ;;  %v10497_v33 = vmul.f32 0.23388076, %v15045_v3  ;;  %v15047_v1 = vld [vmem:[#allocation98_spill] sm:$0xff]  ;;  %v15049_v36 = vld [vmem:[#allocation160_spill] sm:$0xff]  ;;  %v15052_v39 = vld [vmem:[#allocation161_spill] sm:$0xff] }
 0x3bd   : > { %15044 = vst [vmem:[#allocation33_spill] sm:$0xff] %v10494_v52  ;;  %v10501_v53 = vadd.f32 %v10438_v57, %v15047_v1  ;;  %v10504_v2 = vmul.f32 0.23388076, %v15049_v36  ;;  %v10507_v60 = vmul.f32 0.23388076, %v14861_v0  ;;  %v15054_v49 = vld [vmem:[#allocation177_spill] sm:$0xff] }
 0x3be   : > { %15046 = vst [vmem:[#allocation243_spill] sm:$0xff] %v10497_v33  ;;  %v10510_v23 = vmul.f32 0.23388076, %v15052_v39  ;;  %v10514_v8 = vadd.f32 %v10441_v43, %v15054_v49  ;;  %v15056_v48 = vld [vmem:[#allocation162_spill] sm:$0xff]  ;;  %v10520_v50 = vmul.f32 0.23388076, %v14869_v63 }
 0x3bf   : > { %15048 = vst [vmem:[#allocation244_spill] sm:$0xff] %v10501_v53  ;;  %15050 = vst [vmem:[#allocation245_spill] sm:$0xff] %v10504_v2  ;;  %v10517_v3 = vmul.f32 0.23388076, %v15056_v48  ;;  %v10523_v1 = vmul.f32 0.23388076, %v14871_v18 }
 0x3c0   : > { %15051 = vst [vmem:[#allocation246_spill] sm:$0xff] %v10507_v60  ;;  %15053 = vst [vmem:[#allocation247_spill] sm:$0xff] %v10510_v23  ;;  %v10526_v57 = vmul.f32 0.23388076, %v14873_v15  ;;  %v15061_v0 = vld [vmem:[#allocation100_spill] sm:$0xff]  ;;  %v15063_v39 = vld [vmem:[#allocation101_spill] sm:$0xff] }
 0x3c1   : > { %15055 = vst [vmem:[#allocation248_spill] sm:$0xff] %v10514_v8  ;;  %15057 = vst [vmem:[#allocation249_spill] sm:$0xff] %v10517_v3  ;;  %v10529_v36 = vadd.f32 %v3158_v13, %v15061_v0  ;;  %v10532_v53 = vadd.f32 %v3159_v31, %v15063_v39  ;;  %v15065_v49 = vld [vmem:[#allocation102_spill] sm:$0xff]  ;;  %v10538_v48 = vmul.f32 0.23388076, %v14877_v21  ;;  %v15068_v63 = vld [vmem:[#allocation215_spill] sm:$0xff] }
 0x3c2   : > { %15058 = vst [vmem:[#allocation250_spill] sm:$0xff] %v10520_v50  ;;  %15059 = vst [vmem:[#allocation251_spill] sm:$0xff] %v10523_v1  ;;  %v10535_v43 = vadd.f32 %v3160_v22, %v15065_v49  ;;  %v10541_v8 = vmul.f32 0.23388076, %v15068_v63  ;;  %v15070_v18 = vld [vmem:[#allocation216_spill] sm:$0xff]  ;;  %v15073_v0 = vld [vmem:[#allocation105_spill] sm:$0xff] }
 0x3c3   : > { %15060 = vst [vmem:[#allocation252_spill] sm:$0xff] %v10526_v57  ;;  %15062 = vst [vmem:[#allocation100_spill] sm:$0xff] %v10529_v36  ;;  %v10544_v14 = vmul.f32 0.23388076, %v15070_v18  ;;  %v15072_v15 = vld [vmem:[#allocation104_spill] sm:$0xff]  ;;  %v10551_v13 = vadd.f32 %v10494_v52, %v15073_v0  ;;  %v15074_v31 = vld [vmem:[#allocation75_spill] sm:$0xff] }
 0x3c4   : > { %15064 = vst [vmem:[#allocation101_spill] sm:$0xff] %v10532_v53  ;;  %15066 = vst [vmem:[#allocation102_spill] sm:$0xff] %v10535_v43  ;;  %v10547_v10 = vadd.f32 %v3161_v32, %v15072_v15  ;;  %v10555_v22 = vadd.f32 %v10497_v33, %v15074_v31  ;;  %v15075_v39 = vld [vmem:[#allocation236_spill] sm:$0xff]  ;;  %v15076_v43 = vld [vmem:[#allocation57_spill] sm:$0xff] }
 0x3c5   : > { %15067 = vst [vmem:[#allocation253_spill] sm:$0xff] %v10538_v48  ;;  %15069 = vst [vmem:[#allocation254_spill] sm:$0xff] %v10541_v8  ;;  %v10559_v49 = vadd.f32 %v10504_v2, %v15075_v39  ;;  %v10563_v53 = vadd.f32 %v10507_v60, %v15076_v43  ;;  %v15077_v36 = vld [vmem:[#allocation106_spill] sm:$0xff]  ;;  %v15079_v52 = vld [vmem:[#allocation108_spill] sm:$0xff]  ;;  %v3190_v60 = vmul.f32 0.23388076, %v9790_v25 }
 0x3c6   : > { %15071 = vst [vmem:[#allocation255_spill] sm:$0xff] %v10544_v14  ;;  %v10567_v15 = vadd.f32 %v10510_v23, %v15077_v36  ;;  %v15078_v32 = vld [vmem:[#allocation82_spill] sm:$0xff]  ;;  %v10575_v31 = vadd.f32 %v10520_v50, %v15079_v52  ;;  %v15080_v33 = vld [vmem:[#allocation84_spill] sm:$0xff]  ;;  %v3191_v36 = vmul.f32 0.23388076, %v9799_v35 }
 0x3c7   : > { %v10571_v0 = vadd.f32 %v10517_v3, %v15078_v32  ;;  %v10579_v39 = vadd.f32 %v10523_v1, %v15080_v33  ;;  %v15081_v2 = vld [vmem:[#allocation110_spill] sm:$0xff]  ;;  %v3192_v23 = vmul.f32 0.23388076, %v9808_v19  ;;  %v15082_v32 = vld [vmem:[#allocation112_spill] sm:$0xff]  ;;  %v3193_v52 = vmul.f32 0.23388076, %v9815_v58 }
 0x3c8   : > { %v10583_v43 = vadd.f32 %v10526_v57, %v15081_v2  ;;  %v10590_v3 = vadd.f32 %v10538_v48, %v15082_v32  ;;  %v10594_v50 = vmul.f32 0.23388076, %v9818_v55  ;;  %v10597_v33 = vmul.f32 0.23388076, %v9821_v17  ;;  %v15085_v2 = vld [vmem:[#allocation113_spill] sm:$0xff] }
 0x3c9   : > { %v10601_v57 = vadd.f32 %v10541_v8, %v15085_v2  ;;  %v10604_v25 = vmul.f32 0.23388076, %v9824_v12  ;;  %v10607_v35 = vmul.f32 0.23388076, %v9827_v30  ;;  %v10610_v32 = vmul.f32 0.23388076, %v9830_v29 }
 0x3ca   : > { %15083 = vst [vmem:[#allocation104_spill] sm:$0xff] %v10594_v50  ;;  %15084 = vst [vmem:[#allocation105_spill] sm:$0xff] %v10597_v33  ;;  %v10614_v48 = vadd.f32 %v10544_v14, %v10145_v56  ;;  %v10617_v1 = vmul.f32 0.23388076, %v9833_v41  ;;  %v10620_v17 = vmul.f32 0.23388076, %v9836_v11  ;;  %v10632_v29 = vadd.f32 %v3190_v60, %v10148_v24 }
 0x3cb   : > { %15086 = vst [vmem:[#allocation75_spill] sm:$0xff] %v10601_v57  ;;  %15087 = vst [vmem:[#allocation236_spill] sm:$0xff] %v10604_v25  ;;  %v10623_v2 = vmul.f32 0.23388076, %v9839_v9  ;;  %v10626_v8 = vmul.f32 0.23388076, %v9912_v46 }
 0x3cc   : > { %15088 = vst [vmem:[#allocation57_spill] sm:$0xff] %v10607_v35  ;;  %15089 = vst [vmem:[#allocation256_spill] sm:$0xff] %v10610_v32  ;;  %v10629_v30 = vmul.f32 0.23388076, %v9921_v34  ;;  %v15097_v56 = vld [vmem:[#allocation116_spill] sm:$0xff]  ;;  %v15101_v11 = vld [vmem:[#allocation230_spill] sm:$0xff] }
 0x3cd   : > { %15090 = vst [vmem:[#allocation257_spill] sm:$0xff] %v10614_v48  ;;  %15091 = vst [vmem:[#allocation258_spill] sm:$0xff] %v10617_v1  ;;  %v10635_v14 = vadd.f32 %v3191_v36, %v15097_v56  ;;  %v15099_v41 = vld [vmem:[#allocation172_spill] sm:$0xff]  ;;  %v10641_v12 = vmul.f32 0.23388076, %v15101_v11  ;;  %v15103_v9 = vld [vmem:[#allocation121_spill] sm:$0xff] }
 0x3ce   : > { %15092 = vst [vmem:[#allocation259_spill] sm:$0xff] %v10620_v17  ;;  %15093 = vst [vmem:[#allocation260_spill] sm:$0xff] %v10623_v2  ;;  %v10638_v48 = vmul.f32 0.23388076, %v15099_v41  ;;  %v10644_v57 = vadd.f32 %v3192_v23, %v15103_v9  ;;  %v15104_v46 = vld [vmem:[#allocation62_spill] sm:$0xff]  ;;  %v15106_v24 = vld [vmem:[#allocation63_spill] sm:$0xff] }
 0x3cf   : > { %15094 = vst [vmem:[#allocation261_spill] sm:$0xff] %v10626_v8  ;;  %15095 = vst [vmem:[#allocation262_spill] sm:$0xff] %v10629_v30  ;;  %v10647_v55 = vadd.f32 %v3193_v52, %v15104_v46  ;;  %v15105_v34 = vld [vmem:[#allocation58_spill] sm:$0xff]  ;;  %v10655_v56 = vadd.f32 %v10597_v33, %v15106_v24  ;;  %v15107_v60 = vld [vmem:[#allocation59_spill] sm:$0xff] }
 0x3d0   : > { %15096 = vst [vmem:[#allocation263_spill] sm:$0xff] %v10632_v29  ;;  %15098 = vst [vmem:[#allocation116_spill] sm:$0xff] %v10635_v14  ;;  %v10651_v58 = vadd.f32 %v10594_v50, %v15105_v34  ;;  %v10659_v36 = vadd.f32 %v10604_v25, %v15107_v60  ;;  %v15108_v14 = vld [vmem:[#allocation65_spill] sm:$0xff]  ;;  %v15109_v9 = vld [vmem:[#allocation67_spill] sm:$0xff]  ;;  %v10717_v50 = vmul.f32 0.23388076, %v10168_v16 }
 0x3d1   : > { %15100 = vst [vmem:[#allocation264_spill] sm:$0xff] %v10638_v48  ;;  %15102 = vst [vmem:[#allocation265_spill] sm:$0xff] %v10641_v12  ;;  %v10663_v29 = vadd.f32 %v10607_v35, %v15108_v14  ;;  %v10667_v46 = vadd.f32 %v10610_v32, %v15109_v9  ;;  %v15110_v23 = vld [vmem:[#allocation188_spill] sm:$0xff]  ;;  %v15111_v52 = vld [vmem:[#allocation238_spill] sm:$0xff]  ;;  %v3222_v35 = vmul.f32 0.23388076, %v10051_v26 }
 0x3d2   : > { %v10671_v34 = vadd.f32 %v10617_v1, %v15110_v23  ;;  %v10675_v24 = vadd.f32 %v10620_v17, %v15111_v52  ;;  %v15112_v33 = vld [vmem:[#allocation68_spill] sm:$0xff]  ;;  %v15114_v25 = vld [vmem:[#allocation178_spill] sm:$0xff]  ;;  %v3223_v9 = vmul.f32 0.23388076, %v10064_v4  ;;  %v3224_v32 = vmul.f32 0.23388076, %v10077_v6 }
 0x3d3   : > { %v10679_v60 = vadd.f32 %v10623_v2, %v15112_v33  ;;  %v10683_v14 = vadd.f32 %v10626_v8, %v15114_v25  ;;  %v15116_v23 = vld [vmem:[#allocation30_spill] sm:$0xff]  ;;  %v3225_v52 = vmul.f32 0.23388076, %v10090_v59  ;;  %v10694_v17 = vmul.f32 0.23388076, %v10103_v40  ;;  %v15120_v25 = vld [vmem:[#allocation203_spill] sm:$0xff] }
 0x3d4   : > { %v10690_v1 = vadd.f32 %v10629_v30, %v15116_v23  ;;  %v10697_v33 = vmul.f32 0.23388076, %v10116_v7  ;;  %v10701_v8 = vadd.f32 %v10638_v48, %v15120_v25  ;;  %v10704_v4 = vmul.f32 0.23388076, %v10129_v47  ;;  %v15125_v30 = vld [vmem:[#allocation174_spill] sm:$0xff]  ;;  %15127 = vst [vmem:[#allocation270_spill] sm:$0xff] %v10717_v50 }
 0x3d5   : > { %15113 = vst [vmem:[#allocation121_spill] sm:$0xff] %v10679_v60  ;;  %15115 = vst [vmem:[#allocation62_spill] sm:$0xff] %v10683_v14  ;;  %v10707_v26 = vmul.f32 0.23388076, %v10142_v38  ;;  %v10710_v23 = vmul.f32 0.23388076, %v10155_v42  ;;  %v10714_v2 = vadd.f32 %v10641_v12, %v15125_v30 }
 0x3d6   : > { %15117 = vst [vmem:[#allocation58_spill] sm:$0xff] %v10690_v1  ;;  %15118 = vst [vmem:[#allocation63_spill] sm:$0xff] %v10694_v17  ;;  %v10720_v7 = vmul.f32 0.23388076, %v10181_v61  ;;  %v10723_v25 = vmul.f32 0.23388076, %v10194_v28 }
 0x3d7   : > { %15119 = vst [vmem:[#allocation59_spill] sm:$0xff] %v10697_v33  ;;  %15121 = vst [vmem:[#allocation65_spill] sm:$0xff] %v10701_v8  ;;  %v10726_v48 = vmul.f32 0.23388076, %v10207_v44  ;;  %v15131_v38 = vld [vmem:[#allocation205_spill] sm:$0xff]  ;;  %v15133_v42 = vld [vmem:[#allocation164_spill] sm:$0xff] }
 0x3d8   : > { %15122 = vst [vmem:[#allocation266_spill] sm:$0xff] %v10704_v4  ;;  %15123 = vst [vmem:[#allocation267_spill] sm:$0xff] %v10707_v26  ;;  %v10729_v47 = vmul.f32 0.23388076, %v15131_v38  ;;  %v10732_v40 = vadd.f32 %v3222_v35, %v15133_v42  ;;  %v15135_v30 = vld [vmem:[#allocation192_spill] sm:$0xff]  ;;  %v15137_v16 = vld [vmem:[#allocation193_spill] sm:$0xff] }
 0x3d9   : > { %15124 = vst [vmem:[#allocation268_spill] sm:$0xff] %v10710_v23  ;;  %15126 = vst [vmem:[#allocation269_spill] sm:$0xff] %v10714_v2  ;;  %v10735_v12 = vadd.f32 %v3223_v9, %v15135_v30  ;;  %v10738_v2 = vmul.f32 0.23388076, %v15137_v16  ;;  %v15139_v61 = vld [vmem:[#allocation123_spill] sm:$0xff]  ;;  %v15141_v28 = vld [vmem:[#allocation124_spill] sm:$0xff] }
 0x3da   : > { %15128 = vst [vmem:[#allocation271_spill] sm:$0xff] %v10720_v7  ;;  %15129 = vst [vmem:[#allocation272_spill] sm:$0xff] %v10723_v25  ;;  %v10741_v8 = vmul.f32 0.23388076, %v15139_v61  ;;  %v10744_v59 = vadd.f32 %v3224_v32, %v15141_v28  ;;  %v15143_v44 = vld [vmem:[#allocation61_spill] sm:$0xff]  ;;  %v15145_v38 = vld [vmem:[#allocation71_spill] sm:$0xff] }
 0x3db   : > { %15130 = vst [vmem:[#allocation273_spill] sm:$0xff] %v10726_v48  ;;  %15132 = vst [vmem:[#allocation274_spill] sm:$0xff] %v10729_v47  ;;  %v10747_v6 = vadd.f32 %v3225_v52, %v15143_v44  ;;  %v10751_v1 = vadd.f32 %v10694_v17, %v15145_v38  ;;  %v15147_v42 = vld [vmem:[#allocation171_spill] sm:$0xff]  ;;  %v15149_v35 = vld [vmem:[#allocation122_spill] sm:$0xff] }
 0x3dc   : > { %15134 = vst [vmem:[#allocation164_spill] sm:$0xff] %v10732_v40  ;;  %15136 = vst [vmem:[#allocation192_spill] sm:$0xff] %v10735_v12  ;;  %v10755_v30 = vadd.f32 %v10697_v33, %v15147_v42  ;;  %v10759_v9 = vadd.f32 %v10704_v4, %v15149_v35  ;;  %v15151_v61 = vld [vmem:[#allocation126_spill] sm:$0xff]  ;;  %v15153_v28 = vld [vmem:[#allocation127_spill] sm:$0xff] }
 0x3dd   : > { %15138 = vst [vmem:[#allocation275_spill] sm:$0xff] %v10738_v2  ;;  %15140 = vst [vmem:[#allocation276_spill] sm:$0xff] %v10741_v8  ;;  %v10763_v16 = vadd.f32 %v10707_v26, %v15151_v61  ;;  %v10767_v44 = vadd.f32 %v10710_v23, %v15153_v28  ;;  %v15155_v32 = vld [vmem:[#allocation194_spill] sm:$0xff]  ;;  %v15157_v52 = vld [vmem:[#allocation128_spill] sm:$0xff] }
 0x3de   : > { %15142 = vst [vmem:[#allocation124_spill] sm:$0xff] %v10744_v59  ;;  %15144 = vst [vmem:[#allocation61_spill] sm:$0xff] %v10747_v6  ;;  %v10771_v38 = vadd.f32 %v10717_v50, %v15155_v32  ;;  %v10775_v42 = vadd.f32 %v10720_v7, %v15157_v52  ;;  %v15159_v33 = vld [vmem:[#allocation189_spill] sm:$0xff]  ;;  %v15161_v4 = vld [vmem:[#allocation198_spill] sm:$0xff]  ;;  %v3266_v6 = vmul.f32 0.2920817, %v14958_v5 }
 0x3df   : > { %15146 = vst [vmem:[#allocation71_spill] sm:$0xff] %v10751_v1  ;;  %15148 = vst [vmem:[#allocation171_spill] sm:$0xff] %v10755_v30  ;;  %v10779_v35 = vadd.f32 %v10723_v25, %v15159_v33  ;;  %v10783_v61 = vadd.f32 %v10726_v48, %v15161_v4  ;;  %v15163_v26 = vld [vmem:[#allocation175_spill] sm:$0xff]  ;;  %v15164_v28 = vld [vmem:[#allocation158_spill] sm:$0xff] }
 0x3e0   : > { %15150 = vst [vmem:[#allocation122_spill] sm:$0xff] %v10759_v9  ;;  %15152 = vst [vmem:[#allocation126_spill] sm:$0xff] %v10763_v16  ;;  %v3254_v17 = vmul.f32 0.2920817, %v15163_v26  ;;  %v3255_v23 = vmul.f32 0.2920817, %v15164_v28 }
 0x3e1   : > { %15154 = vst [vmem:[#allocation277_spill] sm:$0xff] %v10767_v44  ;;  %15156 = vst [vmem:[#allocation278_spill] sm:$0xff] %v10771_v38  ;;  %v15165_v44 = vld [vmem:[#allocation72_spill] sm:$0xff]  ;;  %v15166_v32 = vld [vmem:[#allocation131_spill] sm:$0xff] }
 0x3e2   : > { %15158 = vst [vmem:[#allocation279_spill] sm:$0xff] %v10775_v42  ;;  %15160 = vst [vmem:[#allocation280_spill] sm:$0xff] %v10779_v35  ;;  %v3256_v16 = vmul.f32 0.2920817, %v15165_v44  ;;  %v10790_v50 = vadd.f32 %v10729_v47, %v15166_v32  ;;  %v15168_v52 = vld [vmem:[#allocation73_spill] sm:$0xff]  ;;  %v15170_v33 = vld [vmem:[#allocation144_spill] sm:$0xff] }
 0x3e3   : > { %15162 = vst [vmem:[#allocation281_spill] sm:$0xff] %v10783_v61  ;;  %v3257_v7 = vmul.f32 0.2920817, %v15168_v52  ;;  %v15169_v42 = vld [vmem:[#allocation77_spill] sm:$0xff]  ;;  %v3259_v25 = vmul.f32 0.2920817, %v15170_v33 }
 0x3e4   : > { %15167 = vst [vmem:[#allocation175_spill] sm:$0xff] %v10790_v50  ;;  %v3258_v38 = vmul.f32 0.2920817, %v15169_v42  ;;  %v15171_v35 = vld [vmem:[#allocation132_spill] sm:$0xff]  ;;  %v15173_v48 = vld [vmem:[#allocation22_spill] sm:$0xff]  ;;  %v15174_v61 = vld [vmem:[#allocation145_spill] sm:$0xff] }
 0x3e5   : > { %v10797_v4 = vadd.f32 %v10738_v2, %v15171_v35  ;;  %v3260_v26 = vmul.f32 0.2920817, %v15173_v48  ;;  %v3261_v28 = vmul.f32 0.2920817, %v15174_v61  ;;  %v15175_v9 = vld [vmem:[#allocation146_spill] sm:$0xff]  ;;  %v15178_v47 = vld [vmem:[#allocation23_spill] sm:$0xff] }
 0x3e6   : > { %v3262_v44 = vmul.f32 0.2920817, %v15175_v9  ;;  %v15176_v30 = vld [vmem:[#allocation74_spill] sm:$0xff]  ;;  %v3263_v52 = vmul.f32 0.2920817, %v15178_v47  ;;  %v15179_v50 = vld [vmem:[#allocation147_spill] sm:$0xff] }
 0x3e7   : > { %15172 = vst [vmem:[#allocation158_spill] sm:$0xff] %v10797_v4  ;;  %v10804_v32 = vadd.f32 %v10741_v8, %v15176_v30  ;;  %v3264_v42 = vmul.f32 0.2920817, %v15179_v50  ;;  %v15180_v1 = vld [vmem:[#allocation148_spill] sm:$0xff]  ;;  %v3267_v35 = vmul.f32 0.2920817, %v14960_v37 }
 0x3e8   : > { %v3265_v33 = vmul.f32 0.2920817, %v15180_v1  ;;  %v15181_v2 = vld [vmem:[#allocation150_spill] sm:$0xff]  ;;  %v15182_v4 = vld [vmem:[#allocation143_spill] sm:$0xff]  ;;  %v15185_v30 = vld [vmem:[#allocation53_spill] sm:$0xff] }
 0x3e9   : > { %15177 = vst [vmem:[#allocation72_spill] sm:$0xff] %v10804_v32  ;;  %v3268_v48 = vmul.f32 0.2920817, %v15181_v2  ;;  %v3270_v61 = vadd.f32 %v3254_v17, %v15182_v4  ;;  %v15183_v59 = vld [vmem:[#allocation27_spill] sm:$0xff]  ;;  %v15184_v12 = vld [vmem:[#allocation214_spill] sm:$0xff]  ;;  %v3272_v8 = vadd.f32 %v3256_v16, %v15185_v30  ;;  %v15186_v32 = vld [vmem:[#allocation168_spill] sm:$0xff] }
 0x3ea   : > { %v3269_v9 = vmul.f32 0.2920817, %v15183_v59  ;;  %v3271_v40 = vadd.f32 %v3255_v23, %v15184_v12  ;;  %v10817_v47 = vadd.f32 %v3257_v7, %v15186_v32  ;;  %v15187_v50 = vld [vmem:[#allocation42_spill] sm:$0xff]  ;;  %v15188_v1 = vld [vmem:[#allocation43_spill] sm:$0xff]  ;;  %v15189_v37 = vld [vmem:[#allocation44_spill] sm:$0xff] }
 0x3eb   : > { %v10820_v14 = vadd.f32 %v3258_v38, %v15187_v50  ;;  %v10823_v5 = vadd.f32 %v3259_v25, %v15188_v1  ;;  %v10826_v60 = vadd.f32 %v3260_v26, %v15189_v37  ;;  %v15190_v2 = vld [vmem:[#allocation46_spill] sm:$0xff]  ;;  %v15191_v4 = vld [vmem:[#allocation47_spill] sm:$0xff]  ;;  %v15193_v12 = vld [vmem:[#allocation48_spill] sm:$0xff] }
 0x3ec   : > { %v10829_v17 = vadd.f32 %v3261_v28, %v15190_v2  ;;  %v10832_v59 = vadd.f32 %v3262_v44, %v15191_v4  ;;  %v10835_v16 = vadd.f32 %v3263_v52, %v15193_v12  ;;  %v15195_v7 = vld [vmem:[#allocation50_spill] sm:$0xff]  ;;  %v15197_v30 = vld [vmem:[#allocation51_spill] sm:$0xff]  ;;  %v15199_v25 = vld [vmem:[#allocation52_spill] sm:$0xff] }
 0x3ed   : > { %v10838_v23 = vadd.f32 %v3264_v42, %v15195_v7  ;;  %v10841_v32 = vadd.f32 %v3265_v33, %v15197_v30  ;;  %v10844_v38 = vadd.f32 %v3266_v6, %v15199_v25  ;;  %v15201_v37 = vld [vmem:[#allocation56_spill] sm:$0xff]  ;;  %v15203_v2 = vld [vmem:[#allocation233_spill] sm:$0xff]  ;;  %v15205_v44 = vld [vmem:[#allocation167_spill] sm:$0xff] }
 0x3ee   : > { %15192 = vst [vmem:[#allocation73_spill] sm:$0xff] %v10832_v59  ;;  %15194 = vst [vmem:[#allocation77_spill] sm:$0xff] %v10835_v16  ;;  %v10847_v26 = vadd.f32 %v3267_v35, %v15201_v37  ;;  %v10850_v28 = vadd.f32 %v3268_v48, %v15203_v2  ;;  %v3286_v50 = vmul.f32 0.2920817, %v15205_v44  ;;  %v15206_v1 = vld [vmem:[#allocation85_spill] sm:$0xff]  ;;  %v15209_v12 = vld [vmem:[#allocation24_spill] sm:$0xff] }
 0x3ef   : > { %15196 = vst [vmem:[#allocation144_spill] sm:$0xff] %v10838_v23  ;;  %15198 = vst [vmem:[#allocation22_spill] sm:$0xff] %v10841_v32  ;;  %v10854_v52 = vadd.f32 %v3269_v9, %v15206_v1  ;;  %v15208_v4 = vld [vmem:[#allocation185_spill] sm:$0xff]  ;;  %v3288_v7 = vmul.f32 0.2920817, %v15209_v12  ;;  %v15211_v32 = vld [vmem:[#allocation190_spill] sm:$0xff] }
 0x3f0   : > { %15200 = vst [vmem:[#allocation145_spill] sm:$0xff] %v10844_v38  ;;  %15202 = vst [vmem:[#allocation146_spill] sm:$0xff] %v10847_v26  ;;  %v3287_v42 = vmul.f32 0.2920817, %v15208_v4  ;;  %v15210_v33 = vld [vmem:[#allocation209_spill] sm:$0xff]  ;;  %v15212_v25 = vld [vmem:[#allocation210_spill] sm:$0xff] }
 0x3f1   : > { %15204 = vst [vmem:[#allocation23_spill] sm:$0xff] %v10850_v28  ;;  %15207 = vst [vmem:[#allocation147_spill] sm:$0xff] %v10854_v52  ;;  %v3289_v30 = vmul.f32 0.2920817, %v15210_v33  ;;  %v3290_v6 = vmul.f32 0.2920817, %v15211_v32 }
 0x3f2   : > { %v3291_v38 = vmul.f32 0.2920817, %v15212_v25  ;;  %v15213_v35 = vld [vmem:[#allocation191_spill] sm:$0xff]  ;;  %v15216_v2 = vld [vmem:[#allocation70_spill] sm:$0xff]  ;;  %v15221_v12 = vld [vmem:[#allocation28_spill] sm:$0xff] }
 0x3f3   : > { %v3292_v37 = vmul.f32 0.2920817, %v15213_v35  ;;  %v15214_v26 = vld [vmem:[#allocation183_spill] sm:$0xff]  ;;  %v3293_v44 = vmul.f32 0.2920817, %v15216_v2  ;;  %v15219_v4 = vld [vmem:[#allocation134_spill] sm:$0xff]  ;;  %v10875_v35 = vadd.f32 %v3286_v50, %v10432_v51 }
 0x3f4   : > { %v10863_v48 = vadd.f32 %v3270_v61, %v15214_v26  ;;  %v15217_v28 = vld [vmem:[#allocation211_spill] sm:$0xff]  ;;  %v10869_v23 = vadd.f32 %v3271_v40, %v15219_v4  ;;  %v3296_v33 = vmul.f32 0.2920817, %v15221_v12  ;;  %v15222_v16 = vld [vmem:[#allocation153_spill] sm:$0xff]  ;;  %v3298_v25 = vmul.f32 0.2920817, %v15015_v45 }
 0x3f5   : > { %v3294_v9 = vmul.f32 0.2920817, %v15217_v28  ;;  %v15218_v1 = vld [vmem:[#allocation239_spill] sm:$0xff]  ;;  %v3297_v32 = vmul.f32 0.2920817, %v15222_v16  ;;  %v15225_v59 = vld [vmem:[#allocation66_spill] sm:$0xff]  ;;  %v10887_v12 = vadd.f32 %v3289_v30, %v10447_v54  ;;  %v10890_v16 = vadd.f32 %v3290_v6, %v10451_v27 }
 0x3f6   : > { %15215 = vst [vmem:[#allocation148_spill] sm:$0xff] %v10863_v48  ;;  %v3295_v52 = vmul.f32 0.2920817, %v15218_v1  ;;  %15220 = vst [vmem:[#allocation143_spill] sm:$0xff] %v10869_v23  ;;  %v15223_v61 = vld [vmem:[#allocation31_spill] sm:$0xff]  ;;  %v10880_v28 = vadd.f32 %v3287_v42, %v15225_v59  ;;  %v10883_v1 = vadd.f32 %v3288_v7, %v10444_v20  ;;  %v15226_v40 = vld [vmem:[#allocation206_spill] sm:$0xff]  ;;  %v10893_v51 = vadd.f32 %v3291_v38, %v10455_v62 }
 0x3f7   : > { %v3299_v26 = vmul.f32 0.2920817, %v15223_v61  ;;  %v15224_v48 = vld [vmem:[#allocation155_spill] sm:$0xff]  ;;  %v3301_v4 = vmul.f32 0.2920817, %v15226_v40  ;;  %v15228_v50 = vld [vmem:[#allocation81_spill] sm:$0xff] }
 0x3f8   : > { %v3300_v2 = vmul.f32 0.2920817, %v15224_v48  ;;  %15227 = vst [vmem:[#allocation214_spill] sm:$0xff] %v10893_v51  ;;  %v10896_v61 = vadd.f32 %v3292_v37, %v15228_v50  ;;  %v15230_v45 = vld [vmem:[#allocation90_spill] sm:$0xff]  ;;  %v15232_v42 = vld [vmem:[#allocation91_spill] sm:$0xff]  ;;  %v15234_v7 = vld [vmem:[#allocation92_spill] sm:$0xff] }
 0x3f9   : > { %v10899_v59 = vadd.f32 %v3293_v44, %v15230_v45  ;;  %v10902_v20 = vadd.f32 %v3294_v9, %v15232_v42  ;;  %v10905_v23 = vadd.f32 %v3295_v52, %v15234_v7  ;;  %v15236_v54 = vld [vmem:[#allocation94_spill] sm:$0xff]  ;;  %v15238_v27 = vld [vmem:[#allocation195_spill] sm:$0xff]  ;;  %v15245_v44 = vld [vmem:[#allocation36_spill] sm:$0xff] }
 0x3fa   : > { %15229 = vst [vmem:[#allocation53_spill] sm:$0xff] %v10896_v61  ;;  %v10908_v30 = vadd.f32 %v3296_v33, %v15236_v54  ;;  %v10911_v6 = vadd.f32 %v3297_v32, %v15238_v27  ;;  %v15240_v62 = vld [vmem:[#allocation242_spill] sm:$0xff]  ;;  %v15242_v37 = vld [vmem:[#allocation35_spill] sm:$0xff]  ;;  %v15243_v61 = vld [vmem:[#allocation157_spill] sm:$0xff]  ;;  %v3319_v9 = vmul.f32 0.2920817, %v15245_v44 }
 0x3fb   : > { %15231 = vst [vmem:[#allocation168_spill] sm:$0xff] %v10899_v59  ;;  %15233 = vst [vmem:[#allocation42_spill] sm:$0xff] %v10902_v20  ;;  %v10914_v38 = vadd.f32 %v3298_v25, %v15240_v62  ;;  %v3318_v50 = vmul.f32 0.2920817, %v15242_v37  ;;  %v10918_v45 = vadd.f32 %v3299_v26, %v15243_v61  ;;  %v15246_v42 = vld [vmem:[#allocation37_spill] sm:$0xff]  ;;  %v15247_v52 = vld [vmem:[#allocation159_spill] sm:$0xff] }
 0x3fc   : > { %15235 = vst [vmem:[#allocation43_spill] sm:$0xff] %v10905_v23  ;;  %15237 = vst [vmem:[#allocation44_spill] sm:$0xff] %v10908_v30  ;;  %v3320_v20 = vmul.f32 0.2920817, %v15246_v42  ;;  %v3321_v7 = vmul.f32 0.2920817, %v15247_v52 }
 0x3fd   : > { %15239 = vst [vmem:[#allocation46_spill] sm:$0xff] %v10911_v6  ;;  %15241 = vst [vmem:[#allocation47_spill] sm:$0xff] %v10914_v38  ;;  %v15248_v23 = vld [vmem:[#allocation244_spill] sm:$0xff]  ;;  %v15251_v27 = vld [vmem:[#allocation197_spill] sm:$0xff] }
 0x3fe   : > { %15244 = vst [vmem:[#allocation48_spill] sm:$0xff] %v10918_v45  ;;  %v10924_v33 = vadd.f32 %v3300_v2, %v15248_v23  ;;  %v15250_v54 = vld [vmem:[#allocation160_spill] sm:$0xff]  ;;  %v3323_v6 = vmul.f32 0.2920817, %v15251_v27  ;;  %v15252_v25 = vld [vmem:[#allocation161_spill] sm:$0xff]  ;;  %v15255_v61 = vld [vmem:[#allocation162_spill] sm:$0xff] }
 0x3ff   : > { %v3322_v32 = vmul.f32 0.2920817, %v15250_v54  ;;  %v3324_v62 = vmul.f32 0.2920817, %v15252_v25  ;;  %v15253_v38 = vld [vmem:[#allocation248_spill] sm:$0xff]  ;;  %v15256_v45 = vld [vmem:[#allocation163_spill] sm:$0xff] }
 0x400   : > { %15249 = vst [vmem:[#allocation50_spill] sm:$0xff] %v10924_v33  ;;  %v10930_v37 = vadd.f32 %v3301_v4, %v15253_v38  ;;  %v3325_v26 = vmul.f32 0.2920817, %v15255_v61  ;;  %v3326_v44 = vmul.f32 0.2920817, %v15256_v45  ;;  %v15257_v30 = vld [vmem:[#allocation212_spill] sm:$0xff] }
 0x401   : > { %v3327_v42 = vmul.f32 0.2920817, %v15257_v30  ;;  %v15258_v59 = vld [vmem:[#allocation213_spill] sm:$0xff]  ;;  %v3329_v23 = vmul.f32 0.2920817, %v14877_v21  ;;  %v15259_v54 = vld [vmem:[#allocation136_spill] sm:$0xff] }
 0x402   : > { %15254 = vst [vmem:[#allocation51_spill] sm:$0xff] %v10930_v37  ;;  %v3328_v52 = vmul.f32 0.2920817, %v15258_v59  ;;  %v3330_v2 = vmul.f32 0.2920817, %v15068_v63  ;;  %v10939_v33 = vadd.f32 %v3272_v8, %v15259_v54  ;;  %v15261_v25 = vld [vmem:[#allocation100_spill] sm:$0xff]  ;;  %v10954_v63 = vadd.f32 %v3321_v7, %v10547_v10 }
 0x403   : > { %v3331_v27 = vmul.f32 0.2920817, %v15070_v18  ;;  %v10943_v4 = vadd.f32 %v3318_v50, %v15261_v25  ;;  %v15262_v38 = vld [vmem:[#allocation101_spill] sm:$0xff]  ;;  %v15263_v45 = vld [vmem:[#allocation102_spill] sm:$0xff]  ;;  %v10957_v8 = vadd.f32 %v3322_v32, %v10551_v13  ;;  %v10960_v54 = vadd.f32 %v3323_v6, %v10555_v22  ;;  %v15266_v6 = vld [vmem:[#allocation223_spill] sm:$0xff] }
 0x404   : > { %15260 = vst [vmem:[#allocation52_spill] sm:$0xff] %v10939_v33  ;;  %v10946_v61 = vadd.f32 %v3319_v9, %v15262_v38  ;;  %v10949_v37 = vadd.f32 %v3320_v20, %v15263_v45  ;;  %v15264_v30 = vld [vmem:[#allocation217_spill] sm:$0xff]  ;;  %v15265_v51 = vld [vmem:[#allocation218_spill] sm:$0xff]  ;;  %v10963_v50 = vadd.f32 %v3324_v62, %v10559_v49  ;;  %v10966_v9 = vadd.f32 %v3325_v26, %v10563_v53  ;;  %v15267_v7 = vld [vmem:[#allocation156_spill] sm:$0xff] }
 0x405   : > { %v3332_v59 = vmul.f32 0.2920817, %v15264_v30  ;;  %v3333_v21 = vmul.f32 0.2920817, %v15265_v51  ;;  %v10969_v20 = vadd.f32 %v3326_v44, %v10567_v15  ;;  %v10972_v25 = vadd.f32 %v3327_v42, %v10571_v0  ;;  %v15268_v0 = vld [vmem:[#allocation75_spill] sm:$0xff]  ;;  %v15271_v44 = vld [vmem:[#allocation225_spill] sm:$0xff] }
 0x406   : > { %v10975_v10 = vadd.f32 %v3328_v52, %v10575_v31  ;;  %v10978_v13 = vadd.f32 %v3329_v23, %v10579_v39  ;;  %v10981_v22 = vadd.f32 %v3330_v2, %v10583_v43  ;;  %v10984_v49 = vadd.f32 %v3331_v27, %v10590_v3  ;;  %v15270_v31 = vld [vmem:[#allocation224_spill] sm:$0xff]  ;;  %v15272_v42 = vld [vmem:[#allocation226_spill] sm:$0xff]  ;;  %v15273_v43 = vld [vmem:[#allocation257_spill] sm:$0xff] }
 0x407   : > { %v3350_v53 = vmul.f32 0.2920817, %v9808_v19  ;;  %v3351_v15 = vmul.f32 0.2920817, %v15266_v6  ;;  %v3352_v32 = vmul.f32 0.2920817, %v15267_v7  ;;  %v10990_v62 = vadd.f32 %v3332_v59, %v15268_v0 }
 0x408   : > { %v3353_v26 = vmul.f32 0.2920817, %v15270_v31  ;;  %v3354_v39 = vmul.f32 0.2920817, %v15271_v44  ;;  %v3355_v52 = vmul.f32 0.2920817, %v15272_v42  ;;  %v10996_v23 = vadd.f32 %v3333_v21, %v15273_v43 }
 0x409   : > { %15269 = vst [vmem:[#allocation56_spill] sm:$0xff] %v10990_v62  ;;  %v15275_v3 = vld [vmem:[#allocation227_spill] sm:$0xff]  ;;  %v15276_v27 = vld [vmem:[#allocation228_spill] sm:$0xff]  ;;  %v15277_v38 = vld [vmem:[#allocation229_spill] sm:$0xff]  ;;  %v3362_v42 = vmul.f32 0.2920817, %v15099_v41 }
 0x40a   : > { %15274 = vst [vmem:[#allocation233_spill] sm:$0xff] %v10996_v23  ;;  %v3356_v2 = vmul.f32 0.2920817, %v15275_v3  ;;  %v3357_v19 = vmul.f32 0.2920817, %v15276_v27  ;;  %v15278_v6 = vld [vmem:[#allocation186_spill] sm:$0xff] }
 0x40b   : > { %v3358_v45 = vmul.f32 0.2920817, %v15277_v38  ;;  %v3359_v7 = vmul.f32 0.2920817, %v15278_v6  ;;  %v15279_v18 = vld [vmem:[#allocation32_spill] sm:$0xff]  ;;  %v15280_v0 = vld [vmem:[#allocation169_spill] sm:$0xff] }
 0x40c   : > { %v3360_v59 = vmul.f32 0.2920817, %v15279_v18  ;;  %v3361_v33 = vmul.f32 0.2920817, %v15280_v0  ;;  %v15281_v31 = vld [vmem:[#allocation138_spill] sm:$0xff]  ;;  %v15283_v43 = vld [vmem:[#allocation263_spill] sm:$0xff]  ;;  %v11019_v0 = vadd.f32 %v3352_v32, %v10644_v57 }
 0x40d   : > { %v11006_v44 = vadd.f32 %v10817_v47, %v15281_v31  ;;  %v3363_v21 = vmul.f32 0.2920817, %v15101_v11  ;;  %v11011_v3 = vadd.f32 %v3350_v53, %v15283_v43  ;;  %v15284_v27 = vld [vmem:[#allocation116_spill] sm:$0xff]  ;;  %v15285_v38 = vld [vmem:[#allocation234_spill] sm:$0xff]  ;;  %v15286_v62 = vld [vmem:[#allocation83_spill] sm:$0xff]  ;;  %v11022_v47 = vadd.f32 %v3353_v26, %v10647_v55 }
 0x40e   : > { %v11014_v23 = vadd.f32 %v3351_v15, %v15284_v27  ;;  %v3364_v6 = vmul.f32 0.2920817, %v15285_v38  ;;  %v3365_v18 = vmul.f32 0.2920817, %v15286_v62  ;;  %v11025_v31 = vadd.f32 %v3354_v39, %v10651_v58  ;;  %v15290_v58 = vld [vmem:[#allocation121_spill] sm:$0xff] }
 0x40f   : > { %15282 = vst [vmem:[#allocation167_spill] sm:$0xff] %v11006_v44  ;;  %v11028_v11 = vadd.f32 %v3355_v52, %v10655_v56  ;;  %v11031_v53 = vadd.f32 %v3356_v2, %v10659_v36  ;;  %v11034_v15 = vadd.f32 %v3357_v19, %v10663_v29  ;;  %v11037_v43 = vadd.f32 %v3358_v45, %v10667_v46  ;;  %v15292_v56 = vld [vmem:[#allocation62_spill] sm:$0xff]  ;;  %v15296_v29 = vld [vmem:[#allocation99_spill] sm:$0xff]  ;;  %v15298_v19 = vld [vmem:[#allocation65_spill] sm:$0xff] }
 0x410   : > { %v11040_v57 = vadd.f32 %v3359_v7, %v10671_v34  ;;  %v11043_v55 = vadd.f32 %v3360_v59, %v10675_v24  ;;  %v11046_v32 = vadd.f32 %v3361_v33, %v15290_v58  ;;  %v11049_v26 = vadd.f32 %v3362_v42, %v15292_v56  ;;  %v15294_v36 = vld [vmem:[#allocation58_spill] sm:$0xff]  ;;  %v15297_v2 = vld [vmem:[#allocation103_spill] sm:$0xff]  ;;  %v15300_v34 = vld [vmem:[#allocation269_spill] sm:$0xff] }
 0x411   : > { %15287 = vst [vmem:[#allocation85_spill] sm:$0xff] %v11037_v43  ;;  %v11052_v39 = vadd.f32 %v3363_v21, %v15294_v36  ;;  %v3382_v52 = vmul.f32 0.2920817, %v15296_v29  ;;  %v3383_v46 = vmul.f32 0.2920817, %v15297_v2  ;;  %v11057_v45 = vadd.f32 %v3364_v6, %v15298_v19  ;;  %v15302_v24 = vld [vmem:[#allocation79_spill] sm:$0xff] }
 0x412   : > { %15288 = vst [vmem:[#allocation185_spill] sm:$0xff] %v11040_v57  ;;  %15289 = vst [vmem:[#allocation24_spill] sm:$0xff] %v11043_v55  ;;  %v11060_v7 = vadd.f32 %v3365_v18, %v15300_v34  ;;  %v3384_v59 = vmul.f32 0.2920817, %v15302_v24  ;;  %v15303_v33 = vld [vmem:[#allocation237_spill] sm:$0xff]  ;;  %v15305_v56 = vld [vmem:[#allocation114_spill] sm:$0xff] }
 0x413   : > { %15291 = vst [vmem:[#allocation209_spill] sm:$0xff] %v11046_v32  ;;  %15293 = vst [vmem:[#allocation190_spill] sm:$0xff] %v11049_v26  ;;  %v3385_v27 = vmul.f32 0.2920817, %v15303_v33  ;;  %v15304_v58 = vld [vmem:[#allocation109_spill] sm:$0xff]  ;;  %v15307_v44 = vld [vmem:[#allocation208_spill] sm:$0xff] }
 0x414   : > { %15295 = vst [vmem:[#allocation210_spill] sm:$0xff] %v11052_v39  ;;  %15299 = vst [vmem:[#allocation191_spill] sm:$0xff] %v11057_v45  ;;  %v3386_v42 = vmul.f32 0.2920817, %v15304_v58  ;;  %v3387_v41 = vmul.f32 0.2920817, %v15305_v56  ;;  %v11069_v29 = vadd.f32 %v10820_v14, %v15307_v44 }
 0x415   : > { %15301 = vst [vmem:[#allocation183_spill] sm:$0xff] %v11060_v7  ;;  %v15306_v21 = vld [vmem:[#allocation117_spill] sm:$0xff]  ;;  %v15309_v2 = vld [vmem:[#allocation118_spill] sm:$0xff]  ;;  %v15316_v26 = vld [vmem:[#allocation164_spill] sm:$0xff] }
 0x416   : > { %v3388_v36 = vmul.f32 0.2920817, %v15306_v21  ;;  %15308 = vst [vmem:[#allocation70_spill] sm:$0xff] %v11069_v29  ;;  %v3389_v6 = vmul.f32 0.2920817, %v15309_v2  ;;  %v15310_v19 = vld [vmem:[#allocation173_spill] sm:$0xff]  ;;  %v11081_v21 = vadd.f32 %v3382_v52, %v15316_v26 }
 0x417   : > { %v3390_v45 = vmul.f32 0.2920817, %v15310_v19  ;;  %v15311_v18 = vld [vmem:[#allocation54_spill] sm:$0xff]  ;;  %v15312_v7 = vld [vmem:[#allocation69_spill] sm:$0xff]  ;;  %v15318_v32 = vld [vmem:[#allocation192_spill] sm:$0xff] }
 0x418   : > { %v3391_v34 = vmul.f32 0.2920817, %v15311_v18  ;;  %v11076_v24 = vadd.f32 %v10823_v5, %v15312_v7  ;;  %v15314_v33 = vld [vmem:[#allocation170_spill] sm:$0xff]  ;;  %v15315_v39 = vld [vmem:[#allocation205_spill] sm:$0xff]  ;;  %15317 = vst [vmem:[#allocation239_spill] sm:$0xff] %v11081_v21  ;;  %v11084_v14 = vadd.f32 %v3383_v46, %v15318_v32  ;;  %v15321_v29 = vld [vmem:[#allocation123_spill] sm:$0xff] }
 0x419   : > { %v3392_v58 = vmul.f32 0.2920817, %v15314_v33  ;;  %v3393_v56 = vmul.f32 0.2920817, %v15315_v39  ;;  %v15320_v44 = vld [vmem:[#allocation193_spill] sm:$0xff]  ;;  %v15323_v57 = vld [vmem:[#allocation124_spill] sm:$0xff] }
 0x41a   : > { %15313 = vst [vmem:[#allocation211_spill] sm:$0xff] %v11076_v24  ;;  %15319 = vst [vmem:[#allocation134_spill] sm:$0xff] %v11084_v14  ;;  %v3394_v2 = vmul.f32 0.2920817, %v15320_v44  ;;  %v3395_v19 = vmul.f32 0.2920817, %v15321_v29  ;;  %v11090_v43 = vadd.f32 %v3384_v59, %v15323_v57 }
 0x41b   : > { %v15322_v55 = vld [vmem:[#allocation25_spill] sm:$0xff]  ;;  %v15325_v5 = vld [vmem:[#allocation130_spill] sm:$0xff]  ;;  %v15327_v39 = vld [vmem:[#allocation71_spill] sm:$0xff] }
 0x41c   : > { %v3396_v18 = vmul.f32 0.2920817, %v15322_v55  ;;  %15324 = vst [vmem:[#allocation28_spill] sm:$0xff] %v11090_v43  ;;  %v3397_v7 = vmul.f32 0.2920817, %v15325_v5  ;;  %v15326_v33 = vld [vmem:[#allocation61_spill] sm:$0xff]  ;;  %v11097_v26 = vadd.f32 %v3386_v42, %v15327_v39 }
 0x41d   : > { %v11094_v24 = vadd.f32 %v3385_v27, %v15326_v33  ;;  %v15329_v52 = vld [vmem:[#allocation171_spill] sm:$0xff]  ;;  %v15331_v46 = vld [vmem:[#allocation122_spill] sm:$0xff]  ;;  %v15333_v21 = vld [vmem:[#allocation277_spill] sm:$0xff] }
 0x41e   : > { %15328 = vst [vmem:[#allocation153_spill] sm:$0xff] %v11097_v26  ;;  %v11100_v32 = vadd.f32 %v3387_v41, %v15329_v52  ;;  %v11103_v44 = vadd.f32 %v3388_v36, %v15331_v46  ;;  %v15332_v29 = vld [vmem:[#allocation126_spill] sm:$0xff]  ;;  %v11109_v57 = vadd.f32 %v3390_v45, %v15333_v21  ;;  %v15336_v27 = vld [vmem:[#allocation279_spill] sm:$0xff]  ;;  %v15340_v36 = vld [vmem:[#allocation280_spill] sm:$0xff] }
 0x41f   : > { %v11106_v14 = vadd.f32 %v3389_v6, %v15332_v29  ;;  %v15334_v59 = vld [vmem:[#allocation278_spill] sm:$0xff]  ;;  %v11115_v33 = vadd.f32 %v3392_v58, %v15336_v27  ;;  %v15338_v26 = vld [vmem:[#allocation27_spill] sm:$0xff]  ;;  %v11121_v46 = vadd.f32 %v3393_v56, %v15340_v36  ;;  %v15341_v29 = vld [vmem:[#allocation281_spill] sm:$0xff] }
 0x420   : > { %15330 = vst [vmem:[#allocation155_spill] sm:$0xff] %v11100_v32  ;;  %v11112_v43 = vadd.f32 %v3391_v34, %v15334_v59  ;;  %v15337_v42 = vld [vmem:[#allocation150_spill] sm:$0xff]  ;;  %v3415_v41 = vmul.f32 0.23388076, %v15338_v26  ;;  %v15339_v52 = vld [vmem:[#allocation151_spill] sm:$0xff]  ;;  %v11124_v6 = vadd.f32 %v3394_v2, %v15341_v29  ;;  %v15344_v34 = vld [vmem:[#allocation152_spill] sm:$0xff] }
 0x421   : > { %v3414_v39 = vmul.f32 0.23388076, %v15337_v42  ;;  %v3416_v32 = vmul.f32 0.23388076, %v15339_v52  ;;  %v15342_v45 = vld [vmem:[#allocation175_spill] sm:$0xff]  ;;  %v15346_v27 = vld [vmem:[#allocation72_spill] sm:$0xff] }
 0x422   : > { %15335 = vst [vmem:[#allocation66_spill] sm:$0xff] %v11112_v43  ;;  %v11127_v21 = vadd.f32 %v3395_v19, %v15342_v45  ;;  %v3417_v59 = vmul.f32 0.23388076, %v15344_v34  ;;  %v15345_v43 = vld [vmem:[#allocation158_spill] sm:$0xff]  ;;  %v11134_v42 = vadd.f32 %v3397_v7, %v15346_v27  ;;  %v15348_v26 = vld [vmem:[#allocation139_spill] sm:$0xff]  ;;  %v15350_v56 = vld [vmem:[#allocation140_spill] sm:$0xff] }
 0x423   : > { %v11131_v58 = vadd.f32 %v3396_v18, %v15345_v43  ;;  %v11138_v52 = vadd.f32 %v10826_v60, %v15348_v26  ;;  %v11142_v36 = vadd.f32 %v10829_v17, %v15350_v56  ;;  %v15351_v2 = vld [vmem:[#allocation141_spill] sm:$0xff]  ;;  %v15353_v45 = vld [vmem:[#allocation142_spill] sm:$0xff]  ;;  %v15356_v43 = vld [vmem:[#allocation39_spill] sm:$0xff] }
 0x424   : > { %15343 = vst [vmem:[#allocation81_spill] sm:$0xff] %v11127_v21  ;;  %15347 = vst [vmem:[#allocation90_spill] sm:$0xff] %v11134_v42  ;;  %v15352_v29 = vld [vmem:[#allocation73_spill] sm:$0xff]  ;;  %v15357_v18 = vld [vmem:[#allocation144_spill] sm:$0xff] }
 0x425   : > { %15349 = vst [vmem:[#allocation91_spill] sm:$0xff] %v11138_v52  ;;  %v11146_v19 = vadd.f32 %v15352_v29, %v15351_v2  ;;  %v15354_v34 = vld [vmem:[#allocation77_spill] sm:$0xff]  ;;  %v11154_v7 = vadd.f32 %v15357_v18, %v15356_v43  ;;  %v15359_v27 = vld [vmem:[#allocation40_spill] sm:$0xff]  ;;  %v15360_v42 = vld [vmem:[#allocation22_spill] sm:$0xff]  ;;  %v3435_v43 = vmul.f32 0.23388076, %v15226_v40 }
 0x426   : > { %v11150_v21 = vadd.f32 %v15354_v34, %v15353_v45  ;;  %v11158_v60 = vadd.f32 %v15360_v42, %v15359_v27  ;;  %v15362_v26 = vld [vmem:[#allocation145_spill] sm:$0xff]  ;;  %v15363_v17 = vld [vmem:[#allocation146_spill] sm:$0xff]  ;;  %v15364_v2 = vld [vmem:[#allocation23_spill] sm:$0xff]  ;;  %v3434_v34 = vmul.f32 0.23388076, %v15224_v48 }
 0x427   : > { %15358 = vst [vmem:[#allocation94_spill] sm:$0xff] %v11154_v7  ;;  %v11161_v52 = vadd.f32 %v3414_v39, %v15362_v26  ;;  %v11164_v56 = vadd.f32 %v3415_v41, %v15363_v17  ;;  %v11167_v29 = vadd.f32 %v3416_v32, %v15364_v2  ;;  %v15365_v45 = vld [vmem:[#allocation147_spill] sm:$0xff]  ;;  %v15367_v42 = vld [vmem:[#allocation64_spill] sm:$0xff]  ;;  %v15379_v40 = vld [vmem:[#allocation214_spill] sm:$0xff] }
 0x428   : > { %15355 = vst [vmem:[#allocation92_spill] sm:$0xff] %v11150_v21  ;;  %15361 = vst [vmem:[#allocation195_spill] sm:$0xff] %v11158_v60  ;;  %v11171_v21 = vadd.f32 %v3417_v59, %v15365_v45  ;;  %v15366_v18 = vld [vmem:[#allocation179_spill] sm:$0xff]  ;;  %v3437_v27 = vmul.f32 0.23388076, %v15367_v42  ;;  %v15372_v32 = vld [vmem:[#allocation232_spill] sm:$0xff] }
 0x429   : > { %v3436_v7 = vmul.f32 0.23388076, %v15366_v18  ;;  %v15368_v60 = vld [vmem:[#allocation187_spill] sm:$0xff]  ;;  %v11186_v17 = vadd.f32 %v10883_v1, %v15372_v32  ;;  %v15376_v45 = vld [vmem:[#allocation80_spill] sm:$0xff] }
 0x42a   : > { %v11178_v39 = vadd.f32 %v10875_v35, %v15368_v60  ;;  %v15370_v41 = vld [vmem:[#allocation231_spill] sm:$0xff]  ;;  %v11194_v18 = vadd.f32 %v10890_v16, %v15376_v45  ;;  %v15386_v32 = vld [vmem:[#allocation184_spill] sm:$0xff] }
 0x42b   : > { %v11182_v26 = vadd.f32 %v10880_v28, %v15370_v41  ;;  %15373 = vst [vmem:[#allocation157_spill] sm:$0xff] %v11186_v17  ;;  %v15374_v59 = vld [vmem:[#allocation235_spill] sm:$0xff]  ;;  %v15384_v41 = vld [vmem:[#allocation166_spill] sm:$0xff]  ;;  %v15391_v45 = vld [vmem:[#allocation120_spill] sm:$0xff] }
 0x42c   : > { %15369 = vst [vmem:[#allocation242_spill] sm:$0xff] %v11178_v39  ;;  %v11190_v2 = vadd.f32 %v10887_v12, %v15374_v59  ;;  %15377 = vst [vmem:[#allocation37_spill] sm:$0xff] %v11194_v18  ;;  %v15378_v42 = vld [vmem:[#allocation87_spill] sm:$0xff]  ;;  %v15382_v39 = vld [vmem:[#allocation53_spill] sm:$0xff] }
 0x42d   : > { %15371 = vst [vmem:[#allocation35_spill] sm:$0xff] %v11182_v26  ;;  %v11198_v35 = vadd.f32 %v15379_v40, %v15378_v42  ;;  %v15381_v60 = vld [vmem:[#allocation119_spill] sm:$0xff]  ;;  %v15385_v26 = vld [vmem:[#allocation168_spill] sm:$0xff]  ;;  %v15387_v17 = vld [vmem:[#allocation42_spill] sm:$0xff] }
 0x42e   : > { %15375 = vst [vmem:[#allocation36_spill] sm:$0xff] %v11190_v2  ;;  %v11202_v28 = vadd.f32 %v15382_v39, %v15381_v60  ;;  %v11206_v1 = vadd.f32 %v15385_v26, %v15384_v41  ;;  %v11210_v12 = vadd.f32 %v15387_v17, %v15386_v32  ;;  %v15389_v59 = vld [vmem:[#allocation240_spill] sm:$0xff]  ;;  %v15390_v2 = vld [vmem:[#allocation43_spill] sm:$0xff]  ;;  %v15394_v42 = vld [vmem:[#allocation241_spill] sm:$0xff] }
 0x42f   : > { %15380 = vst [vmem:[#allocation159_spill] sm:$0xff] %v11198_v35  ;;  %v11214_v16 = vadd.f32 %v15390_v2, %v15389_v59  ;;  %v15392_v18 = vld [vmem:[#allocation44_spill] sm:$0xff]  ;;  %v15395_v35 = vld [vmem:[#allocation46_spill] sm:$0xff]  ;;  %v15396_v60 = vld [vmem:[#allocation47_spill] sm:$0xff]  ;;  %v3454_v59 = vmul.f32 0.23388076, %v15264_v30 }
 0x430   : > { %15383 = vst [vmem:[#allocation244_spill] sm:$0xff] %v11202_v28  ;;  %15388 = vst [vmem:[#allocation160_spill] sm:$0xff] %v11210_v12  ;;  %v11218_v40 = vadd.f32 %v15392_v18, %v15391_v45  ;;  %v11222_v39 = vadd.f32 %v15395_v35, %v15394_v42  ;;  %v11225_v28 = vadd.f32 %v3434_v34, %v15396_v60  ;;  %v15397_v26 = vld [vmem:[#allocation48_spill] sm:$0xff]  ;;  %v15398_v17 = vld [vmem:[#allocation50_spill] sm:$0xff]  ;;  %v3455_v18 = vmul.f32 0.23388076, %v15265_v51 }
 0x431   : > { %v11228_v41 = vadd.f32 %v3435_v43, %v15397_v26  ;;  %v11231_v32 = vadd.f32 %v3436_v7, %v15398_v17  ;;  %v15399_v12 = vld [vmem:[#allocation51_spill] sm:$0xff]  ;;  %v15401_v35 = vld [vmem:[#allocation33_spill] sm:$0xff]  ;;  %v15403_v34 = vld [vmem:[#allocation220_spill] sm:$0xff] }
 0x432   : > { %15393 = vst [vmem:[#allocation197_spill] sm:$0xff] %v11218_v40  ;;  %v11234_v2 = vadd.f32 %v3437_v27, %v15399_v12  ;;  %v15400_v45 = vld [vmem:[#allocation219_spill] sm:$0xff]  ;;  %v11241_v42 = vadd.f32 %v10943_v4, %v15401_v35  ;;  %v3457_v60 = vmul.f32 0.23388076, %v15403_v34  ;;  %v15405_v7 = vld [vmem:[#allocation245_spill] sm:$0xff]  ;;  %v15406_v12 = vld [vmem:[#allocation246_spill] sm:$0xff] }
 0x433   : > { %v3456_v40 = vmul.f32 0.23388076, %v15400_v45  ;;  %v15404_v43 = vld [vmem:[#allocation243_spill] sm:$0xff]  ;;  %v11250_v27 = vadd.f32 %v10949_v37, %v15405_v7  ;;  %v11254_v17 = vadd.f32 %v10954_v63, %v15406_v12  ;;  %v15408_v4 = vld [vmem:[#allocation249_spill] sm:$0xff]  ;;  %v15411_v7 = vld [vmem:[#allocation252_spill] sm:$0xff] }
 0x434   : > { %15402 = vst [vmem:[#allocation161_spill] sm:$0xff] %v11241_v42  ;;  %v11246_v26 = vadd.f32 %v10946_v61, %v15404_v43  ;;  %v15407_v51 = vld [vmem:[#allocation247_spill] sm:$0xff]  ;;  %v11262_v35 = vadd.f32 %v10960_v54, %v15408_v4  ;;  %v15409_v42 = vld [vmem:[#allocation250_spill] sm:$0xff]  ;;  %v11274_v63 = vadd.f32 %v10969_v20, %v15411_v7  ;;  %v15412_v12 = vld [vmem:[#allocation253_spill] sm:$0xff] }
 0x435   : > { %v11258_v45 = vadd.f32 %v10957_v8, %v15407_v51  ;;  %v11266_v61 = vadd.f32 %v10963_v50, %v15409_v42  ;;  %v15410_v43 = vld [vmem:[#allocation251_spill] sm:$0xff]  ;;  %v11278_v51 = vadd.f32 %v10972_v25, %v15412_v12  ;;  %v15413_v8 = vld [vmem:[#allocation254_spill] sm:$0xff]  ;;  %v11289_v42 = vadd.f32 %v3454_v59, %v10981_v22  ;;  %v15417_v20 = vld [vmem:[#allocation56_spill] sm:$0xff] }
 0x436   : > { %v11270_v37 = vadd.f32 %v10966_v9, %v15410_v43  ;;  %v11282_v54 = vadd.f32 %v10975_v10, %v15413_v8  ;;  %v15415_v4 = vld [vmem:[#allocation255_spill] sm:$0xff]  ;;  %v11292_v9 = vadd.f32 %v3455_v18, %v10984_v49  ;;  %v11295_v43 = vadd.f32 %v3456_v40, %v15417_v20  ;;  %v15418_v7 = vld [vmem:[#allocation233_spill] sm:$0xff]  ;;  %v15419_v8 = vld [vmem:[#allocation200_spill] sm:$0xff] }
 0x437   : > { %v11286_v50 = vadd.f32 %v10978_v13, %v15415_v4  ;;  %v3474_v25 = vmul.f32 0.23388076, %v15285_v38  ;;  %v11299_v12 = vadd.f32 %v3457_v60, %v15418_v7  ;;  %v3475_v10 = vmul.f32 0.23388076, %v15286_v62  ;;  %v15420_v13 = vld [vmem:[#allocation34_spill] sm:$0xff]  ;;  %v15422_v49 = vld [vmem:[#allocation105_spill] sm:$0xff] }
 0x438   : > { %15414 = vst [vmem:[#allocation248_spill] sm:$0xff] %v11282_v54  ;;  %v3476_v54 = vmul.f32 0.23388076, %v15419_v8  ;;  %v3477_v4 = vmul.f32 0.23388076, %v15420_v13  ;;  %v11310_v59 = vadd.f32 %v11014_v23, %v15422_v49  ;;  %v15423_v40 = vld [vmem:[#allocation236_spill] sm:$0xff] }
 0x439   : > { %15416 = vst [vmem:[#allocation162_spill] sm:$0xff] %v11286_v50  ;;  %v15421_v50 = vld [vmem:[#allocation104_spill] sm:$0xff]  ;;  %v11314_v18 = vadd.f32 %v11019_v0, %v15423_v40  ;;  %v15425_v60 = vld [vmem:[#allocation57_spill] sm:$0xff]  ;;  %v15429_v13 = vld [vmem:[#allocation258_spill] sm:$0xff] }
 0x43a   : > { %v11306_v22 = vadd.f32 %v11011_v3, %v15421_v50  ;;  %v11318_v20 = vadd.f32 %v11022_v47, %v15425_v60  ;;  %v15427_v7 = vld [vmem:[#allocation256_spill] sm:$0xff]  ;;  %v11326_v3 = vadd.f32 %v11028_v11, %v15429_v13  ;;  %v15431_v50 = vld [vmem:[#allocation259_spill] sm:$0xff]  ;;  %v15434_v40 = vld [vmem:[#allocation261_spill] sm:$0xff] }
 0x43b   : > { %15424 = vst [vmem:[#allocation163_spill] sm:$0xff] %v11314_v18  ;;  %v11322_v8 = vadd.f32 %v11025_v31, %v15427_v7  ;;  %v11330_v23 = vadd.f32 %v11031_v53, %v15431_v50  ;;  %v15433_v49 = vld [vmem:[#allocation260_spill] sm:$0xff]  ;;  %v15435_v18 = vld [vmem:[#allocation85_spill] sm:$0xff]  ;;  %v15437_v60 = vld [vmem:[#allocation262_spill] sm:$0xff] }
 0x43c   : > { %15426 = vst [vmem:[#allocation212_spill] sm:$0xff] %v11318_v20  ;;  %15430 = vst [vmem:[#allocation136_spill] sm:$0xff] %v11326_v3  ;;  %v11334_v0 = vadd.f32 %v11034_v15, %v15433_v49  ;;  %v11338_v47 = vadd.f32 %v15435_v18, %v15434_v40  ;;  %v15438_v20 = vld [vmem:[#allocation185_spill] sm:$0xff]  ;;  %v15439_v7 = vld [vmem:[#allocation264_spill] sm:$0xff] }
 0x43d   : > { %15428 = vst [vmem:[#allocation213_spill] sm:$0xff] %v11322_v8  ;;  %15432 = vst [vmem:[#allocation100_spill] sm:$0xff] %v11330_v23  ;;  %v11342_v31 = vadd.f32 %v15438_v20, %v15437_v60  ;;  %v15440_v8 = vld [vmem:[#allocation24_spill] sm:$0xff]  ;;  %v15442_v13 = vld [vmem:[#allocation265_spill] sm:$0xff]  ;;  %v3494_v60 = vmul.f32 0.23388076, %v15322_v55 }
 0x43e   : > { %15436 = vst [vmem:[#allocation101_spill] sm:$0xff] %v11338_v47  ;;  %v11346_v11 = vadd.f32 %v15440_v8, %v15439_v7  ;;  %v15443_v3 = vld [vmem:[#allocation209_spill] sm:$0xff]  ;;  %v15445_v50 = vld [vmem:[#allocation190_spill] sm:$0xff]  ;;  %v15448_v18 = vld [vmem:[#allocation191_spill] sm:$0xff]  ;;  %v3495_v8 = vmul.f32 0.23388076, %v15325_v5 }
 0x43f   : > { %v11350_v53 = vadd.f32 %v15443_v3, %v15442_v13  ;;  %v11353_v23 = vadd.f32 %v3474_v25, %v15445_v50  ;;  %v15446_v15 = vld [vmem:[#allocation210_spill] sm:$0xff]  ;;  %v11359_v40 = vadd.f32 %v3476_v54, %v15448_v18  ;;  %v15449_v47 = vld [vmem:[#allocation183_spill] sm:$0xff]  ;;  %v15451_v7 = vld [vmem:[#allocation165_spill] sm:$0xff] }
 0x440   : > { %15441 = vst [vmem:[#allocation102_spill] sm:$0xff] %v11346_v11  ;;  %v11356_v49 = vadd.f32 %v3475_v10, %v15446_v15  ;;  %v11362_v20 = vadd.f32 %v3477_v4, %v15449_v47  ;;  %v3496_v11 = vmul.f32 0.23388076, %v15451_v7  ;;  %v15452_v3 = vld [vmem:[#allocation63_spill] sm:$0xff]  ;;  %v15455_v25 = vld [vmem:[#allocation78_spill] sm:$0xff]  ;;  %v15459_v18 = vld [vmem:[#allocation28_spill] sm:$0xff] }
 0x441   : > { %15444 = vst [vmem:[#allocation217_spill] sm:$0xff] %v11350_v53  ;;  %v15453_v13 = vld [vmem:[#allocation239_spill] sm:$0xff]  ;;  %v3497_v50 = vmul.f32 0.23388076, %v15455_v25  ;;  %v15457_v15 = vld [vmem:[#allocation134_spill] sm:$0xff]  ;;  %v15462_v5 = vld [vmem:[#allocation268_spill] sm:$0xff] }
 0x442   : > { %15447 = vst [vmem:[#allocation223_spill] sm:$0xff] %v11356_v49  ;;  %15450 = vst [vmem:[#allocation156_spill] sm:$0xff] %v11362_v20  ;;  %v11369_v53 = vadd.f32 %v15453_v13, %v15452_v3  ;;  %v15456_v10 = vld [vmem:[#allocation59_spill] sm:$0xff]  ;;  %v15458_v54 = vld [vmem:[#allocation266_spill] sm:$0xff] }
 0x443   : > { %v11374_v49 = vadd.f32 %v15457_v15, %v15456_v10  ;;  %v11378_v4 = vadd.f32 %v15459_v18, %v15458_v54  ;;  %v15460_v47 = vld [vmem:[#allocation267_spill] sm:$0xff]  ;;  %v15463_v7 = vld [vmem:[#allocation153_spill] sm:$0xff]  ;;  %v15465_v3 = vld [vmem:[#allocation270_spill] sm:$0xff] }
 0x444   : > { %15454 = vst [vmem:[#allocation75_spill] sm:$0xff] %v11369_v53  ;;  %v11382_v20 = vadd.f32 %v11094_v24, %v15460_v47  ;;  %v11386_v55 = vadd.f32 %v15463_v7, %v15462_v5  ;;  %v15466_v13 = vld [vmem:[#allocation155_spill] sm:$0xff]  ;;  %v15470_v15 = vld [vmem:[#allocation272_spill] sm:$0xff]  ;;  %v15472_v18 = vld [vmem:[#allocation273_spill] sm:$0xff] }
 0x445   : > { %v11390_v53 = vadd.f32 %v15466_v13, %v15465_v3  ;;  %v15468_v25 = vld [vmem:[#allocation271_spill] sm:$0xff]  ;;  %v11398_v54 = vadd.f32 %v11106_v14, %v15470_v15  ;;  %v11402_v24 = vadd.f32 %v11109_v57, %v15472_v18  ;;  %v15474_v47 = vld [vmem:[#allocation274_spill] sm:$0xff]  ;;  %v15479_v13 = vld [vmem:[#allocation276_spill] sm:$0xff]  ;;  %v11423_v57 = vadd.f32 %v3496_v11, %v11131_v58 }
 0x446   : > { %15461 = vst [vmem:[#allocation224_spill] sm:$0xff] %v11382_v20  ;;  %15464 = vst [vmem:[#allocation225_spill] sm:$0xff] %v11386_v55  ;;  %v11394_v10 = vadd.f32 %v11103_v44, %v15468_v25  ;;  %v15475_v20 = vld [vmem:[#allocation66_spill] sm:$0xff]  ;;  %v15477_v7 = vld [vmem:[#allocation275_spill] sm:$0xff]  ;;  %v11414_v44 = vadd.f32 %v11121_v46, %v15479_v13  ;;  %v11417_v25 = vadd.f32 %v3494_v60, %v11124_v6 }
 0x447   : > { %15467 = vst [vmem:[#allocation226_spill] sm:$0xff] %v11390_v53  ;;  %15471 = vst [vmem:[#allocation227_spill] sm:$0xff] %v11398_v54  ;;  %v11406_v5 = vadd.f32 %v15475_v20, %v15474_v47  ;;  %v11410_v3 = vadd.f32 %v11115_v33, %v15477_v7  ;;  %v15482_v14 = vld [vmem:[#allocation81_spill] sm:$0xff]  ;;  %v15485_v18 = vld [vmem:[#allocation26_spill] sm:$0xff] }
 0x448   : > { %15469 = vst [vmem:[#allocation257_spill] sm:$0xff] %v11394_v10  ;;  %15473 = vst [vmem:[#allocation228_spill] sm:$0xff] %v11402_v24  ;;  %v11420_v15 = vadd.f32 %v3495_v8, %v15482_v14  ;;  %v3514_v20 = vmul.f32 0.120078385, %v15485_v18  ;;  %v15486_v47 = vld [vmem:[#allocation90_spill] sm:$0xff]  ;;  %v15488_v33 = vld [vmem:[#allocation149_spill] sm:$0xff] }
 0x449   : > { %15476 = vst [vmem:[#allocation229_spill] sm:$0xff] %v11406_v5  ;;  %15478 = vst [vmem:[#allocation186_spill] sm:$0xff] %v11410_v3  ;;  %v11427_v5 = vadd.f32 %v3497_v50, %v15486_v47  ;;  %v3515_v7 = vmul.f32 0.120078385, %v15488_v33  ;;  %v15489_v3 = vld [vmem:[#allocation150_spill] sm:$0xff]  ;;  %v15490_v46 = vld [vmem:[#allocation27_spill] sm:$0xff] }
 0x44a   : > { %15480 = vst [vmem:[#allocation32_spill] sm:$0xff] %v11414_v44  ;;  %15481 = vst [vmem:[#allocation169_spill] sm:$0xff] %v11417_v25  ;;  %v3516_v24 = vmul.f32 0.120078385, %v15489_v3  ;;  %v3517_v13 = vmul.f32 0.120078385, %v15490_v46 }
 0x44b   : > { %15483 = vst [vmem:[#allocation138_spill] sm:$0xff] %v11420_v15  ;;  %15484 = vst [vmem:[#allocation263_spill] sm:$0xff] %v11423_v57  ;;  %v15491_v44 = vld [vmem:[#allocation151_spill] sm:$0xff]  ;;  %v15492_v60 = vld [vmem:[#allocation152_spill] sm:$0xff] }
 0x44c   : > { %15487 = vst [vmem:[#allocation116_spill] sm:$0xff] %v11427_v5  ;;  %v3518_v6 = vmul.f32 0.120078385, %v15491_v44  ;;  %v3519_v25 = vmul.f32 0.120078385, %v15492_v60  ;;  %v15493_v8 = vld [vmem:[#allocation181_spill] sm:$0xff] }
 0x44d   : > { %v3520_v14 = vmul.f32 0.120078385, %v15493_v8  ;;  %v15494_v15 = vld [vmem:[#allocation201_spill] sm:$0xff]  ;;  %v15495_v58 = vld [vmem:[#allocation148_spill] sm:$0xff]  ;;  %v15497_v18 = vld [vmem:[#allocation182_spill] sm:$0xff] }
 0x44e   : > { %v11437_v11 = vadd.f32 %v15495_v58, %v15494_v15  ;;  %v3521_v57 = vmul.f32 0.120078385, %v15497_v18  ;;  %v15498_v50 = vld [vmem:[#allocation202_spill] sm:$0xff]  ;;  %v15499_v47 = vld [vmem:[#allocation143_spill] sm:$0xff]  ;;  %v15500_v33 = vld [vmem:[#allocation29_spill] sm:$0xff] }
 0x44f   : > { %v11442_v5 = vadd.f32 %v15499_v47, %v15498_v50  ;;  %v15501_v3 = vld [vmem:[#allocation52_spill] sm:$0xff]  ;;  %v15502_v46 = vld [vmem:[#allocation38_spill] sm:$0xff]  ;;  %v15503_v44 = vld [vmem:[#allocation167_spill] sm:$0xff] }
 0x450   : > { %15496 = vst [vmem:[#allocation234_spill] sm:$0xff] %v11437_v11  ;;  %v11446_v54 = vadd.f32 %v15501_v3, %v15500_v33  ;;  %v11450_v10 = vadd.f32 %v15503_v44, %v15502_v46  ;;  %v15504_v60 = vld [vmem:[#allocation41_spill] sm:$0xff]  ;;  %v15505_v8 = vld [vmem:[#allocation70_spill] sm:$0xff]  ;;  %v15508_v58 = vld [vmem:[#allocation211_spill] sm:$0xff]  ;;  %v11469_v3 = vadd.f32 %v3514_v20, %v11146_v19 }
 0x451   : > { %v11454_v53 = vadd.f32 %v15505_v8, %v15504_v60  ;;  %v15507_v15 = vld [vmem:[#allocation45_spill] sm:$0xff]  ;;  %v15509_v18 = vld [vmem:[#allocation55_spill] sm:$0xff]  ;;  %v15511_v47 = vld [vmem:[#allocation60_spill] sm:$0xff] }
 0x452   : > { %v11458_v11 = vadd.f32 %v15508_v58, %v15507_v15  ;;  %v15510_v55 = vld [vmem:[#allocation91_spill] sm:$0xff]  ;;  %v11466_v33 = vadd.f32 %v11142_v36, %v15511_v47  ;;  %v15512_v46 = vld [vmem:[#allocation92_spill] sm:$0xff]  ;;  %v15514_v60 = vld [vmem:[#allocation94_spill] sm:$0xff]  ;;  %v11481_v58 = vadd.f32 %v3518_v6, %v11161_v52  ;;  %v11487_v36 = vadd.f32 %v3520_v14, %v11167_v29 }
 0x453   : > { %15506 = vst [vmem:[#allocation83_spill] sm:$0xff] %v11454_v53  ;;  %v11462_v50 = vadd.f32 %v15510_v55, %v15509_v18  ;;  %v11472_v44 = vadd.f32 %v3515_v7, %v15512_v46  ;;  %v11475_v8 = vadd.f32 %v3516_v24, %v15514_v60  ;;  %v15516_v53 = vld [vmem:[#allocation195_spill] sm:$0xff]  ;;  %v11484_v55 = vadd.f32 %v3519_v25, %v11164_v56  ;;  %v15521_v19 = vld [vmem:[#allocation154_spill] sm:$0xff]  ;;  %v15526_v6 = vld [vmem:[#allocation64_spill] sm:$0xff] }
 0x454   : > { %v11478_v15 = vadd.f32 %v3517_v13, %v15516_v53  ;;  %15518 = vst [vmem:[#allocation99_spill] sm:$0xff] %v11481_v58  ;;  %15520 = vst [vmem:[#allocation65_spill] sm:$0xff] %v11487_v36  ;;  %v3538_v20 = vmul.f32 0.120078385, %v15521_v19  ;;  %v11491_v7 = vadd.f32 %v3521_v57, %v11171_v21  ;;  %v15523_v18 = vld [vmem:[#allocation31_spill] sm:$0xff]  ;;  %v15524_v53 = vld [vmem:[#allocation206_spill] sm:$0xff] }
 0x455   : > { %15513 = vst [vmem:[#allocation121_spill] sm:$0xff] %v11472_v44  ;;  %15515 = vst [vmem:[#allocation62_spill] sm:$0xff] %v11475_v8  ;;  %v3539_v24 = vmul.f32 0.120078385, %v15523_v18  ;;  %v3540_v47 = vmul.f32 0.120078385, %v15224_v48 }
 0x456   : > { %15517 = vst [vmem:[#allocation58_spill] sm:$0xff] %v11478_v15  ;;  %15519 = vst [vmem:[#allocation103_spill] sm:$0xff] %v11484_v55  ;;  %v3541_v13 = vmul.f32 0.120078385, %v15524_v53  ;;  %v15525_v46 = vld [vmem:[#allocation179_spill] sm:$0xff]  ;;  %v15529_v29 = vld [vmem:[#allocation242_spill] sm:$0xff] }
 0x457   : > { %15522 = vst [vmem:[#allocation269_spill] sm:$0xff] %v11491_v7  ;;  %v3542_v52 = vmul.f32 0.120078385, %v15525_v46  ;;  %v3543_v60 = vmul.f32 0.120078385, %v15526_v6  ;;  %v15527_v56 = vld [vmem:[#allocation199_spill] sm:$0xff] }
 0x458   : > { %v3544_v25 = vmul.f32 0.120078385, %v15527_v56  ;;  %v15528_v55 = vld [vmem:[#allocation95_spill] sm:$0xff]  ;;  %v15532_v21 = vld [vmem:[#allocation176_spill] sm:$0xff]  ;;  %v15534_v18 = vld [vmem:[#allocation86_spill] sm:$0xff] }
 0x459   : > { %v11501_v14 = vadd.f32 %v15529_v29, %v15528_v55  ;;  %v15531_v19 = vld [vmem:[#allocation207_spill] sm:$0xff]  ;;  %v15535_v48 = vld [vmem:[#allocation157_spill] sm:$0xff]  ;;  %v15537_v53 = vld [vmem:[#allocation96_spill] sm:$0xff] }
 0x45a   : > { %v3545_v36 = vmul.f32 0.120078385, %v15531_v19  ;;  %v15533_v57 = vld [vmem:[#allocation35_spill] sm:$0xff]  ;;  %v11510_v58 = vadd.f32 %v15535_v48, %v15534_v18  ;;  %v15538_v46 = vld [vmem:[#allocation36_spill] sm:$0xff]  ;;  %v15540_v56 = vld [vmem:[#allocation37_spill] sm:$0xff] }
 0x45b   : > { %15530 = vst [vmem:[#allocation79_spill] sm:$0xff] %v11501_v14  ;;  %v11506_v7 = vadd.f32 %v15533_v57, %v15532_v21  ;;  %v11514_v15 = vadd.f32 %v15538_v46, %v15537_v53  ;;  %v15539_v6 = vld [vmem:[#allocation196_spill] sm:$0xff]  ;;  %v15542_v29 = vld [vmem:[#allocation159_spill] sm:$0xff]  ;;  %v15543_v19 = vld [vmem:[#allocation98_spill] sm:$0xff]  ;;  %v11536_v53 = vadd.f32 %v3539_v24, %v11214_v16 }
 0x45c   : > { %15536 = vst [vmem:[#allocation237_spill] sm:$0xff] %v11510_v58  ;;  %v11518_v8 = vadd.f32 %v15540_v56, %v15539_v6  ;;  %v15541_v55 = vld [vmem:[#allocation204_spill] sm:$0xff]  ;;  %v15545_v57 = vld [vmem:[#allocation177_spill] sm:$0xff]  ;;  %v11542_v56 = vadd.f32 %v3541_v13, %v11222_v39  ;;  %v11555_v16 = vadd.f32 %v3545_v36, %v11234_v2  ;;  %v15550_v39 = vld [vmem:[#allocation218_spill] sm:$0xff] }
 0x45d   : > { %v11522_v14 = vadd.f32 %v15542_v29, %v15541_v55  ;;  %v15544_v44 = vld [vmem:[#allocation244_spill] sm:$0xff]  ;;  %v11530_v18 = vadd.f32 %v11206_v1, %v15545_v57  ;;  %v15547_v46 = vld [vmem:[#allocation197_spill] sm:$0xff]  ;;  %v11545_v55 = vadd.f32 %v3542_v52, %v11225_v28  ;;  %v11551_v1 = vadd.f32 %v3544_v25, %v11231_v32  ;;  %v15551_v57 = vld [vmem:[#allocation219_spill] sm:$0xff] }
 0x45e   : > { %v11526_v21 = vadd.f32 %v15544_v44, %v15543_v19  ;;  %v15546_v48 = vld [vmem:[#allocation160_spill] sm:$0xff]  ;;  %v11539_v6 = vadd.f32 %v3540_v47, %v15547_v46  ;;  %v11548_v44 = vadd.f32 %v3543_v60, %v11228_v41  ;;  %v3564_v19 = vmul.f32 0.120078385, %v15264_v30  ;;  %v15552_v41 = vld [vmem:[#allocation221_spill] sm:$0xff]  ;;  %v15556_v46 = vld [vmem:[#allocation222_spill] sm:$0xff] }
 0x45f   : > { %v11533_v58 = vadd.f32 %v3538_v20, %v15546_v48  ;;  %v15548_v20 = vld [vmem:[#allocation215_spill] sm:$0xff]  ;;  %v15549_v24 = vld [vmem:[#allocation216_spill] sm:$0xff]  ;;  %v3565_v13 = vmul.f32 0.120078385, %v15550_v39  ;;  %v3566_v28 = vmul.f32 0.120078385, %v15551_v57 }
 0x460   : > { %v3562_v29 = vmul.f32 0.120078385, %v15548_v20  ;;  %v3563_v47 = vmul.f32 0.120078385, %v15549_v24  ;;  %v3567_v52 = vmul.f32 0.120078385, %v15403_v34 }
 0x461   : > { %v3568_v60 = vmul.f32 0.120078385, %v15552_v41  ;;  %v15553_v48 = vld [vmem:[#allocation106_spill] sm:$0xff]  ;;  %v15554_v32 = vld [vmem:[#allocation161_spill] sm:$0xff]  ;;  %v3569_v20 = vmul.f32 0.120078385, %v15556_v46 }
 0x462   : > { %v11565_v25 = vadd.f32 %v15554_v32, %v15553_v48  ;;  %v15557_v2 = vld [vmem:[#allocation82_spill] sm:$0xff]  ;;  %v15559_v24 = vld [vmem:[#allocation108_spill] sm:$0xff]  ;;  %v15567_v46 = vld [vmem:[#allocation113_spill] sm:$0xff] }
 0x463   : > { %v11570_v36 = vadd.f32 %v11246_v26, %v15557_v2  ;;  %v11574_v30 = vadd.f32 %v11250_v27, %v15559_v24  ;;  %v15561_v39 = vld [vmem:[#allocation84_spill] sm:$0xff]  ;;  %v15563_v34 = vld [vmem:[#allocation110_spill] sm:$0xff]  ;;  %v11590_v26 = vadd.f32 %v11266_v61, %v15567_v46  ;;  %v15569_v2 = vld [vmem:[#allocation115_spill] sm:$0xff]  ;;  %v11597_v24 = vadd.f32 %v3562_v29, %v11274_v63 }
 0x464   : > { %15555 = vst [vmem:[#allocation109_spill] sm:$0xff] %v11565_v25  ;;  %v11578_v57 = vadd.f32 %v11254_v17, %v15561_v39  ;;  %v11582_v41 = vadd.f32 %v11258_v45, %v15563_v34  ;;  %v15565_v48 = vld [vmem:[#allocation112_spill] sm:$0xff]  ;;  %v11594_v27 = vadd.f32 %v11270_v37, %v15569_v2  ;;  %v11600_v17 = vadd.f32 %v3563_v47, %v11278_v51  ;;  %v15575_v34 = vld [vmem:[#allocation162_spill] sm:$0xff] }
 0x465   : > { %15558 = vst [vmem:[#allocation114_spill] sm:$0xff] %v11570_v36  ;;  %15560 = vst [vmem:[#allocation117_spill] sm:$0xff] %v11574_v30  ;;  %v11586_v32 = vadd.f32 %v11262_v35, %v15565_v48  ;;  %v15573_v45 = vld [vmem:[#allocation248_spill] sm:$0xff]  ;;  %v11606_v35 = vadd.f32 %v3565_v13, %v15575_v34  ;;  %v11609_v48 = vadd.f32 %v3566_v28, %v11289_v42  ;;  %v15582_v47 = vld [vmem:[#allocation230_spill] sm:$0xff]  ;;  %v3588_v46 = vmul.f32 0.120078385, %v15285_v38 }
 0x466   : > { %15562 = vst [vmem:[#allocation208_spill] sm:$0xff] %v11578_v57  ;;  %15564 = vst [vmem:[#allocation118_spill] sm:$0xff] %v11582_v41  ;;  %v11603_v39 = vadd.f32 %v3564_v19, %v15573_v45  ;;  %v11612_v61 = vadd.f32 %v3567_v52, %v11292_v9  ;;  %v11615_v37 = vadd.f32 %v3568_v60, %v11295_v43  ;;  %v15580_v63 = vld [vmem:[#allocation172_spill] sm:$0xff]  ;;  %v3587_v19 = vmul.f32 0.120078385, %v15582_v47  ;;  %v15584_v28 = vld [vmem:[#allocation34_spill] sm:$0xff] }
 0x467   : > { %15566 = vst [vmem:[#allocation173_spill] sm:$0xff] %v11586_v32  ;;  %15568 = vst [vmem:[#allocation54_spill] sm:$0xff] %v11590_v26  ;;  %v3586_v29 = vmul.f32 0.120078385, %v15580_v63  ;;  %v11619_v51 = vadd.f32 %v3569_v20, %v11299_v12  ;;  %v3589_v13 = vmul.f32 0.120078385, %v15286_v62 }
 0x468   : > { %15570 = vst [vmem:[#allocation69_spill] sm:$0xff] %v11594_v27  ;;  %15571 = vst [vmem:[#allocation170_spill] sm:$0xff] %v11597_v24  ;;  %v15583_v2 = vld [vmem:[#allocation200_spill] sm:$0xff]  ;;  %v3591_v45 = vmul.f32 0.120078385, %v15584_v28  ;;  %v15585_v9 = vld [vmem:[#allocation67_spill] sm:$0xff] }
 0x469   : > { %15572 = vst [vmem:[#allocation205_spill] sm:$0xff] %v11600_v17  ;;  %15574 = vst [vmem:[#allocation164_spill] sm:$0xff] %v11603_v39  ;;  %v3590_v42 = vmul.f32 0.120078385, %v15583_v2  ;;  %v11628_v52 = vadd.f32 %v11306_v22, %v15585_v9  ;;  %v15587_v43 = vld [vmem:[#allocation188_spill] sm:$0xff]  ;;  %v15589_v12 = vld [vmem:[#allocation49_spill] sm:$0xff] }
 0x46a   : > { %15576 = vst [vmem:[#allocation192_spill] sm:$0xff] %v11606_v35  ;;  %15577 = vst [vmem:[#allocation124_spill] sm:$0xff] %v11609_v48  ;;  %v11632_v60 = vadd.f32 %v11310_v59, %v15587_v43  ;;  %v3592_v20 = vmul.f32 0.120078385, %v15589_v12  ;;  %v15590_v34 = vld [vmem:[#allocation76_spill] sm:$0xff]  ;;  %v15591_v47 = vld [vmem:[#allocation238_spill] sm:$0xff] }
 0x46b   : > { %15578 = vst [vmem:[#allocation61_spill] sm:$0xff] %v11612_v61  ;;  %15579 = vst [vmem:[#allocation71_spill] sm:$0xff] %v11615_v37  ;;  %v3593_v63 = vmul.f32 0.120078385, %v15590_v34  ;;  %v15592_v38 = vld [vmem:[#allocation163_spill] sm:$0xff]  ;;  %v15594_v62 = vld [vmem:[#allocation68_spill] sm:$0xff] }
 0x46c   : > { %15581 = vst [vmem:[#allocation171_spill] sm:$0xff] %v11619_v51  ;;  %15586 = vst [vmem:[#allocation122_spill] sm:$0xff] %v11628_v52  ;;  %v11638_v51 = vadd.f32 %v15592_v38, %v15591_v47  ;;  %v15595_v2 = vld [vmem:[#allocation212_spill] sm:$0xff]  ;;  %v15597_v28 = vld [vmem:[#allocation178_spill] sm:$0xff] }
 0x46d   : > { %15588 = vst [vmem:[#allocation126_spill] sm:$0xff] %v11632_v60  ;;  %v11642_v37 = vadd.f32 %v15595_v2, %v15594_v62  ;;  %v15598_v61 = vld [vmem:[#allocation213_spill] sm:$0xff]  ;;  %v15600_v9 = vld [vmem:[#allocation30_spill] sm:$0xff]  ;;  %v15601_v52 = vld [vmem:[#allocation136_spill] sm:$0xff]  ;;  %v11664_v62 = vadd.f32 %v3587_v19, %v11342_v31 }
 0x46e   : > { %15593 = vst [vmem:[#allocation277_spill] sm:$0xff] %v11638_v51  ;;  %v11646_v22 = vadd.f32 %v15598_v61, %v15597_v28  ;;  %v11650_v59 = vadd.f32 %v15601_v52, %v15600_v9  ;;  %v15603_v43 = vld [vmem:[#allocation203_spill] sm:$0xff]  ;;  %v15604_v12 = vld [vmem:[#allocation100_spill] sm:$0xff]  ;;  %v15606_v34 = vld [vmem:[#allocation174_spill] sm:$0xff]  ;;  %v11673_v9 = vadd.f32 %v3590_v42, %v11353_v23 }
 0x46f   : > { %15596 = vst [vmem:[#allocation278_spill] sm:$0xff] %v11642_v37  ;;  %v11654_v60 = vadd.f32 %v15604_v12, %v15603_v43  ;;  %v11658_v47 = vadd.f32 %v11334_v0, %v15606_v34  ;;  %v15608_v38 = vld [vmem:[#allocation101_spill] sm:$0xff]  ;;  %15610 = vst [vmem:[#allocation72_spill] sm:$0xff] %v11664_v62  ;;  %v15611_v61 = vld [vmem:[#allocation102_spill] sm:$0xff] }
 0x470   : > { %15599 = vst [vmem:[#allocation279_spill] sm:$0xff] %v11646_v22  ;;  %15602 = vst [vmem:[#allocation280_spill] sm:$0xff] %v11650_v59  ;;  %v11661_v51 = vadd.f32 %v3586_v29, %v15608_v38  ;;  %v11667_v2 = vadd.f32 %v3588_v46, %v15611_v61  ;;  %v15613_v28 = vld [vmem:[#allocation217_spill] sm:$0xff]  ;;  %v15616_v43 = vld [vmem:[#allocation223_spill] sm:$0xff]  ;;  %v11681_v38 = vadd.f32 %v3592_v20, %v11359_v40 }
 0x471   : > { %15605 = vst [vmem:[#allocation281_spill] sm:$0xff] %v11654_v60  ;;  %15607 = vst [vmem:[#allocation175_spill] sm:$0xff] %v11658_v47  ;;  %v11670_v52 = vadd.f32 %v3589_v13, %v15613_v28  ;;  %v11676_v12 = vadd.f32 %v3591_v45, %v15616_v43  ;;  %v15618_v0 = vld [vmem:[#allocation193_spill] sm:$0xff]  ;;  %v15619_v47 = vld [vmem:[#allocation123_spill] sm:$0xff]  ;;  %v11818_v59 = vmul.f32 %v11506_v7, %v11506_v7 }
 0x472   : > { %15609 = vst [vmem:[#allocation158_spill] sm:$0xff] %v11661_v51  ;;  %15612 = vst [vmem:[#allocation139_spill] sm:$0xff] %v11667_v2  ;;  %v3610_v34 = vmul.f32 0.120078385, %v15618_v0  ;;  %v3611_v29 = vmul.f32 0.120078385, %v15619_v47 }
 0x473   : > { %15614 = vst [vmem:[#allocation140_spill] sm:$0xff] %v11670_v52  ;;  %15615 = vst [vmem:[#allocation141_spill] sm:$0xff] %v11673_v9  ;;  %v15621_v31 = vld [vmem:[#allocation25_spill] sm:$0xff]  ;;  %v15622_v46 = vld [vmem:[#allocation130_spill] sm:$0xff] }
 0x474   : > { %15617 = vst [vmem:[#allocation73_spill] sm:$0xff] %v11676_v12  ;;  %15620 = vst [vmem:[#allocation142_spill] sm:$0xff] %v11681_v38  ;;  %v3612_v19 = vmul.f32 0.120078385, %v15621_v31  ;;  %v3613_v61 = vmul.f32 0.120078385, %v15622_v46 }
 0x475   : > { %v15623_v2 = vld [vmem:[#allocation165_spill] sm:$0xff]  ;;  %v15624_v28 = vld [vmem:[#allocation156_spill] sm:$0xff]  ;;  %v15626_v23 = vld [vmem:[#allocation78_spill] sm:$0xff]  ;;  %15683 = vst [vmem:[#allocation43_spill] sm:$0xff] %v11818_v59  ;;  %v11842_v59 = vmul.f32 %v11530_v18, %v11530_v18 }
 0x476   : > { %v3614_v13 = vmul.f32 0.120078385, %v15623_v2  ;;  %v11687_v52 = vadd.f32 %v3593_v63, %v15624_v28  ;;  %v3615_v42 = vmul.f32 0.120078385, %v15626_v23  ;;  %v15627_v45 = vld [vmem:[#allocation135_spill] sm:$0xff]  ;;  %v15628_v12 = vld [vmem:[#allocation180_spill] sm:$0xff] }
 0x477   : > { %v3616_v43 = vmul.f32 0.120078385, %v15627_v45  ;;  %v3617_v0 = vmul.f32 0.120078385, %v15628_v12  ;;  %v15629_v9 = vld [vmem:[#allocation127_spill] sm:$0xff]  ;;  %v15632_v40 = vld [vmem:[#allocation194_spill] sm:$0xff] }
 0x478   : > { %15625 = vst [vmem:[#allocation77_spill] sm:$0xff] %v11687_v52  ;;  %v15630_v47 = vld [vmem:[#allocation75_spill] sm:$0xff]  ;;  %v11698_v20 = vadd.f32 %v11374_v49, %v15632_v40  ;;  %v15634_v31 = vld [vmem:[#allocation128_spill] sm:$0xff]  ;;  %v15636_v63 = vld [vmem:[#allocation189_spill] sm:$0xff] }
 0x479   : > { %v11694_v62 = vadd.f32 %v15630_v47, %v15629_v9  ;;  %v11702_v2 = vadd.f32 %v11378_v4, %v15634_v31  ;;  %v15637_v46 = vld [vmem:[#allocation224_spill] sm:$0xff]  ;;  %v15639_v23 = vld [vmem:[#allocation198_spill] sm:$0xff]  ;;  %v15640_v45 = vld [vmem:[#allocation225_spill] sm:$0xff]  ;;  %15690 = vst [vmem:[#allocation48_spill] sm:$0xff] %v11842_v59  ;;  %v11866_v59 = vmul.f32 %v11548_v44, %v11548_v44 }
 0x47a   : > { %15633 = vst [vmem:[#allocation144_spill] sm:$0xff] %v11698_v20  ;;  %v11706_v28 = vadd.f32 %v15637_v46, %v15636_v63  ;;  %v11710_v52 = vadd.f32 %v15640_v45, %v15639_v23  ;;  %v15642_v12 = vld [vmem:[#allocation131_spill] sm:$0xff]  ;;  %v15643_v38 = vld [vmem:[#allocation226_spill] sm:$0xff]  ;;  %v15645_v47 = vld [vmem:[#allocation132_spill] sm:$0xff] }
 0x47b   : > { %15631 = vst [vmem:[#allocation39_spill] sm:$0xff] %v11694_v62  ;;  %15635 = vst [vmem:[#allocation40_spill] sm:$0xff] %v11702_v2  ;;  %v11714_v9 = vadd.f32 %v15643_v38, %v15642_v12  ;;  %v15646_v62 = vld [vmem:[#allocation257_spill] sm:$0xff]  ;;  %v15648_v40 = vld [vmem:[#allocation74_spill] sm:$0xff] }
 0x47c   : > { %15638 = vst [vmem:[#allocation22_spill] sm:$0xff] %v11706_v28  ;;  %15641 = vst [vmem:[#allocation145_spill] sm:$0xff] %v11710_v52  ;;  %v11718_v49 = vadd.f32 %v15646_v62, %v15645_v47  ;;  %v15649_v20 = vld [vmem:[#allocation227_spill] sm:$0xff]  ;;  %v15651_v31 = vld [vmem:[#allocation228_spill] sm:$0xff] }
 0x47d   : > { %15644 = vst [vmem:[#allocation146_spill] sm:$0xff] %v11714_v9  ;;  %v11722_v4 = vadd.f32 %v15649_v20, %v15648_v40  ;;  %v11725_v2 = vadd.f32 %v3610_v34, %v15651_v31  ;;  %v15653_v63 = vld [vmem:[#allocation229_spill] sm:$0xff]  ;;  %v15655_v23 = vld [vmem:[#allocation186_spill] sm:$0xff]  ;;  %v15657_v52 = vld [vmem:[#allocation32_spill] sm:$0xff] }
 0x47e   : > { %15647 = vst [vmem:[#allocation23_spill] sm:$0xff] %v11718_v49  ;;  %v11728_v46 = vadd.f32 %v3611_v29, %v15653_v63  ;;  %v11731_v45 = vadd.f32 %v3612_v19, %v15655_v23  ;;  %v11734_v38 = vadd.f32 %v3613_v61, %v15657_v52  ;;  %v15659_v12 = vld [vmem:[#allocation169_spill] sm:$0xff]  ;;  %v15661_v62 = vld [vmem:[#allocation138_spill] sm:$0xff]  ;;  %v15663_v20 = vld [vmem:[#allocation263_spill] sm:$0xff]  ;;  %v11754_v52 = vmul.f32 %v11442_v5, %v11442_v5 }
 0x47f   : > { %15650 = vst [vmem:[#allocation147_spill] sm:$0xff] %v11722_v4  ;;  %15652 = vst [vmem:[#allocation187_spill] sm:$0xff] %v11725_v2  ;;  %v11737_v9 = vadd.f32 %v3614_v13, %v15659_v12  ;;  %v11740_v47 = vadd.f32 %v3615_v42, %v15661_v62  ;;  %v11743_v40 = vadd.f32 %v3616_v43, %v15663_v20  ;;  %v15665_v34 = vld [vmem:[#allocation116_spill] sm:$0xff]  ;;  %v15667_v29 = vld [vmem:[#allocation234_spill] sm:$0xff] }
 0x480   : > { %15654 = vst [vmem:[#allocation231_spill] sm:$0xff] %v11728_v46  ;;  %15656 = vst [vmem:[#allocation232_spill] sm:$0xff] %v11731_v45  ;;  %v11746_v31 = vadd.f32 %v3617_v0, %v15665_v34  ;;  %v11750_v63 = vmul.f32 %v15667_v29, %v15667_v29  ;;  %v11758_v19 = vmul.f32 %v11446_v54, %v11446_v54  ;;  %v15668_v13 = vld [vmem:[#allocation83_spill] sm:$0xff]  ;;  %v15669_v62 = vld [vmem:[#allocation121_spill] sm:$0xff] }
 0x481   : > { %15658 = vst [vmem:[#allocation235_spill] sm:$0xff] %v11734_v38  ;;  %15660 = vst [vmem:[#allocation80_spill] sm:$0xff] %v11737_v9  ;;  %v11762_v61 = vmul.f32 %v11450_v10, %v11450_v10  ;;  %v11766_v42 = vmul.f32 %v15668_v13, %v15668_v13  ;;  %v11770_v43 = vmul.f32 %v11458_v11, %v11458_v11  ;;  %v15670_v34 = vld [vmem:[#allocation62_spill] sm:$0xff]  ;;  %v15673_v9 = vld [vmem:[#allocation99_spill] sm:$0xff] }
 0x482   : > { %15662 = vst [vmem:[#allocation87_spill] sm:$0xff] %v11740_v47  ;;  %15664 = vst [vmem:[#allocation214_spill] sm:$0xff] %v11743_v40  ;;  %v11774_v0 = vmul.f32 %v11462_v50, %v11462_v50  ;;  %v11778_v23 = vmul.f32 %v11466_v33, %v11466_v33  ;;  %v11782_v12 = vmul.f32 %v11469_v3, %v11469_v3  ;;  %v15671_v40 = vld [vmem:[#allocation58_spill] sm:$0xff]  ;;  %v15675_v45 = vld [vmem:[#allocation103_spill] sm:$0xff] }
 0x483   : > { %15666 = vst [vmem:[#allocation119_spill] sm:$0xff] %v11746_v31  ;;  %v11786_v20 = vmul.f32 %v15669_v62, %v15669_v62  ;;  %v11790_v31 = vmul.f32 %v15670_v34, %v15670_v34  ;;  %v11794_v47 = vmul.f32 %v15671_v40, %v15671_v40  ;;  %v11798_v38 = vmul.f32 %v15673_v9, %v15673_v9  ;;  %v15677_v2 = vld [vmem:[#allocation65_spill] sm:$0xff]  ;;  %v15681_v51 = vld [vmem:[#allocation79_spill] sm:$0xff]  ;;  %v15719_v17 = vld [vmem:[#allocation48_spill] sm:$0xff] }
 0x484   : > { %v11802_v46 = vmul.f32 %v15675_v45, %v15675_v45  ;;  %v11806_v4 = vmul.f32 %v15677_v2, %v15677_v2  ;;  %v15679_v49 = vld [vmem:[#allocation269_spill] sm:$0xff]  ;;  %v11814_v60 = vmul.f32 %v15681_v51, %v15681_v51  ;;  %15696 = vst [vmem:[#allocation245_spill] sm:$0xff] %v11866_v59  ;;  %v11890_v59 = vmul.f32 %v11514_v15, %v11450_v10  ;;  %v15736_v41 = vld [vmem:[#allocation39_spill] sm:$0xff] }
 0x485   : > { %15672 = vst [vmem:[#allocation53_spill] sm:$0xff] %v11794_v47  ;;  %15674 = vst [vmem:[#allocation166_spill] sm:$0xff] %v11798_v38  ;;  %v11810_v28 = vmul.f32 %v15679_v49, %v15679_v49  ;;  %v15684_v22 = vld [vmem:[#allocation237_spill] sm:$0xff]  ;;  %v11910_v10 = vmul.f32 %v11533_v58, %v11469_v3  ;;  %v11930_v3 = vmul.f32 %v11548_v44, %v15675_v45  ;;  %v15738_v45 = vld [vmem:[#allocation40_spill] sm:$0xff] }
 0x486   : > { %15676 = vst [vmem:[#allocation168_spill] sm:$0xff] %v11802_v46  ;;  %15678 = vst [vmem:[#allocation184_spill] sm:$0xff] %v11806_v4  ;;  %v11822_v37 = vmul.f32 %v15684_v22, %v15684_v22  ;;  %v11826_v46 = vmul.f32 %v11514_v15, %v11514_v15  ;;  %v11830_v4 = vmul.f32 %v11518_v8, %v11518_v8  ;;  %v15740_v44 = vld [vmem:[#allocation145_spill] sm:$0xff] }
 0x487   : > { %15680 = vst [vmem:[#allocation42_spill] sm:$0xff] %v11810_v28  ;;  %15682 = vst [vmem:[#allocation240_spill] sm:$0xff] %v11814_v60  ;;  %v11834_v28 = vmul.f32 %v11522_v14, %v11522_v14  ;;  %v11838_v60 = vmul.f32 %v11526_v21, %v11526_v21  ;;  %v11934_v15 = vmul.f32 %v11551_v1, %v15677_v2  ;;  %v15737_v2 = vld [vmem:[#allocation144_spill] sm:$0xff] }
 0x488   : > { %15685 = vst [vmem:[#allocation120_spill] sm:$0xff] %v11822_v37  ;;  %15686 = vst [vmem:[#allocation44_spill] sm:$0xff] %v11826_v46  ;;  %v11846_v37 = vmul.f32 %v11533_v58, %v11533_v58  ;;  %v11850_v46 = vmul.f32 %v11536_v53, %v11536_v53  ;;  %v11938_v58 = vmul.f32 %v11555_v16, %v15679_v49 }
 0x489   : > { %15687 = vst [vmem:[#allocation241_spill] sm:$0xff] %v11830_v4  ;;  %15688 = vst [vmem:[#allocation46_spill] sm:$0xff] %v11834_v28  ;;  %v11854_v4 = vmul.f32 %v11539_v6, %v11539_v6  ;;  %v11858_v28 = vmul.f32 %v11542_v56, %v11542_v56 }
 0x48a   : > { %15689 = vst [vmem:[#allocation47_spill] sm:$0xff] %v11838_v60  ;;  %15691 = vst [vmem:[#allocation50_spill] sm:$0xff] %v11846_v37  ;;  %v11862_v60 = vmul.f32 %v11545_v55, %v11545_v55  ;;  %v11870_v37 = vmul.f32 %v11551_v1, %v11551_v1 }
 0x48b   : > { %15692 = vst [vmem:[#allocation51_spill] sm:$0xff] %v11850_v46  ;;  %15693 = vst [vmem:[#allocation33_spill] sm:$0xff] %v11854_v4  ;;  %v11874_v46 = vmul.f32 %v11555_v16, %v11555_v16  ;;  %v11878_v4 = vmul.f32 %v15681_v51, %v15667_v29  ;;  %v11898_v51 = vmul.f32 %v11522_v14, %v11458_v11 }
 0x48c   : > { %15694 = vst [vmem:[#allocation220_spill] sm:$0xff] %v11858_v28  ;;  %15695 = vst [vmem:[#allocation243_spill] sm:$0xff] %v11862_v60  ;;  %v11882_v28 = vmul.f32 %v11506_v7, %v11442_v5  ;;  %v11886_v60 = vmul.f32 %v15684_v22, %v11446_v54  ;;  %v11902_v5 = vmul.f32 %v11526_v21, %v11462_v50 }
 0x48d   : > { %15697 = vst [vmem:[#allocation246_spill] sm:$0xff] %v11870_v37  ;;  %15698 = vst [vmem:[#allocation247_spill] sm:$0xff] %v11874_v46  ;;  %v11894_v37 = vmul.f32 %v11518_v8, %v15668_v13  ;;  %v11906_v54 = vmul.f32 %v11530_v18, %v11466_v33  ;;  %v11914_v8 = vmul.f32 %v11536_v53, %v15669_v62  ;;  %v15739_v13 = vld [vmem:[#allocation22_spill] sm:$0xff]  ;;  %v15742_v53 = vld [vmem:[#allocation23_spill] sm:$0xff] }
 0x48e   : > { %v11918_v11 = vmul.f32 %v11539_v6, %v15670_v34  ;;  %v11922_v50 = vmul.f32 %v11542_v56, %v15671_v40  ;;  %v11926_v33 = vmul.f32 %v11545_v55, %v15673_v9  ;;  %v15705_v55 = vld [vmem:[#allocation240_spill] sm:$0xff]  ;;  %v15707_v6 = vld [vmem:[#allocation43_spill] sm:$0xff]  ;;  %v3714_v21 = vsub.f32 %v15736_v41, %v11878_v4  ;;  %v15741_v56 = vld [vmem:[#allocation146_spill] sm:$0xff] }
 0x48f   : > { %v15709_v18 = vld [vmem:[#allocation120_spill] sm:$0xff]  ;;  %v3715_v7 = vsub.f32 %v15737_v2, %v11882_v28  ;;  %v3716_v49 = vsub.f32 %v15738_v45, %v11886_v60  ;;  %v3717_v29 = vsub.f32 %v15739_v13, %v11890_v59  ;;  %v3718_v34 = vsub.f32 %v15740_v44, %v11894_v37  ;;  %v15743_v41 = vld [vmem:[#allocation147_spill] sm:$0xff] }
 0x490   : > { %v15711_v14 = vld [vmem:[#allocation44_spill] sm:$0xff]  ;;  %v15713_v48 = vld [vmem:[#allocation241_spill] sm:$0xff]  ;;  %v15715_v35 = vld [vmem:[#allocation46_spill] sm:$0xff]  ;;  %v3719_v24 = vsub.f32 %v15741_v56, %v11898_v51  ;;  %v3720_v26 = vsub.f32 %v15742_v53, %v11902_v5  ;;  %v3721_v1 = vsub.f32 %v15743_v41, %v11906_v54  ;;  %v3731_v38 = vmul.f32 2.0, %v11882_v28 }
 0x491   : > { %v15717_v39 = vld [vmem:[#allocation47_spill] sm:$0xff]  ;;  %v15721_v27 = vld [vmem:[#allocation50_spill] sm:$0xff]  ;;  %v15746_v13 = vld [vmem:[#allocation232_spill] sm:$0xff]  ;;  %v3734_v22 = vmul.f32 2.0, %v11894_v37  ;;  %v3737_v47 = vmul.f32 2.0, %v11906_v54  ;;  %v3741_v28 = vmul.f32 2.0, %v11922_v50 }
 0x492   : > { %v15723_v32 = vld [vmem:[#allocation51_spill] sm:$0xff]  ;;  %v3724_v62 = vsub.f32 %v15746_v13, %v11918_v11  ;;  %v15748_v56 = vld [vmem:[#allocation80_spill] sm:$0xff]  ;;  %v15750_v41 = vld [vmem:[#allocation214_spill] sm:$0xff]  ;;  %v3732_v13 = vmul.f32 2.0, %v11886_v60  ;;  %v3742_v60 = vmul.f32 2.0, %v11926_v33  ;;  %v3744_v37 = vmul.f32 2.0, %v11934_v15 }
 0x493   : > { %v15744_v2 = vld [vmem:[#allocation187_spill] sm:$0xff]  ;;  %v3726_v40 = vsub.f32 %v15748_v56, %v11926_v33  ;;  %v3728_v9 = vsub.f32 %v15750_v41, %v11934_v15  ;;  %v3735_v56 = vmul.f32 2.0, %v11898_v51  ;;  %v3738_v41 = vmul.f32 2.0, %v11910_v10 }
 0x494   : > { %v3722_v25 = vsub.f32 %v15744_v2, %v11910_v10  ;;  %v15745_v45 = vld [vmem:[#allocation231_spill] sm:$0xff]  ;;  %v3745_v51 = vmul.f32 2.0, %v11938_v58  ;;  %v12056_v54 = vadd.f32 0.0001, %v3732_v13  ;;  %v3810_v10 = vadd.f32 %v15705_v55, %v11750_v63 }
 0x495   : > { %v3723_v46 = vsub.f32 %v15745_v45, %v11914_v8  ;;  %v15747_v44 = vld [vmem:[#allocation235_spill] sm:$0xff]  ;;  %v3730_v45 = vmul.f32 2.0, %v11878_v4  ;;  %v3740_v4 = vmul.f32 2.0, %v11918_v11  ;;  %v12062_v11 = vadd.f32 0.0001, %v3734_v22 }
 0x496   : > { %v3725_v36 = vsub.f32 %v15747_v44, %v11922_v50  ;;  %v15749_v53 = vld [vmem:[#allocation87_spill] sm:$0xff]  ;;  %v3733_v44 = vmul.f32 2.0, %v11890_v59  ;;  %v3743_v59 = vmul.f32 2.0, %v11930_v3  ;;  %15754 = vst [vmem:[#allocation251_spill] sm:$0xff] %v12056_v54  ;;  %v12064_v50 = vadd.f32 0.0001, %v3735_v56 }
 0x497   : > { %v3727_v16 = vsub.f32 %v15749_v53, %v11930_v3  ;;  %v15751_v2 = vld [vmem:[#allocation119_spill] sm:$0xff]  ;;  %v3736_v53 = vmul.f32 2.0, %v11902_v5  ;;  %v12052_v57 = vadd.f32 0.0001, %v3730_v45  ;;  %v12054_v5 = vadd.f32 0.0001, %v3731_v38 }
 0x498   : > { %v3729_v30 = vsub.f32 %v15751_v2, %v11938_v58  ;;  %v3739_v2 = vmul.f32 2.0, %v11914_v8  ;;  %v12060_v8 = vadd.f32 0.0001, %v3733_v44  ;;  %15756 = vst [vmem:[#allocation253_spill] sm:$0xff] %v12062_v11  ;;  %15757 = vst [vmem:[#allocation254_spill] sm:$0xff] %v12064_v50  ;;  %v3811_v33 = vadd.f32 %v15707_v6, %v11754_v52  ;;  %v15793_v50 = vld [vmem:[#allocation42_spill] sm:$0xff] }
 0x499   : > { %15752 = vst [vmem:[#allocation249_spill] sm:$0xff] %v12052_v57  ;;  %15753 = vst [vmem:[#allocation250_spill] sm:$0xff] %v12054_v5  ;;  %v12068_v3 = vadd.f32 0.0001, %v3736_v53  ;;  %v12070_v15 = vadd.f32 0.0001, %v3737_v47  ;;  %v3812_v58 = vadd.f32 %v15709_v18, %v11758_v19  ;;  %v3813_v44 = vadd.f32 %v15711_v14, %v11762_v61 }
 0x49a   : > { %15755 = vst [vmem:[#allocation252_spill] sm:$0xff] %v12060_v8  ;;  %v12072_v38 = vadd.f32 0.0001, %v3738_v41  ;;  %v12076_v45 = vadd.f32 0.0001, %v3739_v2  ;;  %v3814_v41 = vadd.f32 %v15713_v48, %v11766_v42  ;;  %v3762_v2 = vmul.f32 2.0, %v3714_v21 }
 0x49b   : > { %15758 = vst [vmem:[#allocation255_spill] sm:$0xff] %v12068_v3  ;;  %15759 = vst [vmem:[#allocation56_spill] sm:$0xff] %v12070_v15  ;;  %v12078_v13 = vadd.f32 0.0001, %v3740_v4  ;;  %v12080_v22 = vadd.f32 0.0001, %v3741_v28 }
 0x49c   : > { %15760 = vst [vmem:[#allocation233_spill] sm:$0xff] %v12072_v38  ;;  %15761 = vst [vmem:[#allocation104_spill] sm:$0xff] %v12076_v45  ;;  %v12084_v56 = vadd.f32 0.0001, %v3742_v60  ;;  %v12086_v53 = vadd.f32 0.0001, %v3743_v59 }
 0x49d   : > { %15762 = vst [vmem:[#allocation105_spill] sm:$0xff] %v12078_v13  ;;  %15763 = vst [vmem:[#allocation236_spill] sm:$0xff] %v12080_v22  ;;  %v12088_v47 = vadd.f32 0.0001, %v3744_v37  ;;  %v12092_v38 = vadd.f32 0.0001, %v3745_v51 }
 0x49e   : > { %15764 = vst [vmem:[#allocation57_spill] sm:$0xff] %v12084_v56  ;;  %15765 = vst [vmem:[#allocation256_spill] sm:$0xff] %v12086_v53  ;;  %v3763_v45 = vmul.f32 2.0, %v3715_v7  ;;  %v3764_v4 = vmul.f32 2.0, %v3716_v49  ;;  %v3765_v13 = vmul.f32 2.0, %v3717_v29  ;;  %v12094_v28 = vmul.f32 2.0, %v3718_v34 }
 0x49f   : > { %15766 = vst [vmem:[#allocation258_spill] sm:$0xff] %v12088_v47  ;;  %15767 = vst [vmem:[#allocation259_spill] sm:$0xff] %v12092_v38  ;;  %v12096_v22 = vmul.f32 2.0, %v3719_v24  ;;  %v12098_v15 = vmul.f32 2.0, %v3720_v26  ;;  %v12100_v60 = vmul.f32 2.0, %v3721_v1  ;;  %v12102_v59 = vmul.f32 2.0, %v3722_v25 }
 0x4a0   : > { %15768 = vst [vmem:[#allocation260_spill] sm:$0xff] %v12094_v28  ;;  %v12104_v37 = vmul.f32 2.0, %v3723_v46  ;;  %v12106_v47 = vmul.f32 2.0, %v3724_v62  ;;  %v12108_v51 = vmul.f32 2.0, %v3725_v36  ;;  %v12110_v21 = vmul.f32 2.0, %v3726_v40  ;;  %v15784_v40 = vld [vmem:[#allocation33_spill] sm:$0xff] }
 0x4a1   : > { %15769 = vst [vmem:[#allocation261_spill] sm:$0xff] %v12096_v22  ;;  %15770 = vst [vmem:[#allocation85_spill] sm:$0xff] %v12098_v15  ;;  %v12112_v7 = vmul.f32 2.0, %v3727_v16  ;;  %v12114_v49 = vmul.f32 2.0, %v3728_v9  ;;  %v12116_v24 = vmul.f32 2.0, %v3729_v30  ;;  %v3815_v25 = vadd.f32 %v15715_v35, %v11770_v43  ;;  %v15785_v34 = vld [vmem:[#allocation53_spill] sm:$0xff] }
 0x4a2   : > { %15771 = vst [vmem:[#allocation262_spill] sm:$0xff] %v12100_v60  ;;  %15772 = vst [vmem:[#allocation185_spill] sm:$0xff] %v12102_v59  ;;  %v12118_v26 = vadd.f32 0.0009, %v3762_v2  ;;  %v12120_v1 = vadd.f32 0.0009, %v3763_v45  ;;  %v3816_v36 = vadd.f32 %v15717_v39, %v11774_v0  ;;  %v3817_v16 = vadd.f32 %v15719_v17, %v11778_v23 }
 0x4a3   : > { %15773 = vst [vmem:[#allocation264_spill] sm:$0xff] %v12104_v37  ;;  %15774 = vst [vmem:[#allocation24_spill] sm:$0xff] %v12106_v47  ;;  %v12124_v46 = vadd.f32 0.0009, %v3764_v4  ;;  %v12126_v29 = vadd.f32 0.0009, %v3765_v13  ;;  %v3818_v30 = vadd.f32 %v15721_v27, %v11782_v12  ;;  %v3819_v9 = vadd.f32 %v15723_v32, %v11786_v20 }
 0x4a4   : > { %15775 = vst [vmem:[#allocation265_spill] sm:$0xff] %v12108_v51  ;;  %15776 = vst [vmem:[#allocation209_spill] sm:$0xff] %v12110_v21  ;;  %v3820_v62 = vadd.f32 %v15784_v40, %v11790_v31  ;;  %v15786_v45 = vld [vmem:[#allocation220_spill] sm:$0xff]  ;;  %v15787_v13 = vld [vmem:[#allocation166_spill] sm:$0xff]  ;;  %v3826_v11 = vadd.f32 0.0001, %v3810_v10 }
 0x4a5   : > { %15777 = vst [vmem:[#allocation190_spill] sm:$0xff] %v12112_v7  ;;  %15778 = vst [vmem:[#allocation210_spill] sm:$0xff] %v12114_v49  ;;  %v3821_v2 = vadd.f32 %v15786_v45, %v15785_v34  ;;  %v15788_v4 = vld [vmem:[#allocation243_spill] sm:$0xff]  ;;  %v15789_v53 = vld [vmem:[#allocation168_spill] sm:$0xff]  ;;  %v3827_v47 = vadd.f32 0.0001, %v3811_v33 }
 0x4a6   : > { %15779 = vst [vmem:[#allocation191_spill] sm:$0xff] %v12116_v24  ;;  %15780 = vst [vmem:[#allocation183_spill] sm:$0xff] %v12118_v26  ;;  %v3822_v38 = vadd.f32 %v15788_v4, %v15787_v13  ;;  %v15790_v56 = vld [vmem:[#allocation245_spill] sm:$0xff]  ;;  %v15791_v49 = vld [vmem:[#allocation184_spill] sm:$0xff]  ;;  %v3828_v60 = vadd.f32 0.0001, %v3812_v58 }
 0x4a7   : > { %15781 = vst [vmem:[#allocation63_spill] sm:$0xff] %v12120_v1  ;;  %15782 = vst [vmem:[#allocation239_spill] sm:$0xff] %v12124_v46  ;;  %v3823_v24 = vadd.f32 %v15790_v56, %v15789_v53  ;;  %v15792_v7 = vld [vmem:[#allocation246_spill] sm:$0xff]  ;;  %v15794_v21 = vld [vmem:[#allocation247_spill] sm:$0xff]  ;;  %v3829_v15 = vadd.f32 0.0001, %v3813_v44 }
 0x4a8   : > { %15783 = vst [vmem:[#allocation59_spill] sm:$0xff] %v12126_v29  ;;  %v3824_v3 = vadd.f32 %v15792_v7, %v15791_v49  ;;  %v3825_v51 = vadd.f32 %v15794_v21, %v15793_v50  ;;  %v15795_v29 = vld [vmem:[#allocation109_spill] sm:$0xff]  ;;  %v15797_v1 = vld [vmem:[#allocation122_spill] sm:$0xff]  ;;  %v15813_v44 = vld [vmem:[#allocation279_spill] sm:$0xff] }
 0x4a9   : > { %v15796_v8 = vsub.f32 %v15795_v29, %v11750_v63  ;;  %v15798_v5 = vsub.f32 %v15797_v1, %v15705_v55  ;;  %v15799_v54 = vld [vmem:[#allocation114_spill] sm:$0xff]  ;;  %v15803_v22 = vld [vmem:[#allocation117_spill] sm:$0xff]  ;;  %v15807_v29 = vld [vmem:[#allocation208_spill] sm:$0xff]  ;;  %v3831_v1 = vadd.f32 0.0001, %v3815_v25 }
 0x4aa   : > { %v15800_v37 = vsub.f32 %v15799_v54, %v11754_v52  ;;  %v15801_v26 = vld [vmem:[#allocation126_spill] sm:$0xff]  ;;  %v15804_v10 = vsub.f32 %v15803_v22, %v11758_v19  ;;  %v15805_v33 = vld [vmem:[#allocation277_spill] sm:$0xff]  ;;  %v15808_v55 = vsub.f32 %v15807_v29, %v11762_v61  ;;  %v3830_v54 = vadd.f32 0.0001, %v3814_v41 }
 0x4ab   : > { %v3842_v46 = vadd.f32 %v15798_v5, %v15796_v8  ;;  %v15802_v57 = vsub.f32 %v15801_v26, %v15707_v6  ;;  %v15806_v28 = vsub.f32 %v15805_v33, %v15709_v18  ;;  %v15809_v5 = vld [vmem:[#allocation278_spill] sm:$0xff]  ;;  %v3832_v6 = vadd.f32 0.0001, %v3816_v36  ;;  %v15815_v26 = vld [vmem:[#allocation173_spill] sm:$0xff] }
 0x4ac   : > { %v15810_v8 = vsub.f32 %v15809_v5, %v15711_v14  ;;  %v15814_v19 = vsub.f32 %v15813_v44, %v15713_v48  ;;  %v3834_v18 = vadd.f32 0.0001, %v3818_v30  ;;  %v15816_v61 = vsub.f32 %v15815_v26, %v11770_v43  ;;  %v15819_v25 = vld [vmem:[#allocation54_spill] sm:$0xff]  ;;  %v15821_v29 = vld [vmem:[#allocation281_spill] sm:$0xff] }
 0x4ad   : > { %v3843_v59 = vadd.f32 %v15802_v57, %v15800_v37  ;;  %v3844_v63 = vadd.f32 %v15806_v28, %v15804_v10  ;;  %v15811_v57 = vld [vmem:[#allocation118_spill] sm:$0xff]  ;;  %v3833_v37 = vadd.f32 0.0001, %v3817_v16  ;;  %v3835_v28 = vadd.f32 0.0001, %v3819_v9  ;;  %v15817_v10 = vld [vmem:[#allocation280_spill] sm:$0xff] }
 0x4ae   : > { %v3845_v52 = vadd.f32 %v15810_v8, %v15808_v55  ;;  %v15812_v58 = vsub.f32 %v15811_v57, %v11766_v42  ;;  %v15818_v14 = vsub.f32 %v15817_v10, %v15715_v35  ;;  %v3836_v41 = vadd.f32 0.0001, %v3820_v62  ;;  %v15823_v30 = vld [vmem:[#allocation69_spill] sm:$0xff]  ;;  %v15825_v8 = vld [vmem:[#allocation175_spill] sm:$0xff]  ;;  %v15829_v26 = vld [vmem:[#allocation158_spill] sm:$0xff] }
 0x4af   : > { %v15820_v36 = vsub.f32 %v15819_v25, %v11774_v0  ;;  %v15822_v42 = vsub.f32 %v15821_v29, %v15717_v39  ;;  %v3858_v48 = vadd.f32 0.0009, %v3842_v46  ;;  %v3859_v5 = vadd.f32 0.0009, %v3843_v59  ;;  %v15831_v10 = vld [vmem:[#allocation205_spill] sm:$0xff]  ;;  %v15837_v25 = vld [vmem:[#allocation139_spill] sm:$0xff] }
 0x4b0   : > { %v3846_v22 = vadd.f32 %v15814_v19, %v15812_v58  ;;  %v3847_v33 = vadd.f32 %v15818_v14, %v15816_v61  ;;  %v3837_v16 = vadd.f32 0.0001, %v3821_v2  ;;  %v15824_v9 = vsub.f32 %v15823_v30, %v11778_v23  ;;  %v15827_v19 = vld [vmem:[#allocation170_spill] sm:$0xff]  ;;  %v15833_v14 = vld [vmem:[#allocation72_spill] sm:$0xff] }
 0x4b1   : > { %v3848_v55 = vadd.f32 %v15822_v42, %v15820_v36  ;;  %v15826_v43 = vsub.f32 %v15825_v8, %v15719_v17  ;;  %v3860_v35 = vadd.f32 0.0009, %v3844_v63  ;;  %v3861_v58 = vadd.f32 0.0009, %v3845_v52  ;;  %v15841_v42 = vld [vmem:[#allocation140_spill] sm:$0xff] }
 0x4b2   : > { %v3838_v62 = vadd.f32 0.0001, %v3822_v38  ;;  %v3839_v44 = vadd.f32 0.0001, %v3823_v24  ;;  %v15828_v0 = vsub.f32 %v15827_v19, %v11782_v12  ;;  %v15830_v39 = vsub.f32 %v15829_v26, %v15721_v27  ;;  %v15835_v38 = vld [vmem:[#allocation164_spill] sm:$0xff] }
 0x4b3   : > { %v3849_v57 = vadd.f32 %v15826_v43, %v15824_v9  ;;  %v3862_v59 = vadd.f32 0.0009, %v3846_v22  ;;  %v3840_v2 = vadd.f32 0.0001, %v3824_v3  ;;  %v3841_v61 = vadd.f32 0.0001, %v3825_v51 }
 0x4b4   : > { %v3850_v46 = vadd.f32 %v15830_v39, %v15828_v0  ;;  %v15832_v23 = vsub.f32 %v15831_v10, %v11786_v20  ;;  %v15834_v17 = vsub.f32 %v15833_v14, %v15723_v32  ;;  %v3863_v52 = vadd.f32 0.0009, %v3847_v33  ;;  %v15839_v3 = vld [vmem:[#allocation192_spill] sm:$0xff]  ;;  %v15845_v43 = vld [vmem:[#allocation141_spill] sm:$0xff]  ;;  %v15851_v0 = vld [vmem:[#allocation71_spill] sm:$0xff] }
 0x4b5   : > { %v15836_v24 = vsub.f32 %v15835_v38, %v11790_v31  ;;  %v15838_v12 = vsub.f32 %v15837_v25, %v15784_v40  ;;  %v3864_v27 = vadd.f32 0.0009, %v3848_v55  ;;  %v3874_v29 = vmul.f32 %v3858_v48, %v3826_v11  ;;  %v15843_v8 = vld [vmem:[#allocation124_spill] sm:$0xff]  ;;  %v15847_v55 = vld [vmem:[#allocation61_spill] sm:$0xff] }
 0x4b6   : > { %v3851_v63 = vadd.f32 %v15834_v17, %v15832_v23  ;;  %v3875_v22 = vmul.f32 %v3859_v5, %v3827_v47  ;;  %v15840_v51 = vsub.f32 %v15839_v3, %v15785_v34  ;;  %v15842_v20 = vsub.f32 %v15841_v42, %v15786_v45  ;;  %v15849_v47 = vld [vmem:[#allocation73_spill] sm:$0xff] }
 0x4b7   : > { %v3852_v36 = vadd.f32 %v15838_v12, %v15836_v24  ;;  %v3865_v32 = vadd.f32 0.0009, %v3849_v57  ;;  %v3876_v9 = vmul.f32 %v3860_v35, %v3828_v60  ;;  %v3877_v33 = vmul.f32 %v3861_v58, %v3829_v15  ;;  %v15853_v15 = vld [vmem:[#allocation142_spill] sm:$0xff]  ;;  %v15855_v35 = vld [vmem:[#allocation171_spill] sm:$0xff]  ;;  %v15857_v58 = vld [vmem:[#allocation77_spill] sm:$0xff] }
 0x4b8   : > { %v3853_v30 = vadd.f32 %v15842_v20, %v15840_v51  ;;  %v15844_v31 = vsub.f32 %v15843_v8, %v15787_v13  ;;  %v15846_v40 = vsub.f32 %v15845_v43, %v15788_v4  ;;  %v15848_v11 = vsub.f32 %v15847_v55, %v15789_v53  ;;  %v15863_v8 = vld [vmem:[#allocation185_spill] sm:$0xff]  ;;  %v15865_v43 = vld [vmem:[#allocation183_spill] sm:$0xff] }
 0x4b9   : > { %v15850_v34 = vsub.f32 %v15849_v47, %v15790_v56  ;;  %v3866_v5 = vadd.f32 0.0009, %v3850_v46  ;;  %v3878_v45 = vmul.f32 %v3862_v59, %v3830_v54  ;;  %v15852_v60 = vsub.f32 %v15851_v0, %v15791_v49  ;;  %v15868_v47 = vld [vmem:[#allocation239_spill] sm:$0xff]  ;;  %v15871_v0 = vld [vmem:[#allocation252_spill] sm:$0xff] }
 0x4ba   : > { %v3854_v19 = vadd.f32 %v15846_v40, %v15844_v31  ;;  %v15854_v57 = vsub.f32 %v15853_v15, %v15792_v7  ;;  %v15856_v4 = vsub.f32 %v15855_v35, %v15793_v50  ;;  %v15858_v26 = vsub.f32 %v15857_v58, %v15794_v21  ;;  %v15873_v35 = vld [vmem:[#allocation24_spill] sm:$0xff]  ;;  %v15874_v58 = vld [vmem:[#allocation253_spill] sm:$0xff] }
 0x4bb   : > { %v3855_v48 = vadd.f32 %v15850_v34, %v15848_v11  ;;  %v3867_v39 = vadd.f32 0.0009, %v3851_v63  ;;  %v3879_v10 = vmul.f32 %v3863_v52, %v3831_v1  ;;  %v3868_v56 = vadd.f32 0.0009, %v3852_v36  ;;  %v15859_v36 = vld [vmem:[#allocation260_spill] sm:$0xff]  ;;  %v15867_v11 = vld [vmem:[#allocation251_spill] sm:$0xff] }
 0x4bc   : > { %v3856_v13 = vadd.f32 %v15854_v57, %v15852_v60  ;;  %v3857_v53 = vadd.f32 %v15858_v26, %v15856_v4  ;;  %v3880_v23 = vmul.f32 %v3864_v27, %v3832_v6  ;;  %v3890_v46 = vadd.f32 1e-12, %v3874_v29  ;;  %v15872_v60 = vld [vmem:[#allocation59_spill] sm:$0xff] }
 0x4bd   : > { %v3891_v54 = vadd.f32 1e-12, %v3875_v22  ;;  %v3869_v59 = vadd.f32 0.0009, %v3853_v30  ;;  %v3881_v14 = vmul.f32 %v3865_v32, %v3833_v37  ;;  %v3892_v49 = vadd.f32 1e-12, %v3876_v9 }
 0x4be   : > { %v3893_v17 = vadd.f32 1e-12, %v3877_v33  ;;  %v3870_v38 = vadd.f32 0.0009, %v3854_v19  ;;  %v3882_v7 = vmul.f32 %v3866_v5, %v3834_v18  ;;  %v3894_v24 = vadd.f32 1e-12, %v3878_v45 }
 0x4bf   : > { %4361 = vrcp.f32 %v3890_v46  ;;  %v3871_v25 = vadd.f32 0.0009, %v3855_v48  ;;  %v3883_v50 = vmul.f32 %v3867_v39, %v3835_v28  ;;  %v3895_v12 = vadd.f32 1e-12, %v3879_v10  ;;  %v15860_v18 = vld [vmem:[#allocation261_spill] sm:$0xff]  ;;  %v15862_v32 = vld [vmem:[#allocation262_spill] sm:$0xff] }
 0x4c0   : > { %4363 = vrcp.f32 %v3891_v54  ;;  %v3872_v21 = vadd.f32 0.0009, %v3856_v13  ;;  %v3884_v3 = vmul.f32 %v3868_v56, %v3836_v41  ;;  %v3896_v63 = vadd.f32 1e-12, %v3880_v23  ;;  %v15861_v28 = vld [vmem:[#allocation85_spill] sm:$0xff]  ;;  %v15869_v5 = vld [vmem:[#allocation250_spill] sm:$0xff] }
 0x4c1   : > { %4365 = vrcp.f32 %v3892_v49  ;;  %v3873_v1 = vadd.f32 0.0009, %v3857_v53  ;;  %v3885_v6 = vmul.f32 %v3869_v59, %v3837_v16  ;;  %v3897_v52 = vadd.f32 1e-12, %v3881_v14  ;;  %v15870_v45 = vld [vmem:[#allocation63_spill] sm:$0xff]  ;;  %v15875_v10 = vld [vmem:[#allocation265_spill] sm:$0xff] }
 0x4c2   : > { %4367 = vrcp.f32 %v3893_v17  ;;  %v3782_v37 = vadd.f32 0.0009, %v15859_v36  ;;  %v3886_v27 = vmul.f32 %v3870_v38, %v3838_v62  ;;  %v3898_v29 = vadd.f32 1e-12, %v3882_v7  ;;  %v15864_v62 = vld [vmem:[#allocation249_spill] sm:$0xff]  ;;  %v15877_v54 = vld [vmem:[#allocation254_spill] sm:$0xff] }
 0x4c3   : > { %4369 = vrcp.f32 %v3894_v24  ;;  %v3783_v22 = vadd.f32 0.0009, %v15860_v18  ;;  %v3887_v51 = vmul.f32 %v3871_v25, %v3839_v44  ;;  %v3899_v42 = vadd.f32 1e-12, %v3883_v50  ;;  %v15866_v44 = vld [vmem:[#allocation264_spill] sm:$0xff]  ;;  %v15876_v23 = vld [vmem:[#allocation209_spill] sm:$0xff] }
 0x4c4   : > { %4371 = vrcp.f32 %v3895_v12  ;;  %v3784_v20 = vadd.f32 0.0009, %v15861_v28  ;;  %v3888_v30 = vmul.f32 %v3872_v21, %v3840_v2  ;;  %v3900_v41 = vadd.f32 1e-12, %v3884_v3  ;;  %v15878_v49 = vld [vmem:[#allocation255_spill] sm:$0xff]  ;;  %v15879_v25 = vld [vmem:[#allocation56_spill] sm:$0xff] }
 0x4c5   : > { %4373 = vrcp.f32 %v3896_v63  ;;  %v3785_v9 = vadd.f32 0.0009, %v15862_v32  ;;  %v3889_v16 = vmul.f32 %v3873_v1, %v3841_v61  ;;  %v3901_v33 = vadd.f32 1e-12, %v3885_v6  ;;  %v15880_v63 = vld [vmem:[#allocation190_spill] sm:$0xff]  ;;  %v15881_v6 = vld [vmem:[#allocation233_spill] sm:$0xff] }
 0x4c6   : > { %4375 = vrcp.f32 %v3897_v52  ;;  %v3786_v31 = vadd.f32 0.0009, %v15863_v8  ;;  %v3794_v40 = vmul.f32 %v15865_v43, %v15864_v62  ;;  %v3902_v19 = vadd.f32 1e-12, %v3886_v27  ;;  %v15882_v27 = vld [vmem:[#allocation210_spill] sm:$0xff]  ;;  %v15883_v18 = vld [vmem:[#allocation191_spill] sm:$0xff] }
 0x4c7   : > { %4377 = vrcp.f32 %v3898_v29  ;;  %v3787_v55 = vadd.f32 0.0009, %v15866_v44  ;;  %v3796_v34 = vmul.f32 %v15868_v47, %v15867_v11  ;;  %v3903_v2 = vadd.f32 1e-12, %v3887_v51  ;;  %v15884_v51 = vld [vmem:[#allocation104_spill] sm:$0xff]  ;;  %v15887_v44 = vld [vmem:[#allocation57_spill] sm:$0xff] }
 0x4c8   : > { %4379 = vrcp.f32 %v3899_v42  ;;  %v3795_v61 = vmul.f32 %v15870_v45, %v15869_v5  ;;  %v3797_v15 = vmul.f32 %v15872_v60, %v15871_v0  ;;  %v3904_v57 = vadd.f32 1e-12, %v3888_v30  ;;  %v15885_v30 = vld [vmem:[#allocation105_spill] sm:$0xff]  ;;  %v15886_v8 = vld [vmem:[#allocation236_spill] sm:$0xff] }
 0x4c9   : > { %v4362_v48 = vpop.eup %4361  ;;  %4381 = vrcp.f32 %v3900_v41  ;;  %v3788_v4 = vadd.f32 0.0009, %v15873_v35  ;;  %v3798_v26 = vmul.f32 %v3782_v37, %v15874_v58  ;;  %v3905_v53 = vadd.f32 1e-12, %v3889_v16 }
 0x4ca   : > { %v4364_v13 = vpop.eup %4363  ;;  %4383 = vrcp.f32 %v3901_v33  ;;  %v3789_v56 = vadd.f32 0.0009, %v15875_v10  ;;  %v3790_v46 = vadd.f32 0.0009, %v15876_v23  ;;  %v3799_v59 = vmul.f32 %v3783_v22, %v15877_v54 }
 0x4cb   : > { %v4366_v39 = vpop.eup %4365  ;;  %4385 = vrcp.f32 %v3902_v19  ;;  %v3800_v17 = vmul.f32 %v3784_v20, %v15878_v49  ;;  %v3922_v38 = vmul.f32 %v4362_v48, %v3794_v40  ;;  %v3801_v50 = vmul.f32 %v3785_v9, %v15879_v25  ;;  %v15888_v48 = vld [vmem:[#allocation256_spill] sm:$0xff] }
 0x4cc   : > { %v4368_v14 = vpop.eup %4367  ;;  %4387 = vrcp.f32 %v3903_v2  ;;  %v3924_v7 = vmul.f32 %v4366_v39, %v3796_v34  ;;  %v3923_v12 = vmul.f32 %v4364_v13, %v3795_v61  ;;  %v3791_v1 = vadd.f32 0.0009, %v15880_v63 }
 0x4cd   : > { %v4370_v24 = vpop.eup %4369  ;;  %4389 = vrcp.f32 %v3904_v57  ;;  %v3925_v21 = vmul.f32 %v4368_v14, %v3797_v15  ;;  %v3802_v52 = vmul.f32 %v3786_v31, %v15881_v6  ;;  %v3792_v29 = vadd.f32 0.0009, %v15882_v27  ;;  %v15889_v15 = vld [vmem:[#allocation258_spill] sm:$0xff] }
 0x4ce   : > { %v4372_v3 = vpop.eup %4371  ;;  %4391 = vrcp.f32 %v3905_v53  ;;  %v3926_v36 = vmul.f32 %v4370_v24, %v3798_v26  ;;  %v3793_v22 = vadd.f32 0.0009, %v15883_v18  ;;  %v3803_v42 = vmul.f32 %v3787_v55, %v15884_v51  ;;  %v15890_v26 = vld [vmem:[#allocation259_spill] sm:$0xff] }
 0x4cf   : > { %v4374_v37 = vpop.eup %4373  ;;  %v3927_v28 = vmul.f32 %v4372_v3, %v3799_v59  ;;  %v3804_v41 = vmul.f32 %v3788_v4, %v15885_v30  ;;  %v3938_v9 = vsub.f32 1.0, %v3922_v38  ;;  %v3940_v16 = vsub.f32 1.0, %v3924_v7 }
 0x4d0   : > { %v4376_v20 = vpop.eup %4375  ;;  %v3928_v32 = vmul.f32 %v4374_v37, %v3800_v17  ;;  %v3805_v62 = vmul.f32 %v3789_v56, %v15886_v8  ;;  %v3939_v43 = vsub.f32 1.0, %v3923_v12  ;;  %v3941_v40 = vsub.f32 1.0, %v3925_v21  ;;  %v15891_v8 = vld [vmem:[#allocation93_spill] sm:$0xff] }
 0x4d1   : > { %v4378_v33 = vpop.eup %4377  ;;  %v3929_v31 = vmul.f32 %v4376_v20, %v3801_v50  ;;  %v3806_v11 = vmul.f32 %v3790_v46, %v15887_v44  ;;  %v3942_v34 = vsub.f32 1.0, %v3926_v36  ;;  %v3943_v2 = vsub.f32 1.0, %v3927_v28  ;;  %v15893_v44 = vld [vmem:[#allocation97_spill] sm:$0xff] }
 0x4d2   : > { %v4380_v19 = vpop.eup %4379  ;;  %v3930_v47 = vmul.f32 %v4378_v33, %v3802_v52  ;;  %v3807_v5 = vmul.f32 %v3791_v1, %v15888_v48  ;;  %v3944_v61 = vsub.f32 1.0, %v3928_v32  ;;  %v3808_v57 = vmul.f32 %v3792_v29, %v15889_v15 }
 0x4d3   : > { %v4382_v55 = vpop.eup %4381  ;;  %v3931_v45 = vmul.f32 %v4380_v19, %v3803_v42  ;;  %v3945_v0 = vsub.f32 1.0, %v3929_v31  ;;  %v3954_v35 = vmul.f32 0.5, %v3938_v9  ;;  %v3956_v4 = vmul.f32 0.5, %v3940_v16 }
 0x4d4   : > { %v4384_v60 = vpop.eup %4383  ;;  %v3932_v13 = vmul.f32 %v4382_v55, %v3804_v41  ;;  %v3809_v53 = vmul.f32 %v3793_v22, %v15890_v26  ;;  %v3955_v10 = vmul.f32 0.5, %v3939_v43  ;;  %v3957_v56 = vmul.f32 0.5, %v3941_v40 }
 0x4d5   : > { %v4386_v58 = vpop.eup %4385  ;;  %v3933_v39 = vmul.f32 %v4384_v60, %v3805_v62  ;;  %v3946_v54 = vsub.f32 1.0, %v3930_v47  ;;  %v3958_v59 = vmul.f32 0.5, %v3942_v34  ;;  %v3959_v14 = vmul.f32 0.5, %v3943_v2  ;;  %v15892_v62 = vld [vmem:[#allocation133_spill] sm:$0xff] }
 0x4d6   : > { %v4388_v23 = vpop.eup %4387  ;;  %v3934_v46 = vmul.f32 %v4386_v58, %v3806_v11  ;;  %v3947_v38 = vsub.f32 1.0, %v3931_v45  ;;  %v3960_v7 = vmul.f32 0.5, %v3944_v61  ;;  %v3961_v24 = vmul.f32 0.5, %v3945_v0  ;;  %v15894_v11 = vld [vmem:[#allocation137_spill] sm:$0xff] }
 0x4d7   : > { %v4390_v49 = vpop.eup %4389  ;;  %v3935_v17 = vmul.f32 %v4388_v23, %v3807_v5  ;;  %v3948_v12 = vsub.f32 1.0, %v3932_v13  ;;  %v3970_v21 = vmax.f32 %v3954_v35, 0.0  ;;  %v3972_v3 = vmax.f32 %v3956_v4, 0.0  ;;  %v15895_v13 = vld [vmem:[#allocation107_spill] sm:$0xff] }
 0x4d8   : > { %v4392_v25 = vpop.eup %4391  ;;  %v3936_v50 = vmul.f32 %v4390_v49, %v3808_v57  ;;  %v3949_v1 = vsub.f32 1.0, %v3933_v39  ;;  %v3971_v6 = vmax.f32 %v3955_v10, 0.0  ;;  %v3973_v52 = vmax.f32 %v3957_v56, 0.0 }
 0x4d9   : > { %v3937_v63 = vmul.f32 %v4392_v25, %v3809_v53  ;;  %v3950_v36 = vsub.f32 1.0, %v3934_v46  ;;  %v3962_v37 = vmul.f32 0.5, %v3946_v54  ;;  %v3974_v27 = vmax.f32 %v3958_v59, 0.0  ;;  %v15896_v53 = vld [vmem:[#allocation111_spill] sm:$0xff] }
 0x4da   : > { %v3975_v29 = vmax.f32 %v3959_v14, 0.0  ;;  %v3951_v18 = vsub.f32 1.0, %v3935_v17  ;;  %v3963_v22 = vmul.f32 0.5, %v3947_v38  ;;  %v3976_v51 = vmax.f32 %v3960_v7, 0.0  ;;  %v15897_v38 = vld [vmem:[#allocation88_spill] sm:$0xff] }
 0x4db   : > { %v3977_v42 = vmax.f32 %v3961_v24, 0.0  ;;  %v3952_v28 = vsub.f32 1.0, %v3936_v50  ;;  %v3964_v20 = vmul.f32 0.5, %v3948_v12  ;;  %v3986_v30 = vmin.f32 %v3970_v21, 1.0  ;;  %v15898_v24 = vld [vmem:[#allocation125_spill] sm:$0xff] }
 0x4dc   : > { %v3988_v41 = vmin.f32 %v3972_v3, 1.0  ;;  %v3953_v32 = vsub.f32 1.0, %v3937_v63  ;;  %v3965_v9 = vmul.f32 0.5, %v3949_v1  ;;  %v3987_v16 = vmin.f32 %v3971_v6, 1.0  ;;  %v15899_v21 = vld [vmem:[#allocation89_spill] sm:$0xff] }
 0x4dd   : > { %v3989_v33 = vmin.f32 %v3973_v52, 1.0  ;;  %v492_v31 = vadd.f32 %v15892_v62, %v15891_v8  ;;  %v3966_v43 = vmul.f32 0.5, %v3950_v36  ;;  %v3978_v40 = vmax.f32 %v3962_v37, 0.0  ;;  %v15900_v63 = vld [vmem:[#allocation129_spill] sm:$0xff] }
 0x4de   : > { %v3990_v19 = vmin.f32 %v3974_v27, 1.0  ;;  %v499_v47 = vadd.f32 %v15894_v11, %v15893_v44  ;;  %v3967_v34 = vmul.f32 0.5, %v3951_v18  ;;  %v3979_v2 = vmax.f32 %v3963_v22, 0.0 }
 0x4df   : > { %v3991_v55 = vmin.f32 %v3975_v29, 1.0  ;;  %v3968_v48 = vmul.f32 0.5, %v3952_v28  ;;  %v3980_v5 = vmax.f32 %v3964_v20, 0.0  ;;  %v3992_v45 = vmin.f32 %v3976_v51, 1.0 }
 0x4e0   : > { %v4002_v61 = vadd.f32 %v3988_v41, %v3986_v30  ;;  %v3969_v0 = vmul.f32 0.5, %v3953_v32  ;;  %v3981_v60 = vmax.f32 %v3965_v9, 0.0  ;;  %v3993_v15 = vmin.f32 %v3977_v42, 1.0 }
 0x4e1   : > { %v4009_v57 = vadd.f32 %v3989_v33, %v3987_v16  ;;  %v493_v35 = vadd.f32 %v492_v31, %v15895_v13  ;;  %v3982_v4 = vmax.f32 %v3966_v43, 0.0  ;;  %v3994_v58 = vmin.f32 %v3978_v40, 1.0 }
 0x4e2   : > { %v4003_v26 = vadd.f32 %v4002_v61, %v3990_v19  ;;  %v500_v39 = vadd.f32 %v499_v47, %v15896_v53  ;;  %v3983_v10 = vmax.f32 %v3967_v34, 0.0  ;;  %v3995_v56 = vmin.f32 %v3979_v2, 1.0 }
 0x4e3   : > { %v4010_v23 = vadd.f32 %v4009_v57, %v3991_v55  ;;  %v3984_v46 = vmax.f32 %v3968_v48, 0.0  ;;  %v3996_v54 = vmin.f32 %v3980_v5, 1.0  ;;  %v3985_v14 = vmax.f32 %v3969_v0, 0.0 }
 0x4e4   : > { %v4004_v59 = vadd.f32 %v4003_v26, %v3992_v45  ;;  %v3997_v49 = vmin.f32 %v3981_v60, 1.0  ;;  %v487_v7 = vmul.f32 %v15897_v38, %v15897_v38  ;;  %v494_v25 = vadd.f32 %v493_v35, %v15898_v24 }
 0x4e5   : > { %v4011_v17 = vadd.f32 %v4010_v23, %v3993_v15  ;;  %v3998_v50 = vmin.f32 %v3982_v4, 1.0  ;;  %v488_v3 = vmul.f32 %v15899_v21, %v15899_v21  ;;  %v501_v1 = vadd.f32 %v500_v39, %v15900_v63 }
 0x4e6   : > { %v4005_v12 = vadd.f32 %v4004_v59, %v3994_v58  ;;  %v3999_v6 = vmin.f32 %v3983_v10, 1.0  ;;  %v4000_v36 = vmin.f32 %v3984_v46, 1.0  ;;  %v4001_v27 = vmin.f32 %v3985_v14, 1.0 }
 0x4e7   : > { %v4012_v52 = vadd.f32 %v4011_v17, %v3995_v56  ;;  %v495_v18 = vadd.f32 %v494_v25, %v487_v7  ;;  %v502_v51 = vadd.f32 %v501_v1, %v488_v3  ;;  %v15901_v8 = vlaneseq }
 0x4e8   : > { %v4006_v37 = vadd.f32 %v4005_v12, %v3996_v54 }
 0x4e9   : > { %v4013_v29 = vadd.f32 %v4012_v52, %v3997_v49  ;;  %v4027_v62 = vand.u32 127, %v15901_v8 }
 0x4ea   : > { %v4007_v22 = vadd.f32 %v4006_v37, %v3998_v50 }
 0x4eb   : > { %v4014_v42 = vadd.f32 %v4013_v29, %v3999_v6  ;;  %vm4030_vm8 = vcmp.lt.s32.totalorder %v4027_v62, 12 }
 0x4ec   : > { %v4008_v28 = vadd.f32 %v4007_v22, %v4000_v36 }
 0x4ed   : > { %v4015_v20 = vadd.f32 %v4014_v42, %v4001_v27 }
 0x4ee   : > { %v4016_v30 = vadd.f32 %v4008_v28, %v495_v18 }
 0x4ef   : > { %v4017_v41 = vadd.f32 %v4015_v20, %v502_v51 }
 0x4f1   : > { %v4018_v32 = vadd.f32 %v4017_v41, %v4016_v30 }
 0x4f3   : > { %v4019_v9 = vrot.slane %v4018_v32, 4 }
 0x4f5   : > { %v4020_v16 = vadd.f32 %v4019_v9, %v4018_v32 }
 0x4f7   : > { %v4021_v33 = vrot.slane %v4020_v16, 2 }
 0x4f9   : > { %v4022_v31 = vadd.f32 %v4021_v33, %v4020_v16 }
 0x4fb   : > { %v4023_v43 = vrot.slane %v4022_v31, 1 }
 0x4fd   : > { %v4024_v40 = vadd.f32 %v4023_v43, %v4022_v31 }
 0x4ff   : > { %v4031_v19 = vsel %vm4030_vm8, %v4024_v40, 0.0 }
 0x500   : > { %v4032_v11 = vsel %vm747_vm1, %v4031_v19, 0.0 }
 0x501   : > { %4033 = vst [vmem:[%s390_s7] sm:$0xff] %v4032_v11 }
 0x502   : > { %4616 = shalt.err (!%p4613_p0)
}
 0x503   : > { %s4617_s10 = scalar_lea.hbm %s12294_s15, 128  ;;  %s4621_s29 = scalar_lea.hbm %s12358_s4, 256 }
 0x504   : > { %p4618_p3 = scmp.ne.s32.totalorder %s12294_s15, %s4617_s10  ;;  %p4622_p8 = scmp.lt.u32.totalorder %s12294_s15, %s12358_s4 }
 0x505   : > { %p4623_p9 = scmp.lt.u32.totalorder %s4621_s29, %s4617_s10  ;;  %p4625_p10 = scmp.lt.u32.totalorder %s4617_s10, %s12294_s15 }
 0x506   : > { %p4619_p4 = pnand %p4618_p3, %p15903_p12 }
 0x507   : > { %p4624_p11 = por %p4623_p9, %p4622_p8 }
 0x508   : > { %p4620_p5 = pneg %p4619_p4 }
 0x509   : > { %p4626_p6 = por %p4625_p10, %p4624_p11 }
 0x50b   : > { %p4627_p7 = pnand %p4626_p6, %p4620_p5 }
 0x50d   : > { %4630 = shalt.err (!%p4627_p7)
}
 0x50e   : > { %4276 = dma.vmem_to_hbm [thread:$0]  (%p15903_p12), %s12296_s6, 128, %s12294_s15, %s4035_s12  }
 0x50f PF: > { %s15904_s24 = sld [smem:[#allocation16_spill]]  ;;  %s15905_s13 = sld [smem:[#allocation20_spill]] }
 0x510   : > { %p15907_p2 = scmp.ge.s32.totalorder %s4725_s23, 2 }
 0x515   : > { %s4062_s5 = sand.u32 1, %s15904_s24   ;;  %p15906_p13 = scmp.ne.s32.totalorder %s15905_s13, 0 }
 0x516   : > { %s4063_s14 = scalar_lea.sflag [#allocation4], %s4062_s5 }
 0x517   : > { %p4279_p1 = pnand %p15907_p2, %p15906_p13 }
 0x519   : > { %4684 = dma.done.wait (!%p4279_p1), %s4063_s14, 128  }
 0x51a   : > { %4686 = vsyncadd (!%p4279_p1), %s4063_s14, 4294967168  ;;  %s26_s23 = sadd.s32 1, %s4725_s23   ;;  %s15908_s27 = sld [smem:[#allocation19_spill]] }
 0x51b   : > { %p23_p0 = scmp.ge.s32.totalorder %s26_s23, 4   ;;  %s15909_s7 = sld [smem:[#allocation18_spill]] }
 0x51c   : > { %s15910_s6 = sld [smem:[#allocation17_spill]]  ;;  %s15911_s15 = smov %s4697_s16 }
 0x51d   : > { %s15912_s16 = smov %s4701_s17  ;;  %s15914_s18 = smov %s4709_s19 }
 0x51e   : > { %s15915_s19 = smov %s4713_s20  ;;  %s15917_s21 = smov %s4721_s22 }
 0x51f   :  { %25 = sbr.rel (!%p23_p0) target bundleno = 14 (0xe), region = 118 }
 0x520   : > { %s15913_s17 = smov %s15908_s27 }
 0x521   : > { %s15916_s20 = smov %s15909_s7 }
 0x522   : > { %s15918_s22 = smov %s15910_s6 }
 0x526   :  { %4068 = vsyncpa [#allocation3], 1 }
 0x527   :  { %4070 = vsyncpa [#allocation3 + $0x1], 1 }
 0x528   :  { %4071 = vsyncpa [#allocation6], 1 }
 0x529   :  { %4073 = vsyncpa [#allocation6 + $0x1], 1 }
 0x52a   :  { %4074 = vsyncpa [#allocation9], 1 }
 0x52b   :  { %4076 = vsyncpa [#allocation9 + $0x1], 1 }
 0x52c   :  { %4077 = vsyncpa [#allocation4], 1 }
 0x52d   :  { %4079 = vsyncpa [#allocation4 + $0x1], 1 }

</bundles_post_ra>
